<compile_context>
chip_gen: v7x
topology: tpu7x:2x2x1
jax: 0.10.0
libtpu: 0.0.40
codegen_flags: <defaults>
</compile_context>

<pallas_src>
import functools
import math

import jax
import jax.numpy as jnp
from jax.experimental import pallas as pl
from jax.experimental.pallas import tpu as pltpu

_LANE = 128      # vreg lane width
_SUBLANE = 8     # vreg sublane count (f32)


def _round_up(x, m):
    return ((x + m - 1) // m) * m


def _qmul(p, q):
    """Hamilton product; p, q are 4-tuples of equal-shape arrays."""
    pw, px, py, pz = p
    qw, qx, qy, qz = q
    return (pw * qw - px * qx - py * qy - pz * qz,
            pw * qx + px * qw + py * qz - pz * qy,
            pw * qy - px * qz + py * qw + pz * qx,
            pw * qz + px * qy - py * qx + pz * qw)


def _qconv1d_kernel(x_ref, w_ref, o_ref, *, F, stride, CO_BLK, T_CHUNK):
    # x_ref : (1, 1, stride*4, Cin_pad, T_blk_in)  phase-deinterleaved halo tile
    # w_ref : (CO_BLK, Cin_pad, 4*F)               packed [ a | a*b | c | c^2 ]
    # o_ref : (1, CO_BLK*4, T_BLK)                 sublane/lane-dense output
    Cin_pad = x_ref.shape[3]
    T_BLK = o_ref.shape[2]
    wide = (Cin_pad, T_CHUNK)
    half = F // 2

    for ck in range(T_BLK // T_CHUNK):
        base = ck * T_CHUNK

        def window(f, _base=base):
            # Tap #f of every output window in this chunk: (Cin_pad, T_CHUNK).
            # Contiguous lane slice even for stride > 1 (phases were
            # de-interleaved in the wrapper).
            plane = (f % stride) * 4
            start = _base + f // stride
            return tuple(x_ref[0, 0, plane + comp, :, start:start + T_CHUNK]
                         for comp in range(4))

        # Centre quaternion p of every window (tap- and channel-invariant).
        pw, px, py, pz = window(half)
        pw2 = pw * pw
        psq = pw2 + px * px + py * py + pz * pz        # |p|^2
        two_pw = pw + pw
        dd = pw2 + pw2 - psq                           # pw^2 - |vec(p)|^2

        acc = [[jnp.zeros(wide, jnp.float32) for _ in range(4)]
               for _ in range(CO_BLK)]

        for f in range(F):
            q = (pw, px, py, pz) if f == half else window(f)
            qw, qx, qy, qz = q
            # Shared per-tap quantities (amortised over CO_BLK channels):
            # cross = vec(p) x vec(q), dot2 = 2 vec(p).vec(q)
            cx = py * qz - pz * qy
            cy = pz * qx - px * qz
            cz = px * qy - py * qx
            dot2 = (px * qx + py * qy + pz * qz) * 2.0
            # A = p (x) q (x) conj(p)   (sandwich formula)
            A = (qw * psq,
                 dd * qx + dot2 * px + two_pw * cx,
                 dd * qy + dot2 * py + two_pw * cy,
                 dd * qz + dot2 * pz + two_pw * cz)
            # BC = p (x) q + q (x) conj(p) = 2 pw q + 2 (0, cross)
            BC = (two_pw * qw,
                  two_pw * qx + (cx + cx),
                  two_pw * qy + (cy + cy),
                  two_pw * qz + (cz + cz))
            QA = _qmul(q, A)
            QBC = _qmul(q, BC)
            tqw = qw + qw
            QQ = (qw * qw - (qx * qx + qy * qy + qz * qz),
                  tqw * qx, tqw * qy, tqw * qz)

            for co in range(CO_BLK):   # static unroll keeps indexing static
                av = w_ref[co, :, f:f + 1]                    # a
                gv = w_ref[co, :, F + f:F + f + 1]            # a*b
                cv = w_ref[co, :, 2 * F + f:2 * F + f + 1]    # c
                c2 = w_ref[co, :, 3 * F + f:3 * F + f + 1]    # c^2
                cvb = jnp.broadcast_to(cv, wide)
                c2b = jnp.broadcast_to(c2, wide)
                # |p + c e|^2 = |p|^2 + 2 pw c + c^2
                nrm = psq + cvb * two_pw + c2b
                # Approximate reciprocal (EUP slot) + one Newton step.
                r = pl.reciprocal(nrm, approx=True)
                inv = r * (2.0 - nrm * r)
                s1 = jnp.broadcast_to(av, wide) * inv         # a / |pc|^2
                s2 = jnp.broadcast_to(gv, wide) * inv         # a*b / |pc|^2
                a_co = acc[co]
                for i in range(4):
                    # r1u = pc (x) q (x) conj(pc)   (unnormalised)
                    # t   = q (x) r1u               (via hoisted QA/QBC/QQ)
                    r1u = A[i] + cvb * BC[i] + c2b * q[i]
                    t = QA[i] + cvb * QBC[i] + c2b * QQ[i]
                    a_co[i] = a_co[i] + s1 * t + s2 * r1u

        # Reduce over input channels (sublane axis) and store one
        # sublane/lane-dense (CO_BLK*4, T_CHUNK) tile per chunk.
        rows = [jnp.sum(acc[co][i], axis=0, keepdims=True)
                for co in range(CO_BLK) for i in range(4)]
        o_ref[0, :, base:base + T_CHUNK] = jnp.concatenate(rows, axis=0)


def _vmem_limit_bytes(blk_bytes):
    """Generation-aware VMEM limit: 3/4 of physical capacity, >= 32 MiB."""
    cap = 128 * 1024 * 1024
    try:
        cap = int(pltpu.get_tpu_info().vmem_capacity_bytes)
    except Exception:
        pass
    want = max(32 * 1024 * 1024, 2 * blk_bytes + 8 * 1024 * 1024)
    return int(min((cap * 3) // 4, want))


def qconv1d(x_pt, a, b, c, *, filterlen, stride=1):
    """x_pt: (B, Cin, T, 4, 1) float32 (PyTorch layout).
    a, b, c: (Cout, Cin, F) float32.  Returns (B, Cout, T_out, 4, 1)."""
    B, Cin, T, _, _ = x_pt.shape
    Cout = a.shape[0]
    F = int(filterlen)
    S = int(stride)
    assert S >= 1 and T >= F, (T, F, S)
    T_out = (T - F) // S + 1
    assert T_out >= 1

    # ---- blocking decisions -------------------------------------------------
    T_CHUNK = _LANE                               # compute-chunk lane width
    Cin_pad = _round_up(Cin, _SUBLANE)            # dense sublanes
    # Keep the persistent accumulators (4*CO_BLK tiles of (Cin_pad, 128) f32)
    # at roughly half the 64-entry vreg file.
    vregs_per_wide = Cin_pad // _SUBLANE
    CO_BLK = min(max(2, 8 // vregs_per_wide), _round_up(Cout, 2))
    # TODO(synk): also tile the Cin axis for Cin_pad > 32 (accumulators no
    # longer fit the vreg file; today they just spill).
    Cout_pad = _round_up(Cout, CO_BLK)
    T_BLK = min(4 * T_CHUNK, _round_up(T_out, T_CHUNK))   # out lanes / grid step
    n_tt = (T_out + T_BLK - 1) // T_BLK
    halo = (F - 1) // S
    T_blk_in = _round_up(T_BLK + halo, _LANE)     # 128-aligned halo'd input tile
    T_phase = max((n_tt - 1) * T_BLK + T_blk_in, (T + S - 1) // S)
    T_time = T_phase * S

    # ---- input: phase de-interleave + halo'd time tiles ---------------------
    # (B, Cin, T, 4, 1) -> (B, 4, Cin, T)
    x_k = jnp.transpose(x_pt[..., 0].astype(jnp.float32), (0, 3, 1, 2))
    # Pad time; dead lanes get w = 1 so |p + c e|^2 stays away from 0 even when
    # a real weight c is exactly 0 (no Inf/NaN on the sliced-off lanes).
    x_k = jnp.pad(x_k, ((0, 0), (0, 0), (0, 0), (0, T_time - T)))
    if T_time > T:
        x_k = x_k.at[:, 0, :, T:].set(1.0)
    # Pad input channels with zeros (their params are a=ab=0, c=c^2=1, so the
    # padded sublanes contribute exact zeros to the channel reduction).
    x_k = jnp.pad(x_k, ((0, 0), (0, 0), (0, Cin_pad - Cin), (0, 0)))
    # De-interleave the stride phases: time t = u*S + r -> plane r, index u.
    x_k = x_k.reshape(B, 4, Cin_pad, T_phase, S)
    x_k = jnp.transpose(x_k, (0, 4, 1, 2, 3))             # (B,S,4,Cin_pad,T_phase)
    # Materialise overlapping (halo'd) time tiles so a plain Blocked BlockSpec
    # streams them: bounds per-step VMEM (v7x 64 MiB) and adds a parallel axis.
    idx = (jnp.arange(n_tt) * T_BLK)[:, None] + jnp.arange(T_blk_in)[None, :]
    x_k = x_k[:, :, :, :, idx]                            # (B,S,4,Cin_pad,n_tt,T_blk_in)
    x_k = jnp.transpose(x_k, (0, 4, 1, 2, 3, 5))
    x_k = x_k.reshape(B, n_tt, S * 4, Cin_pad, T_blk_in)

    # ---- params: one packed, lane-major block [ a | a*b | c | c^2 ] ---------
    w = jnp.concatenate([a, a * b, c, c * c], axis=-1).astype(jnp.float32)
    fill = jnp.concatenate([jnp.zeros((2 * F,), jnp.float32),
                            jnp.ones((2 * F,), jnp.float32)])
    w_k = jnp.broadcast_to(fill, (Cout_pad, Cin_pad, 4 * F))
    w_k = w_k.at[:Cout, :Cin, :].set(w)

    # ---- VMEM budget (lane/sublane padding + double buffering, honest) -----
    blk_bytes = 4 * 2 * (S * 4 * Cin_pad * T_blk_in
                         + CO_BLK * Cin_pad * _round_up(4 * F, _LANE)
                         + _round_up(CO_BLK * 4, _SUBLANE) * T_BLK)
    vmem_limit = _vmem_limit_bytes(blk_bytes)

    out_k = pl.pallas_call(
        functools.partial(_qconv1d_kernel, F=F, stride=S,
                          CO_BLK=CO_BLK, T_CHUNK=T_CHUNK),
        out_shape=jax.ShapeDtypeStruct((B, Cout_pad * 4, n_tt * T_BLK),
                                       jnp.float32),
        grid=(B, n_tt, Cout_pad // CO_BLK),
        in_specs=[
            pl.BlockSpec((1, 1, S * 4, Cin_pad, T_blk_in),
                         lambda bi, ti, cb: (bi, ti, 0, 0, 0)),
            pl.BlockSpec((CO_BLK, Cin_pad, 4 * F),
                         lambda bi, ti, cb: (cb, 0, 0)),
        ],
        out_specs=pl.BlockSpec((1, CO_BLK * 4, T_BLK),
                               lambda bi, ti, cb: (bi, cb, ti)),
        compiler_params=pltpu.CompilerParams(
            dimension_semantics=("parallel", "parallel", "parallel"),
            vmem_limit_bytes=vmem_limit),
    )(x_k, w_k)

    # (B, Cout_pad*4, n_tt*T_BLK) -> (B, Cout, T_out, 4, 1)
    out = out_k.reshape(B, Cout_pad, 4, n_tt * T_BLK)[:, :Cout, :, :T_out]
    return jnp.transpose(out, (0, 1, 3, 2))[..., None]


def _ref_qconv1d(x_pt, a, b, c, *, filterlen, stride=1):
    """Pure-JAX reference mirroring the PyTorch forward exactly."""
    x = x_pt[..., 0]  # (B, Cin, T, 4)
    B, Cin, T, _ = x.shape
    Cout = a.shape[0]
    F = filterlen
    T_out = (T - F) // stride + 1
    t0 = jnp.arange(T_out) * stride
    win = x[:, :, t0[:, None] + jnp.arange(F)[None, :], :]  # (B,Cin,T_out,F,4)
    ctr = x[:, :, t0 + F // 2, :]                            # (B,Cin,T_out,4)

    qw = win[:, None]                              # (B,1,Cin,T_out,F,4)
    qp = ctr[:, None, :, :, None, :]               # (B,1,Cin,T_out,1,4)
    cc = c[None, :, :, None, :, None]              # (1,Cout,Cin,1,F,1)
    e = jnp.array([1.0, 0.0, 0.0, 0.0], jnp.float32)
    qpc = qp + cc * e                              # (B,Cout,Cin,T_out,F,4)

    def mul(p, q):
        pw, px, py, pz = (p[..., i] for i in range(4))
        qw_, qx, qy, qz = (q[..., i] for i in range(4))
        return jnp.stack([pw * qw_ - px * qx - py * qy - pz * qz,
                          pw * qx + px * qw_ + py * qz - pz * qy,
                          pw * qy - px * qz + py * qw_ + pz * qx,
                          pw * qz + px * qy - py * qx + pz * qw_], axis=-1)

    conj = qpc * jnp.array([1.0, -1.0, -1.0, -1.0], jnp.float32)
    nrm = (qpc ** 2).sum(-1, keepdims=True)
    r1 = mul(qpc, mul(qw, conj)) / nrm
    r2 = mul(qw, r1) + b[None, :, :, None, :, None] * r1
    r3 = r2 * a[None, :, :, None, :, None]
    out = r3.sum(axis=4).sum(axis=2)               # sum over F then Cin
    return out[..., None]


if __name__ == "__main__":
    def _run_case(key, B, Cin, Cout, T, F, stride):
        kx, ka, kb, kc = jax.random.split(key, 4)
        # deterministic parameter init matching the module's __init__ scales
        he = math.sqrt(2.0 / F / Cin)
        a = jax.random.normal(ka, (Cout, Cin, F), jnp.float32) * he
        b = jax.random.normal(kb, (Cout, Cin, F), jnp.float32) / 2.0
        c = jax.random.normal(kc, (Cout, Cin, F), jnp.float32) * math.sqrt(
            1.378 ** 2 - 1.0 / 4.0)
        # input in PyTorch layout (batch, in channels, time, 4, 1)
        x = jax.random.normal(kx, (B, Cin, T, 4, 1), jnp.float32)

        out = qconv1d(x, a, b, c, filterlen=F, stride=stride)
        out = jax.block_until_ready(out)
        ref = _ref_qconv1d(x, a, b, c, filterlen=F, stride=stride)
        T_out = (T - F) // stride + 1
        assert out.shape == (B, Cout, T_out, 4, 1), out.shape
        err = float(jnp.max(jnp.abs(out - ref)))
        assert jnp.allclose(out, ref, atol=1e-4, rtol=1e-4), err

    key = jax.random.PRNGKey(0)
    k1, k2 = jax.random.split(key)
    # main case (small shapes consistent with the module)
    _run_case(k1, B=2, Cin=4, Cout=3, T=16, F=3, stride=1)
    # strided / larger-filter case (exercises the phase-deinterleave path)
    _run_case(k2, B=1, Cin=6, Cout=5, T=33, F=5, stride=2)
    print("KERNEL_OK")
</pallas_src>

<mosaic_0001>
module attributes {stable_mosaic.version = 11 : i64} {
  func.func @_qconv1d_kernel(%arg0: i32, %arg1: i32, %arg2: i32, %arg3: memref<1x1x4x8x256xf32, #tpu.memory_space<vmem>>, %arg4: memref<4x8x12xf32, #tpu.memory_space<vmem>>, %arg5: memref<1x16x128xf32, #tpu.memory_space<vmem>>) attributes {dimension_semantics = [#tpu.dimension_semantics<parallel>, #tpu.dimension_semantics<parallel>, #tpu.dimension_semantics<parallel>], iteration_bounds = array<i64: 2, 1, 1>, scalar_prefetch = 0 : i64, scratch_operands = 0 : i64, tpu.core_type = #tpu.core_type<tc>, window_params = [{transform_indices = @transform_0, window_bounds = array<i64: 1, 1, 4, 8, 256>}, {transform_indices = @transform_1, window_bounds = array<i64: 4, 8, 12>}, {transform_indices = @transform_2, window_bounds = array<i64: 1, 16, 128>}]} {
    %c0 = arith.constant 0 : index
    %c0_0 = arith.constant 0 : index
    %c0_1 = arith.constant 0 : index
    %c0_2 = arith.constant 0 : index
    %c1 = arith.constant 1 : index
    %0 = vector.load %arg3[%c0, %c0_0, %c0_1, %c0_2, %c1] : memref<1x1x4x8x256xf32, #tpu.memory_space<vmem>>, vector<1x1x1x8x128xf32>
    %1 = vector.shape_cast %0 : vector<1x1x1x8x128xf32> to vector<8x128xf32>
    %c0_3 = arith.constant 0 : index
    %c0_4 = arith.constant 0 : index
    %c1_5 = arith.constant 1 : index
    %c0_6 = arith.constant 0 : index
    %c1_7 = arith.constant 1 : index
    %2 = vector.load %arg3[%c0_3, %c0_4, %c1_5, %c0_6, %c1_7] : memref<1x1x4x8x256xf32, #tpu.memory_space<vmem>>, vector<1x1x1x8x128xf32>
    %3 = vector.shape_cast %2 : vector<1x1x1x8x128xf32> to vector<8x128xf32>
    %c0_8 = arith.constant 0 : index
    %c0_9 = arith.constant 0 : index
    %c2 = arith.constant 2 : index
    %c0_10 = arith.constant 0 : index
    %c1_11 = arith.constant 1 : index
    %4 = vector.load %arg3[%c0_8, %c0_9, %c2, %c0_10, %c1_11] : memref<1x1x4x8x256xf32, #tpu.memory_space<vmem>>, vector<1x1x1x8x128xf32>
    %5 = vector.shape_cast %4 : vector<1x1x1x8x128xf32> to vector<8x128xf32>
    %c0_12 = arith.constant 0 : index
    %c0_13 = arith.constant 0 : index
    %c3 = arith.constant 3 : index
    %c0_14 = arith.constant 0 : index
    %c1_15 = arith.constant 1 : index
    %6 = vector.load %arg3[%c0_12, %c0_13, %c3, %c0_14, %c1_15] : memref<1x1x4x8x256xf32, #tpu.memory_space<vmem>>, vector<1x1x1x8x128xf32>
    %7 = vector.shape_cast %6 : vector<1x1x1x8x128xf32> to vector<8x128xf32>
    %8 = arith.mulf %1, %1 : vector<8x128xf32>
    %9 = arith.mulf %3, %3 : vector<8x128xf32>
    %10 = arith.addf %8, %9 : vector<8x128xf32>
    %11 = arith.mulf %5, %5 : vector<8x128xf32>
    %12 = arith.addf %10, %11 : vector<8x128xf32>
    %13 = arith.mulf %7, %7 : vector<8x128xf32>
    %14 = arith.addf %12, %13 : vector<8x128xf32>
    %15 = arith.addf %1, %1 : vector<8x128xf32>
    %16 = arith.addf %8, %8 : vector<8x128xf32>
    %17 = arith.subf %16, %14 : vector<8x128xf32>
    %cst = arith.constant 0.000000e+00 : f32
    %18 = vector.broadcast %cst : f32 to vector<8x128xf32>
    %cst_16 = arith.constant 0.000000e+00 : f32
    %19 = vector.broadcast %cst_16 : f32 to vector<8x128xf32>
    %cst_17 = arith.constant 0.000000e+00 : f32
    %20 = vector.broadcast %cst_17 : f32 to vector<8x128xf32>
    %cst_18 = arith.constant 0.000000e+00 : f32
    %21 = vector.broadcast %cst_18 : f32 to vector<8x128xf32>
    %cst_19 = arith.constant 0.000000e+00 : f32
    %22 = vector.broadcast %cst_19 : f32 to vector<8x128xf32>
    %cst_20 = arith.constant 0.000000e+00 : f32
    %23 = vector.broadcast %cst_20 : f32 to vector<8x128xf32>
    %cst_21 = arith.constant 0.000000e+00 : f32
    %24 = vector.broadcast %cst_21 : f32 to vector<8x128xf32>
    %cst_22 = arith.constant 0.000000e+00 : f32
    %25 = vector.broadcast %cst_22 : f32 to vector<8x128xf32>
    %cst_23 = arith.constant 0.000000e+00 : f32
    %26 = vector.broadcast %cst_23 : f32 to vector<8x128xf32>
    %cst_24 = arith.constant 0.000000e+00 : f32
    %27 = vector.broadcast %cst_24 : f32 to vector<8x128xf32>
    %cst_25 = arith.constant 0.000000e+00 : f32
    %28 = vector.broadcast %cst_25 : f32 to vector<8x128xf32>
    %cst_26 = arith.constant 0.000000e+00 : f32
    %29 = vector.broadcast %cst_26 : f32 to vector<8x128xf32>
    %cst_27 = arith.constant 0.000000e+00 : f32
    %30 = vector.broadcast %cst_27 : f32 to vector<8x128xf32>
    %cst_28 = arith.constant 0.000000e+00 : f32
    %31 = vector.broadcast %cst_28 : f32 to vector<8x128xf32>
    %cst_29 = arith.constant 0.000000e+00 : f32
    %32 = vector.broadcast %cst_29 : f32 to vector<8x128xf32>
    %cst_30 = arith.constant 0.000000e+00 : f32
    %33 = vector.broadcast %cst_30 : f32 to vector<8x128xf32>
    %c0_31 = arith.constant 0 : index
    %c0_32 = arith.constant 0 : index
    %c0_33 = arith.constant 0 : index
    %c0_34 = arith.constant 0 : index
    %c0_35 = arith.constant 0 : index
    %34 = vector.load %arg3[%c0_31, %c0_32, %c0_33, %c0_34, %c0_35] : memref<1x1x4x8x256xf32, #tpu.memory_space<vmem>>, vector<1x1x1x8x128xf32>
    %35 = vector.shape_cast %34 : vector<1x1x1x8x128xf32> to vector<8x128xf32>
    %c0_36 = arith.constant 0 : index
    %c0_37 = arith.constant 0 : index
    %c1_38 = arith.constant 1 : index
    %c0_39 = arith.constant 0 : index
    %c0_40 = arith.constant 0 : index
    %36 = vector.load %arg3[%c0_36, %c0_37, %c1_38, %c0_39, %c0_40] : memref<1x1x4x8x256xf32, #tpu.memory_space<vmem>>, vector<1x1x1x8x128xf32>
    %37 = vector.shape_cast %36 : vector<1x1x1x8x128xf32> to vector<8x128xf32>
    %c0_41 = arith.constant 0 : index
    %c0_42 = arith.constant 0 : index
    %c2_43 = arith.constant 2 : index
    %c0_44 = arith.constant 0 : index
    %c0_45 = arith.constant 0 : index
    %38 = vector.load %arg3[%c0_41, %c0_42, %c2_43, %c0_44, %c0_45] : memref<1x1x4x8x256xf32, #tpu.memory_space<vmem>>, vector<1x1x1x8x128xf32>
    %39 = vector.shape_cast %38 : vector<1x1x1x8x128xf32> to vector<8x128xf32>
    %c0_46 = arith.constant 0 : index
    %c0_47 = arith.constant 0 : index
    %c3_48 = arith.constant 3 : index
    %c0_49 = arith.constant 0 : index
    %c0_50 = arith.constant 0 : index
    %40 = vector.load %arg3[%c0_46, %c0_47, %c3_48, %c0_49, %c0_50] : memref<1x1x4x8x256xf32, #tpu.memory_space<vmem>>, vector<1x1x1x8x128xf32>
    %41 = vector.shape_cast %40 : vector<1x1x1x8x128xf32> to vector<8x128xf32>
    %42 = arith.mulf %5, %41 : vector<8x128xf32>
    %43 = arith.mulf %7, %39 : vector<8x128xf32>
    %44 = arith.subf %42, %43 : vector<8x128xf32>
    %45 = arith.mulf %7, %37 : vector<8x128xf32>
    %46 = arith.mulf %3, %41 : vector<8x128xf32>
    %47 = arith.subf %45, %46 : vector<8x128xf32>
    %48 = arith.mulf %3, %39 : vector<8x128xf32>
    %49 = arith.mulf %5, %37 : vector<8x128xf32>
    %50 = arith.subf %48, %49 : vector<8x128xf32>
    %51 = arith.mulf %3, %37 : vector<8x128xf32>
    %52 = arith.mulf %5, %39 : vector<8x128xf32>
    %53 = arith.addf %51, %52 : vector<8x128xf32>
    %54 = arith.mulf %7, %41 : vector<8x128xf32>
    %55 = arith.addf %53, %54 : vector<8x128xf32>
    %cst_51 = arith.constant 2.000000e+00 : f32
    %56 = vector.broadcast %cst_51 : f32 to vector<8x128xf32>
    %57 = arith.mulf %55, %56 : vector<8x128xf32>
    %58 = arith.mulf %35, %14 : vector<8x128xf32>
    %59 = arith.mulf %17, %37 : vector<8x128xf32>
    %60 = arith.mulf %57, %3 : vector<8x128xf32>
    %61 = arith.addf %59, %60 : vector<8x128xf32>
    %62 = arith.mulf %15, %44 : vector<8x128xf32>
    %63 = arith.addf %61, %62 : vector<8x128xf32>
    %64 = arith.mulf %17, %39 : vector<8x128xf32>
    %65 = arith.mulf %57, %5 : vector<8x128xf32>
    %66 = arith.addf %64, %65 : vector<8x128xf32>
    %67 = arith.mulf %15, %47 : vector<8x128xf32>
    %68 = arith.addf %66, %67 : vector<8x128xf32>
    %69 = arith.mulf %17, %41 : vector<8x128xf32>
    %70 = arith.mulf %57, %7 : vector<8x128xf32>
    %71 = arith.addf %69, %70 : vector<8x128xf32>
    %72 = arith.mulf %15, %50 : vector<8x128xf32>
    %73 = arith.addf %71, %72 : vector<8x128xf32>
    %74 = arith.mulf %15, %35 : vector<8x128xf32>
    %75 = arith.mulf %15, %37 : vector<8x128xf32>
    %76 = arith.addf %44, %44 : vector<8x128xf32>
    %77 = arith.addf %75, %76 : vector<8x128xf32>
    %78 = arith.mulf %15, %39 : vector<8x128xf32>
    %79 = arith.addf %47, %47 : vector<8x128xf32>
    %80 = arith.addf %78, %79 : vector<8x128xf32>
    %81 = arith.mulf %15, %41 : vector<8x128xf32>
    %82 = arith.addf %50, %50 : vector<8x128xf32>
    %83 = arith.addf %81, %82 : vector<8x128xf32>
    %84 = arith.mulf %35, %58 : vector<8x128xf32>
    %85 = arith.mulf %37, %63 : vector<8x128xf32>
    %86 = arith.subf %84, %85 : vector<8x128xf32>
    %87 = arith.mulf %39, %68 : vector<8x128xf32>
    %88 = arith.subf %86, %87 : vector<8x128xf32>
    %89 = arith.mulf %41, %73 : vector<8x128xf32>
    %90 = arith.subf %88, %89 : vector<8x128xf32>
    %91 = arith.mulf %35, %63 : vector<8x128xf32>
    %92 = arith.mulf %37, %58 : vector<8x128xf32>
    %93 = arith.addf %91, %92 : vector<8x128xf32>
    %94 = arith.mulf %39, %73 : vector<8x128xf32>
    %95 = arith.addf %93, %94 : vector<8x128xf32>
    %96 = arith.mulf %41, %68 : vector<8x128xf32>
    %97 = arith.subf %95, %96 : vector<8x128xf32>
    %98 = arith.mulf %35, %68 : vector<8x128xf32>
    %99 = arith.mulf %37, %73 : vector<8x128xf32>
    %100 = arith.subf %98, %99 : vector<8x128xf32>
    %101 = arith.mulf %39, %58 : vector<8x128xf32>
    %102 = arith.addf %100, %101 : vector<8x128xf32>
    %103 = arith.mulf %41, %63 : vector<8x128xf32>
    %104 = arith.addf %102, %103 : vector<8x128xf32>
    %105 = arith.mulf %35, %73 : vector<8x128xf32>
    %106 = arith.mulf %37, %68 : vector<8x128xf32>
    %107 = arith.addf %105, %106 : vector<8x128xf32>
    %108 = arith.mulf %39, %63 : vector<8x128xf32>
    %109 = arith.subf %107, %108 : vector<8x128xf32>
    %110 = arith.mulf %41, %58 : vector<8x128xf32>
    %111 = arith.addf %109, %110 : vector<8x128xf32>
    %112 = arith.mulf %35, %74 : vector<8x128xf32>
    %113 = arith.mulf %37, %77 : vector<8x128xf32>
    %114 = arith.subf %112, %113 : vector<8x128xf32>
    %115 = arith.mulf %39, %80 : vector<8x128xf32>
    %116 = arith.subf %114, %115 : vector<8x128xf32>
    %117 = arith.mulf %41, %83 : vector<8x128xf32>
    %118 = arith.subf %116, %117 : vector<8x128xf32>
    %119 = arith.mulf %35, %77 : vector<8x128xf32>
    %120 = arith.mulf %37, %74 : vector<8x128xf32>
    %121 = arith.addf %119, %120 : vector<8x128xf32>
    %122 = arith.mulf %39, %83 : vector<8x128xf32>
    %123 = arith.addf %121, %122 : vector<8x128xf32>
    %124 = arith.mulf %41, %80 : vector<8x128xf32>
    %125 = arith.subf %123, %124 : vector<8x128xf32>
    %126 = arith.mulf %35, %80 : vector<8x128xf32>
    %127 = arith.mulf %37, %83 : vector<8x128xf32>
    %128 = arith.subf %126, %127 : vector<8x128xf32>
    %129 = arith.mulf %39, %74 : vector<8x128xf32>
    %130 = arith.addf %128, %129 : vector<8x128xf32>
    %131 = arith.mulf %41, %77 : vector<8x128xf32>
    %132 = arith.addf %130, %131 : vector<8x128xf32>
    %133 = arith.mulf %35, %83 : vector<8x128xf32>
    %134 = arith.mulf %37, %80 : vector<8x128xf32>
    %135 = arith.addf %133, %134 : vector<8x128xf32>
    %136 = arith.mulf %39, %77 : vector<8x128xf32>
    %137 = arith.subf %135, %136 : vector<8x128xf32>
    %138 = arith.mulf %41, %74 : vector<8x128xf32>
    %139 = arith.addf %137, %138 : vector<8x128xf32>
    %140 = arith.addf %35, %35 : vector<8x128xf32>
    %141 = arith.mulf %35, %35 : vector<8x128xf32>
    %142 = arith.mulf %37, %37 : vector<8x128xf32>
    %143 = arith.mulf %39, %39 : vector<8x128xf32>
    %144 = arith.addf %142, %143 : vector<8x128xf32>
    %145 = arith.mulf %41, %41 : vector<8x128xf32>
    %146 = arith.addf %144, %145 : vector<8x128xf32>
    %147 = arith.subf %141, %146 : vector<8x128xf32>
    %148 = arith.mulf %140, %37 : vector<8x128xf32>
    %149 = arith.mulf %140, %39 : vector<8x128xf32>
    %150 = arith.mulf %140, %41 : vector<8x128xf32>
    %c0_52 = arith.constant 0 : index
    %c0_53 = arith.constant 0 : index
    %c0_54 = arith.constant 0 : index
    %151 = vector.load %arg4[%c0_52, %c0_53, %c0_54] : memref<4x8x12xf32, #tpu.memory_space<vmem>>, vector<1x8x1xf32>
    %152 = vector.shape_cast %151 : vector<1x8x1xf32> to vector<8x1xf32>
    %c0_55 = arith.constant 0 : index
    %c0_56 = arith.constant 0 : index
    %c3_57 = arith.constant 3 : index
    %153 = vector.load %arg4[%c0_55, %c0_56, %c3_57] : memref<4x8x12xf32, #tpu.memory_space<vmem>>, vector<1x8x1xf32>
    %154 = vector.shape_cast %153 : vector<1x8x1xf32> to vector<8x1xf32>
    %c0_58 = arith.constant 0 : index
    %c0_59 = arith.constant 0 : index
    %c6 = arith.constant 6 : index
    %155 = vector.load %arg4[%c0_58, %c0_59, %c6] : memref<4x8x12xf32, #tpu.memory_space<vmem>>, vector<1x8x1xf32>
    %156 = vector.shape_cast %155 : vector<1x8x1xf32> to vector<8x1xf32>
    %c0_60 = arith.constant 0 : index
    %c0_61 = arith.constant 0 : index
    %c9 = arith.constant 9 : index
    %157 = vector.load %arg4[%c0_60, %c0_61, %c9] : memref<4x8x12xf32, #tpu.memory_space<vmem>>, vector<1x8x1xf32>
    %158 = vector.shape_cast %157 : vector<1x8x1xf32> to vector<8x1xf32>
    %159 = vector.shape_cast %156 : vector<8x1xf32> to vector<8x1xf32>
    %160 = vector.broadcast %159 : vector<8x1xf32> to vector<8x128xf32>
    %161 = vector.shape_cast %158 : vector<8x1xf32> to vector<8x1xf32>
    %162 = vector.broadcast %161 : vector<8x1xf32> to vector<8x128xf32>
    %163 = arith.mulf %160, %15 : vector<8x128xf32>
    %164 = arith.addf %14, %163 : vector<8x128xf32>
    %165 = arith.addf %164, %162 : vector<8x128xf32>
    %166 = tpu.reciprocal %165 {approx = true} : vector<8x128xf32> -> vector<8x128xf32>
    %167 = arith.mulf %165, %166 : vector<8x128xf32>
    %cst_62 = arith.constant 2.000000e+00 : f32
    %168 = vector.broadcast %cst_62 : f32 to vector<8x128xf32>
    %169 = arith.subf %168, %167 : vector<8x128xf32>
    %170 = arith.mulf %166, %169 : vector<8x128xf32>
    %171 = vector.shape_cast %152 : vector<8x1xf32> to vector<8x1xf32>
    %172 = vector.broadcast %171 : vector<8x1xf32> to vector<8x128xf32>
    %173 = arith.mulf %172, %170 : vector<8x128xf32>
    %174 = vector.shape_cast %154 : vector<8x1xf32> to vector<8x1xf32>
    %175 = vector.broadcast %174 : vector<8x1xf32> to vector<8x128xf32>
    %176 = arith.mulf %175, %170 : vector<8x128xf32>
    %177 = arith.mulf %160, %74 : vector<8x128xf32>
    %178 = arith.addf %58, %177 : vector<8x128xf32>
    %179 = arith.mulf %162, %35 : vector<8x128xf32>
    %180 = arith.addf %178, %179 : vector<8x128xf32>
    %181 = arith.mulf %160, %118 : vector<8x128xf32>
    %182 = arith.addf %90, %181 : vector<8x128xf32>
    %183 = arith.mulf %162, %147 : vector<8x128xf32>
    %184 = arith.addf %182, %183 : vector<8x128xf32>
    %185 = arith.mulf %173, %184 : vector<8x128xf32>
    %186 = arith.addf %18, %185 : vector<8x128xf32>
    %187 = arith.mulf %176, %180 : vector<8x128xf32>
    %188 = arith.addf %186, %187 : vector<8x128xf32>
    %189 = arith.mulf %160, %77 : vector<8x128xf32>
    %190 = arith.addf %63, %189 : vector<8x128xf32>
    %191 = arith.mulf %162, %37 : vector<8x128xf32>
    %192 = arith.addf %190, %191 : vector<8x128xf32>
    %193 = arith.mulf %160, %125 : vector<8x128xf32>
    %194 = arith.addf %97, %193 : vector<8x128xf32>
    %195 = arith.mulf %162, %148 : vector<8x128xf32>
    %196 = arith.addf %194, %195 : vector<8x128xf32>
    %197 = arith.mulf %173, %196 : vector<8x128xf32>
    %198 = arith.addf %19, %197 : vector<8x128xf32>
    %199 = arith.mulf %176, %192 : vector<8x128xf32>
    %200 = arith.addf %198, %199 : vector<8x128xf32>
    %201 = arith.mulf %160, %80 : vector<8x128xf32>
    %202 = arith.addf %68, %201 : vector<8x128xf32>
    %203 = arith.mulf %162, %39 : vector<8x128xf32>
    %204 = arith.addf %202, %203 : vector<8x128xf32>
    %205 = arith.mulf %160, %132 : vector<8x128xf32>
    %206 = arith.addf %104, %205 : vector<8x128xf32>
    %207 = arith.mulf %162, %149 : vector<8x128xf32>
    %208 = arith.addf %206, %207 : vector<8x128xf32>
    %209 = arith.mulf %173, %208 : vector<8x128xf32>
    %210 = arith.addf %20, %209 : vector<8x128xf32>
    %211 = arith.mulf %176, %204 : vector<8x128xf32>
    %212 = arith.addf %210, %211 : vector<8x128xf32>
    %213 = arith.mulf %160, %83 : vector<8x128xf32>
    %214 = arith.addf %73, %213 : vector<8x128xf32>
    %215 = arith.mulf %162, %41 : vector<8x128xf32>
    %216 = arith.addf %214, %215 : vector<8x128xf32>
    %217 = arith.mulf %160, %139 : vector<8x128xf32>
    %218 = arith.addf %111, %217 : vector<8x128xf32>
    %219 = arith.mulf %162, %150 : vector<8x128xf32>
    %220 = arith.addf %218, %219 : vector<8x128xf32>
    %221 = arith.mulf %173, %220 : vector<8x128xf32>
    %222 = arith.addf %21, %221 : vector<8x128xf32>
    %223 = arith.mulf %176, %216 : vector<8x128xf32>
    %224 = arith.addf %222, %223 : vector<8x128xf32>
    %c1_63 = arith.constant 1 : index
    %c0_64 = arith.constant 0 : index
    %c0_65 = arith.constant 0 : index
    %225 = vector.load %arg4[%c1_63, %c0_64, %c0_65] : memref<4x8x12xf32, #tpu.memory_space<vmem>>, vector<1x8x1xf32>
    %226 = vector.shape_cast %225 : vector<1x8x1xf32> to vector<8x1xf32>
    %c1_66 = arith.constant 1 : index
    %c0_67 = arith.constant 0 : index
    %c3_68 = arith.constant 3 : index
    %227 = vector.load %arg4[%c1_66, %c0_67, %c3_68] : memref<4x8x12xf32, #tpu.memory_space<vmem>>, vector<1x8x1xf32>
    %228 = vector.shape_cast %227 : vector<1x8x1xf32> to vector<8x1xf32>
    %c1_69 = arith.constant 1 : index
    %c0_70 = arith.constant 0 : index
    %c6_71 = arith.constant 6 : index
    %229 = vector.load %arg4[%c1_69, %c0_70, %c6_71] : memref<4x8x12xf32, #tpu.memory_space<vmem>>, vector<1x8x1xf32>
    %230 = vector.shape_cast %229 : vector<1x8x1xf32> to vector<8x1xf32>
    %c1_72 = arith.constant 1 : index
    %c0_73 = arith.constant 0 : index
    %c9_74 = arith.constant 9 : index
    %231 = vector.load %arg4[%c1_72, %c0_73, %c9_74] : memref<4x8x12xf32, #tpu.memory_space<vmem>>, vector<1x8x1xf32>
    %232 = vector.shape_cast %231 : vector<1x8x1xf32> to vector<8x1xf32>
    %233 = vector.shape_cast %230 : vector<8x1xf32> to vector<8x1xf32>
    %234 = vector.broadcast %233 : vector<8x1xf32> to vector<8x128xf32>
    %235 = vector.shape_cast %232 : vector<8x1xf32> to vector<8x1xf32>
    %236 = vector.broadcast %235 : vector<8x1xf32> to vector<8x128xf32>
    %237 = arith.mulf %234, %15 : vector<8x128xf32>
    %238 = arith.addf %14, %237 : vector<8x128xf32>
    %239 = arith.addf %238, %236 : vector<8x128xf32>
    %240 = tpu.reciprocal %239 {approx = true} : vector<8x128xf32> -> vector<8x128xf32>
    %241 = arith.mulf %239, %240 : vector<8x128xf32>
    %cst_75 = arith.constant 2.000000e+00 : f32
    %242 = vector.broadcast %cst_75 : f32 to vector<8x128xf32>
    %243 = arith.subf %242, %241 : vector<8x128xf32>
    %244 = arith.mulf %240, %243 : vector<8x128xf32>
    %245 = vector.shape_cast %226 : vector<8x1xf32> to vector<8x1xf32>
    %246 = vector.broadcast %245 : vector<8x1xf32> to vector<8x128xf32>
    %247 = arith.mulf %246, %244 : vector<8x128xf32>
    %248 = vector.shape_cast %228 : vector<8x1xf32> to vector<8x1xf32>
    %249 = vector.broadcast %248 : vector<8x1xf32> to vector<8x128xf32>
    %250 = arith.mulf %249, %244 : vector<8x128xf32>
    %251 = arith.mulf %234, %74 : vector<8x128xf32>
    %252 = arith.addf %58, %251 : vector<8x128xf32>
    %253 = arith.mulf %236, %35 : vector<8x128xf32>
    %254 = arith.addf %252, %253 : vector<8x128xf32>
    %255 = arith.mulf %234, %118 : vector<8x128xf32>
    %256 = arith.addf %90, %255 : vector<8x128xf32>
    %257 = arith.mulf %236, %147 : vector<8x128xf32>
    %258 = arith.addf %256, %257 : vector<8x128xf32>
    %259 = arith.mulf %247, %258 : vector<8x128xf32>
    %260 = arith.addf %22, %259 : vector<8x128xf32>
    %261 = arith.mulf %250, %254 : vector<8x128xf32>
    %262 = arith.addf %260, %261 : vector<8x128xf32>
    %263 = arith.mulf %234, %77 : vector<8x128xf32>
    %264 = arith.addf %63, %263 : vector<8x128xf32>
    %265 = arith.mulf %236, %37 : vector<8x128xf32>
    %266 = arith.addf %264, %265 : vector<8x128xf32>
    %267 = arith.mulf %234, %125 : vector<8x128xf32>
    %268 = arith.addf %97, %267 : vector<8x128xf32>
    %269 = arith.mulf %236, %148 : vector<8x128xf32>
    %270 = arith.addf %268, %269 : vector<8x128xf32>
    %271 = arith.mulf %247, %270 : vector<8x128xf32>
    %272 = arith.addf %23, %271 : vector<8x128xf32>
    %273 = arith.mulf %250, %266 : vector<8x128xf32>
    %274 = arith.addf %272, %273 : vector<8x128xf32>
    %275 = arith.mulf %234, %80 : vector<8x128xf32>
    %276 = arith.addf %68, %275 : vector<8x128xf32>
    %277 = arith.mulf %236, %39 : vector<8x128xf32>
    %278 = arith.addf %276, %277 : vector<8x128xf32>
    %279 = arith.mulf %234, %132 : vector<8x128xf32>
    %280 = arith.addf %104, %279 : vector<8x128xf32>
    %281 = arith.mulf %236, %149 : vector<8x128xf32>
    %282 = arith.addf %280, %281 : vector<8x128xf32>
    %283 = arith.mulf %247, %282 : vector<8x128xf32>
    %284 = arith.addf %24, %283 : vector<8x128xf32>
    %285 = arith.mulf %250, %278 : vector<8x128xf32>
    %286 = arith.addf %284, %285 : vector<8x128xf32>
    %287 = arith.mulf %234, %83 : vector<8x128xf32>
    %288 = arith.addf %73, %287 : vector<8x128xf32>
    %289 = arith.mulf %236, %41 : vector<8x128xf32>
    %290 = arith.addf %288, %289 : vector<8x128xf32>
    %291 = arith.mulf %234, %139 : vector<8x128xf32>
    %292 = arith.addf %111, %291 : vector<8x128xf32>
    %293 = arith.mulf %236, %150 : vector<8x128xf32>
    %294 = arith.addf %292, %293 : vector<8x128xf32>
    %295 = arith.mulf %247, %294 : vector<8x128xf32>
    %296 = arith.addf %25, %295 : vector<8x128xf32>
    %297 = arith.mulf %250, %290 : vector<8x128xf32>
    %298 = arith.addf %296, %297 : vector<8x128xf32>
    %c2_76 = arith.constant 2 : index
    %c0_77 = arith.constant 0 : index
    %c0_78 = arith.constant 0 : index
    %299 = vector.load %arg4[%c2_76, %c0_77, %c0_78] : memref<4x8x12xf32, #tpu.memory_space<vmem>>, vector<1x8x1xf32>
    %300 = vector.shape_cast %299 : vector<1x8x1xf32> to vector<8x1xf32>
    %c2_79 = arith.constant 2 : index
    %c0_80 = arith.constant 0 : index
    %c3_81 = arith.constant 3 : index
    %301 = vector.load %arg4[%c2_79, %c0_80, %c3_81] : memref<4x8x12xf32, #tpu.memory_space<vmem>>, vector<1x8x1xf32>
    %302 = vector.shape_cast %301 : vector<1x8x1xf32> to vector<8x1xf32>
    %c2_82 = arith.constant 2 : index
    %c0_83 = arith.constant 0 : index
    %c6_84 = arith.constant 6 : index
    %303 = vector.load %arg4[%c2_82, %c0_83, %c6_84] : memref<4x8x12xf32, #tpu.memory_space<vmem>>, vector<1x8x1xf32>
    %304 = vector.shape_cast %303 : vector<1x8x1xf32> to vector<8x1xf32>
    %c2_85 = arith.constant 2 : index
    %c0_86 = arith.constant 0 : index
    %c9_87 = arith.constant 9 : index
    %305 = vector.load %arg4[%c2_85, %c0_86, %c9_87] : memref<4x8x12xf32, #tpu.memory_space<vmem>>, vector<1x8x1xf32>
    %306 = vector.shape_cast %305 : vector<1x8x1xf32> to vector<8x1xf32>
    %307 = vector.shape_cast %304 : vector<8x1xf32> to vector<8x1xf32>
    %308 = vector.broadcast %307 : vector<8x1xf32> to vector<8x128xf32>
    %309 = vector.shape_cast %306 : vector<8x1xf32> to vector<8x1xf32>
    %310 = vector.broadcast %309 : vector<8x1xf32> to vector<8x128xf32>
    %311 = arith.mulf %308, %15 : vector<8x128xf32>
    %312 = arith.addf %14, %311 : vector<8x128xf32>
    %313 = arith.addf %312, %310 : vector<8x128xf32>
    %314 = tpu.reciprocal %313 {approx = true} : vector<8x128xf32> -> vector<8x128xf32>
    %315 = arith.mulf %313, %314 : vector<8x128xf32>
    %cst_88 = arith.constant 2.000000e+00 : f32
    %316 = vector.broadcast %cst_88 : f32 to vector<8x128xf32>
    %317 = arith.subf %316, %315 : vector<8x128xf32>
    %318 = arith.mulf %314, %317 : vector<8x128xf32>
    %319 = vector.shape_cast %300 : vector<8x1xf32> to vector<8x1xf32>
    %320 = vector.broadcast %319 : vector<8x1xf32> to vector<8x128xf32>
    %321 = arith.mulf %320, %318 : vector<8x128xf32>
    %322 = vector.shape_cast %302 : vector<8x1xf32> to vector<8x1xf32>
    %323 = vector.broadcast %322 : vector<8x1xf32> to vector<8x128xf32>
    %324 = arith.mulf %323, %318 : vector<8x128xf32>
    %325 = arith.mulf %308, %74 : vector<8x128xf32>
    %326 = arith.addf %58, %325 : vector<8x128xf32>
    %327 = arith.mulf %310, %35 : vector<8x128xf32>
    %328 = arith.addf %326, %327 : vector<8x128xf32>
    %329 = arith.mulf %308, %118 : vector<8x128xf32>
    %330 = arith.addf %90, %329 : vector<8x128xf32>
    %331 = arith.mulf %310, %147 : vector<8x128xf32>
    %332 = arith.addf %330, %331 : vector<8x128xf32>
    %333 = arith.mulf %321, %332 : vector<8x128xf32>
    %334 = arith.addf %26, %333 : vector<8x128xf32>
    %335 = arith.mulf %324, %328 : vector<8x128xf32>
    %336 = arith.addf %334, %335 : vector<8x128xf32>
    %337 = arith.mulf %308, %77 : vector<8x128xf32>
    %338 = arith.addf %63, %337 : vector<8x128xf32>
    %339 = arith.mulf %310, %37 : vector<8x128xf32>
    %340 = arith.addf %338, %339 : vector<8x128xf32>
    %341 = arith.mulf %308, %125 : vector<8x128xf32>
    %342 = arith.addf %97, %341 : vector<8x128xf32>
    %343 = arith.mulf %310, %148 : vector<8x128xf32>
    %344 = arith.addf %342, %343 : vector<8x128xf32>
    %345 = arith.mulf %321, %344 : vector<8x128xf32>
    %346 = arith.addf %27, %345 : vector<8x128xf32>
    %347 = arith.mulf %324, %340 : vector<8x128xf32>
    %348 = arith.addf %346, %347 : vector<8x128xf32>
    %349 = arith.mulf %308, %80 : vector<8x128xf32>
    %350 = arith.addf %68, %349 : vector<8x128xf32>
    %351 = arith.mulf %310, %39 : vector<8x128xf32>
    %352 = arith.addf %350, %351 : vector<8x128xf32>
    %353 = arith.mulf %308, %132 : vector<8x128xf32>
    %354 = arith.addf %104, %353 : vector<8x128xf32>
    %355 = arith.mulf %310, %149 : vector<8x128xf32>
    %356 = arith.addf %354, %355 : vector<8x128xf32>
    %357 = arith.mulf %321, %356 : vector<8x128xf32>
    %358 = arith.addf %28, %357 : vector<8x128xf32>
    %359 = arith.mulf %324, %352 : vector<8x128xf32>
    %360 = arith.addf %358, %359 : vector<8x128xf32>
    %361 = arith.mulf %308, %83 : vector<8x128xf32>
    %362 = arith.addf %73, %361 : vector<8x128xf32>
    %363 = arith.mulf %310, %41 : vector<8x128xf32>
    %364 = arith.addf %362, %363 : vector<8x128xf32>
    %365 = arith.mulf %308, %139 : vector<8x128xf32>
    %366 = arith.addf %111, %365 : vector<8x128xf32>
    %367 = arith.mulf %310, %150 : vector<8x128xf32>
    %368 = arith.addf %366, %367 : vector<8x128xf32>
    %369 = arith.mulf %321, %368 : vector<8x128xf32>
    %370 = arith.addf %29, %369 : vector<8x128xf32>
    %371 = arith.mulf %324, %364 : vector<8x128xf32>
    %372 = arith.addf %370, %371 : vector<8x128xf32>
    %c3_89 = arith.constant 3 : index
    %c0_90 = arith.constant 0 : index
    %c0_91 = arith.constant 0 : index
    %373 = vector.load %arg4[%c3_89, %c0_90, %c0_91] : memref<4x8x12xf32, #tpu.memory_space<vmem>>, vector<1x8x1xf32>
    %374 = vector.shape_cast %373 : vector<1x8x1xf32> to vector<8x1xf32>
    %c3_92 = arith.constant 3 : index
    %c0_93 = arith.constant 0 : index
    %c3_94 = arith.constant 3 : index
    %375 = vector.load %arg4[%c3_92, %c0_93, %c3_94] : memref<4x8x12xf32, #tpu.memory_space<vmem>>, vector<1x8x1xf32>
    %376 = vector.shape_cast %375 : vector<1x8x1xf32> to vector<8x1xf32>
    %c3_95 = arith.constant 3 : index
    %c0_96 = arith.constant 0 : index
    %c6_97 = arith.constant 6 : index
    %377 = vector.load %arg4[%c3_95, %c0_96, %c6_97] : memref<4x8x12xf32, #tpu.memory_space<vmem>>, vector<1x8x1xf32>
    %378 = vector.shape_cast %377 : vector<1x8x1xf32> to vector<8x1xf32>
    %c3_98 = arith.constant 3 : index
    %c0_99 = arith.constant 0 : index
    %c9_100 = arith.constant 9 : index
    %379 = vector.load %arg4[%c3_98, %c0_99, %c9_100] : memref<4x8x12xf32, #tpu.memory_space<vmem>>, vector<1x8x1xf32>
    %380 = vector.shape_cast %379 : vector<1x8x1xf32> to vector<8x1xf32>
    %381 = vector.shape_cast %378 : vector<8x1xf32> to vector<8x1xf32>
    %382 = vector.broadcast %381 : vector<8x1xf32> to vector<8x128xf32>
    %383 = vector.shape_cast %380 : vector<8x1xf32> to vector<8x1xf32>
    %384 = vector.broadcast %383 : vector<8x1xf32> to vector<8x128xf32>
    %385 = arith.mulf %382, %15 : vector<8x128xf32>
    %386 = arith.addf %14, %385 : vector<8x128xf32>
    %387 = arith.addf %386, %384 : vector<8x128xf32>
    %388 = tpu.reciprocal %387 {approx = true} : vector<8x128xf32> -> vector<8x128xf32>
    %389 = arith.mulf %387, %388 : vector<8x128xf32>
    %cst_101 = arith.constant 2.000000e+00 : f32
    %390 = vector.broadcast %cst_101 : f32 to vector<8x128xf32>
    %391 = arith.subf %390, %389 : vector<8x128xf32>
    %392 = arith.mulf %388, %391 : vector<8x128xf32>
    %393 = vector.shape_cast %374 : vector<8x1xf32> to vector<8x1xf32>
    %394 = vector.broadcast %393 : vector<8x1xf32> to vector<8x128xf32>
    %395 = arith.mulf %394, %392 : vector<8x128xf32>
    %396 = vector.shape_cast %376 : vector<8x1xf32> to vector<8x1xf32>
    %397 = vector.broadcast %396 : vector<8x1xf32> to vector<8x128xf32>
    %398 = arith.mulf %397, %392 : vector<8x128xf32>
    %399 = arith.mulf %382, %74 : vector<8x128xf32>
    %400 = arith.addf %58, %399 : vector<8x128xf32>
    %401 = arith.mulf %384, %35 : vector<8x128xf32>
    %402 = arith.addf %400, %401 : vector<8x128xf32>
    %403 = arith.mulf %382, %118 : vector<8x128xf32>
    %404 = arith.addf %90, %403 : vector<8x128xf32>
    %405 = arith.mulf %384, %147 : vector<8x128xf32>
    %406 = arith.addf %404, %405 : vector<8x128xf32>
    %407 = arith.mulf %395, %406 : vector<8x128xf32>
    %408 = arith.addf %30, %407 : vector<8x128xf32>
    %409 = arith.mulf %398, %402 : vector<8x128xf32>
    %410 = arith.addf %408, %409 : vector<8x128xf32>
    %411 = arith.mulf %382, %77 : vector<8x128xf32>
    %412 = arith.addf %63, %411 : vector<8x128xf32>
    %413 = arith.mulf %384, %37 : vector<8x128xf32>
    %414 = arith.addf %412, %413 : vector<8x128xf32>
    %415 = arith.mulf %382, %125 : vector<8x128xf32>
    %416 = arith.addf %97, %415 : vector<8x128xf32>
    %417 = arith.mulf %384, %148 : vector<8x128xf32>
    %418 = arith.addf %416, %417 : vector<8x128xf32>
    %419 = arith.mulf %395, %418 : vector<8x128xf32>
    %420 = arith.addf %31, %419 : vector<8x128xf32>
    %421 = arith.mulf %398, %414 : vector<8x128xf32>
    %422 = arith.addf %420, %421 : vector<8x128xf32>
    %423 = arith.mulf %382, %80 : vector<8x128xf32>
    %424 = arith.addf %68, %423 : vector<8x128xf32>
    %425 = arith.mulf %384, %39 : vector<8x128xf32>
    %426 = arith.addf %424, %425 : vector<8x128xf32>
    %427 = arith.mulf %382, %132 : vector<8x128xf32>
    %428 = arith.addf %104, %427 : vector<8x128xf32>
    %429 = arith.mulf %384, %149 : vector<8x128xf32>
    %430 = arith.addf %428, %429 : vector<8x128xf32>
    %431 = arith.mulf %395, %430 : vector<8x128xf32>
    %432 = arith.addf %32, %431 : vector<8x128xf32>
    %433 = arith.mulf %398, %426 : vector<8x128xf32>
    %434 = arith.addf %432, %433 : vector<8x128xf32>
    %435 = arith.mulf %382, %83 : vector<8x128xf32>
    %436 = arith.addf %73, %435 : vector<8x128xf32>
    %437 = arith.mulf %384, %41 : vector<8x128xf32>
    %438 = arith.addf %436, %437 : vector<8x128xf32>
    %439 = arith.mulf %382, %139 : vector<8x128xf32>
    %440 = arith.addf %111, %439 : vector<8x128xf32>
    %441 = arith.mulf %384, %150 : vector<8x128xf32>
    %442 = arith.addf %440, %441 : vector<8x128xf32>
    %443 = arith.mulf %395, %442 : vector<8x128xf32>
    %444 = arith.addf %33, %443 : vector<8x128xf32>
    %445 = arith.mulf %398, %438 : vector<8x128xf32>
    %446 = arith.addf %444, %445 : vector<8x128xf32>
    %447 = arith.mulf %5, %7 : vector<8x128xf32>
    %448 = arith.mulf %7, %5 : vector<8x128xf32>
    %449 = arith.subf %447, %448 : vector<8x128xf32>
    %450 = arith.mulf %7, %3 : vector<8x128xf32>
    %451 = arith.mulf %3, %7 : vector<8x128xf32>
    %452 = arith.subf %450, %451 : vector<8x128xf32>
    %453 = arith.mulf %3, %5 : vector<8x128xf32>
    %454 = arith.mulf %5, %3 : vector<8x128xf32>
    %455 = arith.subf %453, %454 : vector<8x128xf32>
    %456 = arith.mulf %3, %3 : vector<8x128xf32>
    %457 = arith.mulf %5, %5 : vector<8x128xf32>
    %458 = arith.addf %456, %457 : vector<8x128xf32>
    %459 = arith.mulf %7, %7 : vector<8x128xf32>
    %460 = arith.addf %458, %459 : vector<8x128xf32>
    %cst_102 = arith.constant 2.000000e+00 : f32
    %461 = vector.broadcast %cst_102 : f32 to vector<8x128xf32>
    %462 = arith.mulf %460, %461 : vector<8x128xf32>
    %463 = arith.mulf %1, %14 : vector<8x128xf32>
    %464 = arith.mulf %17, %3 : vector<8x128xf32>
    %465 = arith.mulf %462, %3 : vector<8x128xf32>
    %466 = arith.addf %464, %465 : vector<8x128xf32>
    %467 = arith.mulf %15, %449 : vector<8x128xf32>
    %468 = arith.addf %466, %467 : vector<8x128xf32>
    %469 = arith.mulf %17, %5 : vector<8x128xf32>
    %470 = arith.mulf %462, %5 : vector<8x128xf32>
    %471 = arith.addf %469, %470 : vector<8x128xf32>
    %472 = arith.mulf %15, %452 : vector<8x128xf32>
    %473 = arith.addf %471, %472 : vector<8x128xf32>
    %474 = arith.mulf %17, %7 : vector<8x128xf32>
    %475 = arith.mulf %462, %7 : vector<8x128xf32>
    %476 = arith.addf %474, %475 : vector<8x128xf32>
    %477 = arith.mulf %15, %455 : vector<8x128xf32>
    %478 = arith.addf %476, %477 : vector<8x128xf32>
    %479 = arith.mulf %15, %1 : vector<8x128xf32>
    %480 = arith.mulf %15, %3 : vector<8x128xf32>
    %481 = arith.addf %449, %449 : vector<8x128xf32>
    %482 = arith.addf %480, %481 : vector<8x128xf32>
    %483 = arith.mulf %15, %5 : vector<8x128xf32>
    %484 = arith.addf %452, %452 : vector<8x128xf32>
    %485 = arith.addf %483, %484 : vector<8x128xf32>
    %486 = arith.mulf %15, %7 : vector<8x128xf32>
    %487 = arith.addf %455, %455 : vector<8x128xf32>
    %488 = arith.addf %486, %487 : vector<8x128xf32>
    %489 = arith.mulf %1, %463 : vector<8x128xf32>
    %490 = arith.mulf %3, %468 : vector<8x128xf32>
    %491 = arith.subf %489, %490 : vector<8x128xf32>
    %492 = arith.mulf %5, %473 : vector<8x128xf32>
    %493 = arith.subf %491, %492 : vector<8x128xf32>
    %494 = arith.mulf %7, %478 : vector<8x128xf32>
    %495 = arith.subf %493, %494 : vector<8x128xf32>
    %496 = arith.mulf %1, %468 : vector<8x128xf32>
    %497 = arith.mulf %3, %463 : vector<8x128xf32>
    %498 = arith.addf %496, %497 : vector<8x128xf32>
    %499 = arith.mulf %5, %478 : vector<8x128xf32>
    %500 = arith.addf %498, %499 : vector<8x128xf32>
    %501 = arith.mulf %7, %473 : vector<8x128xf32>
    %502 = arith.subf %500, %501 : vector<8x128xf32>
    %503 = arith.mulf %1, %473 : vector<8x128xf32>
    %504 = arith.mulf %3, %478 : vector<8x128xf32>
    %505 = arith.subf %503, %504 : vector<8x128xf32>
    %506 = arith.mulf %5, %463 : vector<8x128xf32>
    %507 = arith.addf %505, %506 : vector<8x128xf32>
    %508 = arith.mulf %7, %468 : vector<8x128xf32>
    %509 = arith.addf %507, %508 : vector<8x128xf32>
    %510 = arith.mulf %1, %478 : vector<8x128xf32>
    %511 = arith.mulf %3, %473 : vector<8x128xf32>
    %512 = arith.addf %510, %511 : vector<8x128xf32>
    %513 = arith.mulf %5, %468 : vector<8x128xf32>
    %514 = arith.subf %512, %513 : vector<8x128xf32>
    %515 = arith.mulf %7, %463 : vector<8x128xf32>
    %516 = arith.addf %514, %515 : vector<8x128xf32>
    %517 = arith.mulf %1, %479 : vector<8x128xf32>
    %518 = arith.mulf %3, %482 : vector<8x128xf32>
    %519 = arith.subf %517, %518 : vector<8x128xf32>
    %520 = arith.mulf %5, %485 : vector<8x128xf32>
    %521 = arith.subf %519, %520 : vector<8x128xf32>
    %522 = arith.mulf %7, %488 : vector<8x128xf32>
    %523 = arith.subf %521, %522 : vector<8x128xf32>
    %524 = arith.mulf %1, %482 : vector<8x128xf32>
    %525 = arith.mulf %3, %479 : vector<8x128xf32>
    %526 = arith.addf %524, %525 : vector<8x128xf32>
    %527 = arith.mulf %5, %488 : vector<8x128xf32>
    %528 = arith.addf %526, %527 : vector<8x128xf32>
    %529 = arith.mulf %7, %485 : vector<8x128xf32>
    %530 = arith.subf %528, %529 : vector<8x128xf32>
    %531 = arith.mulf %1, %485 : vector<8x128xf32>
    %532 = arith.mulf %3, %488 : vector<8x128xf32>
    %533 = arith.subf %531, %532 : vector<8x128xf32>
    %534 = arith.mulf %5, %479 : vector<8x128xf32>
    %535 = arith.addf %533, %534 : vector<8x128xf32>
    %536 = arith.mulf %7, %482 : vector<8x128xf32>
    %537 = arith.addf %535, %536 : vector<8x128xf32>
    %538 = arith.mulf %1, %488 : vector<8x128xf32>
    %539 = arith.mulf %3, %485 : vector<8x128xf32>
    %540 = arith.addf %538, %539 : vector<8x128xf32>
    %541 = arith.mulf %5, %482 : vector<8x128xf32>
    %542 = arith.subf %540, %541 : vector<8x128xf32>
    %543 = arith.mulf %7, %479 : vector<8x128xf32>
    %544 = arith.addf %542, %543 : vector<8x128xf32>
    %545 = arith.addf %1, %1 : vector<8x128xf32>
    %546 = arith.mulf %1, %1 : vector<8x128xf32>
    %547 = arith.mulf %3, %3 : vector<8x128xf32>
    %548 = arith.mulf %5, %5 : vector<8x128xf32>
    %549 = arith.addf %547, %548 : vector<8x128xf32>
    %550 = arith.mulf %7, %7 : vector<8x128xf32>
    %551 = arith.addf %549, %550 : vector<8x128xf32>
    %552 = arith.subf %546, %551 : vector<8x128xf32>
    %553 = arith.mulf %545, %3 : vector<8x128xf32>
    %554 = arith.mulf %545, %5 : vector<8x128xf32>
    %555 = arith.mulf %545, %7 : vector<8x128xf32>
    %c0_103 = arith.constant 0 : index
    %c0_104 = arith.constant 0 : index
    %c1_105 = arith.constant 1 : index
    %556 = vector.load %arg4[%c0_103, %c0_104, %c1_105] : memref<4x8x12xf32, #tpu.memory_space<vmem>>, vector<1x8x1xf32>
    %557 = vector.shape_cast %556 : vector<1x8x1xf32> to vector<8x1xf32>
    %c0_106 = arith.constant 0 : index
    %c0_107 = arith.constant 0 : index
    %c4 = arith.constant 4 : index
    %558 = vector.load %arg4[%c0_106, %c0_107, %c4] : memref<4x8x12xf32, #tpu.memory_space<vmem>>, vector<1x8x1xf32>
    %559 = vector.shape_cast %558 : vector<1x8x1xf32> to vector<8x1xf32>
    %c0_108 = arith.constant 0 : index
    %c0_109 = arith.constant 0 : index
    %c7 = arith.constant 7 : index
    %560 = vector.load %arg4[%c0_108, %c0_109, %c7] : memref<4x8x12xf32, #tpu.memory_space<vmem>>, vector<1x8x1xf32>
    %561 = vector.shape_cast %560 : vector<1x8x1xf32> to vector<8x1xf32>
    %c0_110 = arith.constant 0 : index
    %c0_111 = arith.constant 0 : index
    %c10 = arith.constant 10 : index
    %562 = vector.load %arg4[%c0_110, %c0_111, %c10] : memref<4x8x12xf32, #tpu.memory_space<vmem>>, vector<1x8x1xf32>
    %563 = vector.shape_cast %562 : vector<1x8x1xf32> to vector<8x1xf32>
    %564 = vector.shape_cast %561 : vector<8x1xf32> to vector<8x1xf32>
    %565 = vector.broadcast %564 : vector<8x1xf32> to vector<8x128xf32>
    %566 = vector.shape_cast %563 : vector<8x1xf32> to vector<8x1xf32>
    %567 = vector.broadcast %566 : vector<8x1xf32> to vector<8x128xf32>
    %568 = arith.mulf %565, %15 : vector<8x128xf32>
    %569 = arith.addf %14, %568 : vector<8x128xf32>
    %570 = arith.addf %569, %567 : vector<8x128xf32>
    %571 = tpu.reciprocal %570 {approx = true} : vector<8x128xf32> -> vector<8x128xf32>
    %572 = arith.mulf %570, %571 : vector<8x128xf32>
    %cst_112 = arith.constant 2.000000e+00 : f32
    %573 = vector.broadcast %cst_112 : f32 to vector<8x128xf32>
    %574 = arith.subf %573, %572 : vector<8x128xf32>
    %575 = arith.mulf %571, %574 : vector<8x128xf32>
    %576 = vector.shape_cast %557 : vector<8x1xf32> to vector<8x1xf32>
    %577 = vector.broadcast %576 : vector<8x1xf32> to vector<8x128xf32>
    %578 = arith.mulf %577, %575 : vector<8x128xf32>
    %579 = vector.shape_cast %559 : vector<8x1xf32> to vector<8x1xf32>
    %580 = vector.broadcast %579 : vector<8x1xf32> to vector<8x128xf32>
    %581 = arith.mulf %580, %575 : vector<8x128xf32>
    %582 = arith.mulf %565, %479 : vector<8x128xf32>
    %583 = arith.addf %463, %582 : vector<8x128xf32>
    %584 = arith.mulf %567, %1 : vector<8x128xf32>
    %585 = arith.addf %583, %584 : vector<8x128xf32>
    %586 = arith.mulf %565, %523 : vector<8x128xf32>
    %587 = arith.addf %495, %586 : vector<8x128xf32>
    %588 = arith.mulf %567, %552 : vector<8x128xf32>
    %589 = arith.addf %587, %588 : vector<8x128xf32>
    %590 = arith.mulf %578, %589 : vector<8x128xf32>
    %591 = arith.addf %188, %590 : vector<8x128xf32>
    %592 = arith.mulf %581, %585 : vector<8x128xf32>
    %593 = arith.addf %591, %592 : vector<8x128xf32>
    %594 = arith.mulf %565, %482 : vector<8x128xf32>
    %595 = arith.addf %468, %594 : vector<8x128xf32>
    %596 = arith.mulf %567, %3 : vector<8x128xf32>
    %597 = arith.addf %595, %596 : vector<8x128xf32>
    %598 = arith.mulf %565, %530 : vector<8x128xf32>
    %599 = arith.addf %502, %598 : vector<8x128xf32>
    %600 = arith.mulf %567, %553 : vector<8x128xf32>
    %601 = arith.addf %599, %600 : vector<8x128xf32>
    %602 = arith.mulf %578, %601 : vector<8x128xf32>
    %603 = arith.addf %200, %602 : vector<8x128xf32>
    %604 = arith.mulf %581, %597 : vector<8x128xf32>
    %605 = arith.addf %603, %604 : vector<8x128xf32>
    %606 = arith.mulf %565, %485 : vector<8x128xf32>
    %607 = arith.addf %473, %606 : vector<8x128xf32>
    %608 = arith.mulf %567, %5 : vector<8x128xf32>
    %609 = arith.addf %607, %608 : vector<8x128xf32>
    %610 = arith.mulf %565, %537 : vector<8x128xf32>
    %611 = arith.addf %509, %610 : vector<8x128xf32>
    %612 = arith.mulf %567, %554 : vector<8x128xf32>
    %613 = arith.addf %611, %612 : vector<8x128xf32>
    %614 = arith.mulf %578, %613 : vector<8x128xf32>
    %615 = arith.addf %212, %614 : vector<8x128xf32>
    %616 = arith.mulf %581, %609 : vector<8x128xf32>
    %617 = arith.addf %615, %616 : vector<8x128xf32>
    %618 = arith.mulf %565, %488 : vector<8x128xf32>
    %619 = arith.addf %478, %618 : vector<8x128xf32>
    %620 = arith.mulf %567, %7 : vector<8x128xf32>
    %621 = arith.addf %619, %620 : vector<8x128xf32>
    %622 = arith.mulf %565, %544 : vector<8x128xf32>
    %623 = arith.addf %516, %622 : vector<8x128xf32>
    %624 = arith.mulf %567, %555 : vector<8x128xf32>
    %625 = arith.addf %623, %624 : vector<8x128xf32>
    %626 = arith.mulf %578, %625 : vector<8x128xf32>
    %627 = arith.addf %224, %626 : vector<8x128xf32>
    %628 = arith.mulf %581, %621 : vector<8x128xf32>
    %629 = arith.addf %627, %628 : vector<8x128xf32>
    %c1_113 = arith.constant 1 : index
    %c0_114 = arith.constant 0 : index
    %c1_115 = arith.constant 1 : index
    %630 = vector.load %arg4[%c1_113, %c0_114, %c1_115] : memref<4x8x12xf32, #tpu.memory_space<vmem>>, vector<1x8x1xf32>
    %631 = vector.shape_cast %630 : vector<1x8x1xf32> to vector<8x1xf32>
    %c1_116 = arith.constant 1 : index
    %c0_117 = arith.constant 0 : index
    %c4_118 = arith.constant 4 : index
    %632 = vector.load %arg4[%c1_116, %c0_117, %c4_118] : memref<4x8x12xf32, #tpu.memory_space<vmem>>, vector<1x8x1xf32>
    %633 = vector.shape_cast %632 : vector<1x8x1xf32> to vector<8x1xf32>
    %c1_119 = arith.constant 1 : index
    %c0_120 = arith.constant 0 : index
    %c7_121 = arith.constant 7 : index
    %634 = vector.load %arg4[%c1_119, %c0_120, %c7_121] : memref<4x8x12xf32, #tpu.memory_space<vmem>>, vector<1x8x1xf32>
    %635 = vector.shape_cast %634 : vector<1x8x1xf32> to vector<8x1xf32>
    %c1_122 = arith.constant 1 : index
    %c0_123 = arith.constant 0 : index
    %c10_124 = arith.constant 10 : index
    %636 = vector.load %arg4[%c1_122, %c0_123, %c10_124] : memref<4x8x12xf32, #tpu.memory_space<vmem>>, vector<1x8x1xf32>
    %637 = vector.shape_cast %636 : vector<1x8x1xf32> to vector<8x1xf32>
    %638 = vector.shape_cast %635 : vector<8x1xf32> to vector<8x1xf32>
    %639 = vector.broadcast %638 : vector<8x1xf32> to vector<8x128xf32>
    %640 = vector.shape_cast %637 : vector<8x1xf32> to vector<8x1xf32>
    %641 = vector.broadcast %640 : vector<8x1xf32> to vector<8x128xf32>
    %642 = arith.mulf %639, %15 : vector<8x128xf32>
    %643 = arith.addf %14, %642 : vector<8x128xf32>
    %644 = arith.addf %643, %641 : vector<8x128xf32>
    %645 = tpu.reciprocal %644 {approx = true} : vector<8x128xf32> -> vector<8x128xf32>
    %646 = arith.mulf %644, %645 : vector<8x128xf32>
    %cst_125 = arith.constant 2.000000e+00 : f32
    %647 = vector.broadcast %cst_125 : f32 to vector<8x128xf32>
    %648 = arith.subf %647, %646 : vector<8x128xf32>
    %649 = arith.mulf %645, %648 : vector<8x128xf32>
    %650 = vector.shape_cast %631 : vector<8x1xf32> to vector<8x1xf32>
    %651 = vector.broadcast %650 : vector<8x1xf32> to vector<8x128xf32>
    %652 = arith.mulf %651, %649 : vector<8x128xf32>
    %653 = vector.shape_cast %633 : vector<8x1xf32> to vector<8x1xf32>
    %654 = vector.broadcast %653 : vector<8x1xf32> to vector<8x128xf32>
    %655 = arith.mulf %654, %649 : vector<8x128xf32>
    %656 = arith.mulf %639, %479 : vector<8x128xf32>
    %657 = arith.addf %463, %656 : vector<8x128xf32>
    %658 = arith.mulf %641, %1 : vector<8x128xf32>
    %659 = arith.addf %657, %658 : vector<8x128xf32>
    %660 = arith.mulf %639, %523 : vector<8x128xf32>
    %661 = arith.addf %495, %660 : vector<8x128xf32>
    %662 = arith.mulf %641, %552 : vector<8x128xf32>
    %663 = arith.addf %661, %662 : vector<8x128xf32>
    %664 = arith.mulf %652, %663 : vector<8x128xf32>
    %665 = arith.addf %262, %664 : vector<8x128xf32>
    %666 = arith.mulf %655, %659 : vector<8x128xf32>
    %667 = arith.addf %665, %666 : vector<8x128xf32>
    %668 = arith.mulf %639, %482 : vector<8x128xf32>
    %669 = arith.addf %468, %668 : vector<8x128xf32>
    %670 = arith.mulf %641, %3 : vector<8x128xf32>
    %671 = arith.addf %669, %670 : vector<8x128xf32>
    %672 = arith.mulf %639, %530 : vector<8x128xf32>
    %673 = arith.addf %502, %672 : vector<8x128xf32>
    %674 = arith.mulf %641, %553 : vector<8x128xf32>
    %675 = arith.addf %673, %674 : vector<8x128xf32>
    %676 = arith.mulf %652, %675 : vector<8x128xf32>
    %677 = arith.addf %274, %676 : vector<8x128xf32>
    %678 = arith.mulf %655, %671 : vector<8x128xf32>
    %679 = arith.addf %677, %678 : vector<8x128xf32>
    %680 = arith.mulf %639, %485 : vector<8x128xf32>
    %681 = arith.addf %473, %680 : vector<8x128xf32>
    %682 = arith.mulf %641, %5 : vector<8x128xf32>
    %683 = arith.addf %681, %682 : vector<8x128xf32>
    %684 = arith.mulf %639, %537 : vector<8x128xf32>
    %685 = arith.addf %509, %684 : vector<8x128xf32>
    %686 = arith.mulf %641, %554 : vector<8x128xf32>
    %687 = arith.addf %685, %686 : vector<8x128xf32>
    %688 = arith.mulf %652, %687 : vector<8x128xf32>
    %689 = arith.addf %286, %688 : vector<8x128xf32>
    %690 = arith.mulf %655, %683 : vector<8x128xf32>
    %691 = arith.addf %689, %690 : vector<8x128xf32>
    %692 = arith.mulf %639, %488 : vector<8x128xf32>
    %693 = arith.addf %478, %692 : vector<8x128xf32>
    %694 = arith.mulf %641, %7 : vector<8x128xf32>
    %695 = arith.addf %693, %694 : vector<8x128xf32>
    %696 = arith.mulf %639, %544 : vector<8x128xf32>
    %697 = arith.addf %516, %696 : vector<8x128xf32>
    %698 = arith.mulf %641, %555 : vector<8x128xf32>
    %699 = arith.addf %697, %698 : vector<8x128xf32>
    %700 = arith.mulf %652, %699 : vector<8x128xf32>
    %701 = arith.addf %298, %700 : vector<8x128xf32>
    %702 = arith.mulf %655, %695 : vector<8x128xf32>
    %703 = arith.addf %701, %702 : vector<8x128xf32>
    %c2_126 = arith.constant 2 : index
    %c0_127 = arith.constant 0 : index
    %c1_128 = arith.constant 1 : index
    %704 = vector.load %arg4[%c2_126, %c0_127, %c1_128] : memref<4x8x12xf32, #tpu.memory_space<vmem>>, vector<1x8x1xf32>
    %705 = vector.shape_cast %704 : vector<1x8x1xf32> to vector<8x1xf32>
    %c2_129 = arith.constant 2 : index
    %c0_130 = arith.constant 0 : index
    %c4_131 = arith.constant 4 : index
    %706 = vector.load %arg4[%c2_129, %c0_130, %c4_131] : memref<4x8x12xf32, #tpu.memory_space<vmem>>, vector<1x8x1xf32>
    %707 = vector.shape_cast %706 : vector<1x8x1xf32> to vector<8x1xf32>
    %c2_132 = arith.constant 2 : index
    %c0_133 = arith.constant 0 : index
    %c7_134 = arith.constant 7 : index
    %708 = vector.load %arg4[%c2_132, %c0_133, %c7_134] : memref<4x8x12xf32, #tpu.memory_space<vmem>>, vector<1x8x1xf32>
    %709 = vector.shape_cast %708 : vector<1x8x1xf32> to vector<8x1xf32>
    %c2_135 = arith.constant 2 : index
    %c0_136 = arith.constant 0 : index
    %c10_137 = arith.constant 10 : index
    %710 = vector.load %arg4[%c2_135, %c0_136, %c10_137] : memref<4x8x12xf32, #tpu.memory_space<vmem>>, vector<1x8x1xf32>
    %711 = vector.shape_cast %710 : vector<1x8x1xf32> to vector<8x1xf32>
    %712 = vector.shape_cast %709 : vector<8x1xf32> to vector<8x1xf32>
    %713 = vector.broadcast %712 : vector<8x1xf32> to vector<8x128xf32>
    %714 = vector.shape_cast %711 : vector<8x1xf32> to vector<8x1xf32>
    %715 = vector.broadcast %714 : vector<8x1xf32> to vector<8x128xf32>
    %716 = arith.mulf %713, %15 : vector<8x128xf32>
    %717 = arith.addf %14, %716 : vector<8x128xf32>
    %718 = arith.addf %717, %715 : vector<8x128xf32>
    %719 = tpu.reciprocal %718 {approx = true} : vector<8x128xf32> -> vector<8x128xf32>
    %720 = arith.mulf %718, %719 : vector<8x128xf32>
    %cst_138 = arith.constant 2.000000e+00 : f32
    %721 = vector.broadcast %cst_138 : f32 to vector<8x128xf32>
    %722 = arith.subf %721, %720 : vector<8x128xf32>
    %723 = arith.mulf %719, %722 : vector<8x128xf32>
    %724 = vector.shape_cast %705 : vector<8x1xf32> to vector<8x1xf32>
    %725 = vector.broadcast %724 : vector<8x1xf32> to vector<8x128xf32>
    %726 = arith.mulf %725, %723 : vector<8x128xf32>
    %727 = vector.shape_cast %707 : vector<8x1xf32> to vector<8x1xf32>
    %728 = vector.broadcast %727 : vector<8x1xf32> to vector<8x128xf32>
    %729 = arith.mulf %728, %723 : vector<8x128xf32>
    %730 = arith.mulf %713, %479 : vector<8x128xf32>
    %731 = arith.addf %463, %730 : vector<8x128xf32>
    %732 = arith.mulf %715, %1 : vector<8x128xf32>
    %733 = arith.addf %731, %732 : vector<8x128xf32>
    %734 = arith.mulf %713, %523 : vector<8x128xf32>
    %735 = arith.addf %495, %734 : vector<8x128xf32>
    %736 = arith.mulf %715, %552 : vector<8x128xf32>
    %737 = arith.addf %735, %736 : vector<8x128xf32>
    %738 = arith.mulf %726, %737 : vector<8x128xf32>
    %739 = arith.addf %336, %738 : vector<8x128xf32>
    %740 = arith.mulf %729, %733 : vector<8x128xf32>
    %741 = arith.addf %739, %740 : vector<8x128xf32>
    %742 = arith.mulf %713, %482 : vector<8x128xf32>
    %743 = arith.addf %468, %742 : vector<8x128xf32>
    %744 = arith.mulf %715, %3 : vector<8x128xf32>
    %745 = arith.addf %743, %744 : vector<8x128xf32>
    %746 = arith.mulf %713, %530 : vector<8x128xf32>
    %747 = arith.addf %502, %746 : vector<8x128xf32>
    %748 = arith.mulf %715, %553 : vector<8x128xf32>
    %749 = arith.addf %747, %748 : vector<8x128xf32>
    %750 = arith.mulf %726, %749 : vector<8x128xf32>
    %751 = arith.addf %348, %750 : vector<8x128xf32>
    %752 = arith.mulf %729, %745 : vector<8x128xf32>
    %753 = arith.addf %751, %752 : vector<8x128xf32>
    %754 = arith.mulf %713, %485 : vector<8x128xf32>
    %755 = arith.addf %473, %754 : vector<8x128xf32>
    %756 = arith.mulf %715, %5 : vector<8x128xf32>
    %757 = arith.addf %755, %756 : vector<8x128xf32>
    %758 = arith.mulf %713, %537 : vector<8x128xf32>
    %759 = arith.addf %509, %758 : vector<8x128xf32>
    %760 = arith.mulf %715, %554 : vector<8x128xf32>
    %761 = arith.addf %759, %760 : vector<8x128xf32>
    %762 = arith.mulf %726, %761 : vector<8x128xf32>
    %763 = arith.addf %360, %762 : vector<8x128xf32>
    %764 = arith.mulf %729, %757 : vector<8x128xf32>
    %765 = arith.addf %763, %764 : vector<8x128xf32>
    %766 = arith.mulf %713, %488 : vector<8x128xf32>
    %767 = arith.addf %478, %766 : vector<8x128xf32>
    %768 = arith.mulf %715, %7 : vector<8x128xf32>
    %769 = arith.addf %767, %768 : vector<8x128xf32>
    %770 = arith.mulf %713, %544 : vector<8x128xf32>
    %771 = arith.addf %516, %770 : vector<8x128xf32>
    %772 = arith.mulf %715, %555 : vector<8x128xf32>
    %773 = arith.addf %771, %772 : vector<8x128xf32>
    %774 = arith.mulf %726, %773 : vector<8x128xf32>
    %775 = arith.addf %372, %774 : vector<8x128xf32>
    %776 = arith.mulf %729, %769 : vector<8x128xf32>
    %777 = arith.addf %775, %776 : vector<8x128xf32>
    %c3_139 = arith.constant 3 : index
    %c0_140 = arith.constant 0 : index
    %c1_141 = arith.constant 1 : index
    %778 = vector.load %arg4[%c3_139, %c0_140, %c1_141] : memref<4x8x12xf32, #tpu.memory_space<vmem>>, vector<1x8x1xf32>
    %779 = vector.shape_cast %778 : vector<1x8x1xf32> to vector<8x1xf32>
    %c3_142 = arith.constant 3 : index
    %c0_143 = arith.constant 0 : index
    %c4_144 = arith.constant 4 : index
    %780 = vector.load %arg4[%c3_142, %c0_143, %c4_144] : memref<4x8x12xf32, #tpu.memory_space<vmem>>, vector<1x8x1xf32>
    %781 = vector.shape_cast %780 : vector<1x8x1xf32> to vector<8x1xf32>
    %c3_145 = arith.constant 3 : index
    %c0_146 = arith.constant 0 : index
    %c7_147 = arith.constant 7 : index
    %782 = vector.load %arg4[%c3_145, %c0_146, %c7_147] : memref<4x8x12xf32, #tpu.memory_space<vmem>>, vector<1x8x1xf32>
    %783 = vector.shape_cast %782 : vector<1x8x1xf32> to vector<8x1xf32>
    %c3_148 = arith.constant 3 : index
    %c0_149 = arith.constant 0 : index
    %c10_150 = arith.constant 10 : index
    %784 = vector.load %arg4[%c3_148, %c0_149, %c10_150] : memref<4x8x12xf32, #tpu.memory_space<vmem>>, vector<1x8x1xf32>
    %785 = vector.shape_cast %784 : vector<1x8x1xf32> to vector<8x1xf32>
    %786 = vector.shape_cast %783 : vector<8x1xf32> to vector<8x1xf32>
    %787 = vector.broadcast %786 : vector<8x1xf32> to vector<8x128xf32>
    %788 = vector.shape_cast %785 : vector<8x1xf32> to vector<8x1xf32>
    %789 = vector.broadcast %788 : vector<8x1xf32> to vector<8x128xf32>
    %790 = arith.mulf %787, %15 : vector<8x128xf32>
    %791 = arith.addf %14, %790 : vector<8x128xf32>
    %792 = arith.addf %791, %789 : vector<8x128xf32>
    %793 = tpu.reciprocal %792 {approx = true} : vector<8x128xf32> -> vector<8x128xf32>
    %794 = arith.mulf %792, %793 : vector<8x128xf32>
    %cst_151 = arith.constant 2.000000e+00 : f32
    %795 = vector.broadcast %cst_151 : f32 to vector<8x128xf32>
    %796 = arith.subf %795, %794 : vector<8x128xf32>
    %797 = arith.mulf %793, %796 : vector<8x128xf32>
    %798 = vector.shape_cast %779 : vector<8x1xf32> to vector<8x1xf32>
    %799 = vector.broadcast %798 : vector<8x1xf32> to vector<8x128xf32>
    %800 = arith.mulf %799, %797 : vector<8x128xf32>
    %801 = vector.shape_cast %781 : vector<8x1xf32> to vector<8x1xf32>
    %802 = vector.broadcast %801 : vector<8x1xf32> to vector<8x128xf32>
    %803 = arith.mulf %802, %797 : vector<8x128xf32>
    %804 = arith.mulf %787, %479 : vector<8x128xf32>
    %805 = arith.addf %463, %804 : vector<8x128xf32>
    %806 = arith.mulf %789, %1 : vector<8x128xf32>
    %807 = arith.addf %805, %806 : vector<8x128xf32>
    %808 = arith.mulf %787, %523 : vector<8x128xf32>
    %809 = arith.addf %495, %808 : vector<8x128xf32>
    %810 = arith.mulf %789, %552 : vector<8x128xf32>
    %811 = arith.addf %809, %810 : vector<8x128xf32>
    %812 = arith.mulf %800, %811 : vector<8x128xf32>
    %813 = arith.addf %410, %812 : vector<8x128xf32>
    %814 = arith.mulf %803, %807 : vector<8x128xf32>
    %815 = arith.addf %813, %814 : vector<8x128xf32>
    %816 = arith.mulf %787, %482 : vector<8x128xf32>
    %817 = arith.addf %468, %816 : vector<8x128xf32>
    %818 = arith.mulf %789, %3 : vector<8x128xf32>
    %819 = arith.addf %817, %818 : vector<8x128xf32>
    %820 = arith.mulf %787, %530 : vector<8x128xf32>
    %821 = arith.addf %502, %820 : vector<8x128xf32>
    %822 = arith.mulf %789, %553 : vector<8x128xf32>
    %823 = arith.addf %821, %822 : vector<8x128xf32>
    %824 = arith.mulf %800, %823 : vector<8x128xf32>
    %825 = arith.addf %422, %824 : vector<8x128xf32>
    %826 = arith.mulf %803, %819 : vector<8x128xf32>
    %827 = arith.addf %825, %826 : vector<8x128xf32>
    %828 = arith.mulf %787, %485 : vector<8x128xf32>
    %829 = arith.addf %473, %828 : vector<8x128xf32>
    %830 = arith.mulf %789, %5 : vector<8x128xf32>
    %831 = arith.addf %829, %830 : vector<8x128xf32>
    %832 = arith.mulf %787, %537 : vector<8x128xf32>
    %833 = arith.addf %509, %832 : vector<8x128xf32>
    %834 = arith.mulf %789, %554 : vector<8x128xf32>
    %835 = arith.addf %833, %834 : vector<8x128xf32>
    %836 = arith.mulf %800, %835 : vector<8x128xf32>
    %837 = arith.addf %434, %836 : vector<8x128xf32>
    %838 = arith.mulf %803, %831 : vector<8x128xf32>
    %839 = arith.addf %837, %838 : vector<8x128xf32>
    %840 = arith.mulf %787, %488 : vector<8x128xf32>
    %841 = arith.addf %478, %840 : vector<8x128xf32>
    %842 = arith.mulf %789, %7 : vector<8x128xf32>
    %843 = arith.addf %841, %842 : vector<8x128xf32>
    %844 = arith.mulf %787, %544 : vector<8x128xf32>
    %845 = arith.addf %516, %844 : vector<8x128xf32>
    %846 = arith.mulf %789, %555 : vector<8x128xf32>
    %847 = arith.addf %845, %846 : vector<8x128xf32>
    %848 = arith.mulf %800, %847 : vector<8x128xf32>
    %849 = arith.addf %446, %848 : vector<8x128xf32>
    %850 = arith.mulf %803, %843 : vector<8x128xf32>
    %851 = arith.addf %849, %850 : vector<8x128xf32>
    %c0_152 = arith.constant 0 : index
    %c0_153 = arith.constant 0 : index
    %c0_154 = arith.constant 0 : index
    %c0_155 = arith.constant 0 : index
    %c2_156 = arith.constant 2 : index
    %852 = vector.load %arg3[%c0_152, %c0_153, %c0_154, %c0_155, %c2_156] : memref<1x1x4x8x256xf32, #tpu.memory_space<vmem>>, vector<1x1x1x8x128xf32>
    %853 = vector.shape_cast %852 : vector<1x1x1x8x128xf32> to vector<8x128xf32>
    %c0_157 = arith.constant 0 : index
    %c0_158 = arith.constant 0 : index
    %c1_159 = arith.constant 1 : index
    %c0_160 = arith.constant 0 : index
    %c2_161 = arith.constant 2 : index
    %854 = vector.load %arg3[%c0_157, %c0_158, %c1_159, %c0_160, %c2_161] : memref<1x1x4x8x256xf32, #tpu.memory_space<vmem>>, vector<1x1x1x8x128xf32>
    %855 = vector.shape_cast %854 : vector<1x1x1x8x128xf32> to vector<8x128xf32>
    %c0_162 = arith.constant 0 : index
    %c0_163 = arith.constant 0 : index
    %c2_164 = arith.constant 2 : index
    %c0_165 = arith.constant 0 : index
    %c2_166 = arith.constant 2 : index
    %856 = vector.load %arg3[%c0_162, %c0_163, %c2_164, %c0_165, %c2_166] : memref<1x1x4x8x256xf32, #tpu.memory_space<vmem>>, vector<1x1x1x8x128xf32>
    %857 = vector.shape_cast %856 : vector<1x1x1x8x128xf32> to vector<8x128xf32>
    %c0_167 = arith.constant 0 : index
    %c0_168 = arith.constant 0 : index
    %c3_169 = arith.constant 3 : index
    %c0_170 = arith.constant 0 : index
    %c2_171 = arith.constant 2 : index
    %858 = vector.load %arg3[%c0_167, %c0_168, %c3_169, %c0_170, %c2_171] : memref<1x1x4x8x256xf32, #tpu.memory_space<vmem>>, vector<1x1x1x8x128xf32>
    %859 = vector.shape_cast %858 : vector<1x1x1x8x128xf32> to vector<8x128xf32>
    %860 = arith.mulf %5, %859 : vector<8x128xf32>
    %861 = arith.mulf %7, %857 : vector<8x128xf32>
    %862 = arith.subf %860, %861 : vector<8x128xf32>
    %863 = arith.mulf %7, %855 : vector<8x128xf32>
    %864 = arith.mulf %3, %859 : vector<8x128xf32>
    %865 = arith.subf %863, %864 : vector<8x128xf32>
    %866 = arith.mulf %3, %857 : vector<8x128xf32>
    %867 = arith.mulf %5, %855 : vector<8x128xf32>
    %868 = arith.subf %866, %867 : vector<8x128xf32>
    %869 = arith.mulf %3, %855 : vector<8x128xf32>
    %870 = arith.mulf %5, %857 : vector<8x128xf32>
    %871 = arith.addf %869, %870 : vector<8x128xf32>
    %872 = arith.mulf %7, %859 : vector<8x128xf32>
    %873 = arith.addf %871, %872 : vector<8x128xf32>
    %cst_172 = arith.constant 2.000000e+00 : f32
    %874 = vector.broadcast %cst_172 : f32 to vector<8x128xf32>
    %875 = arith.mulf %873, %874 : vector<8x128xf32>
    %876 = arith.mulf %853, %14 : vector<8x128xf32>
    %877 = arith.mulf %17, %855 : vector<8x128xf32>
    %878 = arith.mulf %875, %3 : vector<8x128xf32>
    %879 = arith.addf %877, %878 : vector<8x128xf32>
    %880 = arith.mulf %15, %862 : vector<8x128xf32>
    %881 = arith.addf %879, %880 : vector<8x128xf32>
    %882 = arith.mulf %17, %857 : vector<8x128xf32>
    %883 = arith.mulf %875, %5 : vector<8x128xf32>
    %884 = arith.addf %882, %883 : vector<8x128xf32>
    %885 = arith.mulf %15, %865 : vector<8x128xf32>
    %886 = arith.addf %884, %885 : vector<8x128xf32>
    %887 = arith.mulf %17, %859 : vector<8x128xf32>
    %888 = arith.mulf %875, %7 : vector<8x128xf32>
    %889 = arith.addf %887, %888 : vector<8x128xf32>
    %890 = arith.mulf %15, %868 : vector<8x128xf32>
    %891 = arith.addf %889, %890 : vector<8x128xf32>
    %892 = arith.mulf %15, %853 : vector<8x128xf32>
    %893 = arith.mulf %15, %855 : vector<8x128xf32>
    %894 = arith.addf %862, %862 : vector<8x128xf32>
    %895 = arith.addf %893, %894 : vector<8x128xf32>
    %896 = arith.mulf %15, %857 : vector<8x128xf32>
    %897 = arith.addf %865, %865 : vector<8x128xf32>
    %898 = arith.addf %896, %897 : vector<8x128xf32>
    %899 = arith.mulf %15, %859 : vector<8x128xf32>
    %900 = arith.addf %868, %868 : vector<8x128xf32>
    %901 = arith.addf %899, %900 : vector<8x128xf32>
    %902 = arith.mulf %853, %876 : vector<8x128xf32>
    %903 = arith.mulf %855, %881 : vector<8x128xf32>
    %904 = arith.subf %902, %903 : vector<8x128xf32>
    %905 = arith.mulf %857, %886 : vector<8x128xf32>
    %906 = arith.subf %904, %905 : vector<8x128xf32>
    %907 = arith.mulf %859, %891 : vector<8x128xf32>
    %908 = arith.subf %906, %907 : vector<8x128xf32>
    %909 = arith.mulf %853, %881 : vector<8x128xf32>
    %910 = arith.mulf %855, %876 : vector<8x128xf32>
    %911 = arith.addf %909, %910 : vector<8x128xf32>
    %912 = arith.mulf %857, %891 : vector<8x128xf32>
    %913 = arith.addf %911, %912 : vector<8x128xf32>
    %914 = arith.mulf %859, %886 : vector<8x128xf32>
    %915 = arith.subf %913, %914 : vector<8x128xf32>
    %916 = arith.mulf %853, %886 : vector<8x128xf32>
    %917 = arith.mulf %855, %891 : vector<8x128xf32>
    %918 = arith.subf %916, %917 : vector<8x128xf32>
    %919 = arith.mulf %857, %876 : vector<8x128xf32>
    %920 = arith.addf %918, %919 : vector<8x128xf32>
    %921 = arith.mulf %859, %881 : vector<8x128xf32>
    %922 = arith.addf %920, %921 : vector<8x128xf32>
    %923 = arith.mulf %853, %891 : vector<8x128xf32>
    %924 = arith.mulf %855, %886 : vector<8x128xf32>
    %925 = arith.addf %923, %924 : vector<8x128xf32>
    %926 = arith.mulf %857, %881 : vector<8x128xf32>
    %927 = arith.subf %925, %926 : vector<8x128xf32>
    %928 = arith.mulf %859, %876 : vector<8x128xf32>
    %929 = arith.addf %927, %928 : vector<8x128xf32>
    %930 = arith.mulf %853, %892 : vector<8x128xf32>
    %931 = arith.mulf %855, %895 : vector<8x128xf32>
    %932 = arith.subf %930, %931 : vector<8x128xf32>
    %933 = arith.mulf %857, %898 : vector<8x128xf32>
    %934 = arith.subf %932, %933 : vector<8x128xf32>
    %935 = arith.mulf %859, %901 : vector<8x128xf32>
    %936 = arith.subf %934, %935 : vector<8x128xf32>
    %937 = arith.mulf %853, %895 : vector<8x128xf32>
    %938 = arith.mulf %855, %892 : vector<8x128xf32>
    %939 = arith.addf %937, %938 : vector<8x128xf32>
    %940 = arith.mulf %857, %901 : vector<8x128xf32>
    %941 = arith.addf %939, %940 : vector<8x128xf32>
    %942 = arith.mulf %859, %898 : vector<8x128xf32>
    %943 = arith.subf %941, %942 : vector<8x128xf32>
    %944 = arith.mulf %853, %898 : vector<8x128xf32>
    %945 = arith.mulf %855, %901 : vector<8x128xf32>
    %946 = arith.subf %944, %945 : vector<8x128xf32>
    %947 = arith.mulf %857, %892 : vector<8x128xf32>
    %948 = arith.addf %946, %947 : vector<8x128xf32>
    %949 = arith.mulf %859, %895 : vector<8x128xf32>
    %950 = arith.addf %948, %949 : vector<8x128xf32>
    %951 = arith.mulf %853, %901 : vector<8x128xf32>
    %952 = arith.mulf %855, %898 : vector<8x128xf32>
    %953 = arith.addf %951, %952 : vector<8x128xf32>
    %954 = arith.mulf %857, %895 : vector<8x128xf32>
    %955 = arith.subf %953, %954 : vector<8x128xf32>
    %956 = arith.mulf %859, %892 : vector<8x128xf32>
    %957 = arith.addf %955, %956 : vector<8x128xf32>
    %958 = arith.addf %853, %853 : vector<8x128xf32>
    %959 = arith.mulf %853, %853 : vector<8x128xf32>
    %960 = arith.mulf %855, %855 : vector<8x128xf32>
    %961 = arith.mulf %857, %857 : vector<8x128xf32>
    %962 = arith.addf %960, %961 : vector<8x128xf32>
    %963 = arith.mulf %859, %859 : vector<8x128xf32>
    %964 = arith.addf %962, %963 : vector<8x128xf32>
    %965 = arith.subf %959, %964 : vector<8x128xf32>
    %966 = arith.mulf %958, %855 : vector<8x128xf32>
    %967 = arith.mulf %958, %857 : vector<8x128xf32>
    %968 = arith.mulf %958, %859 : vector<8x128xf32>
    %c0_173 = arith.constant 0 : index
    %c0_174 = arith.constant 0 : index
    %c2_175 = arith.constant 2 : index
    %969 = vector.load %arg4[%c0_173, %c0_174, %c2_175] : memref<4x8x12xf32, #tpu.memory_space<vmem>>, vector<1x8x1xf32>
    %970 = vector.shape_cast %969 : vector<1x8x1xf32> to vector<8x1xf32>
    %c0_176 = arith.constant 0 : index
    %c0_177 = arith.constant 0 : index
    %c5 = arith.constant 5 : index
    %971 = vector.load %arg4[%c0_176, %c0_177, %c5] : memref<4x8x12xf32, #tpu.memory_space<vmem>>, vector<1x8x1xf32>
    %972 = vector.shape_cast %971 : vector<1x8x1xf32> to vector<8x1xf32>
    %c0_178 = arith.constant 0 : index
    %c0_179 = arith.constant 0 : index
    %c8 = arith.constant 8 : index
    %973 = vector.load %arg4[%c0_178, %c0_179, %c8] : memref<4x8x12xf32, #tpu.memory_space<vmem>>, vector<1x8x1xf32>
    %974 = vector.shape_cast %973 : vector<1x8x1xf32> to vector<8x1xf32>
    %c0_180 = arith.constant 0 : index
    %c0_181 = arith.constant 0 : index
    %c11 = arith.constant 11 : index
    %975 = vector.load %arg4[%c0_180, %c0_181, %c11] : memref<4x8x12xf32, #tpu.memory_space<vmem>>, vector<1x8x1xf32>
    %976 = vector.shape_cast %975 : vector<1x8x1xf32> to vector<8x1xf32>
    %977 = vector.shape_cast %974 : vector<8x1xf32> to vector<8x1xf32>
    %978 = vector.broadcast %977 : vector<8x1xf32> to vector<8x128xf32>
    %979 = vector.shape_cast %976 : vector<8x1xf32> to vector<8x1xf32>
    %980 = vector.broadcast %979 : vector<8x1xf32> to vector<8x128xf32>
    %981 = arith.mulf %978, %15 : vector<8x128xf32>
    %982 = arith.addf %14, %981 : vector<8x128xf32>
    %983 = arith.addf %982, %980 : vector<8x128xf32>
    %984 = tpu.reciprocal %983 {approx = true} : vector<8x128xf32> -> vector<8x128xf32>
    %985 = arith.mulf %983, %984 : vector<8x128xf32>
    %cst_182 = arith.constant 2.000000e+00 : f32
    %986 = vector.broadcast %cst_182 : f32 to vector<8x128xf32>
    %987 = arith.subf %986, %985 : vector<8x128xf32>
    %988 = arith.mulf %984, %987 : vector<8x128xf32>
    %989 = vector.shape_cast %970 : vector<8x1xf32> to vector<8x1xf32>
    %990 = vector.broadcast %989 : vector<8x1xf32> to vector<8x128xf32>
    %991 = arith.mulf %990, %988 : vector<8x128xf32>
    %992 = vector.shape_cast %972 : vector<8x1xf32> to vector<8x1xf32>
    %993 = vector.broadcast %992 : vector<8x1xf32> to vector<8x128xf32>
    %994 = arith.mulf %993, %988 : vector<8x128xf32>
    %995 = arith.mulf %978, %892 : vector<8x128xf32>
    %996 = arith.addf %876, %995 : vector<8x128xf32>
    %997 = arith.mulf %980, %853 : vector<8x128xf32>
    %998 = arith.addf %996, %997 : vector<8x128xf32>
    %999 = arith.mulf %978, %936 : vector<8x128xf32>
    %1000 = arith.addf %908, %999 : vector<8x128xf32>
    %1001 = arith.mulf %980, %965 : vector<8x128xf32>
    %1002 = arith.addf %1000, %1001 : vector<8x128xf32>
    %1003 = arith.mulf %991, %1002 : vector<8x128xf32>
    %1004 = arith.addf %593, %1003 : vector<8x128xf32>
    %1005 = arith.mulf %994, %998 : vector<8x128xf32>
    %1006 = arith.addf %1004, %1005 : vector<8x128xf32>
    %1007 = arith.mulf %978, %895 : vector<8x128xf32>
    %1008 = arith.addf %881, %1007 : vector<8x128xf32>
    %1009 = arith.mulf %980, %855 : vector<8x128xf32>
    %1010 = arith.addf %1008, %1009 : vector<8x128xf32>
    %1011 = arith.mulf %978, %943 : vector<8x128xf32>
    %1012 = arith.addf %915, %1011 : vector<8x128xf32>
    %1013 = arith.mulf %980, %966 : vector<8x128xf32>
    %1014 = arith.addf %1012, %1013 : vector<8x128xf32>
    %1015 = arith.mulf %991, %1014 : vector<8x128xf32>
    %1016 = arith.addf %605, %1015 : vector<8x128xf32>
    %1017 = arith.mulf %994, %1010 : vector<8x128xf32>
    %1018 = arith.addf %1016, %1017 : vector<8x128xf32>
    %1019 = arith.mulf %978, %898 : vector<8x128xf32>
    %1020 = arith.addf %886, %1019 : vector<8x128xf32>
    %1021 = arith.mulf %980, %857 : vector<8x128xf32>
    %1022 = arith.addf %1020, %1021 : vector<8x128xf32>
    %1023 = arith.mulf %978, %950 : vector<8x128xf32>
    %1024 = arith.addf %922, %1023 : vector<8x128xf32>
    %1025 = arith.mulf %980, %967 : vector<8x128xf32>
    %1026 = arith.addf %1024, %1025 : vector<8x128xf32>
    %1027 = arith.mulf %991, %1026 : vector<8x128xf32>
    %1028 = arith.addf %617, %1027 : vector<8x128xf32>
    %1029 = arith.mulf %994, %1022 : vector<8x128xf32>
    %1030 = arith.addf %1028, %1029 : vector<8x128xf32>
    %1031 = arith.mulf %978, %901 : vector<8x128xf32>
    %1032 = arith.addf %891, %1031 : vector<8x128xf32>
    %1033 = arith.mulf %980, %859 : vector<8x128xf32>
    %1034 = arith.addf %1032, %1033 : vector<8x128xf32>
    %1035 = arith.mulf %978, %957 : vector<8x128xf32>
    %1036 = arith.addf %929, %1035 : vector<8x128xf32>
    %1037 = arith.mulf %980, %968 : vector<8x128xf32>
    %1038 = arith.addf %1036, %1037 : vector<8x128xf32>
    %1039 = arith.mulf %991, %1038 : vector<8x128xf32>
    %1040 = arith.addf %629, %1039 : vector<8x128xf32>
    %1041 = arith.mulf %994, %1034 : vector<8x128xf32>
    %1042 = arith.addf %1040, %1041 : vector<8x128xf32>
    %c1_183 = arith.constant 1 : index
    %c0_184 = arith.constant 0 : index
    %c2_185 = arith.constant 2 : index
    %1043 = vector.load %arg4[%c1_183, %c0_184, %c2_185] : memref<4x8x12xf32, #tpu.memory_space<vmem>>, vector<1x8x1xf32>
    %1044 = vector.shape_cast %1043 : vector<1x8x1xf32> to vector<8x1xf32>
    %c1_186 = arith.constant 1 : index
    %c0_187 = arith.constant 0 : index
    %c5_188 = arith.constant 5 : index
    %1045 = vector.load %arg4[%c1_186, %c0_187, %c5_188] : memref<4x8x12xf32, #tpu.memory_space<vmem>>, vector<1x8x1xf32>
    %1046 = vector.shape_cast %1045 : vector<1x8x1xf32> to vector<8x1xf32>
    %c1_189 = arith.constant 1 : index
    %c0_190 = arith.constant 0 : index
    %c8_191 = arith.constant 8 : index
    %1047 = vector.load %arg4[%c1_189, %c0_190, %c8_191] : memref<4x8x12xf32, #tpu.memory_space<vmem>>, vector<1x8x1xf32>
    %1048 = vector.shape_cast %1047 : vector<1x8x1xf32> to vector<8x1xf32>
    %c1_192 = arith.constant 1 : index
    %c0_193 = arith.constant 0 : index
    %c11_194 = arith.constant 11 : index
    %1049 = vector.load %arg4[%c1_192, %c0_193, %c11_194] : memref<4x8x12xf32, #tpu.memory_space<vmem>>, vector<1x8x1xf32>
    %1050 = vector.shape_cast %1049 : vector<1x8x1xf32> to vector<8x1xf32>
    %1051 = vector.shape_cast %1048 : vector<8x1xf32> to vector<8x1xf32>
    %1052 = vector.broadcast %1051 : vector<8x1xf32> to vector<8x128xf32>
    %1053 = vector.shape_cast %1050 : vector<8x1xf32> to vector<8x1xf32>
    %1054 = vector.broadcast %1053 : vector<8x1xf32> to vector<8x128xf32>
    %1055 = arith.mulf %1052, %15 : vector<8x128xf32>
    %1056 = arith.addf %14, %1055 : vector<8x128xf32>
    %1057 = arith.addf %1056, %1054 : vector<8x128xf32>
    %1058 = tpu.reciprocal %1057 {approx = true} : vector<8x128xf32> -> vector<8x128xf32>
    %1059 = arith.mulf %1057, %1058 : vector<8x128xf32>
    %cst_195 = arith.constant 2.000000e+00 : f32
    %1060 = vector.broadcast %cst_195 : f32 to vector<8x128xf32>
    %1061 = arith.subf %1060, %1059 : vector<8x128xf32>
    %1062 = arith.mulf %1058, %1061 : vector<8x128xf32>
    %1063 = vector.shape_cast %1044 : vector<8x1xf32> to vector<8x1xf32>
    %1064 = vector.broadcast %1063 : vector<8x1xf32> to vector<8x128xf32>
    %1065 = arith.mulf %1064, %1062 : vector<8x128xf32>
    %1066 = vector.shape_cast %1046 : vector<8x1xf32> to vector<8x1xf32>
    %1067 = vector.broadcast %1066 : vector<8x1xf32> to vector<8x128xf32>
    %1068 = arith.mulf %1067, %1062 : vector<8x128xf32>
    %1069 = arith.mulf %1052, %892 : vector<8x128xf32>
    %1070 = arith.addf %876, %1069 : vector<8x128xf32>
    %1071 = arith.mulf %1054, %853 : vector<8x128xf32>
    %1072 = arith.addf %1070, %1071 : vector<8x128xf32>
    %1073 = arith.mulf %1052, %936 : vector<8x128xf32>
    %1074 = arith.addf %908, %1073 : vector<8x128xf32>
    %1075 = arith.mulf %1054, %965 : vector<8x128xf32>
    %1076 = arith.addf %1074, %1075 : vector<8x128xf32>
    %1077 = arith.mulf %1065, %1076 : vector<8x128xf32>
    %1078 = arith.addf %667, %1077 : vector<8x128xf32>
    %1079 = arith.mulf %1068, %1072 : vector<8x128xf32>
    %1080 = arith.addf %1078, %1079 : vector<8x128xf32>
    %1081 = arith.mulf %1052, %895 : vector<8x128xf32>
    %1082 = arith.addf %881, %1081 : vector<8x128xf32>
    %1083 = arith.mulf %1054, %855 : vector<8x128xf32>
    %1084 = arith.addf %1082, %1083 : vector<8x128xf32>
    %1085 = arith.mulf %1052, %943 : vector<8x128xf32>
    %1086 = arith.addf %915, %1085 : vector<8x128xf32>
    %1087 = arith.mulf %1054, %966 : vector<8x128xf32>
    %1088 = arith.addf %1086, %1087 : vector<8x128xf32>
    %1089 = arith.mulf %1065, %1088 : vector<8x128xf32>
    %1090 = arith.addf %679, %1089 : vector<8x128xf32>
    %1091 = arith.mulf %1068, %1084 : vector<8x128xf32>
    %1092 = arith.addf %1090, %1091 : vector<8x128xf32>
    %1093 = arith.mulf %1052, %898 : vector<8x128xf32>
    %1094 = arith.addf %886, %1093 : vector<8x128xf32>
    %1095 = arith.mulf %1054, %857 : vector<8x128xf32>
    %1096 = arith.addf %1094, %1095 : vector<8x128xf32>
    %1097 = arith.mulf %1052, %950 : vector<8x128xf32>
    %1098 = arith.addf %922, %1097 : vector<8x128xf32>
    %1099 = arith.mulf %1054, %967 : vector<8x128xf32>
    %1100 = arith.addf %1098, %1099 : vector<8x128xf32>
    %1101 = arith.mulf %1065, %1100 : vector<8x128xf32>
    %1102 = arith.addf %691, %1101 : vector<8x128xf32>
    %1103 = arith.mulf %1068, %1096 : vector<8x128xf32>
    %1104 = arith.addf %1102, %1103 : vector<8x128xf32>
    %1105 = arith.mulf %1052, %901 : vector<8x128xf32>
    %1106 = arith.addf %891, %1105 : vector<8x128xf32>
    %1107 = arith.mulf %1054, %859 : vector<8x128xf32>
    %1108 = arith.addf %1106, %1107 : vector<8x128xf32>
    %1109 = arith.mulf %1052, %957 : vector<8x128xf32>
    %1110 = arith.addf %929, %1109 : vector<8x128xf32>
    %1111 = arith.mulf %1054, %968 : vector<8x128xf32>
    %1112 = arith.addf %1110, %1111 : vector<8x128xf32>
    %1113 = arith.mulf %1065, %1112 : vector<8x128xf32>
    %1114 = arith.addf %703, %1113 : vector<8x128xf32>
    %1115 = arith.mulf %1068, %1108 : vector<8x128xf32>
    %1116 = arith.addf %1114, %1115 : vector<8x128xf32>
    %c2_196 = arith.constant 2 : index
    %c0_197 = arith.constant 0 : index
    %c2_198 = arith.constant 2 : index
    %1117 = vector.load %arg4[%c2_196, %c0_197, %c2_198] : memref<4x8x12xf32, #tpu.memory_space<vmem>>, vector<1x8x1xf32>
    %1118 = vector.shape_cast %1117 : vector<1x8x1xf32> to vector<8x1xf32>
    %c2_199 = arith.constant 2 : index
    %c0_200 = arith.constant 0 : index
    %c5_201 = arith.constant 5 : index
    %1119 = vector.load %arg4[%c2_199, %c0_200, %c5_201] : memref<4x8x12xf32, #tpu.memory_space<vmem>>, vector<1x8x1xf32>
    %1120 = vector.shape_cast %1119 : vector<1x8x1xf32> to vector<8x1xf32>
    %c2_202 = arith.constant 2 : index
    %c0_203 = arith.constant 0 : index
    %c8_204 = arith.constant 8 : index
    %1121 = vector.load %arg4[%c2_202, %c0_203, %c8_204] : memref<4x8x12xf32, #tpu.memory_space<vmem>>, vector<1x8x1xf32>
    %1122 = vector.shape_cast %1121 : vector<1x8x1xf32> to vector<8x1xf32>
    %c2_205 = arith.constant 2 : index
    %c0_206 = arith.constant 0 : index
    %c11_207 = arith.constant 11 : index
    %1123 = vector.load %arg4[%c2_205, %c0_206, %c11_207] : memref<4x8x12xf32, #tpu.memory_space<vmem>>, vector<1x8x1xf32>
    %1124 = vector.shape_cast %1123 : vector<1x8x1xf32> to vector<8x1xf32>
    %1125 = vector.shape_cast %1122 : vector<8x1xf32> to vector<8x1xf32>
    %1126 = vector.broadcast %1125 : vector<8x1xf32> to vector<8x128xf32>
    %1127 = vector.shape_cast %1124 : vector<8x1xf32> to vector<8x1xf32>
    %1128 = vector.broadcast %1127 : vector<8x1xf32> to vector<8x128xf32>
    %1129 = arith.mulf %1126, %15 : vector<8x128xf32>
    %1130 = arith.addf %14, %1129 : vector<8x128xf32>
    %1131 = arith.addf %1130, %1128 : vector<8x128xf32>
    %1132 = tpu.reciprocal %1131 {approx = true} : vector<8x128xf32> -> vector<8x128xf32>
    %1133 = arith.mulf %1131, %1132 : vector<8x128xf32>
    %cst_208 = arith.constant 2.000000e+00 : f32
    %1134 = vector.broadcast %cst_208 : f32 to vector<8x128xf32>
    %1135 = arith.subf %1134, %1133 : vector<8x128xf32>
    %1136 = arith.mulf %1132, %1135 : vector<8x128xf32>
    %1137 = vector.shape_cast %1118 : vector<8x1xf32> to vector<8x1xf32>
    %1138 = vector.broadcast %1137 : vector<8x1xf32> to vector<8x128xf32>
    %1139 = arith.mulf %1138, %1136 : vector<8x128xf32>
    %1140 = vector.shape_cast %1120 : vector<8x1xf32> to vector<8x1xf32>
    %1141 = vector.broadcast %1140 : vector<8x1xf32> to vector<8x128xf32>
    %1142 = arith.mulf %1141, %1136 : vector<8x128xf32>
    %1143 = arith.mulf %1126, %892 : vector<8x128xf32>
    %1144 = arith.addf %876, %1143 : vector<8x128xf32>
    %1145 = arith.mulf %1128, %853 : vector<8x128xf32>
    %1146 = arith.addf %1144, %1145 : vector<8x128xf32>
    %1147 = arith.mulf %1126, %936 : vector<8x128xf32>
    %1148 = arith.addf %908, %1147 : vector<8x128xf32>
    %1149 = arith.mulf %1128, %965 : vector<8x128xf32>
    %1150 = arith.addf %1148, %1149 : vector<8x128xf32>
    %1151 = arith.mulf %1139, %1150 : vector<8x128xf32>
    %1152 = arith.addf %741, %1151 : vector<8x128xf32>
    %1153 = arith.mulf %1142, %1146 : vector<8x128xf32>
    %1154 = arith.addf %1152, %1153 : vector<8x128xf32>
    %1155 = arith.mulf %1126, %895 : vector<8x128xf32>
    %1156 = arith.addf %881, %1155 : vector<8x128xf32>
    %1157 = arith.mulf %1128, %855 : vector<8x128xf32>
    %1158 = arith.addf %1156, %1157 : vector<8x128xf32>
    %1159 = arith.mulf %1126, %943 : vector<8x128xf32>
    %1160 = arith.addf %915, %1159 : vector<8x128xf32>
    %1161 = arith.mulf %1128, %966 : vector<8x128xf32>
    %1162 = arith.addf %1160, %1161 : vector<8x128xf32>
    %1163 = arith.mulf %1139, %1162 : vector<8x128xf32>
    %1164 = arith.addf %753, %1163 : vector<8x128xf32>
    %1165 = arith.mulf %1142, %1158 : vector<8x128xf32>
    %1166 = arith.addf %1164, %1165 : vector<8x128xf32>
    %1167 = arith.mulf %1126, %898 : vector<8x128xf32>
    %1168 = arith.addf %886, %1167 : vector<8x128xf32>
    %1169 = arith.mulf %1128, %857 : vector<8x128xf32>
    %1170 = arith.addf %1168, %1169 : vector<8x128xf32>
    %1171 = arith.mulf %1126, %950 : vector<8x128xf32>
    %1172 = arith.addf %922, %1171 : vector<8x128xf32>
    %1173 = arith.mulf %1128, %967 : vector<8x128xf32>
    %1174 = arith.addf %1172, %1173 : vector<8x128xf32>
    %1175 = arith.mulf %1139, %1174 : vector<8x128xf32>
    %1176 = arith.addf %765, %1175 : vector<8x128xf32>
    %1177 = arith.mulf %1142, %1170 : vector<8x128xf32>
    %1178 = arith.addf %1176, %1177 : vector<8x128xf32>
    %1179 = arith.mulf %1126, %901 : vector<8x128xf32>
    %1180 = arith.addf %891, %1179 : vector<8x128xf32>
    %1181 = arith.mulf %1128, %859 : vector<8x128xf32>
    %1182 = arith.addf %1180, %1181 : vector<8x128xf32>
    %1183 = arith.mulf %1126, %957 : vector<8x128xf32>
    %1184 = arith.addf %929, %1183 : vector<8x128xf32>
    %1185 = arith.mulf %1128, %968 : vector<8x128xf32>
    %1186 = arith.addf %1184, %1185 : vector<8x128xf32>
    %1187 = arith.mulf %1139, %1186 : vector<8x128xf32>
    %1188 = arith.addf %777, %1187 : vector<8x128xf32>
    %1189 = arith.mulf %1142, %1182 : vector<8x128xf32>
    %1190 = arith.addf %1188, %1189 : vector<8x128xf32>
    %c3_209 = arith.constant 3 : index
    %c0_210 = arith.constant 0 : index
    %c2_211 = arith.constant 2 : index
    %1191 = vector.load %arg4[%c3_209, %c0_210, %c2_211] : memref<4x8x12xf32, #tpu.memory_space<vmem>>, vector<1x8x1xf32>
    %1192 = vector.shape_cast %1191 : vector<1x8x1xf32> to vector<8x1xf32>
    %c3_212 = arith.constant 3 : index
    %c0_213 = arith.constant 0 : index
    %c5_214 = arith.constant 5 : index
    %1193 = vector.load %arg4[%c3_212, %c0_213, %c5_214] : memref<4x8x12xf32, #tpu.memory_space<vmem>>, vector<1x8x1xf32>
    %1194 = vector.shape_cast %1193 : vector<1x8x1xf32> to vector<8x1xf32>
    %c3_215 = arith.constant 3 : index
    %c0_216 = arith.constant 0 : index
    %c8_217 = arith.constant 8 : index
    %1195 = vector.load %arg4[%c3_215, %c0_216, %c8_217] : memref<4x8x12xf32, #tpu.memory_space<vmem>>, vector<1x8x1xf32>
    %1196 = vector.shape_cast %1195 : vector<1x8x1xf32> to vector<8x1xf32>
    %c3_218 = arith.constant 3 : index
    %c0_219 = arith.constant 0 : index
    %c11_220 = arith.constant 11 : index
    %1197 = vector.load %arg4[%c3_218, %c0_219, %c11_220] : memref<4x8x12xf32, #tpu.memory_space<vmem>>, vector<1x8x1xf32>
    %1198 = vector.shape_cast %1197 : vector<1x8x1xf32> to vector<8x1xf32>
    %1199 = vector.shape_cast %1196 : vector<8x1xf32> to vector<8x1xf32>
    %1200 = vector.broadcast %1199 : vector<8x1xf32> to vector<8x128xf32>
    %1201 = vector.shape_cast %1198 : vector<8x1xf32> to vector<8x1xf32>
    %1202 = vector.broadcast %1201 : vector<8x1xf32> to vector<8x128xf32>
    %1203 = arith.mulf %1200, %15 : vector<8x128xf32>
    %1204 = arith.addf %14, %1203 : vector<8x128xf32>
    %1205 = arith.addf %1204, %1202 : vector<8x128xf32>
    %1206 = tpu.reciprocal %1205 {approx = true} : vector<8x128xf32> -> vector<8x128xf32>
    %1207 = arith.mulf %1205, %1206 : vector<8x128xf32>
    %cst_221 = arith.constant 2.000000e+00 : f32
    %1208 = vector.broadcast %cst_221 : f32 to vector<8x128xf32>
    %1209 = arith.subf %1208, %1207 : vector<8x128xf32>
    %1210 = arith.mulf %1206, %1209 : vector<8x128xf32>
    %1211 = vector.shape_cast %1192 : vector<8x1xf32> to vector<8x1xf32>
    %1212 = vector.broadcast %1211 : vector<8x1xf32> to vector<8x128xf32>
    %1213 = arith.mulf %1212, %1210 : vector<8x128xf32>
    %1214 = vector.shape_cast %1194 : vector<8x1xf32> to vector<8x1xf32>
    %1215 = vector.broadcast %1214 : vector<8x1xf32> to vector<8x128xf32>
    %1216 = arith.mulf %1215, %1210 : vector<8x128xf32>
    %1217 = arith.mulf %1200, %892 : vector<8x128xf32>
    %1218 = arith.addf %876, %1217 : vector<8x128xf32>
    %1219 = arith.mulf %1202, %853 : vector<8x128xf32>
    %1220 = arith.addf %1218, %1219 : vector<8x128xf32>
    %1221 = arith.mulf %1200, %936 : vector<8x128xf32>
    %1222 = arith.addf %908, %1221 : vector<8x128xf32>
    %1223 = arith.mulf %1202, %965 : vector<8x128xf32>
    %1224 = arith.addf %1222, %1223 : vector<8x128xf32>
    %1225 = arith.mulf %1213, %1224 : vector<8x128xf32>
    %1226 = arith.addf %815, %1225 : vector<8x128xf32>
    %1227 = arith.mulf %1216, %1220 : vector<8x128xf32>
    %1228 = arith.addf %1226, %1227 : vector<8x128xf32>
    %1229 = arith.mulf %1200, %895 : vector<8x128xf32>
    %1230 = arith.addf %881, %1229 : vector<8x128xf32>
    %1231 = arith.mulf %1202, %855 : vector<8x128xf32>
    %1232 = arith.addf %1230, %1231 : vector<8x128xf32>
    %1233 = arith.mulf %1200, %943 : vector<8x128xf32>
    %1234 = arith.addf %915, %1233 : vector<8x128xf32>
    %1235 = arith.mulf %1202, %966 : vector<8x128xf32>
    %1236 = arith.addf %1234, %1235 : vector<8x128xf32>
    %1237 = arith.mulf %1213, %1236 : vector<8x128xf32>
    %1238 = arith.addf %827, %1237 : vector<8x128xf32>
    %1239 = arith.mulf %1216, %1232 : vector<8x128xf32>
    %1240 = arith.addf %1238, %1239 : vector<8x128xf32>
    %1241 = arith.mulf %1200, %898 : vector<8x128xf32>
    %1242 = arith.addf %886, %1241 : vector<8x128xf32>
    %1243 = arith.mulf %1202, %857 : vector<8x128xf32>
    %1244 = arith.addf %1242, %1243 : vector<8x128xf32>
    %1245 = arith.mulf %1200, %950 : vector<8x128xf32>
    %1246 = arith.addf %922, %1245 : vector<8x128xf32>
    %1247 = arith.mulf %1202, %967 : vector<8x128xf32>
    %1248 = arith.addf %1246, %1247 : vector<8x128xf32>
    %1249 = arith.mulf %1213, %1248 : vector<8x128xf32>
    %1250 = arith.addf %839, %1249 : vector<8x128xf32>
    %1251 = arith.mulf %1216, %1244 : vector<8x128xf32>
    %1252 = arith.addf %1250, %1251 : vector<8x128xf32>
    %1253 = arith.mulf %1200, %901 : vector<8x128xf32>
    %1254 = arith.addf %891, %1253 : vector<8x128xf32>
    %1255 = arith.mulf %1202, %859 : vector<8x128xf32>
    %1256 = arith.addf %1254, %1255 : vector<8x128xf32>
    %1257 = arith.mulf %1200, %957 : vector<8x128xf32>
    %1258 = arith.addf %929, %1257 : vector<8x128xf32>
    %1259 = arith.mulf %1202, %968 : vector<8x128xf32>
    %1260 = arith.addf %1258, %1259 : vector<8x128xf32>
    %1261 = arith.mulf %1213, %1260 : vector<8x128xf32>
    %1262 = arith.addf %851, %1261 : vector<8x128xf32>
    %1263 = arith.mulf %1216, %1256 : vector<8x128xf32>
    %1264 = arith.addf %1262, %1263 : vector<8x128xf32>
    %cst_222 = arith.constant dense<0.000000e+00> : vector<128xf32>
    %1265 = vector.multi_reduction <add>, %1006, %cst_222 [0] : vector<8x128xf32> to vector<128xf32>
    %1266 = vector.shape_cast %1265 : vector<128xf32> to vector<1x128xf32>
    %cst_223 = arith.constant dense<0.000000e+00> : vector<128xf32>
    %1267 = vector.multi_reduction <add>, %1018, %cst_223 [0] : vector<8x128xf32> to vector<128xf32>
    %1268 = vector.shape_cast %1267 : vector<128xf32> to vector<1x128xf32>
    %cst_224 = arith.constant dense<0.000000e+00> : vector<128xf32>
    %1269 = vector.multi_reduction <add>, %1030, %cst_224 [0] : vector<8x128xf32> to vector<128xf32>
    %1270 = vector.shape_cast %1269 : vector<128xf32> to vector<1x128xf32>
    %cst_225 = arith.constant dense<0.000000e+00> : vector<128xf32>
    %1271 = vector.multi_reduction <add>, %1042, %cst_225 [0] : vector<8x128xf32> to vector<128xf32>
    %1272 = vector.shape_cast %1271 : vector<128xf32> to vector<1x128xf32>
    %cst_226 = arith.constant dense<0.000000e+00> : vector<128xf32>
    %1273 = vector.multi_reduction <add>, %1080, %cst_226 [0] : vector<8x128xf32> to vector<128xf32>
    %1274 = vector.shape_cast %1273 : vector<128xf32> to vector<1x128xf32>
    %cst_227 = arith.constant dense<0.000000e+00> : vector<128xf32>
    %1275 = vector.multi_reduction <add>, %1092, %cst_227 [0] : vector<8x128xf32> to vector<128xf32>
    %1276 = vector.shape_cast %1275 : vector<128xf32> to vector<1x128xf32>
    %cst_228 = arith.constant dense<0.000000e+00> : vector<128xf32>
    %1277 = vector.multi_reduction <add>, %1104, %cst_228 [0] : vector<8x128xf32> to vector<128xf32>
    %1278 = vector.shape_cast %1277 : vector<128xf32> to vector<1x128xf32>
    %cst_229 = arith.constant dense<0.000000e+00> : vector<128xf32>
    %1279 = vector.multi_reduction <add>, %1116, %cst_229 [0] : vector<8x128xf32> to vector<128xf32>
    %1280 = vector.shape_cast %1279 : vector<128xf32> to vector<1x128xf32>
    %cst_230 = arith.constant dense<0.000000e+00> : vector<128xf32>
    %1281 = vector.multi_reduction <add>, %1154, %cst_230 [0] : vector<8x128xf32> to vector<128xf32>
    %1282 = vector.shape_cast %1281 : vector<128xf32> to vector<1x128xf32>
    %cst_231 = arith.constant dense<0.000000e+00> : vector<128xf32>
    %1283 = vector.multi_reduction <add>, %1166, %cst_231 [0] : vector<8x128xf32> to vector<128xf32>
    %1284 = vector.shape_cast %1283 : vector<128xf32> to vector<1x128xf32>
    %cst_232 = arith.constant dense<0.000000e+00> : vector<128xf32>
    %1285 = vector.multi_reduction <add>, %1178, %cst_232 [0] : vector<8x128xf32> to vector<128xf32>
    %1286 = vector.shape_cast %1285 : vector<128xf32> to vector<1x128xf32>
    %cst_233 = arith.constant dense<0.000000e+00> : vector<128xf32>
    %1287 = vector.multi_reduction <add>, %1190, %cst_233 [0] : vector<8x128xf32> to vector<128xf32>
    %1288 = vector.shape_cast %1287 : vector<128xf32> to vector<1x128xf32>
    %cst_234 = arith.constant dense<0.000000e+00> : vector<128xf32>
    %1289 = vector.multi_reduction <add>, %1228, %cst_234 [0] : vector<8x128xf32> to vector<128xf32>
    %1290 = vector.shape_cast %1289 : vector<128xf32> to vector<1x128xf32>
    %cst_235 = arith.constant dense<0.000000e+00> : vector<128xf32>
    %1291 = vector.multi_reduction <add>, %1240, %cst_235 [0] : vector<8x128xf32> to vector<128xf32>
    %1292 = vector.shape_cast %1291 : vector<128xf32> to vector<1x128xf32>
    %cst_236 = arith.constant dense<0.000000e+00> : vector<128xf32>
    %1293 = vector.multi_reduction <add>, %1252, %cst_236 [0] : vector<8x128xf32> to vector<128xf32>
    %1294 = vector.shape_cast %1293 : vector<128xf32> to vector<1x128xf32>
    %cst_237 = arith.constant dense<0.000000e+00> : vector<128xf32>
    %1295 = vector.multi_reduction <add>, %1264, %cst_237 [0] : vector<8x128xf32> to vector<128xf32>
    %1296 = vector.shape_cast %1295 : vector<128xf32> to vector<1x128xf32>
    %1297 = tpu.concatenate %1266, %1268, %1270, %1272, %1274, %1276, %1278, %1280, %1282, %1284, %1286, %1288, %1290, %1292, %1294, %1296 in 0 : vector<1x128xf32>, vector<1x128xf32>, vector<1x128xf32>, vector<1x128xf32>, vector<1x128xf32>, vector<1x128xf32>, vector<1x128xf32>, vector<1x128xf32>, vector<1x128xf32>, vector<1x128xf32>, vector<1x128xf32>, vector<1x128xf32>, vector<1x128xf32>, vector<1x128xf32>, vector<1x128xf32>, vector<1x128xf32> -> vector<16x128xf32>
    %c0_238 = arith.constant 0 : index
    %c0_239 = arith.constant 0 : index
    %c0_240 = arith.constant 0 : index
    %1298 = vector.load %arg5[%c0_238, %c0_239, %c0_240] : memref<1x16x128xf32, #tpu.memory_space<vmem>>, vector<1x16x128xf32>
    %1299 = vector.shape_cast %1298 : vector<1x16x128xf32> to vector<16x128xf32>
    %1300 = vector.shape_cast %1297 : vector<16x128xf32> to vector<1x16x128xf32>
    tpu.vector_store %arg5[%c0_238, %c0_239, %c0_240], %1300 {strides = array<i32>} : memref<1x16x128xf32, #tpu.memory_space<vmem>>, vector<1x16x128xf32>,
    return
  }
  func.func @transform_0(%arg0: i32, %arg1: i32, %arg2: i32) -> (i32, i32, i32, i32, i32) {
    %c0_i32 = arith.constant 0 : i32
    %c0_i32_0 = arith.constant 0 : i32
    %c0_i32_1 = arith.constant 0 : i32
    %c0_i32_2 = arith.constant 0 : i32
    return %arg0, %arg1, %c0_i32, %c0_i32_0, %c0_i32_1 : i32, i32, i32, i32, i32
  }
  func.func @transform_1(%arg0: i32, %arg1: i32, %arg2: i32) -> (i32, i32, i32) {
    %c0_i32 = arith.constant 0 : i32
    %c0_i32_0 = arith.constant 0 : i32
    %c0_i32_1 = arith.constant 0 : i32
    return %arg2, %c0_i32, %c0_i32_0 : i32, i32, i32
  }
  func.func @transform_2(%arg0: i32, %arg1: i32, %arg2: i32) -> (i32, i32, i32) {
    %c0_i32 = arith.constant 0 : i32
    return %arg0, %arg2, %arg1 : i32, i32, i32
  }
}

</mosaic_0001>

<bundles_post_ra>
// kernel: tpu_custom_call.1
= control target key start
LH: loop header
LB: loop body
LE: loop exit
PB: predicated region body
PF: predicated region fallthrough
CT: control target
= control target key end

     0   :  { %7 = vsyncpa [#allocation3], 0  ;;  %s7721_s0 = inlined_call_operand.hbm [shape: f32[2,1,4,8,256], index: 0, kind: input, shape index: {}]   ;;  %s7722_s1 = inlined_call_operand.hbm [shape: f32[4,8,12], index: 1, kind: input, shape index: {}]   ;;  %s7723_s2 = inlined_call_operand.hbm [shape: f32[2,16,128], index: 2, kind: output, shape index: {}]  }
   0x1   :  { %9 = vsyncpa [#allocation3 + $0x1], 0 }
   0x2   :  { %10 = vsyncpa [#allocation6], 0 }
   0x3   :  { %11 = vsyncpa [#allocation4], 0 }
   0x4   :  { %13 = vsyncpa [#allocation4 + $0x1], 0  ;;  %s3725_s9 = smov 0   ;;  %s3727_s10 = smov 0  }
   0x5   :  { %s3729_s11 = smov 0   ;;  %s3731_s12 = smov 0  }
   0x6   :  { %s3733_s13 = smov 0   ;;  %s3735_s14 = smov 0  }
   0x7 LB: > { %s3309_s15 = sadd.s32 4294967295, %s3685_s14   ;;  %s3310_s16 = sadd.s32 4294967294, %s3685_s14   ;;  %s3685_s14 = sphi %s3735_s14, %s19_s14   ;;  %s3681_s13 = sphi %s3733_s13, %s8818_s13   ;;  %s3677_s12 = sphi %s3731_s12, %s8817_s12   ;;  %s3673_s11 = sphi %s3729_s11, %s8816_s11   ;;  %s3669_s10 = sphi %s3727_s10, %s8815_s10   ;;  %s3665_s9 = sphi %s3725_s9, %s8814_s9  }
   0x8   : > { %p60_p0 = scmp.ne.s32.totalorder %s3669_s10, %s3665_s9  ;;  %p3759_p1 = scmp.eq.s32.totalorder %s3309_s15, 0 }
   0x9   : > { %p3763_p2 = scmp.eq.s32.totalorder %s3309_s15, 1  ;;  %p120_p3 = scmp.eq.s32.totalorder %s3310_s16, 1 }
   0xa   : > { %s8027_s17 = scalar_select %p3759_p1, 1, 0 }
   0xb   : > { %s8028_s18 = scalar_select %p3763_p2, 1, 0 }
   0xc   : > { %p3769_p4 = por %p3759_p1, %p60_p0  ;;  %p3311_p5 = scmp.ge.s32.totalorder %s3685_s14, 1 }
   0xd   : > { %p3774_p6 = por %p120_p3, %p60_p0  ;;  %p127_p7 = scmp.lt.s32.totalorder %s3685_s14, 3 }
   0xe   : > { %s8029_s19 = scalar_select %p3769_p4, 1, 0 }
   0xf   : > { %s8030_s20 = scalar_select %p3774_p6, 1, 0 }
  0x10   : > { %p3779_p8 = pnand %p3311_p5, %p127_p7  ;;  %s3687_s22 = smov [#allocation5]  }
  0x11   : > { %s142_s23 = sshll.u32 %s3687_s22, 4  ;;  %s38_s25 = sadd.s32 1, %s3681_s13  ;;  %s143_s23 = int_to_ptr.vmem [resolvable:$true] %s142_s23 }
  0x12   : > { %s8031_s21 = scalar_select %p3779_p8, 1, 0 }
  0x13   : > { %p3342_p9 = pneg %p3779_p8  ;;  %s3541_s28 = scalar_lea.hbm %s7722_s1, 512 }
  0x14   : > { %p3542_p12 = scmp.ne.s32.totalorder %s7722_s1, %s3541_s28  ;;  %p3548_p5 = scmp.lt.u32.totalorder %s3541_s28, %s7722_s1 }
  0x15   : > { %p3788_p11 = pnand %p3342_p9, %p3759_p1 }
  0x17   : > { %p3543_p13 = pneg %p3788_p11 }
  0x19   : > { %p3544_p0 = pnand %p3543_p13, %p3542_p12 }
  0x1b   : > { %p3545_p3 = pneg %p3544_p0 }
  0x1d   : > { %p3550_p7 = pnand %p3548_p5, %p3545_p3 }
  0x1f   : > { %3553 = shalt.err (!%p3550_p7)
}
  0x20   : > { %s3554_s5 = scalar_lea.vmem %s143_s23, 512  ;;  %p3562_p1 = scmp.lt.s32.totalorder %s143_s23, %s143_s23 }
  0x21   : > { %p3555_p9 = scmp.ne.s32.totalorder %s143_s23, %s3554_s5  ;;  %p3563_p4 = scmp.lt.s32.totalorder %s3554_s5, %s3554_s5 }
  0x23   : > { %p3557_p10 = pnand %p3555_p9, %p3543_p13  ;;  %p3564_p8 = por %p3563_p4, %p3562_p1 }
  0x25   : > { %p3558_p6 = pneg %p3557_p10 }
  0x27   : > { %p3565_p2 = pnand %p3564_p8, %p3558_p6 }
  0x29   : > { %3568 = shalt.err (!%p3565_p2)
}
  0x2a   : > { %s3688_s6 = smov 128   ;;  %s3689_s7 = smov 8  }
  0x2b   : > { %3345 = dma.hbm_to_vmem [thread:$0]  (!%p3788_p11), %s7722_s1, 512, %s143_s23, [#allocation6], %s3688_s6, %s3688_s6, %s3689_s7  }
  0x2c   : > { %p40_p1 = scmp.ge.s32.totalorder %s38_s25, 2  ;;  %s47_s16 = sadd.s32 1, %s3673_s11 }
  0x2d   : > { %p54_p2 = scmp.ne.s32.totalorder %s3673_s11, %s3669_s10  ;;  %p55_p4 = scmp.eq.s32.totalorder %s3685_s14, 0 }
  0x2e   : > { %s8820_s25 = smov (%p40_p1, %s38_s25), 0  ;;  %p8034_p8 = scmp.ne.s32.totalorder %s8028_s18, 0 }
  0x2f   : > { %p3815_p6 = por %p55_p4, %p54_p2  ;;  %s42_s24 = ssub.s32 %s3681_s13, %s8820_s25 }
  0x30   : > { %p3821_p10 = por %p8034_p8, %p54_p2  ;;  %p3355_p12 = scmp.lt.s32.totalorder %s3685_s14, 2 }
  0x31   : > { %p45_p11 = scmp.eq.s32.totalorder %s42_s24, 0  ;;  %s156_s23 = sand.u32 1, %s3673_s11  }
  0x32   : > { %s3314_s27 = sshll.u32 %s156_s23, 6  ;;  %s3332_s29 = sshll.u32 %s3681_s13, 10 }
  0x33   : > { %s3830_s28 = scalar_select %p45_p11, %s3673_s11, %s47_s16  }
  0x34   : > { %s3836_s4 = scalar_lea.hbm %s7721_s0, %s3332_s29  ;;  %s160_s18 = scalar_lea.vmem [#allocation2], %s3314_s27 }
  0x35   : > { %s169_s5 = sshll.u32 %s160_s18, 4  ;;  %p3842_p13 = pnand %p3355_p12, %p3815_p6  ;;  %s3838_s5 = int_to_ptr.vmem [resolvable:$true] %s169_s5 }
  0x36   : > { %s3846_s7 = scalar_lea.sflag [#allocation3], %s156_s23  ;;  %s3569_s8 = scalar_lea.hbm %s3836_s4, 1024 }
  0x37   : > { %p3570_p0 = scmp.ne.s32.totalorder %s3836_s4, %s3569_s8  ;;  %p3571_p3 = pneg %p3842_p13 }
  0x38   : > { %s3574_s22 = scalar_lea.hbm %s7721_s0, 2048  ;;  %p3575_p9 = scmp.lt.u32.totalorder %s3836_s4, %s7721_s0 }
  0x39   : > { %p3572_p5 = pnand %p3571_p3, %p3570_p0  ;;  %p3576_p1 = scmp.lt.u32.totalorder %s3574_s22, %s3569_s8 }
  0x3a   : > { %p3578_p4 = scmp.lt.u32.totalorder %s3569_s8, %s3836_s4 }
  0x3b   : > { %p3573_p7 = pneg %p3572_p5  ;;  %p3577_p2 = por %p3576_p1, %p3575_p9 }
  0x3d   : > { %p3579_p6 = por %p3578_p4, %p3577_p2 }
  0x3f   : > { %p3580_p8 = pnand %p3579_p6, %p3573_p7 }
  0x41   : > { %3583 = shalt.err (!%p3580_p8)
}
  0x42   : > { %s3584_s23 = scalar_lea.vmem %s3838_s5, 1024  ;;  %s3690_s29 = smov [#allocation2]  }
  0x43   : > { %p3585_p12 = scmp.ne.s32.totalorder %s3838_s5, %s3584_s23  ;;  %s3589_s30 = sshll.u32 %s3690_s29, 4  ;;  %s3590_s30 = int_to_ptr.vmem [resolvable:$false] %s3589_s30 }
  0x44   : > { %s3591_s3 = scalar_lea.vmem %s3590_s30, 2048  ;;  %p3592_p5 = scmp.lt.s32.totalorder %s3838_s5, %s3590_s30 }
  0x45   : > { %p3587_p11 = pnand %p3585_p12, %p3571_p3  ;;  %p3593_p9 = scmp.lt.s32.totalorder %s3591_s3, %s3584_s23 }
  0x47   : > { %p3588_p0 = pneg %p3587_p11  ;;  %p3594_p1 = por %p3593_p9, %p3592_p5 }
  0x49   : > { %p3595_p2 = pnand %p3594_p1, %p3588_p0 }
  0x4b   : > { %3598 = shalt.err (!%p3595_p2)
}
  0x4c   : > { %s3691_s18 = smov 256   ;;  %s3692_s8 = smov 16  }
  0x4d   : > { %3349 = dma.hbm_to_vmem [thread:$0]  (!%p3842_p13), %s3836_s4, 1024, %s3838_s5, %s3846_s7, %s3691_s18, %s3691_s18, %s3692_s8  }
  0x4e   : > { %p8037_p3 = scmp.ne.s32.totalorder %s8031_s21, 0 }
  0x50   : > { %181 = sbr.rel (%p8037_p3) target bundleno = 1108 (0x454), region = 28 }
  0x57   : > { %s3877_s15 = sand.u32 1, %s3669_s10   ;;  %p8038_p7 = scmp.ne.s32.totalorder %s8029_s19, 0 }
  0x58   : > { %s3318_s16 = sshll.u32 %s3877_s15, 6  ;;  %s184_s22 = scalar_lea.sflag [#allocation3], %s3877_s15 }
  0x59   : > { %s3881_s24 = scalar_lea.vmem [#allocation2], %s3318_s16 }
  0x5a   : > { %3652 = dma.done.wait (%p8038_p7), %s184_s22, 1024  }
  0x5b   : > { %3654 = vsyncadd (%p8038_p7), %s184_s22, 4294966272  ;;  %p8039_p13 = scmp.ne.s32.totalorder %s8027_s17, 0 }
  0x5d   : > { %3656 = dma.done.wait (%p8039_p13), [#allocation6], 512  }
  0x5e   : > { %3658 = vsyncadd (%p8039_p13), [#allocation6], 4294966784  ;;  %v3693_v0 = vmov 9   ;;  %v3694_v1 = vmov 6   ;;  %v3892_v2 = vld [vmem:[%s3881_s24 + $0x10] sm:$0xff]  ;;  %v3895_v3 = vld [vmem:[%s3881_s24 + $0x18] sm:$0xff] }
  0x5f   : > { %3428 = vset.pattern.permute.xlu1 %v3693_v0  ;;  %3427 = vset.pattern.permute.xlu0 %v3694_v1  ;;  %v3898_v4 = vld [vmem:[%s3881_s24] sm:$0xff]  ;;  %v3901_v5 = vld [vmem:[%s3881_s24 + $0x28] sm:$0xff]  ;;  %v3904_v6 = vld [vmem:[%s3881_s24 + $0x30] sm:$0xff]  ;;  %s3695_s17 = smov 1   ;;  %v3910_v7 = vmul.f32 %v3895_v3, %v3895_v3  ;;  %v227_v10 = vmul.f32 %v3892_v2, %v3892_v2  ;;  %v3696_v24 = vmov 0   ;;  %s3697_s19 = smov 127  }
  0x60   : > { %260 = vrot.lane.b32.xlu1 %v3892_v2, %s3695_s17  ;;  %246 = vrot.lane.b32.xlu0 %v3904_v6, %s3695_s17  ;;  %v3915_v8 = vld [vmem:[%s3881_s24 + $0x8] sm:$0xff]  ;;  %v3919_v9 = vmul.f32 %v3898_v4, %v3898_v4  ;;  %v3924_v11 = vld [vmem:[%s3881_s24 + $0x20] sm:$0xff]  ;;  %v3935_v14 = vmul.f32 %v3901_v5, %v3901_v5  ;;  %v235_v23 = vmul.f32 %v3904_v6, %v3904_v6  ;;  %v3970_v27 = vld [vmem:[#allocation5 + $0x10] sm:$0xff]  ;;  %v3698_v29 = vmov 3   ;;  %s3320_s21 = sshll.u32 %s3877_s15, 4  ;;  %s3333_s6 = sshll.u32 %s3677_s12, 8 }
  0x61   : > { %8040 = vst [vmem:[#allocation11_spill] sm:$0xff] %v3910_v7  ;;  %v3927_v12 = vld [vmem:[%s3881_s24 + $0x38] sm:$0xff]  ;;  %v3931_v13 = vmul.f32 %v3915_v8, %v3915_v8  ;;  %v3943_v16 = vld [vmem:[#allocation5] sm:$0xff]  ;;  %v231_v19 = vmul.f32 %v3924_v11, %v3924_v11  ;;  %v3965_v26 = vld [vmem:[#allocation5 + $0x8] sm:$0xff]  ;;  %v7728_v32 = vmov 10   ;;  %v7730_v33 = vmov 7   ;;  %s7671_s23 = scalar_lea.hbm %s7723_s2, %s3333_s6 }
  0x62   : > { %8042 = vst [vmem:[#allocation13_spill] sm:$0xff] %v3935_v14  ;;  %v3947_v17 = vmul.f32 %v3927_v12, %v3927_v12  ;;  %v229_v18 = vadd.f32 %v227_v10, %v3919_v9  ;;  %v3974_v28 = vld [vmem:[#allocation5 + $0x18] sm:$0xff]  ;;  %v3996_v36 = vadd.f32 %v3915_v8, %v3915_v8  ;;  %v4000_v37 = vadd.f32 %v3898_v4, %v3898_v4  ;;  %s211_s4 = scalar_lea.vmem [#allocation7], %s3320_s21  ;;  %s3190_s29 = scalar_lea.sflag [#allocation4], %s3877_s15 }
  0x63   : > { %8041 = vst [vmem:[#allocation12_spill] sm:$0xff] %v3931_v13  ;;  %v230_v15 = vadd.f32 %v3910_v7, %v3931_v13  ;;  %v463_v30 = vadd.f32 %v231_v19, %v227_v10  ;;  %v241_v42 = vadd.f32 %v3919_v9, %v3919_v9  ;;  %v242_v47 = vadd.f32 %v3931_v13, %v3931_v13  ;;  %s3206_s5 = sshll.u32 %s211_s4, 4  ;;  %s3707_s12 = smov [#allocation7]   ;;  %s7666_s5 = int_to_ptr.vmem [resolvable:$true] %s3206_s5 }
  0x64   : > { %328 = vrot.lane.b32.xlu1 %v3898_v4, %s3695_s17  ;;  %252 = vrot.lane.b32.xlu0 %v3924_v11, %s3695_s17  ;;  %8043 = vst [vmem:[#allocation14_spill] sm:$0xff] %v3947_v17  ;;  %v233_v22 = vadd.f32 %v231_v19, %v229_v18  ;;  %8047 = vst [vmem:[#allocation18_spill] sm:$0xff] %v3996_v36  ;;  %vm293_vm0 = vcmask 1039360   ;;  %vm1828_vm1 = vcmask 7168   ;;  %vm2911_vm2 = vcmask 1047560   ;;  %s3599_s30 = scalar_lea.vmem %s7666_s5, 256 }
  0x65   : > { %v234_v20 = vadd.f32 %v3935_v14, %v230_v15  ;;  %v3985_v31 = vadd.f32 %v463_v30, %v235_v23  ;;  %8048 = vst [vmem:[#allocation19_spill] sm:$0xff] %v4000_v37  ;;  %vm3136_vm3 = vcmask 1040384   ;;  %vm3139_vm4 = vcmask 1041408   ;;  %p3600_p4 = scmp.ne.s32.totalorder %s7666_s5, %s3599_s30  ;;  %s3603_s3 = sshll.u32 %s3707_s12, 4  ;;  %s3604_s3 = int_to_ptr.vmem [resolvable:$false] %s3603_s3 }
  0x66   : > { %v3963_v25 = vadd.f32 %v235_v23, %v233_v22  ;;  %vm3142_vm5 = vcmask 1042432   ;;  %vm3145_vm6 = vcmask 1043456   ;;  %vm3148_vm7 = vcmask 1044480   ;;  %s3605_s18 = scalar_lea.vmem %s3604_s3, 512  ;;  %p3606_p12 = scmp.lt.s32.totalorder %s7666_s5, %s3604_s3 }
  0x67   : > { %v3956_v21 = vadd.f32 %v3947_v17, %v234_v20  ;;  %8046 = vst [vmem:[#allocation17_spill] sm:$0xff] %v3985_v31  ;;  %vm3151_vm8 = vcmask 1045504   ;;  %vm3154_vm9 = vcmask 1046528   ;;  %p3601_p6 = pnand %p3600_p4, %p3821_p10  ;;  %p3607_p11 = scmp.lt.s32.totalorder %s3605_s18, %s3599_s30 }
  0x68   : > { %476 = vperm.xlu1 %3428, %v3943_v16   ;;  %472 = vperm.xlu0 %3427, %v3943_v16   ;;  %8045 = vst [vmem:[#allocation16_spill] sm:$0xff] %v3963_v25 }
  0x69   : > { %8044 = vst [vmem:[#allocation15_spill] sm:$0xff] %v3956_v21  ;;  %p3602_p8 = pneg %p3601_p6  ;;  %p3608_p0 = por %p3607_p11, %p3606_p12 }
  0x6b   : > { %p3609_p5 = pnand %p3608_p0, %p3602_p8 }
  0x6c   : > { %3429 = vset.pattern.permute.xlu1 %v3696_v24  ;;  %291 = vrot.lane.b32.xlu0 %v3956_v21, %s3697_s19 }
  0x6d   : > { %494 = vperm.xlu1 %3429, %v3943_v16  }
  0x70   : > { %623 = vperm.xlu0 %3427, %v3965_v26  }
  0x71   : > { %289 = vrot.lane.b32.xlu1 %v3963_v25, %s3697_s19 }
  0x72   : > { %3430 = vset.pattern.permute.xlu1 %v3693_v0 }
  0x74   : > { %774 = vperm.xlu0 %3427, %v3970_v27  }
  0x75   : > { %627 = vperm.xlu1 %3430, %v3965_v26  }
  0x78   : > { %925 = vperm.xlu0 %3427, %v3974_v28  }
  0x79   : > { %3431 = vset.pattern.permute.xlu1 %v3696_v24 }
  0x7a   : > { %645 = vperm.xlu1 %3431, %v3965_v26  }
  0x7c   : > { %3434 = vset.pattern.permute.xlu0 %v3698_v29 }
  0x7d   : > { %500 = vperm.xlu0 %3434, %v3943_v16  }
  0x7e   : > { %3432 = vset.pattern.permute.xlu1 %v3693_v0 }
  0x7f   : > { %778 = vperm.xlu1 %3432, %v3970_v27  }
  0x81   : > { %651 = vperm.xlu0 %3434, %v3965_v26  }
  0x83   : > { %3433 = vset.pattern.permute.xlu1 %v3696_v24 }
  0x84   : > { %796 = vperm.xlu1 %3433, %v3970_v27  }
  0x85   : > { %802 = vperm.xlu0 %3434, %v3970_v27  }
  0x88   : > { %3435 = vset.pattern.permute.xlu1 %v3693_v0 }
  0x89   : > { %929 = vperm.xlu1 %3435, %v3974_v28   ;;  %953 = vperm.xlu0 %3434, %v3974_v28  }
  0x8d   : > { %3436 = vset.pattern.permute.xlu1 %v3696_v24  ;;  %3437 = vset.pattern.permute.xlu0 %v7730_v33 }
  0x8e   : > { %947 = vperm.xlu1 %3436, %v3974_v28  }
  0x92   : > { %3438 = vset.pattern.permute.xlu1 %v7728_v32 }
  0xd2   : > { %v3990_v34 = vpop.permute.xlu1 %260  ;;  %v3992_v35 = vpop.permute.xlu0 %246 }
  0xd3   : > { %v263_v38 = vmul.f32 %v3904_v6, %v3990_v34  ;;  %v265_v39 = vmul.f32 %v3892_v2, %v3992_v35  ;;  %v264_v40 = vmul.f32 %v3927_v12, %v3990_v34  ;;  %v266_v41 = vmul.f32 %v3895_v3, %v3992_v35 }
  0xd4   : > { %v249_v44 = vmul.f32 %v3924_v11, %v3992_v35  ;;  %v333_v45 = vmul.f32 %v3990_v34, %v4000_v37  ;;  %v334_v46 = vmul.f32 %v3990_v34, %v3996_v36  ;;  %v250_v51 = vmul.f32 %v3901_v5, %v3992_v35 }
  0xd5   : > { %v271_v52 = vmul.f32 %v3924_v11, %v3990_v34  ;;  %v4032_v55 = vsub.f32 %v263_v38, %v265_v39  ;;  %v272_v56 = vmul.f32 %v3901_v5, %v3990_v34  ;;  %v268_v57 = vsub.f32 %v264_v40, %v266_v41 }
  0xd6   : > { %v329_v43 = vpop.permute.xlu1 %328  ;;  %v253_v48 = vpop.permute.xlu0 %252  ;;  %v276_v58 = vmul.f32 %v3895_v3, %v3990_v34  ;;  %v282_v59 = vmul.f32 %v3927_v12, %v3992_v35  ;;  %v275_v10 = vmul.f32 %v3892_v2, %v3990_v34  ;;  %v281_v30 = vmul.f32 %v3904_v6, %v3992_v35 }
  0xd7   : > { %v4021_v49 = vmul.f32 %v329_v43, %v4000_v37  ;;  %v4024_v50 = vmul.f32 %v329_v43, %v3996_v36  ;;  %v255_v53 = vmul.f32 %v3904_v6, %v253_v48  ;;  %v256_v54 = vmul.f32 %v3927_v12, %v253_v48 }
  0xd8   : > { %v269_v62 = vmul.f32 %v3892_v2, %v253_v48  ;;  %v270_v63 = vmul.f32 %v3895_v3, %v253_v48  ;;  %v339_v0 = vmul.f32 %v253_v48, %v4000_v37  ;;  %v278_v1 = vmul.f32 %v3901_v5, %v253_v48 }
  0xd9   : > { %405 = vrot.lane.b32.xlu0 %v4021_v49, %s3697_s19  ;;  %407 = vrot.lane.b32.xlu1 %v4024_v50, %s3697_s19  ;;  %v257_v60 = vsub.f32 %v249_v44, %v255_v53  ;;  %v258_v61 = vsub.f32 %v250_v51, %v256_v54  ;;  %v277_v15 = vmul.f32 %v3924_v11, %v253_v48 }
  0xda   : > { %v341_v20 = vadd.f32 %v4032_v55, %v4032_v55  ;;  %v340_v22 = vmul.f32 %v253_v48, %v3996_v36  ;;  %v342_v23 = vadd.f32 %v268_v57, %v268_v57  ;;  %v280_v24 = vadd.f32 %v278_v1, %v276_v58 }
  0xdb   : > { %v335_v18 = vadd.f32 %v257_v60, %v257_v60  ;;  %v336_v19 = vadd.f32 %v258_v61, %v258_v61  ;;  %v279_v29 = vadd.f32 %v277_v15, %v275_v10  ;;  %v273_v40 = vsub.f32 %v269_v62, %v271_v52 }
  0xdc   : > { %v274_v41 = vsub.f32 %v270_v63, %v272_v56  ;;  %v284_v43 = vadd.f32 %v282_v59, %v280_v24  ;;  %v4065_v51 = vsub.f32 %v241_v42, %v3963_v25  ;;  %v345_v53 = vmul.f32 %v3992_v35, %v4000_v37 }
  0xdd   : > { %v4056_v38 = vadd.f32 %v335_v18, %v333_v45  ;;  %v4058_v39 = vadd.f32 %v336_v19, %v334_v46  ;;  %v283_v44 = vadd.f32 %v281_v30, %v279_v29  ;;  %v4070_v45 = vsub.f32 %v242_v47, %v3956_v21 }
  0xde   : > { %8049 = vst [vmem:[#allocation20_spill] sm:$0xff] %v4065_v51  ;;  %v286_v46 = vmul.f32 2.0, %v284_v43  ;;  %v4072_v54 = vadd.f32 %v341_v20, %v339_v0  ;;  %v4074_v56 = vadd.f32 %v342_v23, %v340_v22  ;;  %v347_v58 = vadd.f32 %v273_v40, %v273_v40 }
  0xdf   : > { %414 = vrot.lane.b32.xlu0 %v4056_v38, %s3697_s19  ;;  %416 = vrot.lane.b32.xlu1 %v4058_v39, %s3697_s19  ;;  %8050 = vst [vmem:[#allocation21_spill] sm:$0xff] %v4070_v45  ;;  %v285_v52 = vmul.f32 2.0, %v283_v44  ;;  %v348_v59 = vadd.f32 %v274_v41, %v274_v41  ;;  %v346_v47 = vmul.f32 %v3992_v35, %v3996_v36 }
  0xe0   : > { %v300_v62 = vmul.f32 %v3895_v3, %v286_v46  ;;  %v310_v42 = vmul.f32 %v3901_v5, %v286_v46  ;;  %v298_v0 = vmul.f32 %v3990_v34, %v4070_v45  ;;  %v297_v10 = vmul.f32 %v3990_v34, %v4065_v51 }
  0xe1   : > { %v299_v63 = vmul.f32 %v3892_v2, %v285_v52  ;;  %v309_v1 = vmul.f32 %v3924_v11, %v285_v52  ;;  %v308_v15 = vmul.f32 %v253_v48, %v4070_v45  ;;  %v307_v18 = vmul.f32 %v253_v48, %v4065_v51 }
  0xe2   : > { %v320_v19 = vmul.f32 %v3927_v12, %v286_v46  ;;  %v319_v20 = vmul.f32 %v3904_v6, %v285_v52  ;;  %v4094_v22 = vadd.f32 %v347_v58, %v345_v53  ;;  %v4096_v23 = vadd.f32 %v348_v59, %v346_v47 }
  0xe3   : > { %424 = vrot.lane.b32.xlu0 %v4072_v54, %s3697_s19  ;;  %426 = vrot.lane.b32.xlu1 %v4074_v56, %s3697_s19  ;;  %v302_v24 = vadd.f32 %v300_v62, %v298_v0  ;;  %v301_v29 = vadd.f32 %v299_v63, %v297_v10  ;;  %v312_v30 = vadd.f32 %v310_v42, %v308_v15 }
  0xe4   : > { %v311_v43 = vadd.f32 %v309_v1, %v307_v18  ;;  %v318_v44 = vmul.f32 %v3992_v35, %v4070_v45  ;;  %v317_v34 = vmul.f32 %v3992_v35, %v4065_v51  ;;  %v304_v48 = vmul.f32 %v258_v61, %v3996_v36 }
  0xe5   : > { %v303_v53 = vmul.f32 %v257_v60, %v4000_v37  ;;  %v314_v46 = vmul.f32 %v268_v57, %v3996_v36  ;;  %v313_v52 = vmul.f32 %v4032_v55, %v4000_v37  ;;  %v324_v35 = vmul.f32 %v274_v41, %v3996_v36 }
  0xe6   : > { %v322_v58 = vadd.f32 %v320_v19, %v318_v44  ;;  %v321_v59 = vadd.f32 %v319_v20, %v317_v34  ;;  %v4114_v62 = vadd.f32 %v304_v48, %v302_v24  ;;  %v323_v55 = vmul.f32 %v273_v40, %v4000_v37 }
  0xe7   : > { %v4102_v32 = vpop.permute.xlu0 %472  ;;  %434 = vrot.lane.b32.xlu0 %v4094_v22, %s3697_s19  ;;  %436 = vrot.lane.b32.xlu1 %v4096_v23, %s3697_s19  ;;  %v4116_v63 = vadd.f32 %v303_v53, %v301_v29  ;;  %v4122_v60 = vadd.f32 %v314_v46, %v312_v30  ;;  %v4124_v57 = vadd.f32 %v313_v52, %v311_v43  ;;  %v4143_v10 = vpop.permute.xlu1 %476 }
  0xe8   : > { %8051 = vst [vmem:[#allocation22_spill] sm:$0xff] %v4102_v32  ;;  %v538_v42 = vmul.f32 %v4102_v32, %v4056_v38  ;;  %v539_v61 = vmul.f32 %v4102_v32, %v4058_v39  ;;  %v565_v41 = vmul.f32 %v4102_v32, %v4072_v54  ;;  %v566_v40 = vmul.f32 %v4102_v32, %v4074_v56 }
  0xe9   : > { %8054 = vst [vmem:[#allocation25_spill] sm:$0xff] %v4143_v10  ;;  %v4145_v15 = vadd.f32 %v323_v55, %v321_v59  ;;  %v592_v19 = vmul.f32 %v4102_v32, %v4094_v22  ;;  %v4152_v20 = vadd.f32 %v324_v35, %v322_v58  ;;  %v593_v29 = vmul.f32 %v4102_v32, %v4096_v23 }
  0xea   : > { %v4136_v47 = vadd.f32 %v539_v61, %v4114_v62  ;;  %v4139_v0 = vadd.f32 %v538_v42, %v4116_v63  ;;  %v4148_v18 = vadd.f32 %v565_v41, %v4124_v57  ;;  %v4155_v24 = vadd.f32 %v566_v40, %v4122_v60 }
  0xeb   : > { %v4129_v1 = vpop.permute.xlu0 %291  ;;  %356 = vrot.lane.b32.xlu1 %v4114_v62, %s3697_s19  ;;  %354 = vrot.lane.b32.xlu0 %v4116_v63, %s3697_s19  ;;  %v4160_v30 = vadd.f32 %v592_v19, %v4145_v15  ;;  %v4167_v43 = vadd.f32 %v593_v29, %v4152_v20  ;;  %v542_v48 = vmul.f32 %v3892_v2, %v4143_v10 }
  0xec   : > { %8052 = vst [vmem:[#allocation23_spill] sm:$0xff] %v4136_v47  ;;  %8053 = vst [vmem:[#allocation24_spill] sm:$0xff] %v4139_v0  ;;  %v4171_v34 = vpop.permute.xlu1 %494  ;;  %v505_v46 = vmul.f32 %v4102_v32, %v4021_v49  ;;  %v569_v59 = vmul.f32 %v3924_v11, %v4143_v10  ;;  %v506_v41 = vmul.f32 %v4102_v32, %v4024_v50 }
  0xed   : > { %8055 = vst [vmem:[#allocation26_spill] sm:$0xff] %v4148_v18  ;;  %8056 = vst [vmem:[#allocation27_spill] sm:$0xff] %v4155_v24 }
  0xee   : > { %8057 = vst [vmem:[#allocation28_spill] sm:$0xff] %v4160_v30  ;;  %8058 = vst [vmem:[#allocation29_spill] sm:$0xff] %v4167_v43 }
  0xef   : > { %366 = vrot.lane.b32.xlu1 %v4122_v60, %s3697_s19  ;;  %364 = vrot.lane.b32.xlu0 %v4124_v57, %s3697_s19  ;;  %v4169_v44 = vpop.permute.xlu0 %623  ;;  %8060 = vst [vmem:[#allocation31_spill] sm:$0xff] %v4171_v34 }
  0xf0   : > { %8059 = vst [vmem:[#allocation30_spill] sm:$0xff] %v4169_v44  ;;  %v690_v53 = vmul.f32 %v4169_v44, %v4058_v39  ;;  %v689_v52 = vmul.f32 %v4169_v44, %v4056_v38  ;;  %v716_v58 = vmul.f32 %v4169_v44, %v4072_v54  ;;  %v717_v35 = vmul.f32 %v4169_v44, %v4074_v56  ;;  %v4196_v61 = vpop.permute.xlu1 %289 }
  0xf2   : > { %v4194_v42 = vadd.f32 %v690_v53, %v4114_v62  ;;  %v4203_v40 = vadd.f32 %v689_v52, %v4116_v63  ;;  %v4206_v19 = vadd.f32 %v716_v58, %v4124_v57  ;;  %v4209_v29 = vadd.f32 %v717_v35, %v4122_v60 }
  0xf3   : > { %376 = vrot.lane.b32.xlu1 %v4152_v20, %s3697_s19  ;;  %374 = vrot.lane.b32.xlu0 %v4145_v15, %s3697_s19  ;;  %v4198_v55 = vpop.permute.xlu0 %774  ;;  %v743_v53 = vmul.f32 %v4169_v44, %v4094_v22  ;;  %v656_v35 = vmul.f32 %v4169_v44, %v4021_v49 }
  0xf4   : > { %8061 = vst [vmem:[#allocation32_spill] sm:$0xff] %v4194_v42  ;;  %8062 = vst [vmem:[#allocation33_spill] sm:$0xff] %v4198_v55  ;;  %v840_v52 = vmul.f32 %v4198_v55, %v4056_v38  ;;  %v841_v58 = vmul.f32 %v4198_v55, %v4058_v39  ;;  %v4239_v30 = vpop.permute.xlu1 %627  ;;  %v868_v18 = vmul.f32 %v4198_v55, %v4074_v56 }
  0xf5   : > { %8063 = vst [vmem:[#allocation34_spill] sm:$0xff] %v4203_v40  ;;  %8064 = vst [vmem:[#allocation35_spill] sm:$0xff] %v4206_v19  ;;  %v4226_v33 = vadd.f32 %v743_v53, %v4145_v15  ;;  %v867_v40 = vmul.f32 %v4198_v55, %v4072_v54  ;;  %v693_v53 = vmul.f32 %v3892_v2, %v4239_v30 }
  0xf6   : > { %8065 = vst [vmem:[#allocation36_spill] sm:$0xff] %v4209_v29  ;;  %8070 = vst [vmem:[#allocation41_spill] sm:$0xff] %v4239_v30 }
  0xf7   : > { %509 = vrot.lane.b32.xlu1 %v505_v46, %s3697_s19  ;;  %544 = vrot.lane.b32.xlu0 %v542_v48, %s3695_s17  ;;  %v596_v48 = vmul.f32 %v3904_v6, %v4143_v10  ;;  %v744_v46 = vmul.f32 %v4169_v44, %v4096_v23  ;;  %8066 = vst [vmem:[#allocation37_spill] sm:$0xff] %v4226_v33 }
  0xf8   : > { %v4257_v33 = vadd.f32 %v868_v18, %v4122_v60 }
  0xf9   : > { %v4229_v19 = vadd.f32 %v744_v46, %v4152_v20  ;;  %v4247_v46 = vpop.permute.xlu0 %925  ;;  %v4271_v0 = vpop.permute.xlu1 %645 }
  0xfa   : > { %8071 = vst [vmem:[#allocation42_spill] sm:$0xff] %v4247_v46  ;;  %8073 = vst [vmem:[#allocation44_spill] sm:$0xff] %v4257_v33  ;;  %v1018_v18 = vmul.f32 %v4247_v46, %v4072_v54 }
  0xfb   : > { %511 = vrot.lane.b32.xlu1 %v506_v41, %s3697_s19  ;;  %571 = vrot.lane.b32.xlu0 %v569_v59, %s3695_s17  ;;  %8067 = vst [vmem:[#allocation38_spill] sm:$0xff] %v4229_v19  ;;  %v4232_v59 = vadd.f32 %v841_v58, %v4114_v62  ;;  %v4235_v41 = vadd.f32 %v840_v52, %v4116_v63  ;;  %8074 = vst [vmem:[#allocation45_spill] sm:$0xff] %v4271_v0 }
  0xfc   : > { %v657_v52 = vmul.f32 %v4169_v44, %v4024_v50  ;;  %v4252_v58 = vadd.f32 %v867_v40, %v4124_v57  ;;  %v991_v40 = vmul.f32 %v4247_v46, %v4056_v38  ;;  %v807_v38 = vmul.f32 %v4198_v55, %v4021_v49 }
  0xfd   : > { %8068 = vst [vmem:[#allocation39_spill] sm:$0xff] %v4232_v59  ;;  %8069 = vst [vmem:[#allocation40_spill] sm:$0xff] %v4235_v41  ;;  %v720_v41 = vmul.f32 %v3924_v11, %v4239_v30  ;;  %v4290_v54 = vadd.f32 %v1018_v18, %v4124_v57 }
  0xfe   : > { %8072 = vst [vmem:[#allocation43_spill] sm:$0xff] %v4252_v58  ;;  %v992_v58 = vmul.f32 %v4247_v46, %v4058_v39  ;;  %v4287_v39 = vadd.f32 %v991_v40, %v4116_v63  ;;  %v808_v63 = vmul.f32 %v4198_v55, %v4024_v50  ;;  %v4305_v57 = vpop.permute.xlu1 %778 }
  0xff   : > { %660 = vrot.lane.b32.xlu1 %v656_v35, %s3697_s19  ;;  %598 = vrot.lane.b32.xlu0 %v596_v48, %s3695_s17  ;;  %v894_v48 = vmul.f32 %v4198_v55, %v4094_v22  ;;  %v895_v35 = vmul.f32 %v4198_v55, %v4096_v23  ;;  %8079 = vst [vmem:[#allocation50_spill] sm:$0xff] %v4290_v54  ;;  %8081 = vst [vmem:[#allocation52_spill] sm:$0xff] %v4305_v57 }
 0x100   : > { %8078 = vst [vmem:[#allocation49_spill] sm:$0xff] %v4287_v39  ;;  %v898_v40 = vmul.f32 %v3904_v6, %v4305_v57 }
 0x101   : > { %v4274_v33 = vadd.f32 %v894_v48, %v4145_v15  ;;  %v4277_v59 = vadd.f32 %v895_v35, %v4152_v20  ;;  %v1045_v35 = vmul.f32 %v4247_v46, %v4094_v22 }
 0x103   : > { %662 = vrot.lane.b32.xlu1 %v657_v52, %s3697_s19  ;;  %695 = vrot.lane.b32.xlu0 %v693_v53, %s3695_s17  ;;  %8075 = vst [vmem:[#allocation46_spill] sm:$0xff] %v4274_v33  ;;  %8076 = vst [vmem:[#allocation47_spill] sm:$0xff] %v4277_v59  ;;  %v1019_v53 = vmul.f32 %v4247_v46, %v4074_v56  ;;  %v4284_v52 = vadd.f32 %v992_v58, %v4114_v62  ;;  %v4323_v58 = vpop.permute.xlu1 %796  ;;  %v3704_v59 = vmov 11  }
 0x104   : > { %v1046_v56 = vmul.f32 %v4247_v46, %v4096_v23  ;;  %v747_v62 = vmul.f32 %v3904_v6, %v4239_v30  ;;  %v844_v23 = vmul.f32 %v3892_v2, %v4305_v57  ;;  %8084 = vst [vmem:[#allocation55_spill] sm:$0xff] %v4323_v58 }
 0x105   : > { %8077 = vst [vmem:[#allocation48_spill] sm:$0xff] %v4284_v52  ;;  %v4293_v48 = vadd.f32 %v1019_v53, %v4122_v60  ;;  %v4308_v60 = vadd.f32 %v1045_v35, %v4145_v15  ;;  %v871_v15 = vmul.f32 %v3924_v11, %v4305_v57  ;;  %v3701_v53 = vmov 1  }
 0x106   : > { %v4311_v22 = vadd.f32 %v1046_v56, %v4152_v20  ;;  %v959_v20 = vmul.f32 %v4247_v46, %v4024_v50  ;;  %v8085_v35 = vmov 7   ;;  %v8086_v56 = vmov 10  }
 0x107   : > { %8080 = vst [vmem:[#allocation51_spill] sm:$0xff] %v4293_v48  ;;  %811 = vrot.lane.b32.xlu1 %v807_v38, %s3697_s19  ;;  %722 = vrot.lane.b32.xlu0 %v720_v41, %s3695_s17  ;;  %8082 = vst [vmem:[#allocation53_spill] sm:$0xff] %v4308_v60  ;;  %v958_v41 = vmul.f32 %v4247_v46, %v4021_v49 }
 0x108   : > { %8083 = vst [vmem:[#allocation54_spill] sm:$0xff] %v4311_v22  ;;  %v4331_v49 = vpop.permute.xlu1 %929 }
 0x109   : > { %v995_v18 = vmul.f32 %v3892_v2, %v4331_v49  ;;  %v1022_v50 = vmul.f32 %v3924_v11, %v4331_v49  ;;  %v1049_v38 = vmul.f32 %v3904_v6, %v4331_v49 }
 0x10b   : > { %813 = vrot.lane.b32.xlu1 %v808_v63, %s3697_s19  ;;  %749 = vrot.lane.b32.xlu0 %v747_v62, %s3695_s17  ;;  %v3702_v62 = vmov 4   ;;  %v3703_v63 = vmov 8  }
 0x10f   : > { %962 = vrot.lane.b32.xlu1 %v958_v41, %s3697_s19  ;;  %846 = vrot.lane.b32.xlu0 %v844_v23, %s3695_s17  ;;  %v4365_v23 = vpop.permute.xlu0 %500 }
 0x110   : > { %8087 = vst [vmem:[#allocation56_spill] sm:$0xff] %v4365_v23 }
 0x113   : > { %964 = vrot.lane.b32.xlu1 %v959_v20, %s3697_s19  ;;  %873 = vrot.lane.b32.xlu0 %v871_v15, %s3695_s17  ;;  %v4370_v41 = vpop.permute.xlu0 %651 }
 0x114   : > { %8088 = vst [vmem:[#allocation57_spill] sm:$0xff] %v4370_v41 }
 0x117   : > { %1255 = vperm.xlu1 %3438, %v3943_v16   ;;  %900 = vrot.lane.b32.xlu0 %v898_v40, %s3695_s17  ;;  %v4375_v15 = vpop.permute.xlu0 %802  ;;  %v4382_v40 = vpop.permute.xlu1 %947 }
 0x118   : > { %8089 = vst [vmem:[#allocation58_spill] sm:$0xff] %v4375_v15  ;;  %8091 = vst [vmem:[#allocation60_spill] sm:$0xff] %v4382_v40 }
 0x11b   : > { %3439 = vset.pattern.permute.xlu1 %v3701_v53  ;;  %997 = vrot.lane.b32.xlu0 %v995_v18, %s3695_s17  ;;  %v4380_v20 = vpop.permute.xlu0 %953 }
 0x11c   : > { %1273 = vperm.xlu1 %3439, %v3943_v16   ;;  %8090 = vst [vmem:[#allocation59_spill] sm:$0xff] %v4380_v20 }
 0x11f   : > { %1024 = vrot.lane.b32.xlu0 %v1022_v50, %s3695_s17 }
 0x120   : > { %3440 = vset.pattern.permute.xlu1 %v8085_v35 }
 0x121   : > { %1381 = vperm.xlu1 %3440, %v3965_v26  }
 0x123   : > { %1051 = vrot.lane.b32.xlu0 %v1049_v38, %s3695_s17 }
 0x125   : > { %3441 = vset.pattern.permute.xlu1 %v8086_v56 }
 0x126   : > { %1385 = vperm.xlu1 %3441, %v3965_v26  }
 0x127   : > { %1251 = vperm.xlu0 %3437, %v3943_v16  }
 0x12a   : > { %3442 = vset.pattern.permute.xlu1 %v3702_v62 }
 0x12b   : > { %1409 = vperm.xlu1 %3442, %v3965_v26   ;;  %3444 = vset.pattern.permute.xlu0 %v8086_v56 }
 0x12c   : > { %1515 = vperm.xlu0 %3444, %v3970_v27  }
 0x12f   : > { %3443 = vset.pattern.permute.xlu1 %v8085_v35 }
 0x130   : > { %1511 = vperm.xlu1 %3443, %v3970_v27   ;;  %1793 = vrot.lane.b32.xlu0 %v3892_v2, %s3697_s19 }
 0x131   : > { %3445 = vset.pattern.permute.xlu0 %v3703_v63 }
 0x134   : > { %1781 = vrot.lane.b32.xlu1 %v3924_v11, %s3697_s19  ;;  %1771 = vrot.lane.b32.xlu0 %v3904_v6, %s3697_s19 }
 0x135   : > { %3446 = vset.pattern.permute.xlu1 %v3703_v63 }
 0x138   : > { %1783 = vrot.lane.b32.xlu1 %v3901_v5, %s3697_s19  ;;  %1865 = vrot.lane.b32.xlu0 %v3898_v4, %s3697_s19 }
 0x13c   : > { %1795 = vrot.lane.b32.xlu1 %v3895_v3, %s3697_s19  ;;  %2068 = vperm.xlu0 %3445, %v3943_v16  }
 0x140   : > { %1773 = vrot.lane.b32.xlu1 %v3927_v12, %s3697_s19  ;;  %2701 = vperm.xlu0 %3445, %v3974_v28  }
 0x144   : > { %1867 = vrot.lane.b32.xlu1 %v3915_v8, %s3697_s19  ;;  %3447 = vset.pattern.permute.xlu0 %v3702_v62 }
 0x145   : > { %1279 = vperm.xlu0 %3447, %v3943_v16  }
 0x148   : > { %2490 = vperm.xlu1 %3446, %v3970_v27  }
 0x149   : > { %1539 = vperm.xlu0 %3447, %v3970_v27  }
 0x14b   : > { %v4386_v18 = vpop.permute.xlu0 %405  ;;  %v4388_v50 = vpop.permute.xlu1 %407 }
 0x14c   : > { %2279 = vperm.xlu1 %3446, %v3965_v26   ;;  %v4567_v46 = vsel %vm293_vm0, %v4386_v18, %v4388_v50 }
 0x14d   : > { %3449 = vset.pattern.permute.xlu0 %v3701_v53 }
 0x14e   : > { %1403 = vperm.xlu0 %3449, %v3965_v26  }
 0x150   : > { %3448 = vset.pattern.permute.xlu1 %v3701_v53 }
 0x151   : > { %v4392_v8 = vpop.permute.xlu0 %414  ;;  %1533 = vperm.xlu1 %3448, %v3970_v27   ;;  %v4395_v16 = vpop.permute.xlu1 %416 }
 0x152   : > { %1663 = vperm.xlu0 %3449, %v3974_v28  }
 0x155   : > { %v4398_v38 = vpop.permute.xlu0 %424  ;;  %v4400_v63 = vpop.permute.xlu1 %426  ;;  %3450 = vset.pattern.permute.xlu1 %v8085_v35 }
 0x156   : > { %1641 = vperm.xlu1 %3450, %v3974_v28   ;;  %1826 = vrot.lane.b32.xlu0 %v3956_v21, %s3695_s17 }
 0x157   : > { %3454 = vset.pattern.permute.xlu0 %v3704_v59 }
 0x159   : > { %v4406_v26 = vpop.permute.xlu0 %434  ;;  %v4408_v53 = vpop.permute.xlu1 %436 }
 0x15a   : > { %3451 = vset.pattern.permute.xlu1 %v8086_v56 }
 0x15b   : > { %1645 = vperm.xlu1 %3451, %v3974_v28  }
 0x15d   : > { %v4412_v27 = vpop.permute.xlu1 %356  ;;  %v4414_v33 = vpop.permute.xlu0 %354 }
 0x15f   : > { %3452 = vset.pattern.permute.xlu1 %v3702_v62 }
 0x160   : > { %1669 = vperm.xlu1 %3452, %v3974_v28  }
 0x161   : > { %v4417_v35 = vpop.permute.xlu1 %366  ;;  %v4419_v22 = vpop.permute.xlu0 %364 }
 0x164   : > { %1824 = vrot.lane.b32.xlu1 %v3963_v25, %s3695_s17 }
 0x165   : > { %v4423_v60 = vpop.permute.xlu1 %376  ;;  %v4425_v48 = vpop.permute.xlu0 %374  ;;  %3453 = vset.pattern.permute.xlu1 %v3704_v59 }
 0x169   : > { %v4427_v56 = vpop.permute.xlu1 %509  ;;  %v4429_v54 = vpop.permute.xlu0 %544 }
 0x16a   : > { %8092 = vst [vmem:[#allocation61_spill] sm:$0xff] %v4429_v54 }
 0x16d   : > { %v4431_v52 = vpop.permute.xlu1 %511  ;;  %v4433_v62 = vpop.permute.xlu0 %571 }
 0x16e   : > { %8093 = vst [vmem:[#allocation62_spill] sm:$0xff] %v4433_v62 }
 0x171   : > { %v4435_v28 = vpop.permute.xlu1 %660  ;;  %v4437_v39 = vpop.permute.xlu0 %598 }
 0x172   : > { %8094 = vst [vmem:[#allocation63_spill] sm:$0xff] %v4437_v39 }
 0x175   : > { %v4439_v19 = vpop.permute.xlu1 %662  ;;  %v4441_v29 = vpop.permute.xlu0 %695 }
 0x176   : > { %8095 = vst [vmem:[#allocation64_spill] sm:$0xff] %v4441_v29 }
 0x179   : > { %v4443_v42 = vpop.permute.xlu1 %811  ;;  %v4445_v43 = vpop.permute.xlu0 %722 }
 0x17a   : > { %8096 = vst [vmem:[#allocation65_spill] sm:$0xff] %v4443_v42  ;;  %8097 = vst [vmem:[#allocation66_spill] sm:$0xff] %v4445_v43 }
 0x17d   : > { %v4447_v24 = vpop.permute.xlu1 %813  ;;  %v4449_v54 = vpop.permute.xlu0 %749 }
 0x17e   : > { %8098 = vst [vmem:[#allocation67_spill] sm:$0xff] %v4447_v24  ;;  %8099 = vst [vmem:[#allocation68_spill] sm:$0xff] %v4449_v54 }
 0x181   : > { %v4451_v62 = vpop.permute.xlu1 %962  ;;  %v4453_v47 = vpop.permute.xlu0 %846 }
 0x182   : > { %8100 = vst [vmem:[#allocation69_spill] sm:$0xff] %v4451_v62  ;;  %8101 = vst [vmem:[#allocation70_spill] sm:$0xff] %v4453_v47 }
 0x185   : > { %v4455_v39 = vpop.permute.xlu1 %964  ;;  %v4457_v13 = vpop.permute.xlu0 %873 }
 0x186   : > { %8102 = vst [vmem:[#allocation71_spill] sm:$0xff] %v4455_v39  ;;  %8103 = vst [vmem:[#allocation72_spill] sm:$0xff] %v4457_v13 }
 0x189   : > { %v4461_v40 = vpop.permute.xlu0 %900 }
 0x18a   : > { %8105 = vst [vmem:[#allocation74_spill] sm:$0xff] %v4461_v40 }
 0x18d   : > { %v4465_v20 = vpop.permute.xlu0 %997 }
 0x18e   : > { %8107 = vst [vmem:[#allocation76_spill] sm:$0xff] %v4465_v20 }
 0x191   : > { %v4469_v15 = vpop.permute.xlu0 %1024 }
 0x192   : > { %8109 = vst [vmem:[#allocation78_spill] sm:$0xff] %v4469_v15 }
 0x195   : > { %v4475_v47 = vpop.permute.xlu0 %1051 }
 0x196   : > { %v4459_v59 = vpop.permute.xlu1 %1255  ;;  %8112 = vst [vmem:[#allocation81_spill] sm:$0xff] %v4475_v47 }
 0x197   : > { %8104 = vst [vmem:[#allocation73_spill] sm:$0xff] %v4459_v59 }
 0x19b   : > { %v4463_v29 = vpop.permute.xlu1 %1273 }
 0x19c   : > { %8106 = vst [vmem:[#allocation75_spill] sm:$0xff] %v4463_v29 }
 0x1a0   : > { %v4467_v43 = vpop.permute.xlu1 %1381 }
 0x1a1   : > { %8108 = vst [vmem:[#allocation77_spill] sm:$0xff] %v4467_v43 }
 0x1a5   : > { %v4471_v54 = vpop.permute.xlu1 %1385 }
 0x1a6   : > { %8110 = vst [vmem:[#allocation79_spill] sm:$0xff] %v4471_v54  ;;  %v4477_v41 = vpop.permute.xlu0 %1251 }
 0x1a7   : > { %8113 = vst [vmem:[#allocation82_spill] sm:$0xff] %v4477_v41 }
 0x1aa   : > { %v4473_v58 = vpop.permute.xlu1 %1409 }
 0x1ab   : > { %8111 = vst [vmem:[#allocation80_spill] sm:$0xff] %v4473_v58  ;;  %v4481_v59 = vpop.permute.xlu0 %1515 }
 0x1ac   : > { %8115 = vst [vmem:[#allocation84_spill] sm:$0xff] %v4481_v59 }
 0x1af   : > { %v4479_v13 = vpop.permute.xlu1 %1511  ;;  %v1794_v20 = vpop.permute.xlu0 %1793 }
 0x1b0   : > { %8114 = vst [vmem:[#allocation83_spill] sm:$0xff] %v4479_v13 }
 0x1b3   : > { %v1782_v40 = vpop.permute.xlu1 %1781  ;;  %v1772_v13 = vpop.permute.xlu0 %1771 }
 0x1b7   : > { %v4483_v29 = vpop.permute.xlu1 %1783 }
 0x1b8   : > { %v4489_v15 = vsel %vm293_vm0, %v1782_v40, %v4483_v29  ;;  %v1815_v54 = vmul.f32 %v3901_v5, %v4483_v29  ;;  %v1789_v7 = vmul.f32 %v3927_v12, %v4483_v29 }
 0x1b9   : > { %v1814_v41 = vmul.f32 %v3924_v11, %v4489_v15  ;;  %v1788_v42 = vmul.f32 %v3904_v6, %v4489_v15 }
 0x1bb   : > { %v4485_v43 = vpop.permute.xlu1 %1795 }
 0x1bc   : > { %v4493_v58 = vsel %vm293_vm0, %v1794_v20, %v4485_v43  ;;  %v1813_v47 = vmul.f32 %v3895_v3, %v4485_v43 }
 0x1bd   : > { %v1812_v59 = vmul.f32 %v3892_v2, %v4493_v58  ;;  %v1808_v24 = vmul.f32 %v3924_v11, %v4493_v58 }
 0x1be   : > { %v1817_v40 = vadd.f32 %v1815_v54, %v1813_v47 }
 0x1bf   : > { %v4503_v0 = vpop.permute.xlu1 %1773  ;;  %v1816_v14 = vadd.f32 %v1814_v41, %v1812_v59  ;;  %v294_v41 = vsel %vm293_vm0, %v4196_v61, %v4129_v1  ;;  %v1845_v1 = vmul.f32 %v4483_v29, %v4070_v45 }
 0x1c0   : > { %v4507_v20 = vsel %vm293_vm0, %v1772_v13, %v4503_v0  ;;  %v1779_v23 = vmul.f32 %v3901_v5, %v4503_v0  ;;  %v1819_v34 = vmul.f32 %v3927_v12, %v4503_v0  ;;  %v1803_v13 = vmul.f32 %v3895_v3, %v4503_v0 }
 0x1c1   : > { %v1818_v17 = vmul.f32 %v3904_v6, %v4507_v20  ;;  %v1778_v47 = vmul.f32 %v3924_v11, %v4507_v20 }
 0x1c2   : > { %v1821_v25 = vadd.f32 %v1819_v34, %v1817_v40  ;;  %v4523_v39 = vsub.f32 %v1779_v23, %v1789_v7  ;;  %v1801_v34 = vmul.f32 %v3927_v12, %v4485_v43  ;;  %v1802_v23 = vmul.f32 %v3892_v2, %v4507_v20 }
 0x1c3   : > { %v1820_v54 = vadd.f32 %v1818_v17, %v1816_v14  ;;  %v1835_v14 = vmul.f32 %v4485_v43, %v4070_v45 }
 0x1c4   : > { %v4521_v62 = vmul.f32 2.0, %v1821_v25  ;;  %v1790_v25 = vsub.f32 %v1778_v47, %v1788_v42  ;;  %v1841_v12 = vmul.f32 %v4523_v39, %v3996_v36  ;;  %v4544_v40 = vsub.f32 %v1801_v34, %v1803_v13 }
 0x1c5   : > { %v1822_v59 = vmul.f32 2.0, %v1820_v54  ;;  %v4549_v42 = vsel %vm293_vm0, %v4392_v8, %v4395_v16  ;;  %v1834_v47 = vmul.f32 %v4493_v58, %v4065_v51  ;;  %v1844_v13 = vmul.f32 %v4489_v15, %v4065_v51 }
 0x1c6   : > { %8116 = vst [vmem:[#allocation85_spill] sm:$0xff] %v4521_v62  ;;  %v1837_v17 = vmul.f32 %v3895_v3, %v4521_v62  ;;  %v1847_v7 = vmul.f32 %v3901_v5, %v4521_v62  ;;  %v1800_v62 = vmul.f32 %v3904_v6, %v4493_v58  ;;  %v1840_v8 = vmul.f32 %v1790_v25, %v4000_v37 }
 0x1c7   : > { %v1836_v54 = vmul.f32 %v3892_v2, %v1822_v59  ;;  %v1846_v34 = vmul.f32 %v3924_v11, %v1822_v59 }
 0x1c8   : > { %v1839_v61 = vadd.f32 %v1837_v17, %v1835_v14  ;;  %v1849_v14 = vadd.f32 %v1847_v7, %v1845_v1  ;;  %v1804_v16 = vsub.f32 %v1800_v62, %v1802_v23  ;;  %v4572_v7 = vsel %vm293_vm0, %v4398_v38, %v4400_v63  ;;  %v1866_v1 = vpop.permute.xlu0 %1865 }
 0x1c9   : > { %v1838_v17 = vadd.f32 %v1836_v54, %v1834_v47  ;;  %v1851_v62 = vmul.f32 %v4544_v40, %v3996_v36  ;;  %v1806_v23 = vmul.f32 %v3892_v2, %v4489_v15  ;;  %v1848_v50 = vadd.f32 %v1846_v34, %v1844_v13 }
 0x1ca   : > { %v4556_v45 = vadd.f32 %v1841_v12, %v1839_v61  ;;  %v1868_v61 = vpop.permute.xlu1 %1867  ;;  %v1856_v47 = vmul.f32 %v3904_v6, %v1822_v59  ;;  %v420_v38 = vmul.f32 %v3892_v2, %v4549_v42  ;;  %v4591_v54 = vsel %vm293_vm0, %v4414_v33, %v4412_v27 }
 0x1cb   : > { %v1869_v12 = vsel %vm293_vm0, %v1866_v1, %v1868_v61  ;;  %v4581_v18 = vadd.f32 %v1840_v8, %v1838_v17  ;;  %v4586_v63 = vadd.f32 %v1851_v62, %v1849_v14  ;;  %v1850_v1 = vmul.f32 %v1804_v16, %v4000_v37 }
 0x1cc   : > { %8117 = vst [vmem:[#allocation86_spill] sm:$0xff] %v4556_v45  ;;  %1898 = vrot.lane.b32.xlu0 %v4556_v45, %s3695_s17  ;;  %v1810_v17 = vsub.f32 %v1806_v23, %v1808_v24  ;;  %v1854_v13 = vmul.f32 %v4507_v20, %v4065_v51  ;;  %v4599_v59 = vmul.f32 %v294_v41, %v3898_v4  ;;  %v4800_v45 = vld [vmem:[%s3881_s24 + $0x38] sm:$0xff] }
 0x1cd   : > { %8118 = vst [vmem:[#allocation87_spill] sm:$0xff] %v4581_v18  ;;  %8119 = vst [vmem:[#allocation88_spill] sm:$0xff] %v4586_v63  ;;  %1896 = vrot.lane.b32.xlu1 %v4581_v18, %s3695_s17  ;;  %v411_v14 = vmul.f32 %v4567_v46, %v3898_v4  ;;  %v430_v34 = vmul.f32 %v3924_v11, %v4572_v7  ;;  %v4606_v33 = vmul.f32 %v1869_v12, %v4000_v37 }
 0x1ce   : > { %v4613_v24 = vsel %vm293_vm0, %v4406_v26, %v4408_v53  ;;  %v4618_v27 = vsel %vm293_vm0, %v4419_v22, %v4417_v35  ;;  %v4620_v41 = vadd.f32 %v1850_v1, %v1848_v50  ;;  %v1858_v8 = vadd.f32 %v1856_v47, %v1854_v13 }
 0x1cf   : > { %v360_v62 = vmul.f32 %v3892_v2, %v4591_v54  ;;  %v1876_v23 = vadd.f32 %v1790_v25, %v1790_v25  ;;  %v421_v12 = vsub.f32 %v411_v14, %v420_v38  ;;  %v1860_v26 = vmul.f32 %v1810_v17, %v4000_v37 }
 0x1d0   : > { %1911 = vrot.lane.b32.xlu0 %v4586_v63, %s3695_s17  ;;  %8120 = vst [vmem:[#allocation89_spill] sm:$0xff] %v4620_v41  ;;  %v4627_v63 = vsel %vm293_vm0, %v4425_v48, %v4423_v60  ;;  %v440_v22 = vmul.f32 %v3904_v6, %v4613_v24  ;;  %v351_v53 = vmul.f32 %v4599_v59, %v3898_v4 }
 0x1d1   : > { %1909 = vrot.lane.b32.xlu1 %v4620_v41, %s3695_s17  ;;  %v370_v35 = vmul.f32 %v3924_v11, %v4618_v27  ;;  %v1874_v48 = vmul.f32 %v4493_v58, %v4000_v37  ;;  %v480_v60 = vmul.f32 %v4102_v32, %v3996_v36  ;;  %v431_v25 = vsub.f32 %v421_v12, %v430_v34 }
 0x1d2   : > { %v4644_v50 = vadd.f32 %v1860_v26, %v1858_v8  ;;  %v361_v47 = vsub.f32 %v351_v53, %v360_v62  ;;  %v380_v38 = vmul.f32 %v3904_v6, %v4627_v63  ;;  %v1882_v13 = vadd.f32 %v1804_v16, %v1804_v16 }
 0x1d3   : > { %v4648_v1 = vadd.f32 %v1876_v23, %v1874_v48  ;;  %v631_v14 = vmul.f32 %v4169_v44, %v3996_v36  ;;  %v4653_v41 = vmul.f32 %v1868_v61, %v3996_v36  ;;  %v4657_v58 = vsub.f32 %v431_v25, %v440_v22 }
 0x1d4   : > { %1977 = vrot.lane.b32.xlu0 %v4606_v33, %s3695_s17  ;;  %8121 = vst [vmem:[#allocation90_spill] sm:$0xff] %v4644_v50  ;;  %v371_v34 = vsub.f32 %v361_v47, %v370_v35  ;;  %v1880_v6 = vmul.f32 %v4489_v15, %v4000_v37  ;;  %v482_v16 = vadd.f32 %v480_v60, %v3956_v21 }
 0x1d5   : > { %8122 = vst [vmem:[#allocation91_spill] sm:$0xff] %v4648_v1  ;;  %1922 = vrot.lane.b32.xlu1 %v4644_v50, %s3695_s17  ;;  %v1809_v8 = vmul.f32 %v3901_v5, %v4485_v43  ;;  %v1877_v61 = vadd.f32 %v4523_v39, %v4523_v39  ;;  %v1886_v12 = vmul.f32 %v4507_v20, %v4000_v37 }
 0x1d6   : > { %v4668_v62 = vsub.f32 %v371_v34, %v380_v38  ;;  %v4670_v23 = vadd.f32 %v1882_v13, %v1880_v6  ;;  %v1888_v26 = vadd.f32 %v1810_v17, %v1810_v17  ;;  %v633_v22 = vadd.f32 %v631_v14, %v3956_v21 }
 0x1d7   : > { %v1807_v15 = vmul.f32 %v3895_v3, %v4483_v29  ;;  %v1875_v5 = vmul.f32 %v4485_v43, %v3996_v36  ;;  %v4685_v39 = vsub.f32 %v3919_v9, %v3985_v31  ;;  %v518_v20 = vmul.f32 %v4102_v32, %v4657_v58 }
 0x1d8   : > { %1988 = vrot.lane.b32.xlu0 %v4648_v1, %s3695_s17  ;;  %8123 = vst [vmem:[#allocation92_spill] sm:$0xff] %v4670_v23  ;;  %v4690_v17 = vadd.f32 %v482_v16, %v4143_v10  ;;  %v1883_v53 = vadd.f32 %v4544_v40, %v4544_v40  ;;  %v4698_v43 = vadd.f32 %v1888_v26, %v1886_v12 }
 0x1d9   : > { %1979 = vrot.lane.b32.xlu1 %v4653_v41, %s3695_s17  ;;  %8124 = vst [vmem:[#allocation93_spill] sm:$0xff] %v4685_v39  ;;  %v4692_v3 = vadd.f32 %v1877_v61, %v1875_v5  ;;  %v4696_v35 = vsub.f32 %v1807_v15, %v1809_v8  ;;  %v519_v48 = vadd.f32 %v518_v20, %v4668_v62 }
 0x1da   : > { %8126 = vst [vmem:[#allocation95_spill] sm:$0xff] %v4698_v43  ;;  %v4702_v9 = vadd.f32 %v633_v22, %v4239_v30  ;;  %v1881_v60 = vmul.f32 %v4483_v29, %v3996_v36  ;;  %v516_v25 = vmul.f32 %v4143_v10, %v3898_v4  ;;  %v520_v40 = vmul.f32 %v4143_v10, %v4685_v39  ;;  %v4752_v22 = vld [vmem:[%s3881_s24 + $0x10] sm:$0xff] }
 0x1db   : > { %8125 = vst [vmem:[#allocation94_spill] sm:$0xff] %v4692_v3  ;;  %v669_v47 = vmul.f32 %v4169_v44, %v4657_v58  ;;  %3460 = vrcp.f32 %v4690_v17  ;;  %v1887_v13 = vmul.f32 %v4503_v0, %v3996_v36  ;;  %v1889_v29 = vadd.f32 %v4696_v35, %v4696_v35  ;;  %8128 = vst [vmem:[#allocation97_spill] sm:$0xff] %v4752_v22 }
 0x1dc   : > { %2001 = vrot.lane.b32.xlu0 %v4670_v23, %s3695_s17  ;;  %v4717_v38 = vadd.f32 %v1883_v53, %v1881_v60  ;;  %v383_v14 = vmul.f32 %v3892_v2, %v4599_v59  ;;  %v513_v34 = vsel %vm293_vm0, %v4427_v56, %v4431_v52  ;;  %v521_v6 = vadd.f32 %v520_v40, %v519_v48  ;;  %v8132_v23 = vld [vmem:[#allocation67_spill] sm:$0xff] }
 0x1dd   : > { %1990 = vrot.lane.b32.xlu1 %v4692_v3, %s3695_s17  ;;  %v670_v16 = vadd.f32 %v669_v47, %v4668_v62  ;;  %3462 = vrcp.f32 %v4702_v9  ;;  %v4732_v8 = vmul.f32 %v4198_v55, %v3996_v36  ;;  %v442_v61 = vmul.f32 %v4549_v42, %v3898_v4 }
 0x1de   : > { %8127 = vst [vmem:[#allocation96_spill] sm:$0xff] %v4717_v38  ;;  %v4738_v12 = vmul.f32 %v3924_v11, %v4599_v59  ;;  %v667_v2 = vmul.f32 %v4239_v30, %v3898_v4  ;;  %v671_v52 = vmul.f32 %v4239_v30, %v4685_v39  ;;  %v820_v56 = vmul.f32 %v4198_v55, %v4657_v58 }
 0x1df   : > { %v822_v26 = vmul.f32 %v4305_v57, %v4685_v39  ;;  %v443_v15 = vmul.f32 %v4752_v22, %v4567_v46  ;;  %v515_v5 = vadd.f32 %v513_v34, %v4599_v59  ;;  %v4757_v4 = vadd.f32 %v1889_v29, %v1887_v13  ;;  %v4775_v34 = vld [vmem:[%s3881_s24] sm:$0xff] }
 0x1e0   : > { %2014 = vrot.lane.b32.xlu0 %v4698_v43, %s3695_s17  ;;  %v973_v20 = vmul.f32 %v4331_v49, %v4685_v39  ;;  %v452_v53 = vmul.f32 %v3924_v11, %v4567_v46  ;;  %v664_v48 = vsel %vm293_vm0, %v4435_v28, %v4439_v19  ;;  %v672_v60 = vadd.f32 %v671_v52, %v670_v16 }
 0x1e1   : > { %2003 = vrot.lane.b32.xlu1 %v4717_v38, %s3695_s17  ;;  %v821_v40 = vadd.f32 %v820_v56, %v4668_v62  ;;  %v444_v47 = vadd.f32 %v443_v15, %v442_v61  ;;  %v450_v29 = vmul.f32 %v4752_v22, %v4613_v24  ;;  %8130 = vst [vmem:[#allocation99_spill] sm:$0xff] %v4775_v34  ;;  %v8131_v61 = vld [vmem:[#allocation42_spill] sm:$0xff]  ;;  %v8133_v38 = vld [vmem:[#allocation65_spill] sm:$0xff] }
 0x1e2   : > { %v382_v11 = vmul.f32 %v4775_v34, %v4591_v54  ;;  %v449_v19 = vmul.f32 %v4775_v34, %v4572_v7  ;;  %v457_v28 = vmul.f32 %v4752_v22, %v4572_v7  ;;  %v456_v16 = vmul.f32 %v4775_v34, %v4613_v24 }
 0x1e3   : > { %v971_v52 = vmul.f32 %v8131_v61, %v4657_v58  ;;  %v390_v15 = vmul.f32 %v4752_v22, %v4627_v63  ;;  %v517_v50 = vadd.f32 %v516_v25, %v515_v5  ;;  %v666_v43 = vadd.f32 %v664_v48, %v4599_v59  ;;  %v8134_v58 = vld [vmem:[#allocation85_spill] sm:$0xff] }
 0x1e4   : > { %523 = vrot.lane.b32.xlu0 %v521_v6, %s3695_s17  ;;  %v4768_v6 = vld [vmem:[%s3881_s24 + $0x20] sm:$0xff]  ;;  %v815_v18 = vsel %vm293_vm0, %v8133_v38, %v8132_v23  ;;  %v1857_v1 = vmul.f32 %v4800_v45, %v8134_v58  ;;  %v451_v31 = vsub.f32 %v449_v19, %v450_v29  ;;  %v384_v39 = vadd.f32 %v383_v14, %v382_v11  ;;  %v4810_v5 = vld [vmem:[%s3881_s24 + $0x30] sm:$0xff] }
 0x1e5   : > { %8129 = vst [vmem:[#allocation98_spill] sm:$0xff] %v4768_v6  ;;  %v445_v13 = vmul.f32 %v4768_v6, %v4613_v24  ;;  %2016 = vrot.lane.b32.xlu1 %v4757_v4, %s3695_s17  ;;  %v385_v56 = vmul.f32 %v4768_v6, %v4627_v63  ;;  %v823_v24 = vadd.f32 %v822_v26, %v821_v40  ;;  %v4804_v3 = vpop.eup %3460  ;;  %8135 = vst [vmem:[#allocation42_spill] sm:$0xff] %v4810_v5  ;;  %v8136_v26 = vld [vmem:[#allocation21_spill] sm:$0xff] }
 0x1e6   : > { %v389_v25 = vmul.f32 %v4775_v34, %v4618_v27  ;;  %v458_v23 = vadd.f32 %v457_v28, %v456_v16  ;;  %v396_v38 = vmul.f32 %v4775_v34, %v4627_v63  ;;  %v1855_v48 = vmul.f32 %v4503_v0, %v8136_v26  ;;  %v8138_v11 = vld [vmem:[#allocation69_spill] sm:$0xff] }
 0x1e7   : > { %v446_v51 = vadd.f32 %v445_v13, %v444_v47  ;;  %v4819_v14 = vpop.eup %3462  ;;  %v386_v40 = vadd.f32 %v385_v56, %v384_v39  ;;  %v668_v13 = vadd.f32 %v667_v2, %v666_v43  ;;  %v397_v29 = vmul.f32 %v4752_v22, %v4618_v27 }
 0x1e8   : > { %674 = vrot.lane.b32.xlu0 %v672_v60, %s3695_s17  ;;  %v972_v60 = vadd.f32 %v971_v52, %v4668_v62  ;;  %v447_v62 = vmul.f32 %v4810_v5, %v4572_v7  ;;  %v391_v47 = vsub.f32 %v389_v25, %v390_v15  ;;  %v8137_v7 = vld [vmem:[#allocation71_spill] sm:$0xff]  ;;  %v1859_v28 = vadd.f32 %v1857_v1, %v1855_v48 }
 0x1e9   : > { %531 = vrot.lane.b32.xlu1 %v517_v50, %s3695_s17  ;;  %v817_v50 = vadd.f32 %v815_v18, %v4599_v59  ;;  %v966_v19 = vsel %vm293_vm0, %v8138_v11, %v8137_v7  ;;  %v453_v0 = vadd.f32 %v452_v53, %v451_v31  ;;  %v387_v52 = vmul.f32 %v4810_v5, %v4618_v27  ;;  %v3513_v7 = vld [vmem:[#allocation5 + $0x10] sm:$0xff] }
 0x1ea   : > { %v974_v63 = vadd.f32 %v973_v20, %v972_v60  ;;  %v4827_v16 = vsub.f32 %v446_v51, %v447_v62  ;;  %v818_v39 = vmul.f32 %v4775_v34, %v4305_v57  ;;  %v454_v18 = vmul.f32 %v4810_v5, %v4549_v42 }
 0x1eb   : > { %v459_v43 = vmul.f32 %v4768_v6, %v4549_v42  ;;  %v398_v2 = vadd.f32 %v397_v29, %v396_v38  ;;  %v1861_v31 = vmul.f32 %v4696_v35, %v3996_v36  ;;  %v4841_v51 = vsub.f32 %v386_v40, %v387_v52 }
 0x1ec   : > { %825 = vrot.lane.b32.xlu0 %v823_v24, %s3695_s17  ;;  %v393_v27 = vadd.f32 %v4738_v12, %v391_v47  ;;  %v819_v1 = vadd.f32 %v818_v39, %v817_v50  ;;  %v968_v20 = vadd.f32 %v966_v19, %v4599_v59  ;;  %v969_v56 = vmul.f32 %v4775_v34, %v4331_v49  ;;  %v4891_v19 = vpop.permute.xlu0 %2068 }
 0x1ed   : > { %682 = vrot.lane.b32.xlu1 %v668_v13, %s3695_s17  ;;  %v460_v53 = vsub.f32 %v458_v23, %v459_v43  ;;  %v4847_v15 = vadd.f32 %v1861_v31, %v1859_v28  ;;  %v4851_v42 = vmul.f32 %v4752_v22, %v4000_v37  ;;  %v4853_v24 = vadd.f32 %v454_v18, %v453_v0  ;;  %v8142_v0 = vld [vmem:[#allocation16_spill] sm:$0xff]  ;;  %v4898_v18 = vpop.permute.xlu1 %2490 }
 0x1ee   : > { %v394_v35 = vmul.f32 %v4810_v5, %v4591_v54  ;;  %v399_v12 = vmul.f32 %v4768_v6, %v4591_v54  ;;  %v549_v60 = vmul.f32 %v4102_v32, %v4827_v16  ;;  %v784_v58 = vadd.f32 %v4732_v8, %v3956_v21  ;;  %8141 = vst [vmem:[#allocation85_spill] sm:$0xff] %v4891_v19 }
 0x1ef   : > { %8139 = vst [vmem:[#allocation67_spill] sm:$0xff] %v4851_v42  ;;  %v461_v25 = vmul.f32 %v4810_v5, %v4567_v46  ;;  %v970_v38 = vadd.f32 %v969_v56, %v968_v20  ;;  %v932_v40 = vmul.f32 %v8131_v61, %v4000_v37  ;;  %v551_v8 = vmul.f32 %v4143_v10, %v4851_v42 }
 0x1f0   : > { %976 = vrot.lane.b32.xlu0 %v974_v63, %s3695_s17  ;;  %v4868_v62 = vadd.f32 %v394_v35, %v393_v27  ;;  %v400_v23 = vsub.f32 %v398_v2, %v399_v12  ;;  %v550_v54 = vadd.f32 %v549_v60, %v4841_v51  ;;  %v786_v48 = vadd.f32 %v784_v58, %v4305_v57 }
 0x1f1   : > { %833 = vrot.lane.b32.xlu1 %v819_v1, %s3695_s17  ;;  %v4878_v46 = vmul.f32 %v4768_v6, %v4000_v37  ;;  %v933_v47 = vmul.f32 %v8131_v61, %v3996_v36  ;;  %v4882_v13 = vadd.f32 %v461_v25, %v460_v53  ;;  %v401_v50 = vmul.f32 %v4810_v5, %v4599_v59 }
 0x1f2   : > { %v576_v29 = vmul.f32 %v4102_v32, %v4853_v24  ;;  %v552_v63 = vadd.f32 %v551_v8, %v550_v54  ;;  %3464 = vrcp.f32 %v786_v48  ;;  %v934_v52 = vadd.f32 %v932_v40, %v8142_v0  ;;  %8143 = vst [vmem:[#allocation21_spill] sm:$0xff] %v4898_v18  ;;  %v8146_v54 = vld [vmem:[#allocation11_spill] sm:$0xff]  ;;  %v8147_v40 = vld [vmem:[#allocation13_spill] sm:$0xff] }
 0x1f3   : > { %8140 = vst [vmem:[#allocation65_spill] sm:$0xff] %v4878_v46  ;;  %v4889_v11 = vadd.f32 %v401_v50, %v400_v23  ;;  %v2101_v59 = vmul.f32 %v4891_v19, %v4606_v33  ;;  %v935_v39 = vadd.f32 %v933_v47, %v3956_v21  ;;  %v578_v43 = vmul.f32 %v4143_v10, %v4878_v46  ;;  %v4932_v23 = vpop.permute.xlu1 %2279 }
 0x1f4   : > { %1924 = vrot.lane.b32.xlu0 %v4847_v15, %s3695_s17  ;;  %v577_v28 = vadd.f32 %v576_v29, %v4868_v62  ;;  %v4905_v2 = vmul.f32 %v4810_v5, %v4000_v37  ;;  %v603_v31 = vmul.f32 %v4102_v32, %v4882_v13  ;;  %v488_v27 = vmul.f32 %v4804_v3, %v4690_v17 }
 0x1f5   : > { %984 = vrot.lane.b32.xlu1 %v970_v38, %s3695_s17  ;;  %v4912_v1 = vadd.f32 %v934_v52, %v4331_v49  ;;  %v4916_v20 = vadd.f32 %v935_v39, %v4331_v49  ;;  %v7796_v35 = vmov 2   ;;  %v639_v12 = vmul.f32 %v4819_v14, %v4702_v9  ;;  %8145 = vst [vmem:[#allocation69_spill] sm:$0xff] %v4932_v23  ;;  %v4946_v52 = vpop.permute.xlu0 %2701 }
 0x1f6   : > { %8144 = vst [vmem:[#allocation71_spill] sm:$0xff] %v4905_v2  ;;  %v579_v53 = vadd.f32 %v578_v43, %v577_v28  ;;  %v604_v56 = vadd.f32 %v603_v31, %v4889_v11  ;;  %v2523_v17 = vmul.f32 %v4898_v18, %v4606_v33  ;;  %v605_v60 = vmul.f32 %v4143_v10, %v4905_v2  ;;  %v8149_v43 = vld [vmem:[#allocation14_spill] sm:$0xff] }
 0x1f7   : > { %v700_v58 = vmul.f32 %v4169_v44, %v4827_v16  ;;  %v490_v25 = vsub.f32 2.0, %v488_v27  ;;  %3466 = vrcp.f32 %v4912_v1  ;;  %v1084_v8 = vadd.f32 %v8147_v40, %v8146_v54  ;;  %8148 = vst [vmem:[#allocation11_spill] sm:$0xff] %v4946_v52  ;;  %v8155_v40 = vld [vmem:[#allocation45_spill] sm:$0xff] }
 0x1f8   : > { %2494 = vperm.xlu0 %3454, %v3513_v7   ;;  %3468 = vrcp.f32 %v4916_v20  ;;  %v606_v9 = vadd.f32 %v605_v60, %v604_v56  ;;  %v641_v47 = vsub.f32 2.0, %v639_v12  ;;  %v2312_v50 = vmul.f32 %v4932_v23, %v4606_v33  ;;  %v8150_v60 = vld [vmem:[#allocation31_spill] sm:$0xff] }
 0x1f9   : > { %554 = vrot.lane.b32.xlu1 %v552_v63, %s3695_s17  ;;  %v701_v38 = vadd.f32 %v700_v58, %v4841_v51  ;;  %v702_v29 = vmul.f32 %v4239_v30, %v4851_v42  ;;  %v727_v7 = vmul.f32 %v4169_v44, %v4853_v24  ;;  %v492_v28 = vmul.f32 %v4804_v3, %v490_v25 }
 0x1fa   : > { %v4950_v31 = vadd.f32 %v1084_v8, %v8149_v43  ;;  %v643_v27 = vmul.f32 %v4819_v14, %v641_v47  ;;  %v729_v3 = vmul.f32 %v4239_v30, %v4878_v46  ;;  %v754_v12 = vmul.f32 %v4169_v44, %v4882_v13  ;;  %v8152_v14 = vld [vmem:[#allocation56_spill] sm:$0xff]  ;;  %v8157_v47 = vld [vmem:[#allocation57_spill] sm:$0xff] }
 0x1fb   : > { %v728_v39 = vadd.f32 %v727_v7, %v4868_v62  ;;  %v4963_v58 = vmul.f32 %v8150_v60, %v492_v28  ;;  %v4966_v25 = vmul.f32 %v8152_v14, %v492_v28  ;;  %v2659_v28 = vmul.f32 %v4898_v18, %v4757_v4 }
 0x1fc   : > { %2105 = vrot.lane.b32.xlu0 %v2101_v59, %s3695_s17  ;;  %v3465_v63 = vpop.eup %3464  ;;  %v703_v59 = vadd.f32 %v702_v29, %v701_v38  ;;  %v4975_v8 = vmul.f32 %v8155_v40, %v643_v27  ;;  %v4981_v29 = vld [vmem:[%s3881_s24 + $0x28] sm:$0xff]  ;;  %v756_v43 = vmul.f32 %v4239_v30, %v4905_v2  ;;  %v5017_v30 = vmul.f32 %v4331_v49, %v4851_v42 }
 0x1fd   : > { %3455 = vset.pattern.permute.xlu0 %v7796_v35  ;;  %581 = vrot.lane.b32.xlu1 %v579_v53, %s3695_s17  ;;  %v2734_v53 = vmul.f32 %v4946_v52, %v4606_v33  ;;  %v790_v56 = vmul.f32 %v3465_v63, %v786_v48  ;;  %8151 = vst [vmem:[#allocation13_spill] sm:$0xff] %v4963_v58  ;;  %8153 = vst [vmem:[#allocation14_spill] sm:$0xff] %v4966_v25 }
 0x1fe   : > { %v730_v33 = vadd.f32 %v729_v3, %v728_v39  ;;  %v755_v48 = vadd.f32 %v754_v12, %v4889_v11  ;;  %8156 = vst [vmem:[#allocation101_spill] sm:$0xff] %v4975_v8  ;;  %8159 = vst [vmem:[#allocation103_spill] sm:$0xff] %v4981_v29  ;;  %v1073_v7 = vmul.f32 %v4981_v29, %v4800_v45 }
 0x1ff   : > { %v792_v39 = vsub.f32 2.0, %v790_v56  ;;  %v880_v3 = vmul.f32 %v4305_v57, %v4878_v46  ;;  %v907_v12 = vmul.f32 %v4305_v57, %v4905_v2  ;;  %v5002_v56 = vld [vmem:[%s3881_s24 + $0x18] sm:$0xff]  ;;  %v5007_v35 = vadd.f32 %v2659_v28, %v4847_v15 }
 0x200   : > { %2527 = vrot.lane.b32.xlu0 %v2523_v17, %s3695_s17  ;;  %v2237_v17 = vmul.f32 %v4891_v19, %v4757_v4  ;;  %v1091_v14 = vmul.f32 %v5002_v56, %v8136_v26  ;;  %v1075_v44 = vsub.f32 %v1073_v7, %v1073_v7  ;;  %v1101_v28 = vmul.f32 %v4981_v29, %v8136_v26 }
 0x201   : > { %608 = vrot.lane.b32.xlu1 %v606_v9, %s3695_s17  ;;  %v1087_v9 = vmul.f32 2.0, %v4950_v31  ;;  %v3467_v54 = vpop.eup %3466  ;;  %8161 = vst [vmem:[#allocation105_spill] sm:$0xff] %v5007_v35  ;;  %v1081_v35 = vmul.f32 %v5002_v56, %v4981_v29  ;;  %v7806_v7 = vmov 5  }
 0x202   : > { %v4972_v38 = vadd.f32 %v2237_v17, %v4847_v15  ;;  %v4998_v17 = vld [vmem:[#allocation5] sm:$0xff]  ;;  %v940_v60 = vmul.f32 %v3467_v54, %v4912_v1  ;;  %v5027_v1 = vmul.f32 %v4331_v49, %v4878_v46  ;;  %v1097_v0 = vmul.f32 %v1075_v44, %v3996_v36 }
 0x203   : > { %8160 = vst [vmem:[#allocation104_spill] sm:$0xff] %v4998_v17  ;;  %v1093_v40 = vmul.f32 %v5002_v56, %v1087_v9 }
 0x204   : > { %2316 = vrot.lane.b32.xlu0 %v2312_v50, %s3695_s17  ;;  %8154 = vst [vmem:[#allocation100_spill] sm:$0xff] %v4972_v38  ;;  %v4978_v50 = vmul.f32 %v8157_v47, %v643_v27  ;;  %v853_v27 = vmul.f32 %v4305_v57, %v4851_v42  ;;  %v757_v38 = vadd.f32 %v756_v43, %v755_v48  ;;  %v942_v32 = vsub.f32 2.0, %v940_v60 }
 0x205   : > { %705 = vrot.lane.b32.xlu1 %v703_v59, %s3695_s17  ;;  %v3469_v59 = vpop.eup %3468  ;;  %v878_v48 = vmul.f32 %v4198_v55, %v4853_v24  ;;  %v1103_v43 = vmul.f32 %v4981_v29, %v1087_v9  ;;  %v1095_v10 = vadd.f32 %v1093_v40, %v1091_v14  ;;  %v8163_v40 = vld [vmem:[#allocation55_spill] sm:$0xff] }
 0x206   : > { %8158 = vst [vmem:[#allocation102_spill] sm:$0xff] %v4978_v50  ;;  %v941_v57 = vmul.f32 %v3469_v59, %v4916_v20  ;;  %v944_v37 = vmul.f32 %v3467_v54, %v942_v32  ;;  %v5082_v32 = vmul.f32 %v4981_v29, %v3996_v36 }
 0x207   : > { %v879_v42 = vadd.f32 %v878_v48, %v4868_v62  ;;  %v5050_v48 = vld [vmem:[%s3881_s24 + $0x8] sm:$0xff] }
 0x208   : > { %2738 = vrot.lane.b32.xlu0 %v2734_v53, %s3695_s17  ;;  %v851_v53 = vmul.f32 %v4198_v55, %v4827_v16  ;;  %v943_v46 = vsub.f32 2.0, %v941_v57  ;;  %8165 = vst [vmem:[#allocation108_spill] sm:$0xff] %v5050_v48  ;;  %v1113_v57 = vmul.f32 %v4800_v45, %v1087_v9  ;;  %8173 = vst [vmem:[#allocation115_spill] sm:$0xff] %v5082_v32 }
 0x209   : > { %732 = vrot.lane.b32.xlu1 %v730_v33, %s3695_s17  ;;  %v1077_v33 = vmul.f32 %v5002_v56, %v4800_v45 }
 0x20a   : > { %v852_v47 = vadd.f32 %v851_v53, %v4841_v51  ;;  %v794_v53 = vmul.f32 %v3465_v63, %v792_v39  ;;  %v5036_v63 = vmul.f32 %v4331_v49, %v4905_v2  ;;  %v5040_v39 = vmul.f32 %v5002_v56, %v3996_v36 }
 0x20b   : > { %v1079_v20 = vsub.f32 %v1077_v33, %v1077_v33  ;;  %v1124_v33 = vadd.f32 %v1075_v44, %v1075_v44  ;;  %v5054_v49 = vmul.f32 %v5050_v48, %v3956_v21  ;;  %v1111_v44 = vmul.f32 %v4800_v45, %v8136_v26 }
 0x20c   : > { %2090 = vperm.xlu0 %3455, %v4998_v17   ;;  %8162 = vst [vmem:[#allocation106_spill] sm:$0xff] %v5040_v39  ;;  %v5047_v60 = vmul.f32 %v8163_v40, %v794_v53  ;;  %v5067_v2 = vmul.f32 %v5050_v48, %v3996_v36  ;;  %v5072_v26 = vmul.f32 %v3469_v59, %v943_v46 }
 0x20d   : > { %759 = vrot.lane.b32.xlu1 %v757_v38, %s3695_s17  ;;  %v854_v38 = vadd.f32 %v853_v27, %v852_v47  ;;  %v905_v47 = vmul.f32 %v4198_v55, %v4882_v13  ;;  %v1105_v27 = vadd.f32 %v1103_v43, %v1101_v28  ;;  %v1107_v14 = vmul.f32 %v1079_v20, %v3996_v36  ;;  %v8168_v55 = vld [vmem:[#allocation58_spill] sm:$0xff] }
 0x20e   : > { %8164 = vst [vmem:[#allocation107_spill] sm:$0xff] %v5047_v60  ;;  %8166 = vst [vmem:[#allocation109_spill] sm:$0xff] %v5054_v49  ;;  %v1083_v28 = vsub.f32 %v1081_v35, %v1081_v35  ;;  %v5060_v43 = vadd.f32 %v1097_v0, %v1095_v10  ;;  %v5063_v40 = vmul.f32 %v8168_v55, %v794_v53 }
 0x20f   : > { %8170 = vst [vmem:[#allocation112_spill] sm:$0xff] %v5067_v2  ;;  %v5070_v60 = vadd.f32 %v1124_v33, %v5040_v39  ;;  %v5077_v10 = vadd.f32 %v1107_v14, %v1105_v27  ;;  %v1115_v35 = vadd.f32 %v1113_v57, %v1111_v44  ;;  %v1129_v9 = vadd.f32 %v1079_v20, %v1079_v20 }
 0x210   : > { %3458 = vset.pattern.permute.xlu0 %v7806_v7  ;;  %v906_v7 = vadd.f32 %v905_v47, %v4889_v11  ;;  %8167 = vst [vmem:[#allocation110_spill] sm:$0xff] %v5060_v43  ;;  %8169 = vst [vmem:[#allocation111_spill] sm:$0xff] %v5063_v40  ;;  %v1117_v0 = vmul.f32 %v1083_v28, %v3996_v36  ;;  %v1138_v54 = vmul.f32 %v5050_v48, %v5054_v49 }
 0x211   : > { %856 = vrot.lane.b32.xlu1 %v854_v38, %s3695_s17  ;;  %v881_v38 = vadd.f32 %v880_v3, %v879_v42  ;;  %8171 = vst [vmem:[#allocation113_spill] sm:$0xff] %v5070_v60  ;;  %v1002_v42 = vmul.f32 %v8131_v61, %v4827_v16  ;;  %8172 = vst [vmem:[#allocation114_spill] sm:$0xff] %v5077_v10  ;;  %v1140_v3 = vmul.f32 %v5002_v56, %v5060_v43 }
 0x212   : > { %v908_v46 = vadd.f32 %v907_v12, %v906_v7  ;;  %v2448_v16 = vmul.f32 %v4932_v23, %v4757_v4  ;;  %v5093_v53 = vmul.f32 %v4800_v45, %v3996_v36  ;;  %v1134_v33 = vadd.f32 %v1083_v28, %v1083_v28  ;;  %v8175_v12 = vld [vmem:[#allocation59_spill] sm:$0xff] }
 0x213   : > { %v1003_v59 = vadd.f32 %v1002_v42, %v4841_v51  ;;  %v1194_v20 = vmul.f32 %v5050_v48, %v5067_v2  ;;  %v1196_v47 = vmul.f32 %v5002_v56, %v5070_v60  ;;  %v5100_v7 = vmul.f32 %v8175_v12, %v944_v37  ;;  %v8177_v51 = vld [vmem:[#allocation60_spill] sm:$0xff] }
 0x214   : > { %8174 = vst [vmem:[#allocation116_spill] sm:$0xff] %v5093_v53  ;;  %v5103_v27 = vmul.f32 %v8177_v51, %v944_v37  ;;  %v1029_v14 = vmul.f32 %v8131_v61, %v4853_v24  ;;  %v5109_v44 = vadd.f32 %v2448_v16, %v4847_v15  ;;  %v5113_v57 = vmul.f32 %v8175_v12, %v5072_v26  ;;  %v8184_v12 = vld [vmem:[#allocation82_spill] sm:$0xff] }
 0x215   : > { %883 = vrot.lane.b32.xlu1 %v881_v38, %s3695_s17  ;;  %8176 = vst [vmem:[#allocation59_spill] sm:$0xff] %v5100_v7  ;;  %v5115_v38 = vadd.f32 %v1117_v0, %v1115_v35  ;;  %v5118_v28 = vadd.f32 %v1129_v9, %v5082_v32  ;;  %v1144_v37 = vmul.f32 %v4981_v29, %v5077_v10 }
 0x216   : > { %8178 = vst [vmem:[#allocation60_spill] sm:$0xff] %v5103_v27  ;;  %8179 = vst [vmem:[#allocation117_spill] sm:$0xff] %v5109_v44  ;;  %v1005_v42 = vadd.f32 %v5017_v30, %v1003_v59  ;;  %v1142_v24 = vsub.f32 %v1138_v54, %v1140_v3  ;;  %v2870_v16 = vmul.f32 %v4946_v52, %v4757_v4  ;;  %v8186_v59 = vld [vmem:[#allocation77_spill] sm:$0xff] }
 0x217   : > { %8180 = vst [vmem:[#allocation118_spill] sm:$0xff] %v5113_v57  ;;  %8181 = vst [vmem:[#allocation119_spill] sm:$0xff] %v5115_v38  ;;  %v5127_v44 = vadd.f32 %v1134_v33, %v5093_v53  ;;  %v5131_v0 = vmul.f32 %v4800_v45, %v5115_v38  ;;  %v1198_v35 = vsub.f32 %v1194_v20, %v1196_v47 }
 0x218   : > { %8182 = vst [vmem:[#allocation120_spill] sm:$0xff] %v5118_v28  ;;  %v1200_v9 = vmul.f32 %v4981_v29, %v5118_v28  ;;  %v1259_v30 = vmul.f32 %v8184_v12, %v3996_v36  ;;  %v1152_v4 = vmul.f32 %v5050_v48, %v5060_v43  ;;  %v5143_v54 = vadd.f32 %v2870_v16, %v4847_v15  ;;  %v5157_v16 = vpop.permute.xlu0 %1279 }
 0x219   : > { %910 = vrot.lane.b32.xlu1 %v908_v46, %s3695_s17  ;;  %v1030_v46 = vadd.f32 %v1029_v14, %v4868_v62  ;;  %8183 = vst [vmem:[#allocation121_spill] sm:$0xff] %v5127_v44  ;;  %v1056_v62 = vmul.f32 %v8131_v61, %v4882_v13  ;;  %v1389_v3 = vmul.f32 %v8186_v59, %v3996_v36  ;;  %v8187_v61 = vld [vmem:[#allocation83_spill] sm:$0xff]  ;;  %8188 = vst [vmem:[#allocation123_spill] sm:$0xff] %v5157_v16 }
 0x21a   : > { %8185 = vst [vmem:[#allocation122_spill] sm:$0xff] %v5143_v54  ;;  %v1154_v33 = vmul.f32 %v5002_v56, %v5054_v49  ;;  %v1208_v20 = vmul.f32 %v5050_v48, %v5070_v60  ;;  %v1210_v47 = vmul.f32 %v5002_v56, %v5067_v2  ;;  %v1519_v13 = vmul.f32 %v8187_v61, %v3996_v36 }
 0x21b   : > { %v1032_v14 = vadd.f32 %v5027_v1, %v1030_v46  ;;  %v1057_v15 = vadd.f32 %v1056_v62, %v4889_v11  ;;  %v1166_v54 = vmul.f32 %v5050_v48, %v5077_v10  ;;  %v1168_v55 = vmul.f32 %v5002_v56, %v5115_v38  ;;  %v5168_v1 = vpop.permute.xlu1 %1533 }
 0x21c   : > { %v1222_v27 = vmul.f32 %v5050_v48, %v5118_v28  ;;  %v1224_v8 = vmul.f32 %v5002_v56, %v5127_v44  ;;  %v1261_v58 = vadd.f32 %v1259_v30, %v3956_v21  ;;  %8189 = vst [vmem:[#allocation124_spill] sm:$0xff] %v5168_v1  ;;  %v1202_v11 = vsub.f32 %v1198_v35, %v1200_v9 }
 0x21d   : > { %1007 = vrot.lane.b32.xlu1 %v1005_v42, %s3695_s17  ;;  %v1146_v42 = vsub.f32 %v1142_v24, %v1144_v37  ;;  %v1204_v37 = vmul.f32 %v4800_v45, %v5127_v44  ;;  %v1158_v46 = vmul.f32 %v4981_v29, %v5115_v38  ;;  %v1391_v24 = vadd.f32 %v1389_v3, %v3956_v21 }
 0x21e   : > { %v1156_v62 = vadd.f32 %v1154_v33, %v1152_v4  ;;  %v1212_v5 = vadd.f32 %v1210_v47, %v1208_v20  ;;  %v1214_v6 = vmul.f32 %v4981_v29, %v5127_v44  ;;  %v1521_v30 = vadd.f32 %v1519_v13, %v3956_v21  ;;  %v8190_v33 = vld [vmem:[#allocation73_spill] sm:$0xff]  ;;  %v5203_v13 = vpop.permute.xlu0 %1539 }
 0x21f   : > { %v1059_v22 = vadd.f32 %v5036_v63, %v1057_v15  ;;  %v1180_v35 = vmul.f32 %v5050_v48, %v5115_v38  ;;  %v1182_v9 = vmul.f32 %v5002_v56, %v5077_v10  ;;  %v1172_v34 = vmul.f32 %v4981_v29, %v5054_v49  ;;  %v5192_v63 = vpop.permute.xlu1 %1641  ;;  %8193 = vst [vmem:[#allocation126_spill] sm:$0xff] %v5203_v13  ;;  %v8194_v38 = vld [vmem:[#allocation84_spill] sm:$0xff] }
 0x220   : > { %v1226_v3 = vsub.f32 %v1222_v27, %v1224_v8  ;;  %v1228_v4 = vmul.f32 %v4981_v29, %v5067_v2  ;;  %v5189_v20 = vadd.f32 %v1261_v58, %v8190_v33  ;;  %8191 = vst [vmem:[#allocation125_spill] sm:$0xff] %v5192_v63  ;;  %v1162_v47 = vmul.f32 %v4800_v45, %v5077_v10  ;;  %v8192_v8 = vld [vmem:[#allocation79_spill] sm:$0xff] }
 0x221   : > { %1034 = vrot.lane.b32.xlu1 %v1032_v14, %s3695_s17  ;;  %v1170_v14 = vsub.f32 %v1166_v54, %v1168_v55  ;;  %v1236_v55 = vmul.f32 %v5050_v48, %v5127_v44  ;;  %v1238_v54 = vmul.f32 %v5002_v56, %v5118_v28  ;;  %v5201_v27 = vadd.f32 %v1391_v24, %v8192_v8 }
 0x222   : > { %v1160_v58 = vadd.f32 %v1158_v46, %v1156_v62  ;;  %v1216_v15 = vadd.f32 %v1214_v6, %v1212_v5  ;;  %v5208_v16 = vadd.f32 %v1521_v30, %v8194_v38  ;;  %v1176_v10 = vmul.f32 %v4800_v45, %v5060_v43 }
 0x223   : > { %v1184_v44 = vadd.f32 %v1182_v9, %v1180_v35  ;;  %v1186_v48 = vmul.f32 %v4981_v29, %v5060_v43  ;;  %v1649_v24 = vmul.f32 %v5192_v63, %v3996_v36  ;;  %v1174_v1 = vadd.f32 %v1172_v34, %v1170_v14  ;;  %v8196_v35 = vld [vmem:[#allocation12_spill] sm:$0xff]  ;;  %v8210_v36 = vld [vmem:[#allocation38_spill] sm:$0xff] }
 0x224   : > { %v1230_v13 = vadd.f32 %v1228_v4, %v1226_v3  ;;  %v1232_v6 = vmul.f32 %v4800_v45, %v5070_v60  ;;  %v5220_v5 = vmul.f32 %v8177_v51, %v5072_v26  ;;  %3470 = vrcp.f32 %v5189_v20  ;;  %v5241_v3 = vpop.permute.xlu0 %1403  ;;  %v8222_v63 = vld [vmem:[#allocation78_spill] sm:$0xff] }
 0x225   : > { %1061 = vrot.lane.b32.xlu1 %v1059_v22, %s3695_s17  ;;  %v1218_v22 = vmul.f32 %v4800_v45, %v5118_v28  ;;  %v1240_v46 = vadd.f32 %v1238_v54, %v1236_v55  ;;  %v1242_v62 = vmul.f32 %v4981_v29, %v5070_v60  ;;  %3472 = vrcp.f32 %v5201_v27  ;;  %8198 = vst [vmem:[#allocation128_spill] sm:$0xff] %v5241_v3  ;;  %v8201_v54 = vld [vmem:[#allocation27_spill] sm:$0xff] }
 0x226   : > { %8195 = vst [vmem:[#allocation127_spill] sm:$0xff] %v5220_v5  ;;  %v5228_v34 = vsub.f32 %v1146_v42, %v5131_v0  ;;  %v5230_v30 = vsub.f32 %v1202_v11, %v1204_v37  ;;  %v5234_v9 = vsub.f32 %v8196_v35, %v4950_v31  ;;  %3474 = vrcp.f32 %v5208_v16  ;;  %v8199_v31 = vld [vmem:[#allocation23_spill] sm:$0xff]  ;;  %v8200_v37 = vld [vmem:[#allocation61_spill] sm:$0xff]  ;;  %v8213_v5 = vld [vmem:[#allocation70_spill] sm:$0xff] }
 0x227   : > { %v5237_v26 = vsub.f32 %v1160_v58, %v1162_v47  ;;  %v1188_v51 = vsub.f32 %v1184_v44, %v1186_v48  ;;  %v1190_v14 = vmul.f32 %v4800_v45, %v5054_v49  ;;  %v1651_v4 = vadd.f32 %v1649_v24, %v3956_v21  ;;  %v8202_v47 = vld [vmem:[#allocation62_spill] sm:$0xff]  ;;  %v5254_v48 = vpop.permute.xlu1 %1645  ;;  %v3518_v44 = vld [vmem:[#allocation5 + $0x8] sm:$0xff]  ;;  %v8216_v28 = vld [vmem:[#allocation47_spill] sm:$0xff] }
 0x228   : > { %8197 = vst [vmem:[#allocation12_spill] sm:$0xff] %v5234_v9  ;;  %v5244_v0 = vsub.f32 %v1216_v15, %v1218_v22  ;;  %v5246_v42 = vadd.f32 %v1176_v10, %v1174_v1  ;;  %v5248_v11 = vadd.f32 %v1232_v6, %v1230_v13  ;;  %v548_v55 = vadd.f32 %v8200_v37, %v8199_v31  ;;  %v8204_v15 = vld [vmem:[#allocation29_spill] sm:$0xff]  ;;  %v8205_v22 = vld [vmem:[#allocation63_spill] sm:$0xff]  ;;  %v8206_v1 = vld [vmem:[#allocation32_spill] sm:$0xff] }
 0x229   : > { %2072 = vperm.xlu1 %3453, %v4998_v17   ;;  %v575_v58 = vadd.f32 %v8202_v47, %v8201_v54  ;;  %8203 = vst [vmem:[#allocation23_spill] sm:$0xff] %v5254_v48  ;;  %v1244_v35 = vsub.f32 %v1240_v46, %v1242_v62  ;;  %v1246_v24 = vmul.f32 %v4800_v45, %v5067_v2  ;;  %v8207_v13 = vld [vmem:[#allocation64_spill] sm:$0xff]  ;;  %v8209_v21 = vld [vmem:[#allocation66_spill] sm:$0xff]  ;;  %v8212_v47 = vld [vmem:[#allocation39_spill] sm:$0xff] }
 0x22a   : > { %v602_v10 = vadd.f32 %v8205_v22, %v8204_v15  ;;  %v699_v6 = vadd.f32 %v8207_v13, %v8206_v1  ;;  %v8208_v49 = vld [vmem:[#allocation36_spill] sm:$0xff]  ;;  %v850_v43 = vadd.f32 %v8213_v5, %v8212_v47  ;;  %v8217_v2 = vld [vmem:[#allocation74_spill] sm:$0xff]  ;;  %v5272_v17 = vadd.f32 %v1190_v14, %v1188_v51  ;;  %v8218_v15 = vld [vmem:[#allocation49_spill] sm:$0xff]  ;;  %v5283_v47 = vpop.permute.xlu0 %1663 }
 0x22b   : > { %v726_v31 = vadd.f32 %v8209_v21, %v8208_v49  ;;  %v8211_v37 = vld [vmem:[#allocation68_spill] sm:$0xff]  ;;  %v904_v60 = vadd.f32 %v8217_v2, %v8216_v28  ;;  %v8221_v21 = vld [vmem:[#allocation50_spill] sm:$0xff]  ;;  %8223 = vst [vmem:[#allocation27_spill] sm:$0xff] %v5283_v47  ;;  %v5289_v28 = vmul.f32 %v575_v58, %v4966_v25  ;;  %v8226_v51 = vld [vmem:[#allocation51_spill] sm:$0xff] }
 0x22c   : > { %v753_v54 = vadd.f32 %v8211_v37, %v8210_v36  ;;  %v8215_v46 = vld [vmem:[#allocation72_spill] sm:$0xff]  ;;  %v1027_v36 = vadd.f32 %v8222_v63, %v8221_v21  ;;  %v5281_v37 = vadd.f32 %v1651_v4, %v5254_v48  ;;  %v1028_v14 = vadd.f32 %v8222_v63, %v8226_v51  ;;  %v8239_v51 = vld [vmem:[#allocation53_spill] sm:$0xff]  ;;  %v8242_v5 = vld [vmem:[#allocation54_spill] sm:$0xff] }
 0x22d   : > { %2283 = vperm.xlu1 %3453, %v3518_v44   ;;  %v8214_v44 = vld [vmem:[#allocation44_spill] sm:$0xff]  ;;  %8225 = vst [vmem:[#allocation32_spill] sm:$0xff] %v5289_v28  ;;  %v5296_v21 = vmul.f32 %v602_v10, %v4966_v25  ;;  %v5299_v4 = vmul.f32 %v699_v6, %v4978_v50  ;;  %v5308_v2 = vmul.f32 %v850_v43, %v5063_v40  ;;  %v5318_v10 = vpop.permute.xlu1 %1669 }
 0x22e   : > { %v877_v62 = vadd.f32 %v8215_v46, %v8214_v44  ;;  %v8219_v22 = vld [vmem:[#allocation76_spill] sm:$0xff]  ;;  %v5286_v44 = vmul.f32 %v548_v55, %v4966_v25  ;;  %v5305_v55 = vmul.f32 %v753_v54, %v4978_v50  ;;  %v3471_v58 = vpop.eup %3470  ;;  %v5327_v43 = vmul.f32 %v1027_v36, %v5100_v7 }
 0x22f   : > { %v1000_v1 = vadd.f32 %v8219_v22, %v8218_v15  ;;  %v8220_v13 = vld [vmem:[#allocation48_spill] sm:$0xff]  ;;  %v3519_v15 = vld [vmem:[#allocation5 + $0x18] sm:$0xff]  ;;  %8227 = vst [vmem:[#allocation36_spill] sm:$0xff] %v5296_v21  ;;  %8228 = vst [vmem:[#allocation38_spill] sm:$0xff] %v5299_v4  ;;  %v3473_v6 = vpop.eup %3472  ;;  %3476 = vrcp.f32 %v5281_v37  ;;  %v1267_v36 = vmul.f32 %v3471_v58, %v5189_v20  ;;  %v1293_v20 = vmul.f32 %v8184_v12, %v5230_v30 }
 0x230   : > { %v1001_v49 = vadd.f32 %v8219_v22, %v8220_v13  ;;  %8224 = vst [vmem:[#allocation29_spill] sm:$0xff] %v5286_v44  ;;  %v5293_v22 = vadd.f32 %v1246_v24, %v1244_v35  ;;  %v5302_v13 = vmul.f32 %v726_v31, %v4978_v50  ;;  %8230 = vst [vmem:[#allocation44_spill] sm:$0xff] %v5305_v55 }
 0x231   : > { %2705 = vperm.xlu1 %3453, %v3519_v15   ;;  %8231 = vst [vmem:[#allocation47_spill] sm:$0xff] %v5308_v2  ;;  %v5311_v63 = vmul.f32 %v877_v62, %v5063_v40  ;;  %v5314_v35 = vmul.f32 %v904_v60, %v5063_v40  ;;  %v2102_v24 = vmul.f32 %v4891_v19, %v4653_v41  ;;  %8234 = vst [vmem:[#allocation48_spill] sm:$0xff] %v5318_v10  ;;  %v3475_v62 = vpop.eup %3474  ;;  %v8240_v15 = vld [vmem:[#allocation81_spill] sm:$0xff] }
 0x232   : > { %8229 = vst [vmem:[#allocation39_spill] sm:$0xff] %v5302_v13  ;;  %v5321_v31 = vmul.f32 %v1000_v1, %v5100_v7  ;;  %v5324_v54 = vmul.f32 %v1001_v49, %v5113_v57  ;;  %8237 = vst [vmem:[#allocation51_spill] sm:$0xff] %v5327_v43  ;;  %v5331_v60 = vmul.f32 %v1028_v14, %v5113_v57  ;;  %v5345_v7 = vpop.permute.xlu0 %1826  ;;  %v8244_v43 = vmov 5  }
 0x233   : > { %8232 = vst [vmem:[#allocation49_spill] sm:$0xff] %v5311_v63  ;;  %8233 = vst [vmem:[#allocation76_spill] sm:$0xff] %v5314_v35  ;;  %v5335_v46 = vadd.f32 %v8240_v15, %v8239_v51  ;;  %v5339_v1 = vadd.f32 %v8240_v15, %v8242_v5  ;;  %v1297_v49 = vmul.f32 %v8190_v33, %v5234_v9  ;;  %v1269_v2 = vsub.f32 2.0, %v1267_v36 }
 0x234   : > { %8235 = vst [vmem:[#allocation50_spill] sm:$0xff] %v5321_v31  ;;  %8236 = vst [vmem:[#allocation78_spill] sm:$0xff] %v5324_v54  ;;  %v1321_v14 = vmul.f32 %v8190_v33, %v5040_v39  ;;  %v1345_v51 = vmul.f32 %v8190_v33, %v5082_v32  ;;  %v1369_v5 = vmul.f32 %v8190_v33, %v5093_v53  ;;  %v5371_v54 = vpop.permute.xlu1 %1824 }
 0x235   : > { %8238 = vst [vmem:[#allocation129_spill] sm:$0xff] %v5331_v60  ;;  %8241 = vst [vmem:[#allocation53_spill] sm:$0xff] %v5335_v46  ;;  %2107 = vrot.lane.b32.xlu1 %v2102_v24, %s3695_s17  ;;  %v1397_v24 = vmul.f32 %v3473_v6, %v5201_v27  ;;  %v2524_v15 = vmul.f32 %v4898_v18, %v4653_v41  ;;  %v1317_v46 = vmul.f32 %v8184_v12, %v5244_v0 }
 0x236   : > { %8243 = vst [vmem:[#allocation81_spill] sm:$0xff] %v5339_v1  ;;  %3456 = vset.pattern.permute.xlu1 %v8244_v43  ;;  %v1423_v43 = vmul.f32 %v8186_v59, %v5230_v30  ;;  %v1527_v1 = vmul.f32 %v3475_v62, %v5208_v16  ;;  %v1341_v60 = vmul.f32 %v8184_v12, %v5248_v11 }
 0x237   : > { %v5368_v27 = vmul.f32 %v5002_v56, %v8190_v33  ;;  %v1553_v31 = vmul.f32 %v8187_v61, %v5230_v30  ;;  %v1365_v16 = vmul.f32 %v8184_v12, %v5293_v22  ;;  %v1447_v35 = vmul.f32 %v8186_v59, %v5244_v0 }
 0x238   : > { %v5381_v63 = vmul.f32 %v4981_v29, %v8190_v33  ;;  %v1427_v55 = vmul.f32 %v8192_v8, %v5234_v9  ;;  %v5389_v13 = vmul.f32 %v4800_v45, %v8190_v33  ;;  %v1399_v4 = vsub.f32 2.0, %v1397_v24 }
 0x239   : > { %2529 = vrot.lane.b32.xlu1 %v2524_v15, %s3695_s17  ;;  %v1471_v15 = vmul.f32 %v8186_v59, %v5248_v11  ;;  %v2313_v21 = vmul.f32 %v4932_v23, %v4653_v41  ;;  %v1295_v28 = vadd.f32 %v1293_v20, %v5228_v34  ;;  %v1425_v18 = vadd.f32 %v1423_v43, %v5228_v34 }
 0x23a   : > { %8245 = vst [vmem:[#allocation54_spill] sm:$0xff] %v5381_v63  ;;  %8246 = vst [vmem:[#allocation130_spill] sm:$0xff] %v5389_v13  ;;  %v1529_v44 = vsub.f32 2.0, %v1527_v1  ;;  %v1319_v19 = vadd.f32 %v1317_v46, %v5237_v26  ;;  %v1343_v57 = vadd.f32 %v1341_v60, %v5246_v42  ;;  %v1451_v40 = vmul.f32 %v8192_v8, %v5040_v39  ;;  %v3477_v1 = vpop.eup %3476 }
 0x23b   : > { %v1555_v24 = vadd.f32 %v1553_v31, %v5228_v34  ;;  %v1557_v33 = vmul.f32 %v8194_v38, %v5234_v9  ;;  %v1367_v20 = vadd.f32 %v1365_v16, %v5272_v17  ;;  %v1449_v43 = vadd.f32 %v1447_v35, %v5237_v26 }
 0x23c   : > { %v1271_v13 = vmul.f32 %v3471_v58, %v1269_v2  ;;  %v1429_v23 = vadd.f32 %v1427_v55, %v1425_v18  ;;  %v1473_v46 = vadd.f32 %v1471_v15, %v5246_v42  ;;  %v1495_v60 = vmul.f32 %v8186_v59, %v5293_v22  ;;  %v8248_v59 = vld [vmem:[#allocation124_spill] sm:$0xff] }
 0x23d   : > { %2318 = vrot.lane.b32.xlu1 %v2313_v21, %s3695_s17  ;;  %v1401_v50 = vmul.f32 %v3473_v6, %v1399_v4  ;;  %v2735_v21 = vmul.f32 %v4946_v52, %v4653_v41  ;;  %v1299_v31 = vadd.f32 %v1297_v49, %v1295_v28  ;;  %v1475_v16 = vmul.f32 %v8192_v8, %v5082_v32  ;;  %v8247_v41 = vld [vmem:[#allocation75_spill] sm:$0xff] }
 0x23e   : > { %v5395_v36 = vpop.permute.xlu0 %1898  ;;  %v1531_v63 = vmul.f32 %v3475_v62, %v1529_v44  ;;  %v1323_v2 = vadd.f32 %v1321_v14, %v1319_v19  ;;  %v1347_v18 = vadd.f32 %v1345_v51, %v1343_v57  ;;  %v1453_v55 = vadd.f32 %v1451_v40, %v1449_v43  ;;  %v8249_v62 = vld [vmem:[#allocation125_spill] sm:$0xff]  ;;  %v8250_v57 = vld [vmem:[#allocation80_spill] sm:$0xff] }
 0x23f   : > { %v5410_v25 = vpop.permute.xlu1 %1896  ;;  %v1657_v58 = vmul.f32 %v3477_v1, %v5281_v37  ;;  %v1559_v4 = vadd.f32 %v1557_v33, %v1555_v24  ;;  %v1371_v6 = vadd.f32 %v1369_v5, %v1367_v20  ;;  %v1577_v15 = vmul.f32 %v8187_v61, %v5244_v0  ;;  %v8252_v5 = vld [vmem:[#allocation123_spill] sm:$0xff]  ;;  %v8254_v20 = vld [vmem:[#allocation126_spill] sm:$0xff] }
 0x240   : > { %v1277_v28 = vmul.f32 %v8247_v41, %v1271_v13  ;;  %v1407_v49 = vmul.f32 %v5241_v3, %v1401_v50  ;;  %v1537_v44 = vmul.f32 %v8248_v59, %v1531_v63  ;;  %v1683_v19 = vmul.f32 %v8249_v62, %v5230_v30 }
 0x241   : > { %2740 = vrot.lane.b32.xlu1 %v2735_v21, %s3695_s17  ;;  %v5428_v40 = vmul.f32 %v8250_v57, %v1401_v50  ;;  %v1477_v14 = vadd.f32 %v1475_v16, %v1473_v46  ;;  %v1497_v33 = vadd.f32 %v1495_v60, %v5272_v17  ;;  %v1601_v51 = vmul.f32 %v8187_v61, %v5248_v11  ;;  %v8256_v57 = vld [vmem:[#allocation104_spill] sm:$0xff] }
 0x242   : > { %v5416_v35 = vpop.permute.xlu0 %1911  ;;  %v5436_v24 = vmul.f32 %v8252_v5, %v1271_v13  ;;  %v5439_v43 = vmul.f32 %v8254_v20, %v1531_v63  ;;  %v1499_v50 = vmul.f32 %v8192_v8, %v5093_v53  ;;  %v1659_v30 = vsub.f32 2.0, %v1657_v58 }
 0x243   : > { %8251 = vst [vmem:[#allocation131_spill] sm:$0xff] %v5428_v40  ;;  %v5430_v37 = vpop.permute.xlu1 %1909  ;;  %v1579_v46 = vadd.f32 %v1577_v15, %v5237_v26  ;;  %v1581_v60 = vmul.f32 %v8194_v38, %v5040_v39  ;;  %v1625_v13 = vmul.f32 %v8187_v61, %v5293_v22  ;;  %v5451_v16 = vmul.f32 %v1299_v31, %v1277_v28 }
 0x244   : > { %8253 = vst [vmem:[#allocation132_spill] sm:$0xff] %v5436_v24  ;;  %8255 = vst [vmem:[#allocation133_spill] sm:$0xff] %v5439_v43  ;;  %v5453_v63 = vmul.f32 %v1429_v23, %v1407_v49  ;;  %v5455_v20 = vmul.f32 %v1559_v4, %v1537_v44  ;;  %v1685_v5 = vadd.f32 %v1683_v19, %v5228_v34  ;;  %v8257_v23 = vld [vmem:[#allocation99_spill] sm:$0xff]  ;;  %v8260_v8 = vmov 2   ;;  %v8261_v43 = vld [vmem:[#allocation108_spill] sm:$0xff] }
 0x245   : > { %2096 = vperm.xlu1 %3456, %v8256_v57   ;;  %v1829_v58 = vsel %vm1828_vm1, %v5371_v54, %v5345_v7  ;;  %v1687_v15 = vmul.f32 %v5254_v48, %v5234_v9  ;;  %v1603_v59 = vadd.f32 %v1601_v51, %v5246_v42  ;;  %v1605_v31 = vmul.f32 %v8194_v38, %v5082_v32 }
 0x246   : > { %v5441_v21 = vpop.permute.xlu0 %1977  ;;  %v5470_v4 = vmul.f32 %v8257_v23, %v5371_v54  ;;  %v5474_v34 = vmul.f32 %v1323_v2, %v1277_v28  ;;  %v5476_v19 = vmul.f32 %v1347_v18, %v1277_v28  ;;  %v1501_v7 = vadd.f32 %v1499_v50, %v1497_v33 }
 0x247   : > { %v5461_v57 = vpop.permute.xlu1 %1922  ;;  %v1661_v41 = vmul.f32 %v3477_v1, %v1659_v30  ;;  %v1583_v40 = vadd.f32 %v1581_v60, %v1579_v46  ;;  %v1627_v9 = vadd.f32 %v1625_v13, %v5272_v17  ;;  %v1629_v51 = vmul.f32 %v8194_v38, %v5093_v53  ;;  %v8268_v46 = vld [vmem:[#allocation97_spill] sm:$0xff] }
 0x248   : > { %8258 = vst [vmem:[#allocation104_spill] sm:$0xff] %v5470_v4  ;;  %v5483_v24 = vmul.f32 %v8261_v43, %v1829_v58  ;;  %v5485_v54 = vmul.f32 %v1371_v6, %v1277_v28  ;;  %v5487_v52 = vmul.f32 %v1453_v55, %v1407_v49  ;;  %v5489_v2 = vmul.f32 %v1477_v14, %v1407_v49  ;;  %v8269_v14 = vld [vmem:[#allocation113_spill] sm:$0xff] }
 0x249   : > { %3457 = vset.pattern.permute.xlu1 %v8260_v8  ;;  %v1689_v1 = vadd.f32 %v1687_v15, %v1685_v5  ;;  %v5493_v33 = vmul.f32 %v1501_v7, %v1407_v49  ;;  %v5495_v50 = vmul.f32 %v1583_v40, %v1537_v44  ;;  %v1607_v30 = vadd.f32 %v1605_v31, %v1603_v59  ;;  %v8271_v59 = vld [vmem:[#allocation98_spill] sm:$0xff] }
 0x24a   : > { %v5472_v3 = vpop.permute.xlu0 %1988  ;;  %8262 = vst [vmem:[#allocation108_spill] sm:$0xff] %v5483_v24  ;;  %8263 = vst [vmem:[#allocation134_spill] sm:$0xff] %v5485_v54  ;;  %v5499_v8 = vmul.f32 %v8257_v23, %v5470_v4  ;;  %v1935_v6 = vmul.f32 %v8268_v46, %v5470_v4  ;;  %v1707_v55 = vmul.f32 %v8249_v62, %v5244_v0 }
 0x24b   : > { %8259 = vst [vmem:[#allocation99_spill] sm:$0xff] %v5472_v3  ;;  %8264 = vst [vmem:[#allocation135_spill] sm:$0xff] %v5487_v52  ;;  %v5491_v18 = vpop.permute.xlu1 %1979  ;;  %v1309_v5 = vmul.f32 %v8184_v12, %v8269_v14  ;;  %v5510_v49 = vmul.f32 %v5283_v47, %v1661_v41  ;;  %v5514_v40 = vmul.f32 %v8271_v59, %v5470_v4  ;;  %v8276_v59 = vld [vmem:[#allocation120_spill] sm:$0xff] }
 0x24c   : > { %8265 = vst [vmem:[#allocation136_spill] sm:$0xff] %v5489_v2  ;;  %8266 = vst [vmem:[#allocation137_spill] sm:$0xff] %v5493_v33  ;;  %v1631_v60 = vadd.f32 %v1629_v51, %v1627_v9  ;;  %v1731_v13 = vmul.f32 %v8249_v62, %v5248_v11  ;;  %v5520_v58 = vmul.f32 %v8261_v43, %v5483_v24 }
 0x24d   : > { %8267 = vst [vmem:[#allocation138_spill] sm:$0xff] %v5495_v50  ;;  %8270 = vst [vmem:[#allocation97_spill] sm:$0xff] %v5510_v49  ;;  %v1936_v0 = vmul.f32 %v5002_v56, %v5483_v24  ;;  %v5526_v15 = vmul.f32 %v4981_v29, %v5483_v24  ;;  %v5530_v31 = vmul.f32 %v4800_v45, %v5483_v24 }
 0x24e   : > { %v5503_v28 = vpop.permute.xlu0 %2001  ;;  %8272 = vst [vmem:[#allocation98_spill] sm:$0xff] %v5514_v40  ;;  %v5532_v9 = vmul.f32 %v1607_v30, %v1537_v44  ;;  %v5534_v51 = vmul.f32 %v1631_v60, %v1537_v44  ;;  %v1569_v11 = vmul.f32 %v8187_v61, %v8269_v14  ;;  %v1333_v47 = vmul.f32 %v8184_v12, %v8276_v59  ;;  %v8278_v30 = vld [vmem:[#allocation110_spill] sm:$0xff] }
 0x24f   : > { %8273 = vst [vmem:[#allocation139_spill] sm:$0xff] %v5526_v15  ;;  %v1991_v7 = vpop.permute.xlu1 %1990  ;;  %v5541_v50 = vmul.f32 %v5318_v10, %v1661_v41  ;;  %v1709_v2 = vadd.f32 %v1707_v55, %v5237_v26  ;;  %v1711_v45 = vmul.f32 %v5254_v48, %v5040_v39  ;;  %v1311_v24 = vadd.f32 %v1309_v5, %v8278_v30 }
 0x250   : > { %8274 = vst [vmem:[#allocation140_spill] sm:$0xff] %v5532_v9  ;;  %8275 = vst [vmem:[#allocation141_spill] sm:$0xff] %v5534_v51  ;;  %v5550_v44 = vmul.f32 %v1689_v1, %v5510_v49  ;;  %v1733_v60 = vadd.f32 %v1731_v13, %v5246_v42  ;;  %v1735_v51 = vmul.f32 %v5254_v48, %v5082_v32  ;;  %v8280_v32 = vld [vmem:[#allocation114_spill] sm:$0xff] }
 0x251   : > { %8277 = vst [vmem:[#allocation142_spill] sm:$0xff] %v5541_v50  ;;  %v1755_v41 = vmul.f32 %v8249_v62, %v5293_v22  ;;  %v5559_v10 = vmul.f32 %v8257_v23, %v5503_v28  ;;  %v2055_v26 = vmul.f32 %v8268_v46, %v5503_v28  ;;  %v5572_v1 = vsel %vm1828_vm1, %v5410_v25, %v5395_v36 }
 0x252   : > { %v5543_v33 = vpop.permute.xlu0 %2014  ;;  %8279 = vst [vmem:[#allocation143_spill] sm:$0xff] %v5572_v1  ;;  %v1571_v5 = vadd.f32 %v1569_v11, %v8278_v30  ;;  %v1573_v13 = vmul.f32 %v5002_v56, %v8194_v38  ;;  %v1335_v39 = vadd.f32 %v1333_v47, %v8280_v32  ;;  %v5584_v62 = vadd.f32 %v1711_v45, %v1709_v2 }
 0x253   : > { %v5565_v55 = vmul.f32 %v8268_v46, %v5543_v33  ;;  %v2053_v42 = vmul.f32 %v8257_v23, %v5543_v33  ;;  %v2004_v22 = vpop.permute.xlu1 %2003  ;;  %v1593_v36 = vmul.f32 %v8187_v61, %v8276_v59  ;;  %v1903_v11 = vmul.f32 %v8268_v46, %v5410_v25  ;;  %v8286_v46 = vld [vmem:[#allocation42_spill] sm:$0xff] }
 0x254   : > { %8282 = vst [vmem:[#allocation145_spill] sm:$0xff] %v5584_v62  ;;  %v1933_v30 = vmul.f32 %v8257_v23, %v5410_v25  ;;  %v5592_v14 = vadd.f32 %v1735_v51, %v1733_v60  ;;  %v5595_v47 = vadd.f32 %v1755_v41, %v5272_v17  ;;  %v5603_v2 = vmul.f32 %v5002_v56, %v5572_v1  ;;  %v5677_v62 = vld [vmem:[%s3881_s24 + $0x10] sm:$0xff]  ;;  %v8301_v59 = vld [vmem:[#allocation14_spill] sm:$0xff] }
 0x255   : > { %v5580_v49 = vadd.f32 %v2055_v26, %v2053_v42  ;;  %v5599_v26 = vsel %vm1828_vm1, %v5503_v28, %v2004_v22  ;;  %v5607_v45 = vmul.f32 %v5254_v48, %v5093_v53  ;;  %v5611_v23 = vmul.f32 %v8286_v46, %v5470_v4  ;;  %v8290_v42 = vld [vmem:[#allocation54_spill] sm:$0xff]  ;;  %8299 = vst [vmem:[#allocation158_spill] sm:$0xff] %v5677_v62 }
 0x256   : > { %v5582_v9 = vpop.permute.xlu0 %523  ;;  %8283 = vst [vmem:[#allocation146_spill] sm:$0xff] %v5592_v14  ;;  %8284 = vst [vmem:[#allocation147_spill] sm:$0xff] %v5595_v47  ;;  %v1934_v17 = vmul.f32 %v8261_v43, %v5572_v1  ;;  %v5616_v60 = vadd.f32 %v5368_v27, %v1311_v24  ;;  %v5618_v41 = vadd.f32 %v1573_v13, %v1571_v5  ;;  %v5646_v13 = vld [vmem:[%s3881_s24 + $0x20] sm:$0xff] }
 0x257   : > { %8281 = vst [vmem:[#allocation144_spill] sm:$0xff] %v5582_v9  ;;  %8285 = vst [vmem:[#allocation148_spill] sm:$0xff] %v5607_v45  ;;  %v2017_v51 = vpop.permute.xlu1 %2016  ;;  %v5621_v22 = vadd.f32 %v8290_v42, %v1335_v39  ;;  %v5625_v50 = vsel %vm1828_vm1, %v5472_v3, %v1991_v7  ;;  %v5634_v47 = vadd.f32 %v1593_v36, %v8280_v32 }
 0x258   : > { %8287 = vst [vmem:[#allocation42_spill] sm:$0xff] %v5611_v23  ;;  %8288 = vst [vmem:[#allocation149_spill] sm:$0xff] %v5616_v60  ;;  %v5629_v4 = vsel %vm1828_vm1, %v5543_v33, %v2017_v51  ;;  %v5638_v27 = vmul.f32 %v4981_v29, %v8194_v38  ;;  %v1905_v39 = vsub.f32 %v5499_v8, %v1903_v11  ;;  %v5688_v38 = vld [vmem:[%s3881_s24] sm:$0xff] }
 0x259   : > { %8289 = vst [vmem:[#allocation150_spill] sm:$0xff] %v5618_v41  ;;  %8291 = vst [vmem:[#allocation54_spill] sm:$0xff] %v5621_v22  ;;  %v1937_v24 = vadd.f32 %v1935_v6, %v1933_v30  ;;  %v2056_v7 = vmul.f32 %v5002_v56, %v5599_v26  ;;  %v2054_v5 = vmul.f32 %v8261_v43, %v5629_v4 }
 0x25a   : > { %8292 = vst [vmem:[#allocation151_spill] sm:$0xff] %v5625_v50  ;;  %v5631_v45 = vpop.permute.xlu0 %674  ;;  %8294 = vst [vmem:[#allocation153_spill] sm:$0xff] %v5634_v47  ;;  %v1916_v36 = vmul.f32 %v5646_v13, %v5430_v37  ;;  %v5653_v51 = vsel %vm1828_vm1, %v5441_v21, %v5491_v18  ;;  %v5659_v6 = vmul.f32 %v4981_v29, %v5572_v1 }
 0x25b   : > { %8293 = vst [vmem:[#allocation152_spill] sm:$0xff] %v5631_v45  ;;  %8295 = vst [vmem:[#allocation154_spill] sm:$0xff] %v5638_v27  ;;  %v5664_v30 = vsel %vm1828_vm1, %v5430_v37, %v5416_v35  ;;  %v2060_v11 = vmul.f32 %v4981_v29, %v5625_v50  ;;  %v2058_v42 = vadd.f32 %v2056_v7, %v2054_v5  ;;  %v5668_v14 = vpop.permute.xlu1 %531  ;;  %v8300_v35 = vld [vmem:[#allocation13_spill] sm:$0xff] }
 0x25c   : > { %8296 = vst [vmem:[#allocation155_spill] sm:$0xff] %v5646_v13  ;;  %8297 = vst [vmem:[#allocation156_spill] sm:$0xff] %v5653_v51  ;;  %v5670_v18 = vadd.f32 %v1936_v0, %v1934_v17  ;;  %v5674_v8 = vmul.f32 %v8286_v46, %v5430_v37  ;;  %v1963_v32 = vmul.f32 %v5677_v62, %v5430_v37  ;;  %v5695_v17 = vld [vmem:[%s3881_s24 + $0x38] sm:$0xff] }
 0x25d   : > { %8298 = vst [vmem:[#allocation157_spill] sm:$0xff] %v5668_v14  ;;  %v527_v48 = vmul.f32 %v5582_v9, %v8300_v35  ;;  %v535_v7 = vmul.f32 %v5668_v14, %v8301_v59  ;;  %v1984_v0 = vmul.f32 %v5688_v38, %v5441_v21  ;;  %v2027_v46 = vmul.f32 %v5677_v62, %v5441_v21  ;;  %v5704_v14 = vld [vmem:[%s3881_s24 + $0x30] sm:$0xff] }
 0x25e   : > { %v5685_v5 = vpop.permute.xlu0 %825  ;;  %v2064_v53 = vmul.f32 %v5695_v17, %v5653_v51  ;;  %v2062_v1 = vsub.f32 %v2058_v42, %v2060_v11  ;;  %v1918_v9 = vsub.f32 %v1905_v39, %v1916_v36  ;;  %v5701_v59 = vmul.f32 %v5646_v13, %v5441_v21  ;;  %8303 = vst [vmem:[#allocation14_spill] sm:$0xff] %v5704_v14  ;;  %v8305_v42 = vld [vmem:[#allocation101_spill] sm:$0xff] }
 0x25f   : > { %8302 = vst [vmem:[#allocation13_spill] sm:$0xff] %v5685_v5  ;;  %v1929_v61 = vmul.f32 %v5704_v14, %v5461_v57  ;;  %v537_v23 = vadd.f32 %v535_v7, %v527_v48  ;;  %v5710_v15 = vmul.f32 %v5704_v14, %v5441_v21  ;;  %v1939_v52 = vmul.f32 %v5646_v13, %v5461_v57  ;;  %v5718_v11 = vpop.permute.xlu1 %682  ;;  %v8307_v48 = vld [vmem:[#allocation102_spill] sm:$0xff] }
 0x260   : > { %v1961_v39 = vmul.f32 %v5688_v38, %v5461_v57  ;;  %v5716_v36 = vadd.f32 %v2064_v53, %v2062_v1  ;;  %8304 = vst [vmem:[#allocation159_spill] sm:$0xff] %v5718_v11  ;;  %v678_v40 = vmul.f32 %v5631_v45, %v8305_v42  ;;  %v686_v21 = vmul.f32 %v5718_v11, %v8307_v48 }
 0x261   : > { %v5723_v27 = vadd.f32 %v5451_v16, %v537_v23  ;;  %v1917_v47 = vmul.f32 %v4981_v29, %v5664_v30  ;;  %v5733_v53 = vmul.f32 %v5677_v62, %v5461_v57  ;;  %v1995_v1 = vmul.f32 %v5677_v62, %v5472_v3 }
 0x262   : > { %v5727_v7 = vpop.permute.xlu0 %976  ;;  %v5739_v45 = vmul.f32 %v5695_v17, %v5664_v30  ;;  %v1964_v16 = vmul.f32 %v5002_v56, %v5664_v30  ;;  %v5743_v23 = vsub.f32 %v1918_v9, %v1929_v61  ;;  %v2025_v48 = vmul.f32 %v5688_v38, %v5472_v3  ;;  %v8312_v9 = vld [vmem:[#allocation107_spill] sm:$0xff] }
 0x263   : > { %8306 = vst [vmem:[#allocation160_spill] sm:$0xff] %v5723_v27  ;;  %8308 = vst [vmem:[#allocation102_spill] sm:$0xff] %v5727_v7  ;;  %v5749_v11 = vmul.f32 %v5646_v13, %v5472_v3  ;;  %v688_v27 = vadd.f32 %v686_v21, %v678_v40  ;;  %v1941_v22 = vadd.f32 %v1939_v52, %v1937_v24  ;;  %v5757_v42 = vpop.permute.xlu1 %833  ;;  %v8314_v52 = vld [vmem:[#allocation111_spill] sm:$0xff] }
 0x264   : > { %8309 = vst [vmem:[#allocation161_spill] sm:$0xff] %v5733_v53  ;;  %v5751_v41 = vadd.f32 %v1963_v32, %v1961_v39  ;;  %v2008_v62 = vmul.f32 %v5646_v13, %v5503_v28  ;;  %v1996_v60 = vmul.f32 %v5002_v56, %v5625_v50  ;;  %8311 = vst [vmem:[#allocation163_spill] sm:$0xff] %v5757_v42 }
 0x265   : > { %v2026_v61 = vmul.f32 %v8261_v43, %v5625_v50  ;;  %v829_v54 = vmul.f32 %v5685_v5, %v8312_v9  ;;  %v5764_v3 = vadd.f32 %v5453_v63, %v688_v27  ;;  %v837_v32 = vmul.f32 %v5757_v42, %v8314_v52 }
 0x266   : > { %8310 = vst [vmem:[#allocation162_spill] sm:$0xff] %v5751_v41  ;;  %v1925_v40 = vpop.permute.xlu0 %1924  ;;  %v1985_v24 = vmul.f32 %v8261_v43, %v5653_v51  ;;  %v2028_v39 = vmul.f32 %v5002_v56, %v5653_v51  ;;  %v1997_v21 = vsub.f32 %v1984_v0, %v1995_v1  ;;  %v2021_v5 = vmul.f32 %v5704_v14, %v5543_v33 }
 0x267   : > { %8313 = vst [vmem:[#allocation164_spill] sm:$0xff] %v5764_v3  ;;  %v1926_v50 = vsel %vm1828_vm1, %v5461_v57, %v1925_v40  ;;  %v2031_v63 = vmul.f32 %v5646_v13, %v5543_v33  ;;  %v2032_v27 = vmul.f32 %v4981_v29, %v5629_v4  ;;  %v839_v52 = vadd.f32 %v837_v32, %v829_v54  ;;  %v5783_v1 = vpop.permute.xlu1 %984  ;;  %v8317_v54 = vld [vmem:[#allocation127_spill] sm:$0xff] }
 0x268   : > { %v2010_v3 = vsub.f32 %v1997_v21, %v2008_v62  ;;  %v2029_v42 = vadd.f32 %v2027_v46, %v2025_v48  ;;  %v2009_v9 = vmul.f32 %v4981_v29, %v5599_v26  ;;  %v1962_v0 = vmul.f32 %v8261_v43, %v1926_v50  ;;  %8315 = vst [vmem:[#allocation111_spill] sm:$0xff] %v5783_v1  ;;  %v8318_v48 = vld [vmem:[#allocation118_spill] sm:$0xff] }
 0x269   : > { %v1998_v57 = vsub.f32 %v1985_v24, %v1996_v60  ;;  %v2030_v40 = vadd.f32 %v2028_v39, %v2026_v61  ;;  %v5786_v41 = vadd.f32 %v5455_v20, %v839_v52  ;;  %v1940_v33 = vmul.f32 %v4981_v29, %v1926_v50 }
 0x26a   : > { %v2022_v51 = vmul.f32 %v5695_v17, %v5629_v4  ;;  %v980_v62 = vmul.f32 %v5727_v7, %v8317_v54  ;;  %v1966_v46 = vadd.f32 %v1964_v16, %v1962_v0  ;;  %v988_v32 = vmul.f32 %v5783_v1, %v8318_v48 }
 0x26b   : > { %8316 = vst [vmem:[#allocation165_spill] sm:$0xff] %v5786_v41  ;;  %v5795_v21 = vsub.f32 %v2010_v3, %v2021_v5  ;;  %v2033_v53 = vadd.f32 %v2031_v63, %v2029_v42  ;;  %v2034_v60 = vadd.f32 %v2032_v27, %v2030_v40  ;;  %v8319_v20 = vsub.f32 %v5520_v58, %v5603_v2  ;;  %v5802_v29 = vpop.permute.xlu1 %554  ;;  %v8322_v42 = vld [vmem:[#allocation85_spill] sm:$0xff] }
 0x26c   : > { %v2011_v24 = vsub.f32 %v1998_v57, %v2009_v9  ;;  %v1930_v39 = vmul.f32 %v5695_v17, %v1926_v50  ;;  %v1970_v52 = vsub.f32 %v1966_v46, %v5659_v6  ;;  %v990_v41 = vadd.f32 %v988_v32, %v980_v62  ;;  %8320 = vst [vmem:[#allocation127_spill] sm:$0xff] %v5802_v29  ;;  %v8326_v27 = vld [vmem:[#allocation29_spill] sm:$0xff] }
 0x26d   : > { %v1919_v61 = vsub.f32 %v8319_v20, %v1917_v47  ;;  %v2035_v16 = vmul.f32 %v5704_v14, %v5503_v28  ;;  %v2036_v3 = vmul.f32 %v5695_v17, %v5599_v26  ;;  %v1942_v5 = vadd.f32 %v1940_v33, %v5670_v18  ;;  %v8329_v40 = vld [vmem:[#allocation69_spill] sm:$0xff] }
 0x26e   : > { %v558_v58 = vmul.f32 %v5802_v29, %v8300_v35  ;;  %v5811_v47 = vsub.f32 %v2011_v24, %v2022_v51  ;;  %v5814_v2 = vadd.f32 %v5530_v31, %v1970_v52  ;;  %v5817_v6 = vadd.f32 %v5550_v44, %v990_v41  ;;  %v8328_v44 = vld [vmem:[#allocation21_spill] sm:$0xff]  ;;  %v8362_v29 = vld [vmem:[#allocation135_spill] sm:$0xff] }
 0x26f   : > { %v2254_v9 = vmul.f32 %v8322_v42, %v5716_v36  ;;  %v5822_v28 = vsub.f32 %v1941_v22, %v5674_v8  ;;  %v5824_v63 = vsub.f32 %v2033_v53, %v2035_v16  ;;  %v5826_v18 = vsub.f32 %v2034_v60, %v2036_v3  ;;  %v5831_v57 = vpop.permute.xlu1 %581 }
 0x270   : > { %8321 = vst [vmem:[#allocation118_spill] sm:$0xff] %v5817_v6  ;;  %v564_v0 = vadd.f32 %v8326_v27, %v558_v58  ;;  %v5829_v51 = vsub.f32 %v1919_v61, %v1930_v39  ;;  %8327 = vst [vmem:[#allocation29_spill] sm:$0xff] %v5831_v57  ;;  %v2676_v41 = vmul.f32 %v8328_v44, %v5716_v36 }
 0x271   : > { %8323 = vst [vmem:[#allocation85_spill] sm:$0xff] %v5822_v28  ;;  %8324 = vst [vmem:[#allocation166_spill] sm:$0xff] %v5824_v63  ;;  %v5834_v31 = vadd.f32 %v2254_v9, %v5814_v2  ;;  %v2329_v22 = vmul.f32 %v8329_v40, %v5795_v21  ;;  %v2061_v8 = vsub.f32 %v5580_v49, %v5749_v11  ;;  %v8331_v49 = vld [vmem:[#allocation11_spill] sm:$0xff] }
 0x272   : > { %8325 = vst [vmem:[#allocation167_spill] sm:$0xff] %v5826_v18  ;;  %v5843_v53 = vsub.f32 %v1942_v5, %v5739_v45  ;;  %v5846_v33 = vadd.f32 %v5474_v34, %v564_v0  ;;  %v585_v62 = vmul.f32 %v5831_v57, %v8300_v35  ;;  %v5851_v46 = vadd.f32 %v2676_v41, %v5814_v2  ;;  %v8332_v34 = vld [vmem:[#allocation32_spill] sm:$0xff]  ;;  %v8361_v57 = vld [vmem:[#allocation151_spill] sm:$0xff] }
 0x273   : > { %v5854_v32 = vadd.f32 %v2329_v22, %v5743_v23  ;;  %v2330_v60 = vmul.f32 %v8329_v40, %v5811_v47  ;;  %v2751_v11 = vmul.f32 %v8331_v49, %v5795_v21  ;;  %v2042_v45 = vmul.f32 %v5002_v56, %v5629_v4  ;;  %v5867_v39 = vpop.permute.xlu1 %608 }
 0x274   : > { %8330 = vst [vmem:[#allocation168_spill] sm:$0xff] %v5843_v53  ;;  %v591_v20 = vadd.f32 %v8332_v34, %v585_v62  ;;  %v2752_v61 = vmul.f32 %v8331_v49, %v5811_v47  ;;  %v2380_v24 = vmul.f32 %v8329_v40, %v5824_v63  ;;  %8333 = vst [vmem:[#allocation32_spill] sm:$0xff] %v5867_v39 }
 0x275   : > { %v5870_v52 = vadd.f32 %v2330_v60, %v5829_v51  ;;  %v5873_v16 = vadd.f32 %v2751_v11, %v5743_v23  ;;  %v2381_v3 = vmul.f32 %v8329_v40, %v5826_v18  ;;  %v2802_v4 = vmul.f32 %v8331_v49, %v5824_v63  ;;  %v8338_v60 = vld [vmem:[#allocation121_spill] sm:$0xff]  ;;  %v8364_v63 = vld [vmem:[#allocation42_spill] sm:$0xff] }
 0x276   : > { %v2040_v5 = vmul.f32 %v8261_v43, %v5599_v26  ;;  %v1950_v58 = vmul.f32 %v5002_v56, %v1926_v50  ;;  %v5883_v9 = vadd.f32 %v5476_v19, %v591_v20  ;;  %v612_v27 = vmul.f32 %v5867_v39, %v8300_v35  ;;  %v8337_v50 = vld [vmem:[#allocation36_spill] sm:$0xff]  ;;  %v8345_v39 = vld [vmem:[#allocation101_spill] sm:$0xff] }
 0x277   : > { %v5888_v0 = vadd.f32 %v2752_v61, %v5829_v51  ;;  %v5891_v41 = vadd.f32 %v2380_v24, %v5822_v28  ;;  %v5894_v22 = vadd.f32 %v2381_v3, %v5843_v53  ;;  %v5897_v62 = vadd.f32 %v2802_v4, %v5822_v28  ;;  %v8341_v24 = vld [vmem:[#allocation161_spill] sm:$0xff]  ;;  %v8342_v4 = vld [vmem:[#allocation156_spill] sm:$0xff] }
 0x278   : > { %v1947_v56 = vmul.f32 %v5688_v38, %v5430_v37  ;;  %v2044_v19 = vsub.f32 %v2040_v5, %v2042_v45  ;;  %v618_v26 = vadd.f32 %v8337_v50, %v612_v27  ;;  %v1357_v35 = vmul.f32 %v8184_v12, %v8338_v60  ;;  %v5915_v45 = vpop.permute.xlu1 %705  ;;  %v8343_v5 = vld [vmem:[#allocation103_spill] sm:$0xff]  ;;  %v8344_v50 = vld [vmem:[#allocation134_spill] sm:$0xff] }
 0x279   : > { %8334 = vst [vmem:[#allocation169_spill] sm:$0xff] %v5891_v41  ;;  %8335 = vst [vmem:[#allocation170_spill] sm:$0xff] %v5894_v22  ;;  %v1967_v11 = vmul.f32 %v5646_v13, %v5410_v25  ;;  %v8339_v34 = vsub.f32 %v5559_v10, %v5565_v55  ;;  %v5911_v61 = vadd.f32 %v5710_v15, %v2061_v8  ;;  %v8346_v55 = vld [vmem:[#allocation162_spill] sm:$0xff]  ;;  %v8347_v15 = vld [vmem:[#allocation99_spill] sm:$0xff] }
 0x27a   : > { %8336 = vst [vmem:[#allocation171_spill] sm:$0xff] %v5897_v62  ;;  %v1948_v37 = vmul.f32 %v8261_v43, %v5664_v30  ;;  %8340 = vst [vmem:[#allocation36_spill] sm:$0xff] %v5915_v45  ;;  %v1951_v3 = vsub.f32 %v1947_v56, %v8341_v24  ;;  %v2046_v27 = vmul.f32 %v8343_v5, %v8342_v4  ;;  %v8348_v43 = vld [vmem:[#allocation132_spill] sm:$0xff]  ;;  %v8349_v30 = vld [vmem:[#allocation149_spill] sm:$0xff] }
 0x27b   : > { %v2047_v20 = vadd.f32 %v5701_v59, %v8339_v34  ;;  %v5921_v6 = vadd.f32 %v8344_v50, %v618_v26  ;;  %v709_v10 = vmul.f32 %v5915_v45, %v8345_v39  ;;  %v1969_v59 = vsub.f32 %v8346_v55, %v1967_v11  ;;  %v8350_v24 = vld [vmem:[#allocation38_spill] sm:$0xff]  ;;  %v8351_v4 = vld [vmem:[#allocation133_spill] sm:$0xff]  ;;  %v5943_v55 = vpop.permute.xlu0 %2494  ;;  %v8369_v13 = vld [vmem:[#allocation71_spill] sm:$0xff] }
 0x27c   : > { %v2049_v8 = vmul.f32 %v5704_v14, %v8347_v15  ;;  %v1952_v34 = vsub.f32 %v1948_v37, %v1950_v58  ;;  %v5930_v1 = vmul.f32 %v8349_v30, %v8348_v43  ;;  %v2048_v56 = vadd.f32 %v2046_v27, %v2044_v19  ;;  %v8352_v5 = vld [vmem:[#allocation150_spill] sm:$0xff]  ;;  %8355 = vst [vmem:[#allocation161_spill] sm:$0xff] %v5943_v55  ;;  %v5945_v58 = vpop.permute.xlu1 %732  ;;  %v8357_v19 = vld [vmem:[#allocation153_spill] sm:$0xff]  ;;  %v8359_v15 = vld [vmem:[#allocation119_spill] sm:$0xff] }
 0x27d   : > { %v715_v7 = vadd.f32 %v8350_v24, %v709_v10  ;;  %v5935_v26 = vmul.f32 %v8352_v5, %v8351_v4  ;;  %v8353_v50 = vld [vmem:[#allocation54_spill] sm:$0xff]  ;;  %8356 = vst [vmem:[#allocation156_spill] sm:$0xff] %v5945_v58  ;;  %v2675_v37 = vmul.f32 %v8328_v44, %v5911_v61  ;;  %v1359_v30 = vadd.f32 %v1357_v35, %v8359_v15  ;;  %v8363_v44 = vld [vmem:[#allocation139_spill] sm:$0xff] }
 0x27e   : > { %v5939_v45 = vmul.f32 %v8353_v50, %v8348_v43  ;;  %v5941_v11 = vadd.f32 %v2049_v8, %v2047_v20  ;;  %v8358_v27 = vld [vmem:[#allocation154_spill] sm:$0xff]  ;;  %v2050_v50 = vmul.f32 %v5695_v17, %v8361_v57  ;;  %v736_v8 = vmul.f32 %v5945_v58, %v8345_v39  ;;  %v8365_v35 = vld [vmem:[#allocation83_spill] sm:$0xff] }
 0x27f   : > { %v1599_v10 = vadd.f32 %v8358_v27, %v8357_v19  ;;  %v8360_v24 = vld [vmem:[#allocation98_spill] sm:$0xff]  ;;  %v5956_v20 = vadd.f32 %v8362_v29, %v715_v7  ;;  %v1957_v12 = vmul.f32 %v5704_v14, %v5410_v25  ;;  %v1956_v28 = vadd.f32 %v8363_v44, %v1952_v34  ;;  %v8367_v57 = vld [vmem:[#allocation143_spill] sm:$0xff] }
 0x280   : > { %8354 = vst [vmem:[#allocation121_spill] sm:$0xff] %v5941_v11  ;;  %v1955_v5 = vadd.f32 %v8360_v24, %v1951_v3  ;;  %v5964_v19 = vadd.f32 %v8364_v63, %v1969_v59  ;;  %v1617_v3 = vmul.f32 %v8365_v35, %v8338_v60  ;;  %v5968_v27 = vadd.f32 %v2050_v50, %v2048_v56  ;;  %v8368_v7 = vld [vmem:[#allocation39_spill] sm:$0xff]  ;;  %v5975_v62 = vpop.permute.xlu1 %759  ;;  %v8371_v63 = vld [vmem:[#allocation116_spill] sm:$0xff]  ;;  %v8375_v35 = vld [vmem:[#allocation77_spill] sm:$0xff] }
 0x281   : > { %v1958_v29 = vmul.f32 %v5695_v17, %v8367_v57  ;;  %v742_v24 = vadd.f32 %v8368_v7, %v736_v8  ;;  %v2679_v58 = vmul.f32 %v5943_v55, %v8369_v13  ;;  %8370 = vst [vmem:[#allocation134_spill] sm:$0xff] %v5975_v62  ;;  %v2680_v44 = vmul.f32 %v5943_v55, %v8371_v63  ;;  %v8372_v56 = vld [vmem:[#allocation136_spill] sm:$0xff]  ;;  %v8374_v7 = vld [vmem:[#allocation113_spill] sm:$0xff] }
 0x282   : > { %8366 = vst [vmem:[#allocation103_spill] sm:$0xff] %v5968_v27  ;;  %v2677_v25 = vadd.f32 %v2675_v37, %v5964_v19  ;;  %v2803_v59 = vmul.f32 %v8331_v49, %v5826_v18  ;;  %v2422_v34 = vmul.f32 %v8329_v40, %v5941_v11  ;;  %v763_v8 = vmul.f32 %v5975_v62, %v8345_v39  ;;  %v6009_v39 = vld [vmem:[%s3881_s24 + $0x18] sm:$0xff] }
 0x283   : > { %v5985_v50 = vadd.f32 %v8372_v56, %v742_v24  ;;  %v5989_v57 = vadd.f32 %v1957_v12, %v1955_v5  ;;  %v1439_v37 = vmul.f32 %v8375_v35, %v8374_v7  ;;  %v5993_v14 = vadd.f32 %v1958_v29, %v1956_v28  ;;  %v8380_v24 = vld [vmem:[#allocation44_spill] sm:$0xff]  ;;  %8382 = vst [vmem:[#allocation54_spill] sm:$0xff] %v6009_v39  ;;  %v8383_v5 = vld [vmem:[#allocation79_spill] sm:$0xff] }
 0x284   : > { %v5995_v55 = vadd.f32 %v2679_v58, %v2677_v25  ;;  %v5998_v18 = vadd.f32 %v2680_v44, %v5851_v46  ;;  %v6001_v22 = vadd.f32 %v2803_v59, %v5843_v53  ;;  %v769_v56 = vadd.f32 %v8380_v24, %v763_v8  ;;  %v6013_v58 = vpop.permute.xlu1 %856  ;;  %v8385_v25 = vld [vmem:[#allocation130_spill] sm:$0xff]  ;;  %v8386_v59 = vld [vmem:[#allocation84_spill] sm:$0xff]  ;;  %v8387_v8 = vld [vmem:[#allocation137_spill] sm:$0xff] }
 0x285   : > { %8373 = vst [vmem:[#allocation101_spill] sm:$0xff] %v5989_v57  ;;  %8376 = vst [vmem:[#allocation162_spill] sm:$0xff] %v5993_v14  ;;  %v6005_v41 = vadd.f32 %v2422_v34, %v5989_v57  ;;  %v1613_v12 = vmul.f32 %v1599_v10, %v8351_v4  ;;  %v1443_v28 = vmul.f32 %v6009_v39, %v8383_v5  ;;  %v8388_v24 = vld [vmem:[#allocation107_spill] sm:$0xff] }
 0x286   : > { %8377 = vst [vmem:[#allocation99_spill] sm:$0xff] %v5995_v55  ;;  %8378 = vst [vmem:[#allocation149_spill] sm:$0xff] %v5998_v18  ;;  %v2423_v46 = vmul.f32 %v8329_v40, %v5968_v27  ;;  %v2844_v29 = vmul.f32 %v8331_v49, %v5941_v11  ;;  %v1363_v44 = vadd.f32 %v8385_v25, %v1359_v30  ;;  %v8389_v55 = vld [vmem:[#allocation110_spill] sm:$0xff]  ;;  %v8390_v25 = vld [vmem:[#allocation47_spill] sm:$0xff] }
 0x287   : > { %8379 = vst [vmem:[#allocation38_spill] sm:$0xff] %v6001_v22  ;;  %8381 = vst [vmem:[#allocation150_spill] sm:$0xff] %v6005_v41  ;;  %v1621_v34 = vmul.f32 %v5695_v17, %v8386_v59  ;;  %v6023_v10 = vadd.f32 %v8387_v8, %v769_v56  ;;  %v860_v62 = vmul.f32 %v6013_v58, %v8388_v24 }
 0x288   : > { %8384 = vst [vmem:[#allocation153_spill] sm:$0xff] %v6013_v58  ;;  %v1619_v18 = vadd.f32 %v1617_v3, %v8359_v15  ;;  %v1441_v53 = vadd.f32 %v1439_v37, %v8389_v55  ;;  %v6030_v41 = vadd.f32 %v2423_v46, %v5993_v14  ;;  %v6033_v11 = vadd.f32 %v2844_v29, %v5989_v57  ;;  %v8391_v37 = vld [vmem:[#allocation125_spill] sm:$0xff]  ;;  %v6043_v22 = vpop.permute.xlu1 %883 }
 0x289   : > { %v2845_v30 = vmul.f32 %v8331_v49, %v5968_v27  ;;  %v2464_v56 = vmul.f32 %v8329_v40, %v5911_v61  ;;  %v866_v8 = vadd.f32 %v8390_v25, %v860_v62  ;;  %v1377_v58 = vmul.f32 %v1363_v44, %v8348_v43  ;;  %8392 = vst [vmem:[#allocation154_spill] sm:$0xff] %v6043_v22  ;;  %v8395_v27 = vld [vmem:[#allocation120_spill] sm:$0xff]  ;;  %v8396_v25 = vld [vmem:[#allocation138_spill] sm:$0xff] }
 0x28a   : > { %v1445_v3 = vadd.f32 %v1443_v28, %v1441_v53  ;;  %v1699_v59 = vmul.f32 %v8391_v37, %v8374_v7  ;;  %v2465_v57 = vmul.f32 %v8329_v40, %v5716_v36  ;;  %v1463_v62 = vmul.f32 %v8375_v35, %v8395_v27  ;;  %v6059_v7 = vld [vmem:[%s3881_s24 + $0x28] sm:$0xff] }
 0x28b   : > { %v6046_v46 = vadd.f32 %v2845_v30, %v5993_v14  ;;  %v6049_v29 = vadd.f32 %v2464_v56, %v5964_v19  ;;  %v1587_v44 = vadd.f32 %v8396_v25, %v866_v8  ;;  %v887_v53 = vmul.f32 %v6043_v22, %v8388_v24  ;;  %v8398_v22 = vld [vmem:[#allocation49_spill] sm:$0xff] }
 0x28c   : > { %v1467_v28 = vmul.f32 %v6059_v7, %v8383_v5  ;;  %v1487_v30 = vmul.f32 %v8375_v35, %v8338_v60  ;;  %v6066_v56 = vadd.f32 %v2465_v57, %v5814_v2  ;;  %v2886_v43 = vmul.f32 %v8331_v49, %v5911_v61 }
 0x28d   : > { %8393 = vst [vmem:[#allocation119_spill] sm:$0xff] %v6046_v46  ;;  %8394 = vst [vmem:[#allocation98_spill] sm:$0xff] %v6049_v29  ;;  %v2887_v8 = vmul.f32 %v8331_v49, %v5716_v36  ;;  %v1491_v25 = vmul.f32 %v5695_v17, %v8383_v5  ;;  %v893_v40 = vadd.f32 %v8398_v22, %v887_v53  ;;  %v8400_v29 = vld [vmem:[#allocation23_spill] sm:$0xff]  ;;  %v8403_v49 = vld [vmem:[#allocation114_spill] sm:$0xff] }
 0x28e   : > { %8397 = vst [vmem:[#allocation151_spill] sm:$0xff] %v6066_v56  ;;  %v6077_v14 = vadd.f32 %v5930_v1, %v5846_v33  ;;  %v1701_v35 = vadd.f32 %v1699_v59, %v8389_v55  ;;  %v1703_v57 = vmul.f32 %v6009_v39, %v8400_v29  ;;  %v6082_v56 = vpop.permute.xlu1 %910  ;;  %v6085_v46 = vadd.f32 %v2886_v43, %v5964_v19  ;;  %v8404_v1 = vld [vmem:[#allocation140_spill] sm:$0xff]  ;;  %v8407_v43 = vld [vmem:[#allocation131_spill] sm:$0xff] }
 0x28f   : > { %8401 = vst [vmem:[#allocation139_spill] sm:$0xff] %v6082_v56  ;;  %v6088_v36 = vadd.f32 %v2887_v8, %v5814_v2  ;;  %v1465_v5 = vadd.f32 %v1463_v62, %v8403_v49  ;;  %v1723_v22 = vmul.f32 %v8391_v37, %v8395_v27  ;;  %v1611_v33 = vadd.f32 %v8404_v1, %v893_v40  ;;  %v8408_v39 = vld [vmem:[#allocation76_spill] sm:$0xff] }
 0x290   : > { %8399 = vst [vmem:[#allocation135_spill] sm:$0xff] %v6077_v14  ;;  %v914_v55 = vmul.f32 %v6082_v56, %v8388_v24  ;;  %v1623_v59 = vadd.f32 %v1621_v34, %v1619_v18  ;;  %v1489_v53 = vadd.f32 %v1487_v30, %v8359_v15  ;;  %v6098_v14 = vadd.f32 %v5935_v26, %v1587_v44  ;;  %v8413_v44 = vld [vmem:[#allocation97_spill] sm:$0xff] }
 0x291   : > { %8402 = vst [vmem:[#allocation42_spill] sm:$0xff] %v6088_v36  ;;  %v6102_v2 = vadd.f32 %v5939_v45, %v5883_v9  ;;  %v1459_v62 = vmul.f32 %v1445_v3, %v8407_v43  ;;  %v1469_v8 = vadd.f32 %v1467_v28, %v1465_v5  ;;  %v6106_v36 = vadd.f32 %v1613_v12, %v1611_v33  ;;  %v8411_v45 = vld [vmem:[#allocation141_spill] sm:$0xff]  ;;  %v8412_v3 = vld [vmem:[#allocation60_spill] sm:$0xff] }
 0x292   : > { %8405 = vst [vmem:[#allocation143_spill] sm:$0xff] %v6098_v14  ;;  %v920_v27 = vadd.f32 %v8408_v39, %v914_v55  ;;  %v1705_v40 = vadd.f32 %v1703_v57, %v1701_v35  ;;  %v1493_v1 = vadd.f32 %v1491_v25, %v1489_v53  ;;  %v1008_v24 = vpop.permute.xlu1 %1007  ;;  %v6109_v18 = vadd.f32 %v1377_v58, %v5921_v6  ;;  %v8414_v28 = vld [vmem:[#allocation145_spill] sm:$0xff]  ;;  %v8416_v25 = vld [vmem:[#allocation50_spill] sm:$0xff]  ;;  %v8473_v14 = vld [vmem:[#allocation20_spill] sm:$0xff] }
 0x293   : > { %8406 = vst [vmem:[#allocation39_spill] sm:$0xff] %v6102_v2  ;;  %8409 = vst [vmem:[#allocation71_spill] sm:$0xff] %v6106_v36  ;;  %v1725_v26 = vadd.f32 %v1723_v22, %v8403_v49  ;;  %v1727_v34 = vmul.f32 %v6059_v7, %v8400_v29  ;;  %v1747_v9 = vmul.f32 %v8391_v37, %v8338_v60  ;;  %v8418_v57 = vld [vmem:[#allocation78_spill] sm:$0xff] }
 0x294   : > { %8410 = vst [vmem:[#allocation116_spill] sm:$0xff] %v6109_v18  ;;  %v1635_v5 = vadd.f32 %v8411_v45, %v920_v27  ;;  %v1010_v39 = vmul.f32 %v1008_v24, %v8412_v3  ;;  %v1011_v12 = vmul.f32 %v1008_v24, %v8317_v54  ;;  %v1637_v35 = vmul.f32 %v1623_v59, %v8351_v4  ;;  %v8420_v55 = vld [vmem:[#allocation142_spill] sm:$0xff] }
 0x295   : > { %v1715_v6 = vmul.f32 %v8414_v28, %v8413_v44  ;;  %v6123_v58 = vadd.f32 %v1459_v62, %v5956_v20  ;;  %v1483_v49 = vmul.f32 %v1469_v8, %v8407_v43  ;;  %v1507_v30 = vmul.f32 %v1493_v1, %v8407_v43  ;;  %v8468_v18 = vld [vmem:[#allocation38_spill] sm:$0xff] }
 0x296   : > { %v6128_v60 = vadd.f32 %v8416_v25, %v1010_v39  ;;  %v1017_v22 = vadd.f32 %v8418_v57, %v1011_v12  ;;  %v6131_v33 = vadd.f32 %v1637_v35, %v1635_v5  ;;  %v1719_v53 = vmul.f32 %v1705_v40, %v8420_v55  ;;  %v1035_v59 = vpop.permute.xlu1 %1034  ;;  %v8423_v39 = vld [vmem:[#allocation19_spill] sm:$0xff]  ;;  %v8424_v40 = vld [vmem:[#allocation22_spill] sm:$0xff]  ;;  %v8433_v25 = vld [vmem:[#allocation53_spill] sm:$0xff] }
 0x297   : > { %8415 = vst [vmem:[#allocation136_spill] sm:$0xff] %v6123_v58  ;;  %v6135_v27 = vadd.f32 %v1483_v49, %v5985_v50  ;;  %v1729_v24 = vadd.f32 %v1727_v34, %v1725_v26  ;;  %v6138_v20 = vadd.f32 %v1507_v30, %v6023_v10  ;;  %v1749_v62 = vadd.f32 %v1747_v9, %v8359_v15  ;;  %v8425_v50 = vld [vmem:[#allocation146_spill] sm:$0xff]  ;;  %v8426_v26 = vld [vmem:[#allocation51_spill] sm:$0xff]  ;;  %v8428_v10 = vld [vmem:[#allocation129_spill] sm:$0xff] }
 0x298   : > { %8417 = vst [vmem:[#allocation113_spill] sm:$0xff] %v6128_v60  ;;  %8419 = vst [vmem:[#allocation44_spill] sm:$0xff] %v6131_v33  ;;  %v1717_v8 = vadd.f32 %v1715_v6, %v1017_v22  ;;  %v1037_v1 = vmul.f32 %v1035_v59, %v8412_v3  ;;  %v1038_v45 = vmul.f32 %v1035_v59, %v8317_v54  ;;  %v8429_v15 = vld [vmem:[#allocation147_spill] sm:$0xff]  ;;  %v8430_v9 = vld [vmem:[#allocation148_spill] sm:$0xff] }
 0x299   : > { %8421 = vst [vmem:[#allocation130_spill] sm:$0xff] %v6135_v27  ;;  %8422 = vst [vmem:[#allocation137_spill] sm:$0xff] %v6138_v20  ;;  %v1751_v5 = vmul.f32 %v5695_v17, %v8400_v29  ;;  %v479_v12 = vmul.f32 %v8424_v40, %v8423_v39  ;;  %v1739_v35 = vmul.f32 %v8425_v50, %v8413_v44  ;;  %v8432_v30 = vld [vmem:[#allocation59_spill] sm:$0xff]  ;;  %v8434_v17 = vld [vmem:[#allocation81_spill] sm:$0xff] }
 0x29a   : > { %v6150_v34 = vadd.f32 %v8426_v26, %v1037_v1  ;;  %v1044_v28 = vadd.f32 %v8428_v10, %v1038_v45  ;;  %v1761_v6 = vadd.f32 %v8430_v9, %v8429_v15  ;;  %v6155_v49 = vadd.f32 %v1719_v53, %v1717_v8  ;;  %v1062_v59 = vpop.permute.xlu1 %1061  ;;  %v8435_v10 = vld [vmem:[#allocation16_spill] sm:$0xff]  ;;  %v8462_v60 = vld [vmem:[#allocation171_spill] sm:$0xff]  ;;  %v8474_v43 = vld [vmem:[#allocation150_spill] sm:$0xff] }
 0x29b   : > { %v1068_v57 = vmul.f32 %v8433_v25, %v8432_v30  ;;  %v1069_v22 = vmul.f32 %v8434_v17, %v8318_v48  ;;  %v1743_v40 = vmul.f32 %v1729_v24, %v8420_v55  ;;  %v1064_v1 = vmul.f32 %v1062_v59, %v8412_v3  ;;  %v8438_v17 = vld [vmem:[#allocation25_spill] sm:$0xff] }
 0x29c   : > { %8427 = vst [vmem:[#allocation107_spill] sm:$0xff] %v6150_v34  ;;  %8431 = vst [vmem:[#allocation110_spill] sm:$0xff] %v6155_v49  ;;  %v1741_v50 = vadd.f32 %v1739_v35, %v1044_v28  ;;  %v1065_v26 = vmul.f32 %v1062_v59, %v8317_v54  ;;  %v1753_v45 = vadd.f32 %v1751_v5, %v1749_v62  ;;  %v8440_v54 = vld [vmem:[#allocation30_spill] sm:$0xff] }
 0x29d   : > { %v481_v20 = vadd.f32 %v479_v12, %v8435_v10  ;;  %v6165_v15 = vadd.f32 %v1068_v57, %v1064_v1  ;;  %v1763_v8 = vmul.f32 %v1761_v6, %v8413_v44  ;;  %v630_v62 = vmul.f32 %v8440_v54, %v8423_v39  ;;  %v8441_v44 = vld [vmem:[#allocation33_spill] sm:$0xff]  ;;  %v8460_v49 = vld [vmem:[#allocation170_spill] sm:$0xff] }
 0x29e   : > { %v1071_v53 = vadd.f32 %v1069_v22, %v1065_v26  ;;  %v6168_v9 = vadd.f32 %v1743_v40, %v1741_v50  ;;  %v1767_v48 = vmul.f32 %v1753_v45, %v8420_v55  ;;  %v2118_v5 = vmul.f32 %v8322_v42, %v5795_v21  ;;  %v8442_v22 = vld [vmem:[#allocation93_spill] sm:$0xff]  ;;  %v8443_v50 = vld [vmem:[#allocation12_spill] sm:$0xff] }
 0x29f   : > { %8436 = vst [vmem:[#allocation47_spill] sm:$0xff] %v6165_v15  ;;  %v483_v24 = vadd.f32 %v481_v20, %v8438_v17  ;;  %v632_v12 = vadd.f32 %v630_v62, %v8435_v10  ;;  %v781_v28 = vmul.f32 %v8441_v44, %v8423_v39  ;;  %v2119_v6 = vmul.f32 %v8322_v42, %v5811_v47  ;;  %v8444_v26 = vld [vmem:[#allocation41_spill] sm:$0xff]  ;;  %v8446_v44 = vld [vmem:[#allocation52_spill] sm:$0xff] }
 0x2a0   : > { %8437 = vst [vmem:[#allocation120_spill] sm:$0xff] %v6168_v9  ;;  %v1765_v25 = vadd.f32 %v1763_v8, %v1071_v53  ;;  %v2120_v20 = vadd.f32 %v2118_v5, %v5743_v23  ;;  %v2106_v53 = vpop.permute.xlu0 %2105  ;;  %v2253_v8 = vmul.f32 %v8322_v42, %v5911_v61  ;;  %v8458_v9 = vld [vmem:[#allocation169_spill] sm:$0xff]  ;;  %v3529_v55 = vld [vmem:[#allocation5 + $0x8] sm:$0xff] }
 0x2a1   : > { %3478 = vrcp.f32 %v483_v24  ;;  %v2121_v40 = vadd.f32 %v2119_v6, %v5829_v51  ;;  %v6192_v45 = vadd.f32 %v632_v12, %v8444_v26  ;;  %v3527_v15 = vld [vmem:[#allocation5 + $0x10] sm:$0xff] }
 0x2a2   : > { %v6172_v35 = vadd.f32 %v1767_v48, %v1765_v25  ;;  %v783_v48 = vadd.f32 %v781_v28, %v8435_v10  ;;  %v2255_v28 = vadd.f32 %v2253_v8, %v5964_v19 }
 0x2a3   : > { %3480 = vrcp.f32 %v6192_v45 }
 0x2a4   : > { %8439 = vst [vmem:[#allocation138_spill] sm:$0xff] %v6172_v35  ;;  %v6202_v6 = vadd.f32 %v783_v48, %v8446_v44  ;;  %v8447_v35 = vld [vmem:[#allocation104_spill] sm:$0xff]  ;;  %v8453_v44 = vld [vmem:[#allocation67_spill] sm:$0xff] }
 0x2a5   : > { %v2112_v12 = vadd.f32 %v2106_v53, %v8447_v35 }
 0x2a6   : > { %3482 = vrcp.f32 %v6202_v6 }
 0x2a8   : > { %v6183_v57 = vpop.permute.xlu1 %2072 }
 0x2a9   : > { %v2122_v59 = vmul.f32 %v6183_v57, %v8442_v22  ;;  %v2123_v1 = vmul.f32 %v6183_v57, %v8443_v50  ;;  %v2114_v62 = vmul.f32 %v5688_v38, %v6183_v57 }
 0x2ab   : > { %v3479_v25 = vpop.eup %3478  ;;  %v2124_v17 = vadd.f32 %v2122_v59, %v2120_v20  ;;  %v2125_v54 = vadd.f32 %v2123_v1, %v2121_v40  ;;  %v2116_v20 = vadd.f32 %v2114_v62, %v2112_v12  ;;  %v2258_v59 = vmul.f32 %v6183_v57, %v8371_v63 }
 0x2ac   : > { %v6199_v5 = vpop.permute.xlu1 %2283  ;;  %v487_v61 = vmul.f32 %v3479_v25, %v483_v24  ;;  %v2257_v40 = vmul.f32 %v6183_v57, %v8369_v13 }
 0x2ad   : > { %8445 = vst [vmem:[#allocation49_spill] sm:$0xff] %v6199_v5  ;;  %2128 = vrot.lane.b32.xlu1 %v2124_v17, %s3697_s19  ;;  %2130 = vrot.lane.b32.xlu0 %v2125_v54, %s3697_s19  ;;  %v2333_v1 = vmul.f32 %v6199_v5, %v8442_v22  ;;  %v2334_v48 = vmul.f32 %v6199_v5, %v8443_v50  ;;  %v6278_v2 = vpop.eup %3480 }
 0x2ae   : > { %v6222_v19 = vadd.f32 %v2258_v59, %v5834_v31  ;;  %v6224_v24 = vadd.f32 %v2257_v40, %v2255_v28  ;;  %v2384_v12 = vmul.f32 %v6199_v5, %v8453_v44  ;;  %v489_v31 = vsub.f32 2.0, %v487_v61  ;;  %v8455_v59 = vld [vmem:[#allocation106_spill] sm:$0xff] }
 0x2af   : > { %v6227_v8 = vadd.f32 %v2333_v1, %v5854_v32  ;;  %v6230_v17 = vadd.f32 %v2334_v48, %v5870_v52  ;;  %v2385_v32 = vmul.f32 %v6199_v5, %v8455_v59 }
 0x2b0   : > { %v6215_v26 = vpop.permute.xlu1 %2705  ;;  %8449 = vst [vmem:[#allocation140_spill] sm:$0xff] %v6222_v19  ;;  %8450 = vst [vmem:[#allocation76_spill] sm:$0xff] %v6224_v24  ;;  %v6250_v27 = vadd.f32 %v2384_v12, %v8458_v9  ;;  %v8467_v12 = vld [vmem:[#allocation108_spill] sm:$0xff]  ;;  %v6280_v56 = vmul.f32 %v3479_v25, %v489_v31 }
 0x2b1   : > { %8448 = vst [vmem:[#allocation114_spill] sm:$0xff] %v6215_v26  ;;  %2141 = vrot.lane.b32.xlu1 %v2116_v20, %s3697_s19  ;;  %8451 = vst [vmem:[#allocation141_spill] sm:$0xff] %v6227_v8  ;;  %v2755_v54 = vmul.f32 %v6215_v26, %v8442_v22  ;;  %v2756_v62 = vmul.f32 %v6215_v26, %v8443_v50  ;;  %v8454_v20 = vld [vmem:[#allocation17_spill] sm:$0xff]  ;;  %v2806_v52 = vmul.f32 %v6215_v26, %v8453_v44 }
 0x2b2   : > { %8452 = vst [vmem:[#allocation97_spill] sm:$0xff] %v6230_v17  ;;  %v1086_v28 = vmul.f32 2.0, %v8454_v20  ;;  %8459 = vst [vmem:[#allocation78_spill] sm:$0xff] %v6250_v27  ;;  %v2807_v61 = vmul.f32 %v6215_v26, %v8455_v59  ;;  %v6256_v34 = vadd.f32 %v2385_v32, %v8460_v49  ;;  %v8471_v32 = vld [vmem:[#allocation65_spill] sm:$0xff]  ;;  %v8480_v27 = vld [vmem:[#allocation119_spill] sm:$0xff] }
 0x2b3   : > { %v6244_v1 = vadd.f32 %v2755_v54, %v5873_v16  ;;  %v6247_v48 = vadd.f32 %v2756_v62, %v5888_v0  ;;  %v6259_v58 = vadd.f32 %v2806_v52, %v8462_v60  ;;  %v8464_v16 = vld [vmem:[#allocation155_spill] sm:$0xff]  ;;  %v8465_v54 = vld [vmem:[#allocation14_spill] sm:$0xff]  ;;  %v6264_v62 = vld [vmem:[%s3881_s24 + $0x8] sm:$0xff]  ;;  %v2426_v60 = vmul.f32 %v6199_v5, %v8471_v32 }
 0x2b4   : > { %v2108_v40 = vpop.permute.xlu1 %2107  ;;  %8461 = vst [vmem:[#allocation19_spill] sm:$0xff] %v6256_v34  ;;  %v1072_v0 = vmul.f32 %v8465_v54, %v8464_v16  ;;  %8466 = vst [vmem:[#allocation146_spill] sm:$0xff] %v6264_v62  ;;  %v2115_v9 = vmul.f32 %v6264_v62, %v6183_v57  ;;  %v8472_v52 = vld [vmem:[#allocation115_spill] sm:$0xff]  ;;  %v1102_v3 = vmul.f32 %v8464_v16, %v1086_v28 }
 0x2b5   : > { %8456 = vst [vmem:[#allocation145_spill] sm:$0xff] %v6244_v1  ;;  %8457 = vst [vmem:[#allocation50_spill] sm:$0xff] %v6247_v48  ;;  %v2109_v20 = vsel %vm1828_vm1, %v2106_v53, %v2108_v40  ;;  %2512 = vperm.xlu1 %3457, %v3527_v15   ;;  %v6270_v53 = vadd.f32 %v2807_v61, %v8468_v18  ;;  %v8470_v40 = vld [vmem:[#allocation158_spill] sm:$0xff]  ;;  %v2427_v36 = vmul.f32 %v6199_v5, %v8472_v52 }
 0x2b6   : > { %8463 = vst [vmem:[#allocation22_spill] sm:$0xff] %v6259_v58  ;;  %v2113_v33 = vadd.f32 %v2109_v20, %v8467_v12  ;;  %v1076_v49 = vmul.f32 %v8465_v54, %v8470_v40  ;;  %v1090_v30 = vmul.f32 %v8470_v40, %v8473_v14  ;;  %v1092_v20 = vmul.f32 %v8470_v40, %v1086_v28 }
 0x2b7   : > { %8469 = vst [vmem:[#allocation51_spill] sm:$0xff] %v6270_v53  ;;  %v1100_v61 = vmul.f32 %v8464_v16, %v8473_v14  ;;  %v6289_v4 = vadd.f32 %v2426_v60, %v8474_v43  ;;  %v6292_v53 = vadd.f32 %v2427_v36, %v6030_v41  ;;  %v1074_v25 = vsub.f32 %v1072_v0, %v1072_v0  ;;  %v8477_v43 = vld [vmem:[#allocation31_spill] sm:$0xff] }
 0x2b8   : > { %v2117_v18 = vadd.f32 %v2115_v9, %v2113_v33  ;;  %v1080_v31 = vmul.f32 %v8470_v40, %v8464_v16  ;;  %v6297_v33 = vpop.eup %3482  ;;  %v1078_v9 = vsub.f32 %v1076_v49, %v1076_v49  ;;  %v2848_v58 = vmul.f32 %v6215_v26, %v8471_v32 }
 0x2b9   : > { %2301 = vperm.xlu1 %3457, %v3529_v55   ;;  %8475 = vst [vmem:[#allocation129_spill] sm:$0xff] %v6289_v4  ;;  %8476 = vst [vmem:[#allocation147_spill] sm:$0xff] %v6292_v53  ;;  %v2849_v34 = vmul.f32 %v6215_v26, %v8472_v52  ;;  %v6305_v60 = vmul.f32 %v8477_v43, %v6280_v56  ;;  %v6309_v41 = vmul.f32 %v6278_v2, %v6192_v45  ;;  %v3530_v53 = vld [vmem:[#allocation5 + $0x18] sm:$0xff] }
 0x2ba   : > { %2143 = vrot.lane.b32.xlu0 %v2117_v18, %s3697_s19  ;;  %v1094_v36 = vadd.f32 %v1092_v20, %v1090_v30  ;;  %v1096_v0 = vmul.f32 %v1074_v25, %v8423_v39  ;;  %v1104_v18 = vadd.f32 %v1102_v3, %v1100_v61  ;;  %v1106_v49 = vmul.f32 %v1078_v9, %v8423_v39  ;;  %v8486_v61 = vld [vmem:[#allocation151_spill] sm:$0xff] }
 0x2bb   : > { %8478 = vst [vmem:[#allocation148_spill] sm:$0xff] %v6305_v60  ;;  %v6314_v4 = vadd.f32 %v2848_v58, %v6033_v11  ;;  %v6317_v48 = vadd.f32 %v2849_v34, %v8480_v27  ;;  %v6321_v43 = vmul.f32 %v6297_v33, %v6202_v6  ;;  %v1082_v45 = vsub.f32 %v1080_v31, %v1080_v31  ;;  %v8484_v6 = vld [vmem:[#allocation98_spill] sm:$0xff] }
 0x2bc   : > { %v2468_v30 = vmul.f32 %v6199_v5, %v8369_v13  ;;  %v2469_v3 = vmul.f32 %v6199_v5, %v8371_v63  ;;  %v6329_v20 = vmul.f32 %v5688_v38, %v8435_v10  ;;  %v1110_v11 = vmul.f32 %v8465_v54, %v8473_v14 }
 0x2bd   : > { %2723 = vperm.xlu1 %3457, %v3530_v53   ;;  %8479 = vst [vmem:[#allocation53_spill] sm:$0xff] %v6314_v4  ;;  %8481 = vst [vmem:[#allocation81_spill] sm:$0xff] %v6317_v48  ;;  %v1112_v58 = vmul.f32 %v8465_v54, %v1086_v28  ;;  %v1123_v27 = vadd.f32 %v1074_v25, %v1074_v25  ;;  %v6334_v34 = vadd.f32 %v1096_v0, %v1094_v36  ;;  %v8489_v14 = vmov 5   ;;  %v8490_v0 = vld [vmem:[#allocation166_spill] sm:$0xff] }
 0x2be   : > { %2518 = vperm.xlu0 %3458, %v3527_v15   ;;  %8482 = vst [vmem:[#allocation16_spill] sm:$0xff] %v6329_v20  ;;  %v6337_v15 = vadd.f32 %v2468_v30, %v8484_v6  ;;  %v6340_v31 = vadd.f32 %v2469_v3, %v8486_v61  ;;  %v2890_v48 = vmul.f32 %v6215_v26, %v8369_v13  ;;  %v640_v25 = vsub.f32 2.0, %v6309_v41  ;;  %v8493_v3 = vld [vmem:[#allocation167_spill] sm:$0xff]  ;;  %v8494_v41 = vld [vmem:[#allocation42_spill] sm:$0xff] }
 0x2bf   : > { %8483 = vst [vmem:[#allocation25_spill] sm:$0xff] %v6334_v34  ;;  %v6344_v4 = vadd.f32 %v1106_v49, %v1104_v18  ;;  %v1116_v60 = vmul.f32 %v1082_v45, %v8423_v39  ;;  %v1128_v5 = vadd.f32 %v1078_v9, %v1078_v9  ;;  %v2891_v28 = vmul.f32 %v6215_v26, %v8371_v63  ;;  %v8496_v61 = vld [vmem:[#allocation54_spill] sm:$0xff] }
 0x2c0   : > { %8485 = vst [vmem:[#allocation30_spill] sm:$0xff] %v6337_v15  ;;  %8487 = vst [vmem:[#allocation33_spill] sm:$0xff] %v6340_v31  ;;  %v6353_v36 = vmul.f32 %v5688_v38, %v8423_v39  ;;  %v2169_v18 = vmul.f32 %v8322_v42, %v8490_v0  ;;  %v6358_v49 = vadd.f32 %v2890_v48, %v6085_v46 }
 0x2c1   : > { %8488 = vst [vmem:[#allocation93_spill] sm:$0xff] %v6344_v4  ;;  %3459 = vset.pattern.permute.xlu1 %v8489_v14  ;;  %v1114_v9 = vadd.f32 %v1112_v58, %v1110_v11  ;;  %v6361_v30 = vadd.f32 %v1123_v27, %v8453_v44  ;;  %v2170_v63 = vmul.f32 %v8322_v42, %v8493_v3 }
 0x2c2   : > { %2729 = vperm.xlu1 %3459, %v3530_v53   ;;  %2307 = vperm.xlu0 %3458, %v3529_v55   ;;  %8491 = vst [vmem:[#allocation12_spill] sm:$0xff] %v6358_v49  ;;  %v6366_v6 = vadd.f32 %v2891_v28, %v8494_v41  ;;  %v2157_v53 = vmul.f32 %v8496_v61, %v6183_v57  ;;  %v791_v28 = vsub.f32 2.0, %v6321_v43  ;;  %v8498_v41 = vld [vmem:[#allocation168_spill] sm:$0xff]  ;;  %v8499_v49 = vld [vmem:[#allocation85_spill] sm:$0xff] }
 0x2c3   : > { %8492 = vst [vmem:[#allocation41_spill] sm:$0xff] %v6361_v30  ;;  %v2156_v55 = vmul.f32 %v8470_v40, %v6183_v57  ;;  %v2174_v46 = vmul.f32 %v6183_v57, %v8455_v59  ;;  %v2173_v48 = vmul.f32 %v6183_v57, %v8453_v44  ;;  %v6377_v11 = vadd.f32 %v1128_v5, %v8471_v32  ;;  %v8500_v5 = vld [vmem:[#allocation21_spill] sm:$0xff] }
 0x2c4   : > { %8495 = vst [vmem:[#allocation52_spill] sm:$0xff] %v6366_v6  ;;  %v1133_v58 = vadd.f32 %v1082_v45, %v1082_v45  ;;  %v1137_v27 = vmul.f32 %v5688_v38, %v6329_v20  ;;  %v1139_v14 = vmul.f32 %v8470_v40, %v6334_v34  ;;  %v2172_v6 = vadd.f32 %v2170_v63, %v8498_v41  ;;  %v8501_v63 = vld [vmem:[#allocation161_spill] sm:$0xff] }
 0x2c5   : > { %8497 = vst [vmem:[#allocation67_spill] sm:$0xff] %v6377_v11  ;;  %v2171_v31 = vadd.f32 %v2169_v18, %v8499_v49  ;;  %v2540_v15 = vmul.f32 %v8500_v5, %v5795_v21  ;;  %v1143_v45 = vmul.f32 %v8464_v16, %v6344_v4  ;;  %v1193_v26 = vmul.f32 %v5688_v38, %v6353_v36 }
 0x2c6   : > { %2162 = vrot.lane.b32.xlu1 %v2157_v53, %s3697_s19  ;;  %2160 = vrot.lane.b32.xlu0 %v2156_v55, %s3697_s19  ;;  %v1195_v43 = vmul.f32 %v8470_v40, %v6361_v30  ;;  %v2541_v53 = vmul.f32 %v8500_v5, %v5811_v47  ;;  %v2176_v55 = vadd.f32 %v2174_v46, %v2172_v6 }
 0x2c7   : > { %v2175_v1 = vadd.f32 %v2173_v48, %v2171_v31  ;;  %v2545_v18 = vmul.f32 %v8501_v63, %v8443_v50  ;;  %v2544_v21 = vmul.f32 %v8501_v63, %v8442_v22  ;;  %v1151_v17 = vmul.f32 %v5688_v38, %v6334_v34 }
 0x2c8   : > { %v1153_v8 = vmul.f32 %v8470_v40, %v6329_v20  ;;  %v1207_v24 = vmul.f32 %v5688_v38, %v6361_v30  ;;  %v1209_v47 = vmul.f32 %v8470_v40, %v6353_v36  ;;  %v1141_v6 = vsub.f32 %v1137_v27, %v1139_v14 }
 0x2c9   : > { %v2543_v50 = vadd.f32 %v2541_v53, %v5829_v51  ;;  %v2542_v31 = vadd.f32 %v2540_v15, %v5743_v23  ;;  %v6414_v46 = vadd.f32 %v1116_v60, %v1114_v9  ;;  %v6417_v48 = vadd.f32 %v1133_v58, %v8369_v13  ;;  %v8504_v53 = vld [vmem:[#allocation45_spill] sm:$0xff] }
 0x2ca   : > { %2181 = vrot.lane.b32.xlu1 %v2176_v55, %s3697_s19  ;;  %2179 = vrot.lane.b32.xlu0 %v2175_v1, %s3697_s19  ;;  %v1197_v19 = vsub.f32 %v1193_v26, %v1195_v43  ;;  %v1199_v29 = vmul.f32 %v8464_v16, %v6377_v11  ;;  %v642_v62 = vmul.f32 %v6278_v2, %v640_v25 }
 0x2cb   : > { %8502 = vst [vmem:[#allocation17_spill] sm:$0xff] %v6414_v46  ;;  %8503 = vst [vmem:[#allocation106_spill] sm:$0xff] %v6417_v48  ;;  %v793_v27 = vmul.f32 %v6297_v33, %v791_v28  ;;  %v2547_v14 = vadd.f32 %v2545_v18, %v2543_v50  ;;  %v2546_v55 = vadd.f32 %v2544_v21, %v2542_v31  ;;  %v8506_v21 = vld [vmem:[#allocation56_spill] sm:$0xff]  ;;  %v8510_v31 = vld [vmem:[#allocation57_spill] sm:$0xff] }
 0x2cc   : > { %v1155_v1 = vadd.f32 %v1153_v8, %v1151_v17  ;;  %v1157_v51 = vmul.f32 %v8464_v16, %v6414_v46  ;;  %v1211_v23 = vadd.f32 %v1209_v47, %v1207_v24  ;;  %v1213_v60 = vmul.f32 %v8464_v16, %v6417_v48 }
 0x2cd   : > { %v1145_v15 = vsub.f32 %v1141_v6, %v1143_v45  ;;  %v1147_v26 = vmul.f32 %v8465_v54, %v6414_v46  ;;  %v2591_v2 = vmul.f32 %v8500_v5, %v8490_v0  ;;  %v1201_v33 = vsub.f32 %v1197_v19, %v1199_v29  ;;  %v8508_v6 = vld [vmem:[#allocation55_spill] sm:$0xff] }
 0x2ce   : > { %2552 = vrot.lane.b32.xlu1 %v2547_v14, %s3697_s19  ;;  %2550 = vrot.lane.b32.xlu0 %v2546_v55, %s3697_s19  ;;  %v1203_v8 = vmul.f32 %v8465_v54, %v6417_v48  ;;  %v1161_v24 = vmul.f32 %v8465_v54, %v6344_v4  ;;  %v2592_v17 = vmul.f32 %v8500_v5, %v8493_v3  ;;  %v8512_v55 = vld [vmem:[#allocation58_spill] sm:$0xff] }
 0x2cf   : > { %v2579_v25 = vmul.f32 %v8496_v61, %v8501_v63  ;;  %v2578_v9 = vmul.f32 %v8470_v40, %v8501_v63  ;;  %v2596_v58 = vmul.f32 %v8501_v63, %v8455_v59  ;;  %v2595_v29 = vmul.f32 %v8501_v63, %v8453_v44 }
 0x2d0   : > { %v1159_v19 = vadd.f32 %v1157_v51, %v1155_v1  ;;  %v1215_v0 = vadd.f32 %v1213_v60, %v1211_v23  ;;  %v1217_v28 = vmul.f32 %v8465_v54, %v6377_v11  ;;  %v1165_v3 = vmul.f32 %v5688_v38, %v6344_v4  ;;  %v8514_v23 = vld [vmem:[#allocation82_spill] sm:$0xff] }
 0x2d1   : > { %v1167_v45 = vmul.f32 %v8470_v40, %v6414_v46  ;;  %v2594_v59 = vadd.f32 %v2592_v17, %v8498_v41  ;;  %v2593_v43 = vadd.f32 %v2591_v2, %v8499_v49  ;;  %v6458_v18 = vmul.f32 %v8504_v53, %v642_v62 }
 0x2d2   : > { %2584 = vrot.lane.b32.xlu1 %v2579_v25, %s3697_s19  ;;  %2582 = vrot.lane.b32.xlu0 %v2578_v9, %s3697_s19  ;;  %v6462_v47 = vmul.f32 %v8506_v21, %v6280_v56  ;;  %v6465_v50 = vmul.f32 %v8508_v6, %v793_v27  ;;  %v6468_v14 = vmul.f32 %v8510_v31, %v642_v62  ;;  %v8519_v6 = vld [vmem:[#allocation162_spill] sm:$0xff] }
 0x2d3   : > { %8505 = vst [vmem:[#allocation169_spill] sm:$0xff] %v6458_v18  ;;  %v6471_v1 = vmul.f32 %v8512_v55, %v793_v27  ;;  %v6473_v51 = vsub.f32 %v1145_v15, %v1147_v26  ;;  %v2598_v41 = vadd.f32 %v2596_v58, %v2594_v59  ;;  %v2597_v49 = vadd.f32 %v2595_v29, %v2593_v43  ;;  %v8515_v27 = vld [vmem:[#allocation121_spill] sm:$0xff]  ;;  %v8518_v58 = vld [vmem:[#allocation103_spill] sm:$0xff] }
 0x2d4   : > { %8507 = vst [vmem:[#allocation170_spill] sm:$0xff] %v6462_v47  ;;  %8509 = vst [vmem:[#allocation171_spill] sm:$0xff] %v6465_v50  ;;  %v1258_v60 = vmul.f32 %v8514_v23, %v8423_v39  ;;  %v6477_v2 = vsub.f32 %v1201_v33, %v1203_v8  ;;  %v6479_v56 = vsub.f32 %v1159_v19, %v1161_v24  ;;  %v8516_v26 = vld [vmem:[#allocation77_spill] sm:$0xff]  ;;  %v8517_v33 = vld [vmem:[#allocation83_spill] sm:$0xff] }
 0x2d5   : > { %8511 = vst [vmem:[#allocation155_spill] sm:$0xff] %v6468_v14  ;;  %8513 = vst [vmem:[#allocation14_spill] sm:$0xff] %v6471_v1  ;;  %v1171_v17 = vmul.f32 %v8464_v16, %v6329_v20  ;;  %v6483_v25 = vsub.f32 %v1215_v0, %v1217_v28  ;;  %v1169_v62 = vsub.f32 %v1165_v3, %v1167_v45  ;;  %v8520_v55 = vld [vmem:[#allocation101_spill] sm:$0xff] }
 0x2d6   : > { %2603 = vrot.lane.b32.xlu1 %v2598_v41, %s3697_s19  ;;  %2601 = vrot.lane.b32.xlu0 %v2597_v49, %s3697_s19  ;;  %v2211_v15 = vmul.f32 %v8322_v42, %v8515_v27  ;;  %v1388_v9 = vmul.f32 %v8516_v26, %v8423_v39  ;;  %v1518_v8 = vmul.f32 %v8517_v33, %v8423_v39 }
 0x2d7   : > { %v1175_v24 = vmul.f32 %v8465_v54, %v6334_v34  ;;  %v2212_v29 = vmul.f32 %v8322_v42, %v8518_v58  ;;  %v2199_v19 = vmul.f32 %v6059_v7, %v6183_v57  ;;  %v2198_v0 = vmul.f32 %v8464_v16, %v6183_v57 }
 0x2d8   : > { %v2216_v28 = vmul.f32 %v6183_v57, %v8472_v52  ;;  %v2215_v3 = vmul.f32 %v6183_v57, %v8471_v32  ;;  %v1260_v45 = vadd.f32 %v1258_v60, %v8435_v10  ;;  %v1221_v59 = vmul.f32 %v5688_v38, %v6377_v11 }
 0x2d9   : > { %v1223_v43 = vmul.f32 %v8470_v40, %v6417_v48  ;;  %v1179_v53 = vmul.f32 %v5688_v38, %v6414_v46  ;;  %v1181_v21 = vmul.f32 %v8470_v40, %v6344_v4  ;;  %v2214_v31 = vadd.f32 %v2212_v29, %v8519_v6  ;;  %v8521_v29 = vld [vmem:[#allocation73_spill] sm:$0xff] }
 0x2da   : > { %2204 = vrot.lane.b32.xlu1 %v2199_v19, %s3697_s19  ;;  %2202 = vrot.lane.b32.xlu0 %v2198_v0, %s3697_s19  ;;  %v2213_v41 = vadd.f32 %v2211_v15, %v8520_v55  ;;  %v1390_v49 = vadd.f32 %v1388_v9, %v8435_v10  ;;  %v1520_v60 = vadd.f32 %v1518_v8, %v8435_v10 }
 0x2db   : > { %v1235_v18 = vmul.f32 %v5688_v38, %v6417_v48  ;;  %v1237_v50 = vmul.f32 %v8470_v40, %v6377_v11  ;;  %v1173_v46 = vadd.f32 %v1171_v17, %v1169_v62  ;;  %v1227_v19 = vmul.f32 %v8464_v16, %v6353_v36  ;;  %v8522_v62 = vld [vmem:[#allocation79_spill] sm:$0xff]  ;;  %v8536_v48 = vld [vmem:[#allocation68_spill] sm:$0xff]  ;;  %v8538_v11 = vld [vmem:[#allocation70_spill] sm:$0xff] }
 0x2dc   : > { %v2218_v4 = vadd.f32 %v2216_v28, %v2214_v31  ;;  %v2217_v0 = vadd.f32 %v2215_v3, %v2213_v41  ;;  %v6527_v61 = vadd.f32 %v1260_v45, %v8521_v29  ;;  %v1225_v15 = vsub.f32 %v1221_v59, %v1223_v43  ;;  %v8523_v3 = vld [vmem:[#allocation84_spill] sm:$0xff] }
 0x2dd   : > { %v1231_v9 = vmul.f32 %v8465_v54, %v6361_v30  ;;  %v1185_v38 = vmul.f32 %v8464_v16, %v6334_v34  ;;  %v1183_v8 = vadd.f32 %v1181_v21, %v1179_v53  ;;  %v1241_v40 = vmul.f32 %v8464_v16, %v6361_v30  ;;  %v6550_v53 = vld [vmem:[%s3881_s24 + $0x20] sm:$0xff]  ;;  %v8525_v41 = vld [vmem:[#allocation24_spill] sm:$0xff] }
 0x2de   : > { %2223 = vrot.lane.b32.xlu1 %v2218_v4, %s3697_s19  ;;  %2221 = vrot.lane.b32.xlu0 %v2217_v0, %s3697_s19  ;;  %v2633_v17 = vmul.f32 %v8500_v5, %v8515_v27  ;;  %v6540_v28 = vadd.f32 %v1390_v49, %v8522_v62  ;;  %v6543_v45 = vadd.f32 %v1520_v60, %v8523_v3  ;;  %3484 = vrcp.f32 %v6527_v61  ;;  %v8526_v49 = vld [vmem:[#allocation61_spill] sm:$0xff]  ;;  %v8528_v0 = vld [vmem:[#allocation62_spill] sm:$0xff]  ;;  %v8566_v34 = vld [vmem:[#allocation75_spill] sm:$0xff] }
 0x2df   : > { %v1239_v59 = vadd.f32 %v1237_v50, %v1235_v18  ;;  %v2634_v43 = vmul.f32 %v8500_v5, %v8518_v58  ;;  %v2621_v16 = vmul.f32 %v6059_v7, %v8501_v63  ;;  %8524 = vst [vmem:[#allocation38_spill] sm:$0xff] %v6550_v53  ;;  %v2620_v4 = vmul.f32 %v6550_v53, %v8501_v63 }
 0x2e0   : > { %v2638_v27 = vmul.f32 %v8501_v63, %v8472_v52  ;;  %v2637_v21 = vmul.f32 %v8501_v63, %v8471_v32  ;;  %v6559_v18 = vadd.f32 %v1175_v24, %v1173_v46  ;;  %v1229_v50 = vadd.f32 %v1227_v19, %v1225_v15  ;;  %v8527_v19 = vld [vmem:[#allocation26_spill] sm:$0xff] }
 0x2e1   : > { %v1189_v58 = vmul.f32 %v8465_v54, %v6329_v20  ;;  %v1187_v7 = vsub.f32 %v1183_v8, %v1185_v38  ;;  %v2636_v31 = vadd.f32 %v2634_v43, %v8519_v6  ;;  %v2635_v52 = vadd.f32 %v2633_v17, %v8520_v55  ;;  %v8530_v6 = vld [vmem:[#allocation63_spill] sm:$0xff]  ;;  %v8531_v55 = vld [vmem:[#allocation34_spill] sm:$0xff]  ;;  %v8532_v17 = vld [vmem:[#allocation64_spill] sm:$0xff] }
 0x2e2   : > { %2626 = vrot.lane.b32.xlu1 %v2621_v16, %s3697_s19  ;;  %2624 = vrot.lane.b32.xlu0 %v2620_v4, %s3697_s19  ;;  %v547_v60 = vadd.f32 %v8526_v49, %v8525_v41  ;;  %3486 = vrcp.f32 %v6540_v28  ;;  %v1243_v46 = vsub.f32 %v1239_v59, %v1241_v40  ;;  %v1245_v24 = vmul.f32 %v8465_v54, %v6353_v36  ;;  %v8529_v16 = vld [vmem:[#allocation28_spill] sm:$0xff]  ;;  %v8533_v41 = vld [vmem:[#allocation35_spill] sm:$0xff]  ;;  %v8534_v49 = vld [vmem:[#allocation66_spill] sm:$0xff] }
 0x2e3   : > { %v574_v15 = vadd.f32 %v8528_v0, %v8527_v19  ;;  %3488 = vrcp.f32 %v6543_v45  ;;  %v2640_v38 = vadd.f32 %v2638_v27, %v2636_v31  ;;  %v2639_v8 = vadd.f32 %v2637_v21, %v2635_v52  ;;  %v8535_v54 = vld [vmem:[#allocation37_spill] sm:$0xff]  ;;  %v8537_v0 = vld [vmem:[#allocation40_spill] sm:$0xff]  ;;  %v2530_v31 = vpop.permute.xlu1 %2529  ;;  %v8539_v52 = vld [vmem:[#allocation43_spill] sm:$0xff] }
 0x2e4   : > { %v601_v43 = vadd.f32 %v8530_v6, %v8529_v16  ;;  %v698_v4 = vadd.f32 %v8532_v17, %v8531_v55  ;;  %v725_v40 = vadd.f32 %v8534_v49, %v8533_v41  ;;  %v6581_v59 = vadd.f32 %v1231_v9, %v1229_v50  ;;  %v8540_v16 = vld [vmem:[#allocation72_spill] sm:$0xff]  ;;  %v8541_v9 = vld [vmem:[#allocation46_spill] sm:$0xff]  ;;  %v2528_v49 = vpop.permute.xlu0 %2527  ;;  %v8568_v20 = vld [vmem:[#allocation99_spill] sm:$0xff] }
 0x2e5   : > { %v752_v19 = vadd.f32 %v8536_v48, %v8535_v54  ;;  %v849_v27 = vadd.f32 %v8538_v11, %v8537_v0  ;;  %v1648_v21 = vmul.f32 %v8391_v37, %v8423_v39  ;;  %v876_v6 = vadd.f32 %v8540_v16, %v8539_v52  ;;  %v8542_v50 = vld [vmem:[#allocation74_spill] sm:$0xff]  ;;  %v6611_v54 = vld [vmem:[%s3881_s24 + $0x30] sm:$0xff] }
 0x2e6   : > { %2645 = vrot.lane.b32.xlu1 %v2640_v38, %s3697_s19  ;;  %2643 = vrot.lane.b32.xlu0 %v2639_v8, %s3697_s19  ;;  %v903_v55 = vadd.f32 %v8542_v50, %v8541_v9  ;;  %v6595_v17 = vadd.f32 %v1189_v58, %v1187_v7  ;;  %v6597_v48 = vadd.f32 %v1245_v24, %v1243_v46  ;;  %v6606_v38 = vld [vmem:[%s3881_s24 + $0x38] sm:$0xff] }
 0x2e7   : > { %v6600_v11 = vmul.f32 %v547_v60, %v6462_v47  ;;  %v6603_v41 = vmul.f32 %v574_v15, %v6462_v47  ;;  %8545 = vst [vmem:[#allocation115_spill] sm:$0xff] %v6606_v38  ;;  %v2241_v8 = vmul.f32 %v6606_v38, %v6183_v57  ;;  %8546 = vst [vmem:[#allocation20_spill] sm:$0xff] %v6611_v54 }
 0x2e8   : > { %v2240_v58 = vmul.f32 %v6611_v54, %v6183_v57  ;;  %v6616_v7 = vmul.f32 %v601_v43, %v6462_v47  ;;  %v6619_v60 = vmul.f32 %v698_v4, %v6468_v14  ;;  %v6622_v46 = vmul.f32 %v725_v40, %v6468_v14  ;;  %v3485_v43 = vpop.eup %3484 }
 0x2e9   : > { %8543 = vst [vmem:[#allocation158_spill] sm:$0xff] %v6600_v11  ;;  %8544 = vst [vmem:[#allocation65_spill] sm:$0xff] %v6603_v41  ;;  %v2531_v24 = vsel %vm1828_vm1, %v2528_v49, %v2530_v31  ;;  %v6626_v15 = vmul.f32 %v752_v19, %v6468_v14  ;;  %v6629_v0 = vmul.f32 %v849_v27, %v6471_v1  ;;  %v6647_v31 = vld [vmem:[%s3881_s24] sm:$0xff]  ;;  %v8560_v41 = vld [vmem:[#allocation76_spill] sm:$0xff] }
 0x2ea   : > { %8547 = vst [vmem:[#allocation150_spill] sm:$0xff] %v6616_v7  ;;  %8548 = vst [vmem:[#allocation31_spill] sm:$0xff] %v6619_v60  ;;  %v1650_v52 = vadd.f32 %v1648_v21, %v8435_v10  ;;  %2246 = vrot.lane.b32.xlu1 %v2241_v8, %s3697_s19  ;;  %2244 = vrot.lane.b32.xlu0 %v2240_v58, %s3697_s19  ;;  %v6635_v4 = vmul.f32 %v876_v6, %v6471_v1  ;;  %v8558_v60 = vld [vmem:[#allocation23_spill] sm:$0xff]  ;;  %v6680_v11 = vld [vmem:[%s3881_s24 + $0x10] sm:$0xff] }
 0x2eb   : > { %8549 = vst [vmem:[#allocation119_spill] sm:$0xff] %v6622_v46  ;;  %8550 = vst [vmem:[#allocation98_spill] sm:$0xff] %v6626_v15  ;;  %v6638_v40 = vmul.f32 %v903_v55, %v6471_v1  ;;  %v1296_v19 = vmul.f32 %v8521_v29, %v8442_v22  ;;  %v1320_v27 = vmul.f32 %v8521_v29, %v8453_v44  ;;  %v8556_v15 = vld [vmem:[#allocation146_spill] sm:$0xff] }
 0x2ec   : > { %8551 = vst [vmem:[#allocation151_spill] sm:$0xff] %v6629_v0  ;;  %8552 = vst [vmem:[#allocation166_spill] sm:$0xff] %v6635_v4  ;;  %v1344_v21 = vmul.f32 %v8521_v29, %v8471_v32  ;;  %v2536_v16 = vmul.f32 %v6647_v31, %v8501_v63  ;;  %v2534_v6 = vadd.f32 %v2528_v49, %v8447_v35  ;;  %v3487_v50 = vpop.eup %3486  ;;  %v8559_v4 = vld [vmem:[#allocation140_spill] sm:$0xff] }
 0x2ed   : > { %8553 = vst [vmem:[#allocation167_spill] sm:$0xff] %v6638_v40  ;;  %8554 = vst [vmem:[#allocation42_spill] sm:$0xff] %v6647_v31  ;;  %v2535_v9 = vadd.f32 %v2531_v24, %v8467_v12  ;;  %v1422_v55 = vmul.f32 %v8516_v26, %v6477_v2  ;;  %v1368_v8 = vmul.f32 %v8521_v29, %v8369_v13  ;;  %v3489_v40 = vpop.eup %3488 }
 0x2ee   : > { %v6659_v58 = vmul.f32 %v6647_v31, %v8521_v29  ;;  %v6663_v46 = vmul.f32 %v8556_v15, %v8521_v29  ;;  %v1266_v49 = vmul.f32 %v3485_v43, %v6527_v61  ;;  %v6667_v24 = vadd.f32 %v1650_v52, %v8558_v60  ;;  %2265 = vrot.lane.b32.xlu1 %v8559_v4, %s3697_s19 }
 0x2ef   : > { %v2537_v7 = vmul.f32 %v8556_v15, %v8501_v63  ;;  %2263 = vrot.lane.b32.xlu0 %v8560_v41, %s3697_s19  ;;  %v1446_v0 = vmul.f32 %v8516_v26, %v6483_v25  ;;  %v1470_v14 = vmul.f32 %v8516_v26, %v6581_v59  ;;  %v6684_v61 = vmul.f32 %v6680_v11, %v8521_v29 }
 0x2f0   : > { %8555 = vst [vmem:[#allocation168_spill] sm:$0xff] %v6659_v58  ;;  %8557 = vst [vmem:[#allocation85_spill] sm:$0xff] %v6663_v46  ;;  %v6688_v52 = vmul.f32 %v6550_v53, %v8521_v29  ;;  %v1396_v4 = vmul.f32 %v3487_v50, %v6540_v28  ;;  %v1292_v41 = vmul.f32 %v8514_v23, %v6477_v2  ;;  %3490 = vrcp.f32 %v6667_v24  ;;  %v8567_v46 = vld [vmem:[#allocation128_spill] sm:$0xff] }
 0x2f1   : > { %8561 = vst [vmem:[#allocation45_spill] sm:$0xff] %v6684_v61  ;;  %v2538_v1 = vadd.f32 %v2536_v16, %v2534_v6  ;;  %v2539_v47 = vadd.f32 %v2537_v7, %v2535_v9  ;;  %v1526_v15 = vmul.f32 %v3489_v40, %v6543_v45  ;;  %v1316_v35 = vmul.f32 %v8514_v23, %v6483_v25 }
 0x2f2   : > { %8562 = vst [vmem:[#allocation56_spill] sm:$0xff] %v6688_v52  ;;  %v1340_v31 = vmul.f32 %v8514_v23, %v6581_v59  ;;  %v6700_v61 = vmul.f32 %v6611_v54, %v8521_v29  ;;  %v1268_v52 = vsub.f32 2.0, %v1266_v49  ;;  %v1424_v28 = vadd.f32 %v1422_v55, %v6473_v51 }
 0x2f3   : > { %v1364_v7 = vmul.f32 %v8514_v23, %v6597_v48  ;;  %2563 = vrot.lane.b32.xlu0 %v2538_v1, %s3697_s19  ;;  %2565 = vrot.lane.b32.xlu1 %v2539_v47, %s3697_s19  ;;  %v1426_v45 = vmul.f32 %v8522_v62, %v8442_v22  ;;  %v1552_v16 = vmul.f32 %v8517_v33, %v6477_v2  ;;  %v1398_v9 = vsub.f32 2.0, %v1396_v4 }
 0x2f4   : > { %8563 = vst [vmem:[#allocation55_spill] sm:$0xff] %v6700_v61  ;;  %v1448_v29 = vadd.f32 %v1446_v0, %v6479_v56  ;;  %v1472_v6 = vadd.f32 %v1470_v14, %v6559_v18  ;;  %v1294_v55 = vadd.f32 %v1292_v41, %v6473_v51  ;;  %v2662_v49 = vmul.f32 %v6611_v54, %v8501_v63 }
 0x2f5   : > { %v2663_v1 = vmul.f32 %v6606_v38, %v8501_v63  ;;  %v1528_v47 = vsub.f32 2.0, %v1526_v15  ;;  %v1318_v61 = vadd.f32 %v1316_v35, %v6479_v56  ;;  %v1342_v53 = vadd.f32 %v1340_v31, %v6559_v18  ;;  %v8564_v31 = vld [vmem:[#allocation112_spill] sm:$0xff] }
 0x2f6   : > { %v1450_v12 = vmul.f32 %v8522_v62, %v8453_v44  ;;  %v1270_v0 = vmul.f32 %v3485_v43, %v1268_v52  ;;  %v1366_v14 = vadd.f32 %v1364_v7, %v6595_v17  ;;  %v1494_v4 = vmul.f32 %v8516_v26, %v6597_v48 }
 0x2f7   : > { %2666 = vrot.lane.b32.xlu0 %v2662_v49, %s3697_s19  ;;  %2668 = vrot.lane.b32.xlu1 %v2663_v1, %s3697_s19  ;;  %v1554_v41 = vadd.f32 %v1552_v16, %v6473_v51  ;;  %v1556_v35 = vmul.f32 %v8523_v3, %v8442_v22  ;;  %v1474_v15 = vmul.f32 %v8522_v62, %v8471_v32 }
 0x2f8   : > { %v6735_v43 = vmul.f32 %v8516_v26, %v8564_v31  ;;  %v1400_v52 = vmul.f32 %v3487_v50, %v1398_v9  ;;  %v1298_v7 = vadd.f32 %v1296_v19, %v1294_v55  ;;  %v1428_v38 = vadd.f32 %v1426_v45, %v1424_v28  ;;  %v8569_v50 = vld [vmem:[#allocation149_spill] sm:$0xff]  ;;  %v8570_v19 = vld [vmem:[#allocation124_spill] sm:$0xff] }
 0x2f9   : > { %v6739_v49 = vmul.f32 %v8516_v26, %v6353_v36  ;;  %v1530_v1 = vmul.f32 %v3489_v40, %v1528_v47  ;;  %v1322_v54 = vadd.f32 %v1320_v27, %v1318_v61  ;;  %v1346_v16 = vadd.f32 %v1344_v21, %v1342_v53  ;;  %v8571_v40 = vld [vmem:[#allocation18_spill] sm:$0xff]  ;;  %v8572_v21 = vld [vmem:[#allocation80_spill] sm:$0xff]  ;;  %v8574_v61 = vld [vmem:[#allocation123_spill] sm:$0xff] }
 0x2fa   : > { %v1452_v63 = vadd.f32 %v1450_v12, %v1448_v29  ;;  %v1276_v5 = vmul.f32 %v8566_v34, %v1270_v0  ;;  %v1406_v30 = vmul.f32 %v8567_v46, %v1400_v52  ;;  %v1370_v58 = vadd.f32 %v1368_v8, %v1366_v14  ;;  %v3491_v12 = vpop.eup %3490 }
 0x2fb   : > { %8565 = vst [vmem:[#allocation57_spill] sm:$0xff] %v6739_v49  ;;  %2685 = vrot.lane.b32.xlu0 %v8568_v20, %s3697_s19  ;;  %2687 = vrot.lane.b32.xlu1 %v8569_v50, %s3697_s19  ;;  %v6748_v28 = vmul.f32 %v8570_v19, %v1530_v1  ;;  %v1558_v45 = vadd.f32 %v1556_v35, %v1554_v41  ;;  %v8577_v41 = vld [vmem:[#allocation141_spill] sm:$0xff] }
 0x2fc   : > { %v1476_v9 = vadd.f32 %v1474_v15, %v1472_v6  ;;  %v2076_v53 = vmul.f32 %v8322_v42, %v8571_v40  ;;  %v1682_v34 = vmul.f32 %v8391_v37, %v6477_v2  ;;  %v1496_v46 = vadd.f32 %v1494_v4, %v6595_v17  ;;  %v8575_v6 = vld [vmem:[#allocation126_spill] sm:$0xff]  ;;  %v8578_v35 = vld [vmem:[#allocation97_spill] sm:$0xff] }
 0x2fd   : > { %v1498_v20 = vmul.f32 %v8522_v62, %v8369_v13  ;;  %v2075_v27 = vmul.f32 %v8322_v42, %v8423_v39  ;;  %v6760_v8 = vmul.f32 %v8572_v21, %v1400_v52  ;;  %v6763_v29 = vmul.f32 %v8574_v61, %v1270_v0 }
 0x2fe   : > { %v6766_v55 = vmul.f32 %v8575_v6, %v1530_v1  ;;  %v1576_v2 = vmul.f32 %v8517_v33, %v6483_v25  ;;  %v6770_v47 = vmul.f32 %v1298_v7, %v1276_v5  ;;  %v6772_v14 = vmul.f32 %v1428_v38, %v1406_v30  ;;  %v8580_v7 = vld [vmem:[#allocation15_spill] sm:$0xff] }
 0x2ff   : > { %8573 = vst [vmem:[#allocation58_spill] sm:$0xff] %v6760_v8  ;;  %v1600_v4 = vmul.f32 %v8517_v33, %v6581_v59  ;;  %2339 = vrot.lane.b32.xlu0 %v8577_v41, %s3697_s19  ;;  %2341 = vrot.lane.b32.xlu1 %v8578_v35, %s3697_s19  ;;  %v1656_v0 = vmul.f32 %v3491_v12, %v6667_v24 }
 0x300   : > { %8576 = vst [vmem:[#allocation82_spill] sm:$0xff] %v6772_v14  ;;  %v6782_v15 = vmul.f32 %v1558_v45, %v6748_v28  ;;  %v1624_v52 = vmul.f32 %v8517_v33, %v6597_v48  ;;  %v2078_v38 = vadd.f32 %v2076_v53, %v8580_v7  ;;  %v1684_v1 = vadd.f32 %v1682_v34, %v6473_v51 }
 0x301   : > { %v6788_v50 = vmul.f32 %v1322_v54, %v1276_v5  ;;  %v6790_v19 = vmul.f32 %v1346_v16, %v1276_v5  ;;  %v2077_v21 = vadd.f32 %v2075_v27, %v8435_v10  ;;  %v1686_v61 = vmul.f32 %v8558_v60, %v8442_v22  ;;  %v8583_v16 = vld [vmem:[#allocation145_spill] sm:$0xff]  ;;  %v8584_v22 = vld [vmem:[#allocation50_spill] sm:$0xff] }
 0x302   : > { %8579 = vst [vmem:[#allocation121_spill] sm:$0xff] %v6782_v15  ;;  %v1578_v24 = vadd.f32 %v1576_v2, %v6479_v56  ;;  %v1580_v45 = vmul.f32 %v8523_v3, %v8453_v44  ;;  %v6799_v6 = vadd.f32 %v2078_v38, %v6183_v57  ;;  %v1602_v53 = vadd.f32 %v1600_v4, %v6559_v18 }
 0x303   : > { %8581 = vst [vmem:[#allocation83_spill] sm:$0xff] %v6788_v50  ;;  %8582 = vst [vmem:[#allocation103_spill] sm:$0xff] %v6790_v19  ;;  %v1604_v51 = vmul.f32 %v8523_v3, %v8471_v32  ;;  %v6805_v54 = vadd.f32 %v2077_v21, %v6183_v57  ;;  %2761 = vrot.lane.b32.xlu0 %v8583_v16, %s3697_s19  ;;  %2763 = vrot.lane.b32.xlu1 %v8584_v22, %s3697_s19  ;;  %v1658_v34 = vsub.f32 2.0, %v1656_v0  ;;  %v8587_v57 = vld [vmem:[#allocation49_spill] sm:$0xff]  ;;  %v8588_v21 = vld [vmem:[#allocation54_spill] sm:$0xff] }
 0x304   : > { %v1626_v27 = vadd.f32 %v1624_v52, %v6595_v17  ;;  %v1628_v2 = vmul.f32 %v8523_v3, %v8369_v13  ;;  %v1284_v4 = vmul.f32 %v8514_v23, %v6353_v36  ;;  %v6816_v41 = vmul.f32 %v1370_v58, %v1276_v5  ;;  %v8617_v50 = vld [vmem:[#allocation104_spill] sm:$0xff] }
 0x305   : > { %v6818_v35 = vmul.f32 %v1452_v63, %v1406_v30  ;;  %v2367_v38 = vmul.f32 %v6680_v11, %v8587_v57  ;;  %v2368_v16 = vmul.f32 %v8588_v21, %v8587_v57  ;;  %v1688_v22 = vadd.f32 %v1686_v61, %v1684_v1  ;;  %v8590_v1 = vld [vmem:[#allocation16_spill] sm:$0xff] }
 0x306   : > { %8585 = vst [vmem:[#allocation162_spill] sm:$0xff] %v6816_v41  ;;  %v6824_v0 = vmul.f32 %v1476_v9, %v1406_v30  ;;  %v1500_v52 = vadd.f32 %v1498_v20, %v1496_v46  ;;  %3492 = vrcp.f32 %v6799_v6  ;;  %v1582_v14 = vadd.f32 %v1580_v45, %v1578_v24  ;;  %v8592_v24 = vld [vmem:[#allocation94_spill] sm:$0xff] }
 0x307   : > { %8586 = vst [vmem:[#allocation101_spill] sm:$0xff] %v6818_v35  ;;  %v1606_v19 = vadd.f32 %v1604_v51, %v1602_v53  ;;  %3494 = vrcp.f32 %v6805_v54  ;;  %2371 = vrot.lane.b32.xlu0 %v2367_v38, %s3697_s19  ;;  %2373 = vrot.lane.b32.xlu1 %v2368_v16, %s3697_s19  ;;  %v1285_v5 = vmul.f32 %v8514_v23, %v8564_v31  ;;  %v8593_v53 = vld [vmem:[#allocation91_spill] sm:$0xff]  ;;  %v2317_v35 = vpop.permute.xlu0 %2316 }
 0x308   : > { %8589 = vst [vmem:[#allocation73_spill] sm:$0xff] %v6824_v0  ;;  %v1660_v63 = vmul.f32 %v3491_v12, %v1658_v34  ;;  %v1630_v58 = vadd.f32 %v1628_v2, %v1626_v27  ;;  %v1706_v9 = vmul.f32 %v8391_v37, %v6483_v25  ;;  %v1286_v46 = vadd.f32 %v1284_v4, %v8590_v1  ;;  %v8597_v34 = vld [vmem:[#allocation78_spill] sm:$0xff]  ;;  %v8598_v27 = vld [vmem:[#allocation19_spill] sm:$0xff]  ;;  %v8599_v2 = vld [vmem:[#allocation109_spill] sm:$0xff] }
 0x309   : > { %v6835_v20 = vmul.f32 %v1500_v52, %v1406_v30  ;;  %v1730_v61 = vmul.f32 %v8391_v37, %v6581_v59  ;;  %v2153_v45 = vmul.f32 %v8322_v42, %v8592_v24  ;;  %v2152_v51 = vmul.f32 %v8322_v42, %v8593_v53  ;;  %v2319_v59 = vpop.permute.xlu1 %2318  ;;  %v8600_v4 = vld [vmem:[#allocation86_spill] sm:$0xff]  ;;  %v8606_v0 = vld [vmem:[#allocation41_spill] sm:$0xff] }
 0x30a   : > { %v6844_v38 = vmul.f32 %v1582_v14, %v6748_v28  ;;  %v6847_v12 = vmul.f32 %v1606_v19, %v6748_v28  ;;  %v6850_v25 = vmul.f32 %v1630_v58, %v6748_v28  ;;  %v1754_v30 = vmul.f32 %v8391_v37, %v6597_v48  ;;  %v8602_v19 = vld [vmem:[#allocation87_spill] sm:$0xff]  ;;  %v8605_v48 = vld [vmem:[#allocation168_spill] sm:$0xff] }
 0x30b   : > { %8591 = vst [vmem:[#allocation79_spill] sm:$0xff] %v6835_v20  ;;  %2390 = vrot.lane.b32.xlu0 %v8597_v34, %s3697_s19  ;;  %2392 = vrot.lane.b32.xlu1 %v8598_v27, %s3697_s19  ;;  %v1287_v14 = vadd.f32 %v1285_v5, %v8599_v2  ;;  %v6860_v21 = vadd.f32 %v2153_v45, %v8600_v4  ;;  %v8604_v28 = vld [vmem:[#allocation27_spill] sm:$0xff]  ;;  %v8607_v45 = vld [vmem:[#allocation114_spill] sm:$0xff] }
 0x30c   : > { %8594 = vst [vmem:[#allocation84_spill] sm:$0xff] %v6844_v38  ;;  %8595 = vst [vmem:[#allocation24_spill] sm:$0xff] %v6847_v12  ;;  %v6863_v16 = vadd.f32 %v2152_v51, %v8602_v19  ;;  %v1666_v52 = vmul.f32 %v8604_v28, %v1660_v63  ;;  %v1708_v58 = vadd.f32 %v1706_v9, %v6479_v56  ;;  %v3536_v51 = vld [vmem:[%s3881_s24 + $0x18] sm:$0xff]  ;;  %v8614_v38 = vld [vmem:[#allocation108_spill] sm:$0xff] }
 0x30d   : > { %8596 = vst [vmem:[#allocation61_spill] sm:$0xff] %v6850_v25  ;;  %8601 = vst [vmem:[#allocation26_spill] sm:$0xff] %v6860_v21  ;;  %v1290_v20 = vadd.f32 %v8605_v48, %v1286_v46  ;;  %v1308_v34 = vmul.f32 %v8514_v23, %v8606_v0  ;;  %v1710_v27 = vmul.f32 %v8558_v60, %v8453_v44  ;;  %v8608_v48 = vld [vmem:[#allocation48_spill] sm:$0xff]  ;;  %v8619_v21 = vld [vmem:[#allocation22_spill] sm:$0xff] }
 0x30e   : > { %8603 = vst [vmem:[#allocation62_spill] sm:$0xff] %v6863_v16  ;;  %v1732_v5 = vadd.f32 %v1730_v61, %v6559_v18  ;;  %v2789_v25 = vmul.f32 %v6680_v11, %v8607_v45  ;;  %v2790_v41 = vmul.f32 %v3536_v51, %v8607_v45  ;;  %v1734_v56 = vmul.f32 %v8558_v60, %v8471_v32  ;;  %v8610_v18 = vld [vmem:[#allocation85_spill] sm:$0xff] }
 0x30f   : > { %v1756_v9 = vadd.f32 %v1754_v30, %v6595_v17  ;;  %v1758_v46 = vmul.f32 %v8558_v60, %v8369_v13  ;;  %v2320_v28 = vsel %vm1828_vm1, %v2317_v35, %v2319_v59  ;;  %v6884_v44 = vmul.f32 %v8608_v48, %v1660_v63  ;;  %v8612_v13 = vld [vmem:[#allocation21_spill] sm:$0xff]  ;;  %v8620_v60 = vld [vmem:[#allocation51_spill] sm:$0xff] }
 0x310   : > { %2793 = vrot.lane.b32.xlu0 %v2789_v25, %s3697_s19  ;;  %2795 = vrot.lane.b32.xlu1 %v2790_v41, %s3697_s19  ;;  %v1291_v61 = vadd.f32 %v8610_v18, %v1287_v14  ;;  %v1545_v51 = vmul.f32 %v8517_v33, %v8564_v31  ;;  %v3493_v32 = vpop.eup %3492  ;;  %v6891_v12 = vmul.f32 %v1688_v22, %v1666_v52  ;;  %v8613_v63 = vld [vmem:[#allocation25_spill] sm:$0xff]  ;;  %v8615_v14 = vld [vmem:[#allocation42_spill] sm:$0xff] }
 0x311   : > { %8609 = vst [vmem:[#allocation28_spill] sm:$0xff] %v6884_v44  ;;  %v6894_v17 = vmul.f32 %v1290_v20, %v6763_v29  ;;  %v2497_v30 = vmul.f32 %v8612_v13, %v8423_v39  ;;  %v1310_v59 = vadd.f32 %v1308_v34, %v8613_v63  ;;  %v3495_v48 = vpop.eup %3494  ;;  %v1712_v25 = vadd.f32 %v1710_v27, %v1708_v58  ;;  %v8616_v20 = vld [vmem:[#allocation69_spill] sm:$0xff]  ;;  %v8618_v27 = vld [vmem:[#allocation146_spill] sm:$0xff] }
 0x312   : > { %8611 = vst [vmem:[#allocation63_spill] sm:$0xff] %v6891_v12  ;;  %v2324_v41 = vadd.f32 %v2320_v28, %v8614_v38  ;;  %v2325_v18 = vmul.f32 %v8615_v14, %v8587_v57  ;;  %v2498_v15 = vmul.f32 %v8612_v13, %v8571_v40  ;;  %v1736_v22 = vadd.f32 %v1734_v56, %v1732_v5  ;;  %v8621_v56 = vld [vmem:[#allocation132_spill] sm:$0xff] }
 0x313   : > { %v1760_v12 = vadd.f32 %v1758_v46, %v1756_v9  ;;  %v2286_v44 = vmul.f32 %v8616_v20, %v8423_v39  ;;  %v2287_v16 = vmul.f32 %v8616_v20, %v8571_v40  ;;  %v2323_v34 = vadd.f32 %v2317_v35, %v8617_v50  ;;  %v8622_v46 = vld [vmem:[#allocation11_spill] sm:$0xff]  ;;  %v8624_v20 = vld [vmem:[#allocation157_spill] sm:$0xff] }
 0x314   : > { %v2084_v58 = vmul.f32 %v3493_v32, %v6799_v6  ;;  %v2326_v28 = vmul.f32 %v8618_v27, %v8587_v57  ;;  %2812 = vrot.lane.b32.xlu0 %v8619_v21, %s3697_s19  ;;  %2814 = vrot.lane.b32.xlu1 %v8620_v60, %s3697_s19  ;;  %v2083_v5 = vmul.f32 %v3495_v48, %v6805_v54  ;;  %v8623_v21 = vld [vmem:[#allocation170_spill] sm:$0xff] }
 0x315   : > { %v1305_v9 = vmul.f32 %v1291_v61, %v8621_v56  ;;  %v2708_v37 = vmul.f32 %v8622_v46, %v8423_v39  ;;  %v2709_v35 = vmul.f32 %v8622_v46, %v8571_v40  ;;  %v2327_v31 = vadd.f32 %v2325_v18, %v2323_v34  ;;  %v2741_v61 = vpop.permute.xlu1 %2740  ;;  %v8629_v18 = vld [vmem:[#allocation148_spill] sm:$0xff]  ;;  %v2739_v34 = vpop.permute.xlu0 %2738 }
 0x316   : > { %v2328_v6 = vadd.f32 %v2326_v28, %v2324_v41  ;;  %v2499_v8 = vadd.f32 %v2497_v30, %v8435_v10  ;;  %v2500_v26 = vadd.f32 %v2498_v15, %v8580_v7  ;;  %v534_v49 = vmul.f32 %v8624_v20, %v8623_v21  ;;  %v8628_v30 = vld [vmem:[#allocation45_spill] sm:$0xff] }
 0x317   : > { %v6926_v60 = vmul.f32 %v1712_v25, %v1666_v52  ;;  %v6928_v54 = vmul.f32 %v1736_v22, %v1666_v52  ;;  %v2288_v39 = vadd.f32 %v2286_v44, %v8435_v10  ;;  %v6931_v56 = vmul.f32 %v1760_v12, %v1666_v52  ;;  %v8630_v25 = vld [vmem:[#allocation144_spill] sm:$0xff]  ;;  %v8631_v12 = vld [vmem:[#allocation38_spill] sm:$0xff] }
 0x318   : > { %v2086_v40 = vsub.f32 2.0, %v2084_v58  ;;  %2352 = vrot.lane.b32.xlu0 %v2327_v31, %s3697_s19  ;;  %2354 = vrot.lane.b32.xlu1 %v2328_v6, %s3697_s19  ;;  %v2289_v15 = vadd.f32 %v2287_v16, %v8580_v7  ;;  %v1314_v41 = vadd.f32 %v8628_v30, %v1310_v59  ;;  %v526_v20 = vmul.f32 %v8630_v25, %v8629_v18  ;;  %v3537_v58 = vld [vmem:[%s3881_s24 + $0x28] sm:$0xff]  ;;  %v8632_v6 = vld [vmem:[#allocation161_spill] sm:$0xff] }
 0x319   : > { %8625 = vst [vmem:[#allocation34_spill] sm:$0xff] %v6926_v60  ;;  %8626 = vst [vmem:[#allocation64_spill] sm:$0xff] %v6928_v54  ;;  %v2085_v22 = vsub.f32 2.0, %v2083_v5  ;;  %v2710_v28 = vadd.f32 %v2708_v37, %v8435_v10  ;;  %v2711_v44 = vadd.f32 %v2709_v35, %v8580_v7  ;;  %v2409_v52 = vmul.f32 %v8631_v12, %v8587_v57  ;;  %v2091_v35 = vpop.permute.xlu0 %2090 }
 0x31a   : > { %8627 = vst [vmem:[#allocation35_spill] sm:$0xff] %v6931_v56  ;;  %v2410_v31 = vmul.f32 %v3537_v58, %v8587_v57  ;;  %v6946_v21 = vadd.f32 %v2499_v8, %v8632_v6  ;;  %v1544_v16 = vmul.f32 %v8517_v33, %v6353_v36  ;;  %v536_v59 = vadd.f32 %v534_v49, %v526_v20 }
 0x31b   : > { %v2742_v30 = vsel %vm1828_vm1, %v2739_v34, %v2741_v61  ;;  %v6952_v5 = vadd.f32 %v2500_v26, %v8632_v6  ;;  %v1547_v37 = vadd.f32 %v1545_v51, %v8599_v2  ;;  %v6955_v10 = vmul.f32 %v3493_v32, %v2086_v40  ;;  %v6966_v61 = vpop.permute.xlu1 %2096  ;;  %v8636_v6 = vld [vmem:[#allocation147_spill] sm:$0xff] }
 0x31c   : > { %2413 = vrot.lane.b32.xlu0 %v2409_v52, %s3697_s19  ;;  %2415 = vrot.lane.b32.xlu1 %v2410_v31, %s3697_s19  ;;  %v6960_v8 = vmul.f32 %v1314_v41, %v6763_v29  ;;  %v1549_v7 = vmul.f32 %v8618_v27, %v8523_v3  ;;  %v6964_v49 = vmul.f32 %v3495_v48, %v2085_v22  ;;  %3496 = vrcp.f32 %v6946_v21  ;;  %v8635_v31 = vld [vmem:[#allocation129_spill] sm:$0xff] }
 0x31d   : > { %v1548_v26 = vmul.f32 %v8615_v14, %v8523_v3  ;;  %v2575_v51 = vmul.f32 %v8612_v13, %v8592_v24  ;;  %v2574_v32 = vmul.f32 %v8612_v13, %v8593_v53  ;;  %v2746_v40 = vadd.f32 %v2742_v30, %v8614_v38 }
 0x31e   : > { %8633 = vst [vmem:[#allocation66_spill] sm:$0xff] %v6960_v8  ;;  %v2747_v41 = vmul.f32 %v8615_v14, %v8607_v45  ;;  %v1546_v48 = vadd.f32 %v1544_v16, %v8590_v1  ;;  %v1302_v25 = vadd.f32 %v6770_v47, %v536_v59  ;;  %v2745_v20 = vadd.f32 %v2739_v34, %v8617_v50  ;;  %v8638_v34 = vld [vmem:[#allocation160_spill] sm:$0xff]  ;;  %v8667_v8 = vld [vmem:[#allocation17_spill] sm:$0xff] }
 0x31f   : > { %3498 = vrcp.f32 %v6952_v5  ;;  %v6983_v22 = vadd.f32 %v2288_v39, %v8587_v57  ;;  %v6986_v52 = vmul.f32 %v2091_v35, %v6955_v10  ;;  %v2748_v38 = vmul.f32 %v8618_v27, %v8607_v45  ;;  %v2129_v39 = vpop.permute.xlu1 %2128  ;;  %v2131_v59 = vpop.permute.xlu0 %2130  ;;  %v8639_v27 = vld [vmem:[#allocation67_spill] sm:$0xff] }
 0x320   : > { %2432 = vrot.lane.b32.xlu0 %v8635_v31, %s3697_s19  ;;  %2434 = vrot.lane.b32.xlu1 %v8636_v6, %s3697_s19  ;;  %v6995_v47 = vadd.f32 %v2289_v15, %v8587_v57  ;;  %v6998_v50 = vmul.f32 %v2091_v35, %v6964_v49  ;;  %v1307_v16 = vadd.f32 %v1305_v9, %v8638_v34 }
 0x321   : > { %8634 = vst [vmem:[#allocation37_spill] sm:$0xff] %v6986_v52  ;;  %v1568_v30 = vmul.f32 %v8517_v33, %v8606_v0  ;;  %v1332_v56 = vmul.f32 %v8514_v23, %v8639_v27  ;;  %v2750_v31 = vadd.f32 %v2748_v38, %v2746_v40  ;;  %v2132_v54 = vsel %vm293_vm0, %v2129_v39, %v2131_v59 }
 0x322   : > { %8637 = vst [vmem:[#allocation68_spill] sm:$0xff] %v6998_v50  ;;  %v2136_v6 = vmul.f32 %v2131_v59, %v6986_v52  ;;  %v2749_v15 = vadd.f32 %v2747_v41, %v2745_v20  ;;  %v1306_v60 = vadd.f32 %v6894_v17, %v1302_v25  ;;  %v2135_v35 = vmul.f32 %v2132_v54, %v6998_v50 }
 0x323   : > { %3500 = vrcp.f32 %v6983_v22  ;;  %v7011_v9 = vadd.f32 %v2710_v28, %v8607_v45  ;;  %v7019_v40 = vadd.f32 %v2711_v44, %v8607_v45  ;;  %v1551_v41 = vadd.f32 %v1549_v7, %v1547_v37 }
 0x324   : > { %v7013_v34 = vadd.f32 %v2136_v6, %v1307_v16  ;;  %2774 = vrot.lane.b32.xlu0 %v2749_v15, %s3697_s19  ;;  %2776 = vrot.lane.b32.xlu1 %v2750_v31, %s3697_s19  ;;  %3502 = vrcp.f32 %v6995_v47  ;;  %v7021_v17 = vadd.f32 %v2135_v35, %v1306_v60  ;;  %v1570_v54 = vadd.f32 %v1568_v30, %v8613_v63  ;;  %v8641_v60 = vld [vmem:[#allocation133_spill] sm:$0xff] }
 0x325   : > { %v1572_v28 = vmul.f32 %v6680_v11, %v8523_v3  ;;  %v1592_v25 = vmul.f32 %v8517_v33, %v8639_v27  ;;  %v2831_v20 = vmul.f32 %v8631_v12, %v8607_v45  ;;  %v2832_v38 = vmul.f32 %v3537_v58, %v8607_v45  ;;  %v8644_v16 = vld [vmem:[#allocation93_spill] sm:$0xff] }
 0x326   : > { %v1550_v39 = vadd.f32 %v1548_v26, %v1546_v48  ;;  %v7032_v44 = vadd.f32 %v2575_v51, %v8600_v4  ;;  %3504 = vrcp.f32 %v7011_v9  ;;  %v7036_v37 = vmul.f32 %v1551_v41, %v8641_v60  ;;  %v7042_v30 = vpop.eup %3496  ;;  %v8646_v26 = vld [vmem:[#allocation96_spill] sm:$0xff] }
 0x327   : > { %v7039_v7 = vadd.f32 %v2574_v32, %v8602_v19  ;;  %v1334_v59 = vadd.f32 %v1332_v56, %v8644_v16  ;;  %3506 = vrcp.f32 %v7019_v40  ;;  %v2195_v51 = vmul.f32 %v8322_v42, %v8646_v26  ;;  %v8647_v48 = vld [vmem:[#allocation92_spill] sm:$0xff] }
 0x328   : > { %8640 = vst [vmem:[#allocation40_spill] sm:$0xff] %v7032_v44  ;;  %8642 = vst [vmem:[#allocation70_spill] sm:$0xff] %v7036_v37  ;;  %2835 = vrot.lane.b32.xlu0 %v2831_v20, %s3697_s19  ;;  %2837 = vrot.lane.b32.xlu1 %v2832_v38, %s3697_s19  ;;  %v7048_v58 = vmul.f32 %v1550_v39, %v6766_v55  ;;  %v2194_v32 = vmul.f32 %v8322_v42, %v8647_v48  ;;  %v8648_v41 = vld [vmem:[#allocation88_spill] sm:$0xff]  ;;  %v8650_v38 = vld [vmem:[#allocation89_spill] sm:$0xff] }
 0x329   : > { %8643 = vst [vmem:[#allocation43_spill] sm:$0xff] %v7039_v7  ;;  %v3499_v31 = vpop.eup %3498  ;;  %v1574_v6 = vadd.f32 %v1572_v28, %v1570_v54  ;;  %v2617_v56 = vmul.f32 %v8612_v13, %v8646_v26  ;;  %v1594_v15 = vadd.f32 %v1592_v25, %v8644_v16  ;;  %v1596_v35 = vmul.f32 %v8631_v12, %v8523_v3  ;;  %v8652_v7 = vld [vmem:[#allocation106_spill] sm:$0xff]  ;;  %v8654_v44 = vld [vmem:[#allocation56_spill] sm:$0xff]  ;;  %v8656_v37 = vld [vmem:[#allocation95_spill] sm:$0xff] }
 0x32a   : > { %8645 = vst [vmem:[#allocation72_spill] sm:$0xff] %v7048_v58  ;;  %v7060_v20 = vadd.f32 %v2195_v51, %v8648_v41  ;;  %v7063_v39 = vadd.f32 %v2194_v32, %v8650_v38  ;;  %v2616_v60 = vmul.f32 %v8612_v13, %v8647_v48  ;;  %v1356_v54 = vmul.f32 %v8514_v23, %v8652_v7  ;;  %v8657_v32 = vld [vmem:[#allocation53_spill] sm:$0xff] }
 0x32b   : > { %v7070_v28 = vmul.f32 %v1574_v6, %v6766_v55  ;;  %v1338_v25 = vadd.f32 %v8654_v44, %v1334_v59  ;;  %v7074_v58 = vadd.f32 %v2617_v56, %v8648_v41  ;;  %v2236_v51 = vmul.f32 %v8322_v42, %v8656_v37 }
 0x32c   : > { %8649 = vst [vmem:[#allocation46_spill] sm:$0xff] %v7060_v20  ;;  %8651 = vst [vmem:[#allocation74_spill] sm:$0xff] %v7063_v39  ;;  %2854 = vrot.lane.b32.xlu0 %v8657_v32, %s3697_s19  ;;  %v8658_v39 = vld [vmem:[#allocation81_spill] sm:$0xff]  ;;  %v2505_v23 = vmul.f32 %v7042_v30, %v6946_v21  ;;  %v2506_v6 = vmul.f32 %v3499_v31, %v6952_v5  ;;  %v7086_v20 = vadd.f32 %v2616_v60, %v8650_v38  ;;  %v8662_v32 = vld [vmem:[#allocation90_spill] sm:$0xff]  ;;  %v2142_v5 = vpop.permute.xlu1 %2141  ;;  %v2144_v60 = vpop.permute.xlu0 %2143 }
 0x32d   : > { %8653 = vst [vmem:[#allocation140_spill] sm:$0xff] %v7070_v28  ;;  %8655 = vst [vmem:[#allocation76_spill] sm:$0xff] %v7074_v58  ;;  %2856 = vrot.lane.b32.xlu1 %v8658_v39, %s3697_s19  ;;  %v3501_v44 = vpop.eup %3500  ;;  %v7090_v59 = vmul.f32 %v6966_v61, %v6955_v10  ;;  %v7093_v42 = vmul.f32 %v1338_v25, %v6763_v29  ;;  %v1598_v56 = vadd.f32 %v1596_v35, %v1594_v15  ;;  %v8666_v10 = vld [vmem:[#allocation115_spill] sm:$0xff] }
 0x32e   : > { %8659 = vst [vmem:[#allocation75_spill] sm:$0xff] %v7086_v20  ;;  %v7096_v39 = vadd.f32 %v2236_v51, %v8662_v32  ;;  %v3503_v58 = vpop.eup %3502  ;;  %v7100_v21 = vmul.f32 %v6966_v61, %v6964_v49  ;;  %v8665_v20 = vld [vmem:[#allocation20_spill] sm:$0xff]  ;;  %v2452_v50 = vmul.f32 %v8666_v10, %v8587_v57  ;;  %v1358_v25 = vadd.f32 %v1356_v54, %v8667_v8 }
 0x32f   : > { %8660 = vst [vmem:[#allocation128_spill] sm:$0xff] %v7090_v59  ;;  %8661 = vst [vmem:[#allocation99_spill] sm:$0xff] %v7093_v42  ;;  %v2451_v28 = vmul.f32 %v8665_v20, %v8587_v57  ;;  %v2145_v15 = vsel %vm293_vm0, %v2142_v5, %v2144_v60  ;;  %v2149_v35 = vmul.f32 %v2144_v60, %v7090_v59  ;;  %v2507_v57 = vsub.f32 2.0, %v2505_v23  ;;  %v8669_v23 = vld [vmem:[#allocation55_spill] sm:$0xff] }
 0x330   : > { %8663 = vst [vmem:[#allocation149_spill] sm:$0xff] %v7096_v39  ;;  %8664 = vst [vmem:[#allocation124_spill] sm:$0xff] %v7100_v21  ;;  %v1616_v51 = vmul.f32 %v8517_v33, %v8652_v7  ;;  %v7112_v39 = vld [vmem:[%s3881_s24 + $0x8] sm:$0xff]  ;;  %v2148_v61 = vmul.f32 %v2145_v15, %v7100_v21  ;;  %v2508_v54 = vsub.f32 2.0, %v2506_v6  ;;  %v2658_v5 = vmul.f32 %v8612_v13, %v8656_v37  ;;  %v3505_v60 = vpop.eup %3504 }
 0x331   : > { %v1419_v49 = vmul.f32 %v7112_v39, %v8522_v62  ;;  %2455 = vrot.lane.b32.xlu0 %v2451_v28, %s3697_s19  ;;  %2457 = vrot.lane.b32.xlu1 %v2452_v50, %s3697_s19  ;;  %v7122_v42 = vadd.f32 %v2149_v35, %v7013_v34  ;;  %v2294_v33 = vmul.f32 %v3501_v44, %v6983_v22  ;;  %v3507_v21 = vpop.eup %3506 }
 0x332   : > { %v2295_v52 = vmul.f32 %v3503_v58, %v6995_v47  ;;  %v1417_v15 = vadd.f32 %v6735_v43, %v8599_v2  ;;  %v7129_v28 = vadd.f32 %v2148_v61, %v7021_v17  ;;  %v7132_v50 = vmul.f32 %v1598_v56, %v6766_v55  ;;  %v8671_v43 = vld [vmem:[#allocation57_spill] sm:$0xff]  ;;  %v8672_v17 = vld [vmem:[#allocation30_spill] sm:$0xff] }
 0x333   : > { %v1362_v13 = vadd.f32 %v8669_v23, %v1358_v25  ;;  %v7136_v6 = vadd.f32 %v2658_v5, %v8662_v32  ;;  %v1618_v34 = vadd.f32 %v1616_v51, %v8667_v8  ;;  %v1620_v22 = vmul.f32 %v8665_v20, %v8523_v3  ;;  %v8673_v56 = vld [vmem:[#allocation33_spill] sm:$0xff] }
 0x334   : > { %8668 = vst [vmem:[#allocation18_spill] sm:$0xff] %v7132_v50  ;;  %v1421_v47 = vadd.f32 %v1419_v49, %v1417_v15  ;;  %v1416_v35 = vadd.f32 %v8671_v43, %v8590_v1  ;;  %v2509_v25 = vmul.f32 %v7042_v30, %v2507_v57  ;;  %v2510_v61 = vmul.f32 %v3499_v31, %v2508_v54  ;;  %v2513_v15 = vpop.permute.xlu1 %2512  ;;  %v8677_v54 = vld [vmem:[#allocation131_spill] sm:$0xff] }
 0x335   : > { %8670 = vst [vmem:[#allocation80_spill] sm:$0xff] %v7136_v6  ;;  %2474 = vrot.lane.b32.xlu0 %v8672_v17, %s3697_s19  ;;  %2476 = vrot.lane.b32.xlu1 %v8673_v56, %s3697_s19  ;;  %v1418_v5 = vmul.f32 %v8615_v14, %v8522_v62  ;;  %v2296_v51 = vsub.f32 2.0, %v2294_v33  ;;  %v2297_v23 = vsub.f32 2.0, %v2295_v52  ;;  %v2716_v3 = vmul.f32 %v3505_v60, %v7011_v9  ;;  %v8674_v56 = vld [vmem:[#allocation69_spill] sm:$0xff] }
 0x336   : > { %v2717_v49 = vmul.f32 %v3507_v21, %v7019_v40  ;;  %v2873_v43 = vmul.f32 %v8665_v20, %v8607_v45  ;;  %v2874_v17 = vmul.f32 %v8666_v10, %v8607_v45  ;;  %v2364_v30 = vmul.f32 %v8674_v56, %v8592_v24  ;;  %v8678_v33 = vld [vmem:[#allocation77_spill] sm:$0xff] }
 0x337   : > { %v2363_v31 = vmul.f32 %v8674_v56, %v8593_v53  ;;  %v7160_v57 = vmul.f32 %v2513_v15, %v2509_v25  ;;  %v7162_v52 = vmul.f32 %v2513_v15, %v2510_v61  ;;  %v7165_v9 = vmul.f32 %v1362_v13, %v6763_v29 }
 0x338   : > { %v1622_v40 = vadd.f32 %v1620_v22, %v1618_v34  ;;  %v7170_v45 = vmul.f32 %v1421_v47, %v8677_v54  ;;  %v1420_v10 = vadd.f32 %v1418_v5, %v1416_v35  ;;  %v1438_v6 = vmul.f32 %v8678_v33, %v8606_v0  ;;  %v8680_v5 = vld [vmem:[#allocation52_spill] sm:$0xff] }
 0x339   : > { %8675 = vst [vmem:[#allocation123_spill] sm:$0xff] %v7160_v57  ;;  %8676 = vst [vmem:[#allocation126_spill] sm:$0xff] %v7162_v52  ;;  %2877 = vrot.lane.b32.xlu0 %v2873_v43, %s3697_s19  ;;  %2879 = vrot.lane.b32.xlu1 %v2874_v17, %s3697_s19  ;;  %v2298_v50 = vmul.f32 %v3501_v44, %v2296_v51  ;;  %v2299_v59 = vmul.f32 %v3503_v58, %v2297_v23  ;;  %v2718_v57 = vsub.f32 2.0, %v2716_v3  ;;  %v2302_v52 = vpop.permute.xlu1 %2301  ;;  %v8679_v44 = vld [vmem:[#allocation12_spill] sm:$0xff]  ;;  %v8681_v51 = vld [vmem:[#allocation58_spill] sm:$0xff] }
 0x33a   : > { %v2719_v15 = vsub.f32 2.0, %v2717_v49  ;;  %v7175_v29 = vmul.f32 %v1622_v40, %v6766_v55  ;;  %v7178_v13 = vadd.f32 %v2364_v30, %v8600_v4  ;;  %v7181_v34 = vadd.f32 %v2363_v31, %v8602_v19  ;;  %v8684_v40 = vld [vmem:[#allocation125_spill] sm:$0xff] }
 0x33b   : > { %v2406_v22 = vmul.f32 %v8674_v56, %v8646_v26  ;;  %v7185_v47 = vmul.f32 %v2302_v52, %v2298_v50  ;;  %v7187_v35 = vmul.f32 %v2302_v52, %v2299_v59  ;;  %v1442_v58 = vmul.f32 %v6680_v11, %v8522_v62  ;;  %v8683_v52 = vld [vmem:[#allocation112_spill] sm:$0xff] }
 0x33c   : > { %v2786_v55 = vmul.f32 %v8622_v46, %v8592_v24  ;;  %v7198_v23 = vmul.f32 %v1420_v10, %v8681_v51  ;;  %v2785_v3 = vmul.f32 %v8622_v46, %v8593_v53  ;;  %v2405_v49 = vmul.f32 %v8674_v56, %v8647_v48 }
 0x33d   : > { %2896 = vrot.lane.b32.xlu0 %v8679_v44, %s3697_s19  ;;  %2898 = vrot.lane.b32.xlu1 %v8680_v5, %s3697_s19  ;;  %v2720_v43 = vmul.f32 %v3505_v60, %v2718_v57  ;;  %v2721_v17 = vmul.f32 %v3507_v21, %v2719_v15  ;;  %v1440_v30 = vadd.f32 %v1438_v6, %v8613_v63  ;;  %v2724_v31 = vpop.permute.xlu1 %2723  ;;  %v2519_v6 = vpop.permute.xlu0 %2518  ;;  %v8688_v5 = vld [vmem:[#allocation127_spill] sm:$0xff] }
 0x33e   : > { %v7206_v24 = vadd.f32 %v2786_v55, %v8600_v4  ;;  %v1675_v54 = vmul.f32 %v8684_v40, %v8683_v52  ;;  %v7211_v10 = vadd.f32 %v2785_v3, %v8602_v19  ;;  %v7214_v44 = vadd.f32 %v2406_v22, %v8648_v41 }
 0x33f   : > { %v1462_v53 = vmul.f32 %v8678_v33, %v8639_v27  ;;  %v7218_v60 = vmul.f32 %v2724_v31, %v2720_v43  ;;  %v7220_v21 = vmul.f32 %v2724_v31, %v2721_v17  ;;  %v1674_v4 = vmul.f32 %v8684_v40, %v6353_v36 }
 0x340   : > { %8682 = vst [vmem:[#allocation141_spill] sm:$0xff] %v7206_v24  ;;  %8685 = vst [vmem:[#allocation97_spill] sm:$0xff] %v7211_v10  ;;  %v1444_v57 = vadd.f32 %v1442_v58, %v1440_v30  ;;  %v7224_v15 = vmul.f32 %v2519_v6, %v2509_v25  ;;  %v7226_v55 = vmul.f32 %v2519_v6, %v2510_v61  ;;  %v8690_v6 = vld [vmem:[#allocation23_spill] sm:$0xff] }
 0x341   : > { %8686 = vst [vmem:[#allocation15_spill] sm:$0xff] %v7214_v44  ;;  %v7229_v19 = vadd.f32 %v2405_v49, %v8650_v38  ;;  %v1466_v22 = vmul.f32 %v8631_v12, %v8522_v62  ;;  %v557_v3 = vmul.f32 %v8688_v5, %v8629_v18  ;;  %v2828_v36 = vmul.f32 %v8622_v46, %v8646_v26  ;;  %v2730_v30 = vpop.permute.xlu1 %2729  ;;  %v2308_v52 = vpop.permute.xlu0 %2307  ;;  %v8696_v5 = vld [vmem:[#allocation163_spill] sm:$0xff]  ;;  %v8697_v44 = vld [vmem:[#allocation158_spill] sm:$0xff] }
 0x342   : > { %v7236_v31 = vmul.f32 %v1444_v57, %v8681_v51  ;;  %v2827_v25 = vmul.f32 %v8622_v46, %v8647_v48  ;;  %v1677_v61 = vadd.f32 %v1675_v54, %v8599_v2  ;;  %v1464_v58 = vadd.f32 %v1462_v53, %v8644_v16 }
 0x343   : > { %8687 = vst [vmem:[#allocation145_spill] sm:$0xff] %v7229_v19  ;;  %v2447_v49 = vmul.f32 %v8674_v56, %v8656_v37  ;;  %v1486_v12 = vmul.f32 %v8678_v33, %v8652_v7  ;;  %v1679_v57 = vmul.f32 %v7112_v39, %v8690_v6  ;;  %v1676_v26 = vadd.f32 %v1674_v4, %v8590_v1  ;;  %v8695_v33 = vld [vmem:[#allocation14_spill] sm:$0xff]  ;;  %v8702_v4 = vld [vmem:[#allocation13_spill] sm:$0xff] }
 0x344   : > { %8689 = vst [vmem:[#allocation50_spill] sm:$0xff] %v7236_v31  ;;  %v1678_v48 = vmul.f32 %v8615_v14, %v8690_v6  ;;  %v7253_v2 = vmul.f32 %v2730_v30, %v2720_v43  ;;  %v7255_v54 = vmul.f32 %v2730_v30, %v2721_v17  ;;  %v7257_v53 = vmul.f32 %v2308_v52, %v2298_v50  ;;  %v8701_v17 = vld [vmem:[#allocation171_spill] sm:$0xff]  ;;  %v8728_v31 = vld [vmem:[#allocation72_spill] sm:$0xff] }
 0x345   : > { %v7259_v56 = vmul.f32 %v2308_v52, %v2299_v59  ;;  %v836_v19 = vmul.f32 %v8696_v5, %v8695_v33  ;;  %v563_v10 = vadd.f32 %v8697_v44, %v557_v3  ;;  %v7265_v39 = vadd.f32 %v2828_v36, %v8648_v41  ;;  %v2163_v44 = vpop.permute.xlu1 %2162  ;;  %v2161_v3 = vpop.permute.xlu0 %2160  ;;  %v8705_v5 = vld [vmem:[#allocation62_spill] sm:$0xff] }
 0x346   : > { %8691 = vst [vmem:[#allocation49_spill] sm:$0xff] %v7253_v2  ;;  %8692 = vst [vmem:[#allocation54_spill] sm:$0xff] %v7255_v54  ;;  %v7268_v1 = vadd.f32 %v2827_v25, %v8650_v38  ;;  %v2919_v14 = vsel %vm1828_vm1, %v7122_v42, 0.0  ;;  %v1468_v43 = vadd.f32 %v1466_v22, %v1464_v58  ;;  %v7273_v50 = vadd.f32 %v2447_v49, %v8662_v32  ;;  %v8703_v25 = vld [vmem:[#allocation26_spill] sm:$0xff]  ;;  %v8720_v54 = vld [vmem:[#allocation135_spill] sm:$0xff] }
 0x347   : > { %8693 = vst [vmem:[#allocation16_spill] sm:$0xff] %v7257_v53  ;;  %8694 = vst [vmem:[#allocation94_spill] sm:$0xff] %v7259_v56  ;;  %v1490_v59 = vmul.f32 %v8665_v20, %v8522_v62  ;;  %v828_v30 = vmul.f32 %v8702_v4, %v8701_v17  ;;  %v2912_v41 = vsel %vm2911_vm2, %v7129_v28, 0.0  ;;  %v1681_v38 = vadd.f32 %v1679_v57, %v1677_v61  ;;  %v8704_v20 = vld [vmem:[#allocation83_spill] sm:$0xff]  ;;  %v8709_v57 = vld [vmem:[#allocation153_spill] sm:$0xff] }
 0x348   : > { %8698 = vst [vmem:[#allocation91_spill] sm:$0xff] %v7265_v39  ;;  %8699 = vst [vmem:[#allocation78_spill] sm:$0xff] %v7268_v1  ;;  %v1488_v36 = vadd.f32 %v1486_v12, %v8667_v8  ;;  %v2168_v42 = vadd.f32 %v2163_v44, %v8703_v25  ;;  %v2164_v22 = vsel %vm293_vm0, %v2161_v3, %v2163_v44  ;;  %v2920_v33 = vrot.slane %v2919_v14, 4  ;;  %v8713_v25 = vld [vmem:[#allocation37_spill] sm:$0xff]  ;;  %v8735_v53 = vld [vmem:[#allocation40_spill] sm:$0xff] }
 0x349   : > { %8700 = vst [vmem:[#allocation19_spill] sm:$0xff] %v7273_v50  ;;  %v1680_v58 = vadd.f32 %v1678_v48, %v1676_v26  ;;  %v1698_v49 = vmul.f32 %v8684_v40, %v8606_v0  ;;  %v838_v62 = vadd.f32 %v836_v19, %v828_v30  ;;  %v1326_v52 = vadd.f32 %v8704_v20, %v563_v10  ;;  %v8706_v50 = vld [vmem:[#allocation128_spill] sm:$0xff]  ;;  %v2182_v48 = vpop.permute.xlu1 %2181  ;;  %v2180_v10 = vpop.permute.xlu0 %2179  ;;  %v8711_v30 = vld [vmem:[#allocation142_spill] sm:$0xff] }
 0x34a   : > { %v2167_v4 = vadd.f32 %v2164_v22, %v8705_v5  ;;  %v2913_v28 = vrot.slane %v2912_v41, 4  ;;  %v2191_v1 = vmul.f32 %v2168_v42, %v8706_v50  ;;  %v7290_v61 = vmul.f32 %v1468_v43, %v8681_v51  ;;  %v8710_v0 = vld [vmem:[#allocation124_spill] sm:$0xff] }
 0x34b   : > { %v7294_v12 = vmul.f32 %v8622_v46, %v8656_v37  ;;  %v859_v26 = vmul.f32 %v8709_v57, %v8701_v17  ;;  %v7300_v44 = vmul.f32 %v1681_v38, %v8711_v30  ;;  %v7302_v3 = vadd.f32 %v1490_v59, %v1488_v36  ;;  %v8714_v22 = vld [vmem:[#allocation28_spill] sm:$0xff]  ;;  %v8715_v37 = vld [vmem:[#allocation121_spill] sm:$0xff] }
 0x34c   : > { %8707 = vst [vmem:[#allocation109_spill] sm:$0xff] %v7290_v61  ;;  %v2190_v19 = vmul.f32 %v2167_v4, %v8710_v0  ;;  %v2187_v42 = vmul.f32 %v2182_v48, %v8713_v25  ;;  %v2183_v43 = vsel %vm293_vm0, %v2180_v10, %v2182_v48  ;;  %v7307_v20 = vmul.f32 %v1680_v58, %v8714_v22  ;;  %v8716_v4 = vld [vmem:[#allocation66_spill] sm:$0xff]  ;;  %v8717_v61 = vld [vmem:[#allocation68_spill] sm:$0xff]  ;;  %v8718_v38 = vld [vmem:[#allocation169_spill] sm:$0xff] }
 0x34d   : > { %8708 = vst [vmem:[#allocation86_spill] sm:$0xff] %v7294_v12  ;;  %8712 = vst [vmem:[#allocation87_spill] sm:$0xff] %v7302_v3  ;;  %v1700_v46 = vadd.f32 %v1698_v49, %v8613_v63  ;;  %v1562_v5 = vadd.f32 %v8715_v37, %v838_v62  ;;  %v2921_v57 = vadd.f32 %v2920_v33, %v2919_v14  ;;  %v8719_v30 = vld [vmem:[#allocation152_spill] sm:$0xff]  ;;  %v8721_v58 = vld [vmem:[#allocation155_spill] sm:$0xff]  ;;  %v2553_v33 = vpop.permute.xlu1 %2552 }
 0x34e   : > { %v1330_v39 = vadd.f32 %v8716_v4, %v1326_v52  ;;  %v2186_v2 = vmul.f32 %v2183_v43, %v8717_v61  ;;  %v677_v59 = vmul.f32 %v8719_v30, %v8718_v38  ;;  %v2914_v36 = vadd.f32 %v2913_v28, %v2912_v41  ;;  %v8722_v10 = vld [vmem:[#allocation159_spill] sm:$0xff]  ;;  %v8723_v63 = vld [vmem:[#allocation29_spill] sm:$0xff]  ;;  %v2551_v43 = vpop.permute.xlu0 %2550  ;;  %v8726_v30 = vld [vmem:[#allocation70_spill] sm:$0xff] }
 0x34f   : > { %v2189_v24 = vadd.f32 %v2187_v42, %v8720_v54  ;;  %v1702_v48 = vmul.f32 %v6680_v11, %v8690_v6  ;;  %v685_v8 = vmul.f32 %v8722_v10, %v8721_v58  ;;  %v584_v49 = vmul.f32 %v8723_v63, %v8629_v18  ;;  %v8724_v14 = vld [vmem:[#allocation151_spill] sm:$0xff]  ;;  %v8725_v4 = vld [vmem:[#allocation165_spill] sm:$0xff]  ;;  %v8727_v28 = vld [vmem:[#allocation126_spill] sm:$0xff] }
 0x350   : > { %v865_v62 = vadd.f32 %v8724_v14, %v859_v26  ;;  %v2188_v52 = vadd.f32 %v2186_v2, %v1330_v39  ;;  %v1567_v41 = vadd.f32 %v8726_v30, %v8725_v4  ;;  %v2558_v54 = vmul.f32 %v2553_v33, %v8727_v28  ;;  %v8729_v10 = vld [vmem:[#allocation123_spill] sm:$0xff]  ;;  %v8730_v63 = vld [vmem:[#allocation60_spill] sm:$0xff]  ;;  %v8731_v22 = vld [vmem:[#allocation102_spill] sm:$0xff] }
 0x351   : > { %v2193_v37 = vadd.f32 %v2191_v1, %v2189_v24  ;;  %v2554_v42 = vsel %vm293_vm0, %v2551_v43, %v2553_v33  ;;  %v2922_v11 = vrot.slane %v2921_v57, 2  ;;  %v1566_v58 = vadd.f32 %v8728_v31, %v1562_v5  ;;  %v8732_v1 = vld [vmem:[#allocation59_spill] sm:$0xff]  ;;  %v8734_v5 = vld [vmem:[#allocation65_spill] sm:$0xff] }
 0x352   : > { %v2192_v6 = vadd.f32 %v2190_v19, %v2188_v52  ;;  %v2557_v16 = vmul.f32 %v2554_v42, %v8729_v10  ;;  %v979_v26 = vmul.f32 %v8731_v22, %v8730_v63  ;;  %v2915_v2 = vrot.slane %v2914_v36, 2  ;;  %v8733_v14 = vld [vmem:[#allocation111_spill] sm:$0xff]  ;;  %v2585_v19 = vpop.permute.xlu1 %2584  ;;  %v2583_v31 = vpop.permute.xlu0 %2582 }
 0x353   : > { %v2933_v39 = vsel %vm1828_vm1, %v2193_v37, 0.0  ;;  %v7332_v24 = vadd.f32 %v2558_v54, %v1567_v41  ;;  %v987_v4 = vmul.f32 %v8733_v14, %v8732_v1  ;;  %v590_v52 = vadd.f32 %v8734_v5, %v584_v49  ;;  %v8736_v37 = vld [vmem:[#allocation84_spill] sm:$0xff]  ;;  %v8737_v3 = vld [vmem:[#allocation43_spill] sm:$0xff] }
 0x354   : > { %v2934_v30 = vrot.slane %v2933_v39, 4  ;;  %v2926_v33 = vsel %vm2911_vm2, %v2192_v6, 0.0  ;;  %v7337_v43 = vadd.f32 %v2557_v16, %v1566_v58  ;;  %v2590_v22 = vadd.f32 %v2585_v19, %v8735_v53 }
 0x355   : > { %v2927_v42 = vrot.slane %v2926_v33, 4  ;;  %v2586_v63 = vsel %vm293_vm0, %v2583_v31, %v2585_v19  ;;  %v1586_v41 = vadd.f32 %v8736_v37, %v865_v62  ;;  %v2923_v54 = vadd.f32 %v2922_v11, %v2921_v57  ;;  %v8738_v19 = vld [vmem:[#allocation103_spill] sm:$0xff] }
 0x356   : > { %v2935_v7 = vadd.f32 %v2934_v30, %v2933_v39  ;;  %v2589_v1 = vadd.f32 %v2586_v63, %v8737_v3  ;;  %v2916_v14 = vadd.f32 %v2915_v2, %v2914_v36  ;;  %v2613_v16 = vmul.f32 %v2590_v22, %v7226_v55  ;;  %v2604_v53 = vpop.permute.xlu1 %2603  ;;  %v2602_v12 = vpop.permute.xlu0 %2601  ;;  %v8739_v2 = vld [vmem:[#allocation140_spill] sm:$0xff] }
 0x357   : > { %v2928_v51 = vadd.f32 %v2927_v42, %v2926_v33  ;;  %v7345_v6 = vadd.f32 %v1702_v48, %v1700_v46  ;;  %v687_v58 = vadd.f32 %v685_v8, %v677_v59  ;;  %v989_v56 = vadd.f32 %v987_v4, %v979_v26  ;;  %v8740_v8 = vld [vmem:[#allocation154_spill] sm:$0xff]  ;;  %v8741_v4 = vld [vmem:[#allocation143_spill] sm:$0xff]  ;;  %v8742_v33 = vld [vmem:[#allocation32_spill] sm:$0xff] }
 0x358   : > { %v2936_v49 = vrot.slane %v2935_v7, 2  ;;  %v2612_v5 = vmul.f32 %v2589_v1, %v7224_v15  ;;  %v1350_v31 = vadd.f32 %v8738_v19, %v590_v52  ;;  %v2609_v57 = vmul.f32 %v2604_v53, %v8727_v28 }
 0x359   : > { %v2929_v62 = vrot.slane %v2928_v51, 2  ;;  %v2605_v3 = vsel %vm293_vm0, %v2602_v12, %v2604_v53  ;;  %v2924_v36 = vrot.slane %v2923_v54, 1  ;;  %v1590_v39 = vadd.f32 %v8739_v2, %v1586_v41  ;;  %v8743_v41 = vld [vmem:[#allocation46_spill] sm:$0xff] }
 0x35a   : > { %v2937_v11 = vadd.f32 %v2936_v49, %v2935_v7  ;;  %v2608_v46 = vmul.f32 %v2605_v3, %v8729_v10  ;;  %v886_v59 = vmul.f32 %v8740_v8, %v8701_v17  ;;  %v2917_v48 = vrot.slane %v2916_v14, 1  ;;  %v2205_v63 = vpop.permute.xlu1 %2204  ;;  %v2203_v12 = vpop.permute.xlu0 %2202 }
 0x35b   : > { %v2930_v26 = vadd.f32 %v2929_v62, %v2928_v51  ;;  %v2611_v30 = vadd.f32 %v2609_v57, %v8741_v4  ;;  %v611_v52 = vmul.f32 %v8742_v33, %v8629_v18  ;;  %v2210_v1 = vadd.f32 %v2205_v63, %v8743_v41  ;;  %v8744_v51 = vld [vmem:[#allocation74_spill] sm:$0xff] }
 0x35c   : > { %v2938_v42 = vrot.slane %v2937_v11, 1  ;;  %v2610_v22 = vadd.f32 %v2608_v46, %v1590_v39  ;;  %v2206_v49 = vsel %vm293_vm0, %v2203_v12, %v2205_v63  ;;  %v2925_v53 = vadd.f32 %v2924_v36, %v2923_v54  ;;  %v8745_v57 = vld [vmem:[#allocation166_spill] sm:$0xff]  ;;  %v8750_v12 = vld [vmem:[#allocation24_spill] sm:$0xff] }
 0x35d   : > { %v2931_v7 = vrot.slane %v2930_v26, 1  ;;  %v2615_v37 = vadd.f32 %v2613_v16, %v2611_v30  ;;  %v2209_v62 = vadd.f32 %v2206_v49, %v8744_v51  ;;  %v892_v2 = vadd.f32 %v8745_v57, %v886_v59  ;;  %v8746_v46 = vld [vmem:[#allocation150_spill] sm:$0xff]  ;;  %v8751_v49 = vld [vmem:[#allocation39_spill] sm:$0xff] }
 0x35e   : > { %v2939_v19 = vadd.f32 %v2938_v42, %v2937_v11  ;;  %v2614_v3 = vadd.f32 %v2612_v5, %v2610_v22  ;;  %v2918_v8 = vadd.f32 %v2917_v48, %v2916_v14  ;;  %v2233_v39 = vmul.f32 %v2210_v1, %v8706_v50  ;;  %v2224_v30 = vpop.permute.xlu1 %2223  ;;  %v2222_v41 = vpop.permute.xlu0 %2221  ;;  %v8747_v5 = vld [vmem:[#allocation36_spill] sm:$0xff]  ;;  %v8748_v48 = vld [vmem:[#allocation139_spill] sm:$0xff] }
 0x35f   : > { %v2932_v18 = vadd.f32 %v2931_v7, %v2930_v26  ;;  %v617_v4 = vadd.f32 %v8746_v46, %v611_v52  ;;  %v3045_v33 = vsel %vm1828_vm1, %v2615_v37, 0.0  ;;  %v2232_v16 = vmul.f32 %v2209_v62, %v8710_v0  ;;  %v8749_v52 = vld [vmem:[#allocation99_spill] sm:$0xff] }
 0x360   : > { %v7367_v54 = vsel %vm3136_vm3, %v2925_v53, %v2939_v19  ;;  %v708_v36 = vmul.f32 %v8747_v5, %v8718_v38  ;;  %v2229_v11 = vmul.f32 %v2224_v30, %v8713_v25  ;;  %v2225_v14 = vsel %vm293_vm0, %v2222_v41, %v2224_v30  ;;  %v8752_v19 = vld [vmem:[#allocation82_spill] sm:$0xff]  ;;  %v8753_v62 = vld [vmem:[#allocation63_spill] sm:$0xff] }
 0x361   : > { %v7374_v59 = vsel %vm3136_vm3, %v2918_v8, %v2932_v18  ;;  %v913_v26 = vmul.f32 %v8748_v48, %v8701_v17  ;;  %v1354_v42 = vadd.f32 %v8749_v52, %v1350_v31  ;;  %v2228_v22 = vmul.f32 %v2225_v14, %v8717_v61  ;;  %v8754_v17 = vld [vmem:[#allocation162_spill] sm:$0xff]  ;;  %v8755_v30 = vld [vmem:[#allocation31_spill] sm:$0xff] }
 0x362   : > { %v7382_v63 = vmul.f32 %v8684_v40, %v8639_v27  ;;  %v1610_v7 = vadd.f32 %v8750_v12, %v892_v2  ;;  %v3046_v37 = vrot.slane %v3045_v33, 4  ;;  %v3038_v1 = vsel %vm2911_vm2, %v2614_v3, 0.0  ;;  %v2627_v18 = vpop.permute.xlu1 %2626  ;;  %v2625_v46 = vpop.permute.xlu0 %2624  ;;  %v8756_v2 = vld [vmem:[#allocation76_spill] sm:$0xff]  ;;  %v8757_v14 = vld [vmem:[#allocation167_spill] sm:$0xff] }
 0x363   : > { %v2231_v53 = vadd.f32 %v2229_v11, %v8751_v49  ;;  %v1432_v51 = vadd.f32 %v8752_v19, %v687_v58  ;;  %v7389_v57 = vadd.f32 %v8753_v62, %v989_v56  ;;  %v1374_v31 = vadd.f32 %v8754_v17, %v617_v4  ;;  %v8758_v52 = vld [vmem:[#allocation75_spill] sm:$0xff] }
 0x364   : > { %v2230_v8 = vadd.f32 %v2228_v22, %v1354_v42  ;;  %v7393_v27 = vadd.f32 %v8755_v30, %v708_v36  ;;  %v2632_v5 = vadd.f32 %v2627_v18, %v8756_v2  ;;  %v2628_v3 = vsel %vm293_vm0, %v2625_v46, %v2627_v18  ;;  %v8759_v22 = vld [vmem:[#allocation18_spill] sm:$0xff]  ;;  %v8761_v18 = vld [vmem:[#allocation61_spill] sm:$0xff] }
 0x365   : > { %v2235_v41 = vadd.f32 %v2233_v39, %v2231_v53  ;;  %v919_v11 = vadd.f32 %v8757_v14, %v913_v26  ;;  %v3039_v48 = vrot.slane %v3038_v1, 4  ;;  %v2631_v56 = vadd.f32 %v2628_v3, %v8758_v52  ;;  %v8762_v3 = vld [vmem:[#allocation71_spill] sm:$0xff] }
 0x366   : > { %v2234_v58 = vadd.f32 %v2232_v16, %v2230_v8  ;;  %v3047_v12 = vadd.f32 %v3046_v37, %v3045_v33  ;;  %v2655_v42 = vmul.f32 %v2632_v5, %v7226_v55  ;;  %v1614_v49 = vadd.f32 %v8759_v22, %v1610_v7  ;;  %v2646_v19 = vpop.permute.xlu1 %2645  ;;  %v2644_v62 = vpop.permute.xlu0 %2643  ;;  %v8760_v37 = vld [vmem:[#allocation164_spill] sm:$0xff]  ;;  %v8763_v22 = vld [vmem:[#allocation118_spill] sm:$0xff] }
 0x367   : > { %v2947_v4 = vsel %vm1828_vm1, %v2235_v41, 0.0  ;;  %v2654_v53 = vmul.f32 %v2631_v56, %v7224_v15  ;;  %v1378_v26 = vadd.f32 %v7165_v9, %v1374_v31  ;;  %v2651_v16 = vmul.f32 %v2646_v19, %v8727_v28 }
 0x368   : > { %v2948_v36 = vrot.slane %v2947_v4, 4  ;;  %v2940_v39 = vsel %vm2911_vm2, %v2234_v58, 0.0  ;;  %v2647_v33 = vsel %vm293_vm0, %v2644_v62, %v2646_v19  ;;  %v7409_v8 = vadd.f32 %v7170_v45, %v8760_v37 }
 0x369   : > { %v2941_v17 = vrot.slane %v2940_v39, 4  ;;  %v1634_v7 = vadd.f32 %v8761_v18, %v919_v11  ;;  %v3040_v46 = vadd.f32 %v3039_v48, %v3038_v1  ;;  %v2650_v41 = vmul.f32 %v2647_v33, %v8729_v10  ;;  %v8764_v48 = vld [vmem:[#allocation100_spill] sm:$0xff] }
 0x36a   : > { %v2949_v30 = vadd.f32 %v2948_v36, %v2947_v4  ;;  %v3048_v2 = vrot.slane %v3047_v12, 2  ;;  %v2653_v14 = vadd.f32 %v2651_v16, %v8762_v3  ;;  %v7415_v9 = vadd.f32 %v7198_v23, %v1432_v51  ;;  %v2247_v52 = vpop.permute.xlu1 %2246  ;;  %v2245_v56 = vpop.permute.xlu0 %2244  ;;  %v8765_v23 = vld [vmem:[#allocation149_spill] sm:$0xff] }
 0x36b   : > { %v2942_v5 = vadd.f32 %v2941_v17, %v2940_v39  ;;  %v2652_v58 = vadd.f32 %v2650_v41, %v1614_v49  ;;  %v7419_v45 = vadd.f32 %v7300_v44, %v8763_v22  ;;  %v2252_v4 = vadd.f32 %v2247_v52, %v8764_v48 }
 0x36c   : > { %v2950_v31 = vrot.slane %v2949_v30, 2  ;;  %v2657_v11 = vadd.f32 %v2655_v42, %v2653_v14  ;;  %v2248_v36 = vsel %vm293_vm0, %v2245_v56, %v2247_v52  ;;  %v3041_v39 = vrot.slane %v3040_v46, 2 }
 0x36d   : > { %v2943_v1 = vrot.slane %v2942_v5, 2  ;;  %v2656_v62 = vadd.f32 %v2654_v53, %v2652_v58  ;;  %v2251_v51 = vadd.f32 %v2248_v36, %v8765_v23  ;;  %v3049_v17 = vadd.f32 %v3048_v2, %v3047_v12 }
 0x36e   : > { %v2951_v19 = vadd.f32 %v2950_v31, %v2949_v30  ;;  %v3059_v16 = vsel %vm1828_vm1, %v2657_v11, 0.0  ;;  %v2275_v33 = vmul.f32 %v2252_v4, %v8706_v50  ;;  %v2266_v41 = vpop.permute.xlu1 %2265  ;;  %v2264_v3 = vpop.permute.xlu0 %2263  ;;  %v7433_v50 = vadd.f32 %v7307_v20, %v7389_v57 }
 0x36f   : > { %v2944_v49 = vadd.f32 %v2943_v1, %v2942_v5  ;;  %v3060_v37 = vrot.slane %v3059_v16, 4  ;;  %v3052_v18 = vsel %vm2911_vm2, %v2656_v62, 0.0  ;;  %v2274_v42 = vmul.f32 %v2251_v51, %v8710_v0  ;;  %v8766_v0 = vld [vmem:[#allocation116_spill] sm:$0xff] }
 0x370   : > { %v2952_v44 = vrot.slane %v2951_v19, 1  ;;  %v3053_v52 = vrot.slane %v3052_v18, 4  ;;  %v2271_v53 = vmul.f32 %v2266_v41, %v8713_v25  ;;  %v2267_v30 = vsel %vm293_vm0, %v2264_v3, %v2266_v41 }
 0x371   : > { %v2945_v14 = vrot.slane %v2944_v49, 1  ;;  %v3061_v2 = vadd.f32 %v3060_v37, %v3059_v16  ;;  %v2270_v5 = vmul.f32 %v2267_v30, %v8717_v61  ;;  %v3042_v31 = vadd.f32 %v3041_v39, %v3040_v46 }
 0x372   : > { %v2953_v12 = vadd.f32 %v2952_v44, %v2951_v19  ;;  %v3054_v56 = vadd.f32 %v3053_v52, %v3052_v18  ;;  %v2273_v22 = vadd.f32 %v2271_v53, %v8766_v0  ;;  %v3050_v1 = vrot.slane %v3049_v17, 1  ;;  %v2566_v4 = vpop.permute.xlu1 %2565  ;;  %v2564_v25 = vpop.permute.xlu0 %2563 }
 0x373   : > { %v2946_v58 = vadd.f32 %v2945_v14, %v2944_v49  ;;  %v3062_v11 = vrot.slane %v3061_v2, 2  ;;  %v2272_v48 = vadd.f32 %v2270_v5, %v1378_v26  ;;  %v2571_v62 = vmul.f32 %v2566_v4, %v7226_v55  ;;  %v8767_v14 = vld [vmem:[#allocation105_spill] sm:$0xff] }
 0x374   : > { %v7438_v36 = vsel %vm3139_vm4, %v7367_v54, %v2953_v12  ;;  %v3055_v19 = vrot.slane %v3054_v56, 2  ;;  %v2277_v61 = vadd.f32 %v2275_v33, %v2273_v22  ;;  %v2567_v20 = vsel %vm293_vm0, %v2564_v25, %v2566_v4 }
 0x375   : > { %v3063_v57 = vadd.f32 %v3062_v11, %v3061_v2  ;;  %v2276_v46 = vadd.f32 %v2274_v42, %v2272_v48  ;;  %v2570_v39 = vmul.f32 %v2567_v20, %v7224_v15  ;;  %v7445_v23 = vsel %vm3139_vm4, %v7374_v59, %v2946_v58  ;;  %v8768_v48 = vld [vmem:[#allocation80_spill] sm:$0xff] }
 0x376   : > { %v3043_v26 = vrot.slane %v3042_v31, 1  ;;  %v2961_v51 = vsel %vm1828_vm1, %v2277_v61, 0.0  ;;  %v2573_v54 = vadd.f32 %v2571_v62, %v7332_v24  ;;  %v1638_v49 = vadd.f32 %v7175_v29, %v1634_v7  ;;  %v2669_v18 = vpop.permute.xlu1 %2668  ;;  %v2667_v42 = vpop.permute.xlu0 %2666 }
 0x377   : > { %v3056_v16 = vadd.f32 %v3055_v19, %v3054_v56  ;;  %v2962_v33 = vrot.slane %v2961_v51, 4  ;;  %v2954_v44 = vsel %vm2911_vm2, %v2276_v46, 0.0  ;;  %v2572_v37 = vadd.f32 %v2570_v39, %v7337_v43  ;;  %v8769_v39 = vld [vmem:[#allocation44_spill] sm:$0xff] }
 0x378   : > { %v3051_v41 = vadd.f32 %v3050_v1, %v3049_v17  ;;  %v2955_v3 = vrot.slane %v2954_v44, 4  ;;  %v3031_v59 = vsel %vm1828_vm1, %v2573_v54, 0.0  ;;  %v2674_v52 = vadd.f32 %v2669_v18, %v8767_v14 }
 0x379   : > { %v3064_v53 = vrot.slane %v3063_v57, 1  ;;  %v2963_v30 = vadd.f32 %v2962_v33, %v2961_v51  ;;  %v3032_v12 = vrot.slane %v3031_v59, 4  ;;  %v3024_v24 = vsel %vm2911_vm2, %v2572_v37, 0.0 }
 0x37a   : > { %v3044_v29 = vadd.f32 %v3043_v26, %v3042_v31  ;;  %v2956_v7 = vadd.f32 %v2955_v3, %v2954_v44  ;;  %v3025_v2 = vrot.slane %v3024_v24, 4  ;;  %v2697_v5 = vmul.f32 %v2674_v52, %v7226_v55  ;;  %v2688_v0 = vpop.permute.xlu1 %2687  ;;  %v2686_v22 = vpop.permute.xlu0 %2685 }
 0x37b   : > { %v3057_v43 = vrot.slane %v3056_v16, 1  ;;  %v2964_v58 = vrot.slane %v2963_v30, 2  ;;  %v3033_v56 = vadd.f32 %v3032_v12, %v3031_v59  ;;  %v2670_v17 = vsel %vm293_vm0, %v2667_v42, %v2669_v18 }
 0x37c   : > { %v2957_v1 = vrot.slane %v2956_v7, 2  ;;  %v3026_v11 = vadd.f32 %v3025_v2, %v3024_v24  ;;  %v2673_v4 = vadd.f32 %v2670_v17, %v8768_v48  ;;  %v2693_v25 = vmul.f32 %v2688_v0, %v8727_v28 }
 0x37d   : > { %v3065_v19 = vadd.f32 %v3064_v53, %v3063_v57  ;;  %v2965_v61 = vadd.f32 %v2964_v58, %v2963_v30  ;;  %v3034_v31 = vrot.slane %v3033_v56, 2  ;;  %v2689_v62 = vsel %vm293_vm0, %v2686_v22, %v2688_v0 }
 0x37e   : > { %v2958_v20 = vadd.f32 %v2957_v1, %v2956_v7  ;;  %v3027_v55 = vrot.slane %v3026_v11, 2  ;;  %v2696_v46 = vmul.f32 %v2673_v4, %v7224_v15  ;;  %v2695_v26 = vadd.f32 %v2693_v25, %v8769_v39  ;;  %v2342_v37 = vpop.permute.xlu1 %2341  ;;  %v2340_v18 = vpop.permute.xlu0 %2339 }
 0x37f   : > { %v3058_v51 = vadd.f32 %v3057_v43, %v3056_v16  ;;  %v2966_v54 = vrot.slane %v2965_v61, 1  ;;  %v3035_v33 = vadd.f32 %v3034_v31, %v3033_v56  ;;  %v2692_v44 = vmul.f32 %v2689_v62, %v8729_v10 }
 0x380   : > { %v2959_v42 = vrot.slane %v2958_v20, 1  ;;  %v3028_v28 = vadd.f32 %v3027_v55, %v3026_v11  ;;  %v2699_v57 = vadd.f32 %v2697_v5, %v2695_v26  ;;  %v2347_v3 = vmul.f32 %v2342_v37, %v7187_v35 }
 0x381   : > { %v2967_v59 = vadd.f32 %v2966_v54, %v2965_v61  ;;  %v3036_v14 = vrot.slane %v3035_v33, 1  ;;  %v2694_v52 = vadd.f32 %v2692_v44, %v1638_v49  ;;  %v2343_v53 = vsel %vm293_vm0, %v2340_v18, %v2342_v37  ;;  %v8773_v37 = vld [vmem:[#allocation58_spill] sm:$0xff] }
 0x382   : > { %v2960_v15 = vadd.f32 %v2959_v42, %v2958_v20  ;;  %v3029_v30 = vrot.slane %v3028_v28, 1  ;;  %v3073_v16 = vsel %vm1828_vm1, %v2699_v57, 0.0  ;;  %v7467_v12 = vadd.f32 %v2347_v3, %v7409_v8  ;;  %v2764_v5 = vpop.permute.xlu1 %2763  ;;  %v2762_v43 = vpop.permute.xlu0 %2761 }
 0x383   : > { %v3037_v10 = vadd.f32 %v3036_v14, %v3035_v33  ;;  %v3074_v24 = vrot.slane %v3073_v16, 4  ;;  %v2698_v7 = vadd.f32 %v2696_v46, %v2694_v52  ;;  %v2346_v2 = vmul.f32 %v2343_v53, %v7185_v47  ;;  %v8770_v46 = vld [vmem:[#allocation101_spill] sm:$0xff]  ;;  %v8778_v14 = vld [vmem:[#allocation28_spill] sm:$0xff] }
 0x384   : > { %v3030_v58 = vadd.f32 %v3029_v30, %v3028_v28  ;;  %v2769_v56 = vmul.f32 %v2764_v5, %v7220_v21  ;;  %v2765_v49 = vsel %vm293_vm0, %v2762_v43, %v2764_v5  ;;  %v7474_v17 = vsel %vm3142_vm5, %v7438_v36, %v2967_v59  ;;  %v8776_v28 = vld [vmem:[#allocation156_spill] sm:$0xff] }
 0x385   : > { %v3158_v0 = vsel %vm3136_vm3, %v3037_v10, %v3051_v41  ;;  %v3075_v8 = vadd.f32 %v3074_v24, %v3073_v16  ;;  %v3066_v22 = vsel %vm2911_vm2, %v2698_v7, 0.0  ;;  %v7479_v1 = vadd.f32 %v2346_v2, %v7415_v9  ;;  %v8779_v16 = vld [vmem:[#allocation93_spill] sm:$0xff]  ;;  %v8780_v10 = vld [vmem:[#allocation134_spill] sm:$0xff] }
 0x386   : > { %v3157_v11 = vsel %vm3136_vm3, %v3030_v58, %v3044_v29  ;;  %v3067_v48 = vrot.slane %v3066_v22, 4  ;;  %v7483_v4 = vadd.f32 %v2769_v56, %v7419_v45  ;;  %v2768_v25 = vmul.f32 %v2765_v49, %v7218_v60  ;;  %v2374_v31 = vpop.permute.xlu1 %2373  ;;  %v2372_v36 = vpop.permute.xlu0 %2371  ;;  %v8781_v2 = vld [vmem:[#allocation50_spill] sm:$0xff]  ;;  %v8782_v56 = vld [vmem:[#allocation136_spill] sm:$0xff]  ;;  %v3539_v49 = vld [vmem:[%s3881_s24 + $0x20] sm:$0xff] }
 0x387   : > { %v3076_v61 = vrot.slane %v3075_v8, 2  ;;  %v7488_v41 = vsel %vm3142_vm5, %v7445_v23, %v2960_v15  ;;  %v3160_v62 = vsel %vm3139_vm4, %v3158_v0, %v3065_v19  ;;  %v3159_v9 = vsel %vm3139_vm4, %v3157_v11, %v3058_v51  ;;  %v8771_v23 = vld [vmem:[#allocation86_spill] sm:$0xff]  ;;  %v8783_v0 = vld [vmem:[#allocation23_spill] sm:$0xff] }
 0x388   : > { %v3068_v20 = vadd.f32 %v3067_v48, %v3066_v22  ;;  %v7493_v29 = vadd.f32 %v2768_v25, %v7433_v50  ;;  %v2379_v45 = vadd.f32 %v2374_v31, %v7178_v13  ;;  %v2375_v55 = vsel %vm293_vm0, %v2372_v36, %v2374_v31  ;;  %v8772_v51 = vld [vmem:[#allocation94_spill] sm:$0xff]  ;;  %v8774_v50 = vld [vmem:[#allocation87_spill] sm:$0xff]  ;;  %v8784_v22 = vld [vmem:[#allocation17_spill] sm:$0xff] }
 0x389   : > { %v1456_v39 = vadd.f32 %v8770_v46, %v7393_v27  ;;  %v3077_v26 = vadd.f32 %v3076_v61, %v3075_v8  ;;  %v2378_v54 = vadd.f32 %v2375_v55, %v7181_v34  ;;  %v7502_v33 = vadd.f32 %v8771_v23, %v8662_v32  ;;  %v8775_v13 = vld [vmem:[#allocation106_spill] sm:$0xff]  ;;  %v8777_v34 = vld [vmem:[#allocation16_spill] sm:$0xff]  ;;  %v8785_v48 = vld [vmem:[#allocation119_spill] sm:$0xff] }
 0x38a   : > { %v3069_v19 = vrot.slane %v3068_v20, 2  ;;  %v2402_v44 = vmul.f32 %v2379_v45, %v8772_v51  ;;  %v7507_v18 = vmul.f32 %v8774_v50, %v8773_v37  ;;  %v1746_v42 = vmul.f32 %v8684_v40, %v8775_v13  ;;  %v2393_v59 = vpop.permute.xlu1 %2392  ;;  %v2391_v32 = vpop.permute.xlu0 %2390  ;;  %v3540_v36 = vld [vmem:[%s3881_s24 + $0x30] sm:$0xff]  ;;  %v8789_v37 = vld [vmem:[#allocation34_spill] sm:$0xff] }
 0x38b   : > { %v735_v27 = vmul.f32 %v8776_v28, %v8718_v38  ;;  %v3078_v57 = vrot.slane %v3077_v26, 1  ;;  %v2401_v3 = vmul.f32 %v2378_v54, %v8777_v34  ;;  %v1718_v52 = vmul.f32 %v7345_v6, %v8778_v14  ;;  %v8786_v46 = vld [vmem:[#allocation141_spill] sm:$0xff]  ;;  %v8787_v54 = vld [vmem:[#allocation98_spill] sm:$0xff] }
 0x38c   : > { %v3070_v53 = vadd.f32 %v3069_v19, %v3068_v20  ;;  %v2398_v15 = vmul.f32 %v2393_v59, %v7187_v35  ;;  %v2394_v30 = vsel %vm293_vm0, %v2391_v32, %v2393_v59  ;;  %v1724_v40 = vadd.f32 %v7382_v63, %v8779_v16  ;;  %v8788_v19 = vld [vmem:[#allocation113_spill] sm:$0xff] }
 0x38d   : > { %v762_v24 = vmul.f32 %v8780_v10, %v8718_v38  ;;  %v3079_v7 = vadd.f32 %v3078_v57, %v3077_v26  ;;  %v1460_v5 = vadd.f32 %v8781_v2, %v1456_v39  ;;  %v2397_v43 = vmul.f32 %v2394_v30, %v7185_v47  ;;  %v8791_v57 = vld [vmem:[#allocation54_spill] sm:$0xff] }
 0x38e   : > { %v3071_v58 = vrot.slane %v3070_v53, 1  ;;  %v2400_v6 = vadd.f32 %v2398_v15, %v8782_v56  ;;  %v1726_v8 = vmul.f32 %v3539_v49, %v8783_v0  ;;  %v1748_v11 = vadd.f32 %v1746_v42, %v8784_v22  ;;  %v2796_v63 = vpop.permute.xlu1 %2795  ;;  %v2794_v31 = vpop.permute.xlu0 %2793  ;;  %v8790_v42 = vld [vmem:[#allocation97_spill] sm:$0xff]  ;;  %v8795_v49 = vld [vmem:[#allocation107_spill] sm:$0xff] }
 0x38f   : > { %v741_v25 = vadd.f32 %v8785_v48, %v735_v27  ;;  %v2399_v61 = vadd.f32 %v2397_v43, %v1460_v5  ;;  %v1750_v38 = vmul.f32 %v3540_v36, %v8783_v0  ;;  %v7532_v20 = vsel %vm3142_vm5, %v3160_v62, %v3079_v7  ;;  %v8792_v15 = vld [vmem:[#allocation49_spill] sm:$0xff]  ;;  %v8796_v0 = vld [vmem:[#allocation64_spill] sm:$0xff]  ;;  %v8797_v48 = vld [vmem:[#allocation110_spill] sm:$0xff] }
 0x390   : > { %v3072_v45 = vadd.f32 %v3071_v58, %v3070_v53  ;;  %v2404_v55 = vadd.f32 %v2402_v44, %v2400_v6  ;;  %v2801_v39 = vadd.f32 %v2796_v63, %v8786_v46  ;;  %v2797_v26 = vsel %vm293_vm0, %v2794_v31, %v2796_v63  ;;  %v8793_v7 = vld [vmem:[#allocation73_spill] sm:$0xff]  ;;  %v8794_v58 = vld [vmem:[#allocation79_spill] sm:$0xff] }
 0x391   : > { %v768_v23 = vadd.f32 %v8787_v54, %v762_v24  ;;  %v1716_v50 = vadd.f32 %v8789_v37, %v8788_v19  ;;  %v2403_v13 = vadd.f32 %v2401_v3, %v2399_v61  ;;  %v2800_v28 = vadd.f32 %v2797_v26, %v8790_v42  ;;  %v8799_v63 = vld [vmem:[#allocation35_spill] sm:$0xff]  ;;  %v8800_v37 = vld [vmem:[#allocation109_spill] sm:$0xff] }
 0x392   : > { %v2989_v27 = vsel %vm1828_vm1, %v2404_v55, 0.0  ;;  %v2824_v59 = vmul.f32 %v2801_v39, %v8791_v57  ;;  %v1728_v62 = vadd.f32 %v1726_v8, %v1724_v40  ;;  %v7543_v32 = vsel %vm3142_vm5, %v3159_v9, %v3072_v45  ;;  %v2815_v16 = vpop.permute.xlu1 %2814  ;;  %v2813_v10 = vpop.permute.xlu0 %2812 }
 0x393   : > { %v2990_v44 = vrot.slane %v2989_v27, 4  ;;  %v2982_v53 = vsel %vm2911_vm2, %v2403_v13, 0.0  ;;  %v2823_v30 = vmul.f32 %v2800_v28, %v8792_v15  ;;  %v1752_v24 = vadd.f32 %v1750_v38, %v1748_v11 }
 0x394   : > { %v1480_v3 = vadd.f32 %v8793_v7, %v741_v25  ;;  %v2983_v2 = vrot.slane %v2982_v53, 4  ;;  %v2820_v5 = vmul.f32 %v2815_v16, %v7220_v21  ;;  %v2816_v43 = vsel %vm293_vm0, %v2813_v10, %v2815_v16  ;;  %v8798_v25 = vld [vmem:[#allocation47_spill] sm:$0xff] }
 0x395   : > { %v1504_v40 = vadd.f32 %v8794_v58, %v768_v23  ;;  %v2991_v56 = vadd.f32 %v2990_v44, %v2989_v27  ;;  %v1720_v9 = vadd.f32 %v1718_v52, %v1716_v50  ;;  %v2819_v6 = vmul.f32 %v2816_v43, %v7218_v60 }
 0x396   : > { %v1740_v8 = vadd.f32 %v8796_v0, %v8795_v49  ;;  %v2984_v22 = vadd.f32 %v2983_v2, %v2982_v53  ;;  %v2822_v61 = vadd.f32 %v2820_v5, %v8797_v48  ;;  %v1742_v11 = vmul.f32 %v1728_v62, %v8778_v14  ;;  %v2355_v45 = vpop.permute.xlu1 %2354  ;;  %v2353_v55 = vpop.permute.xlu0 %2352 }
 0x397   : > { %v1764_v31 = vadd.f32 %v8799_v63, %v8798_v25  ;;  %v2992_v36 = vrot.slane %v2991_v56, 2  ;;  %v2821_v38 = vadd.f32 %v2819_v6, %v1720_v9  ;;  %v1766_v46 = vmul.f32 %v1752_v24, %v8778_v14 }
 0x398   : > { %v2985_v52 = vrot.slane %v2984_v22, 2  ;;  %v2826_v39 = vadd.f32 %v2824_v59, %v2822_v61  ;;  %v2360_v26 = vmul.f32 %v2355_v45, %v8772_v51  ;;  %v2356_v54 = vsel %vm293_vm0, %v2353_v55, %v2355_v45 }
 0x399   : > { %v2825_v23 = vadd.f32 %v2823_v30, %v2821_v38  ;;  %v2359_v19 = vmul.f32 %v2356_v54, %v8777_v34  ;;  %v1484_v50 = vadd.f32 %v8800_v37, %v1480_v3  ;;  %v7564_v13 = vadd.f32 %v7507_v18, %v1504_v40  ;;  %v8801_v18 = vld [vmem:[#allocation15_spill] sm:$0xff] }
 0x39a   : > { %v2993_v42 = vadd.f32 %v2992_v36, %v2991_v56  ;;  %v3101_v28 = vsel %vm1828_vm1, %v2826_v39, 0.0  ;;  %v2362_v27 = vadd.f32 %v2360_v26, %v7467_v12  ;;  %v7568_v14 = vadd.f32 %v1742_v11, %v1740_v8  ;;  %v2416_v30 = vpop.permute.xlu1 %2415  ;;  %v2414_v16 = vpop.permute.xlu0 %2413 }
 0x39b   : > { %v2986_v59 = vadd.f32 %v2985_v52, %v2984_v22  ;;  %v3102_v62 = vrot.slane %v3101_v28, 4  ;;  %v3094_v44 = vsel %vm2911_vm2, %v2825_v23, 0.0  ;;  %v2361_v53 = vadd.f32 %v2359_v19, %v7479_v1  ;;  %v8802_v1 = vld [vmem:[#allocation145_spill] sm:$0xff] }
 0x39c   : > { %v3095_v10 = vrot.slane %v3094_v44, 4  ;;  %v2975_v24 = vsel %vm1828_vm1, %v2362_v27, 0.0  ;;  %v2421_v7 = vadd.f32 %v2416_v30, %v8801_v18  ;;  %v7574_v3 = vadd.f32 %v1766_v46, %v1764_v31  ;;  %v8803_v46 = vld [vmem:[#allocation130_spill] sm:$0xff] }
 0x39d   : > { %v3103_v2 = vadd.f32 %v3102_v62, %v3101_v28  ;;  %v2976_v5 = vrot.slane %v2975_v24, 4  ;;  %v2968_v12 = vsel %vm2911_vm2, %v2361_v53, 0.0  ;;  %v2417_v43 = vsel %vm293_vm0, %v2414_v16, %v2416_v30 }
 0x39e   : > { %v3096_v58 = vadd.f32 %v3095_v10, %v3094_v44  ;;  %v2969_v40 = vrot.slane %v2968_v12, 4  ;;  %v2444_v56 = vmul.f32 %v2421_v7, %v8772_v51  ;;  %v2420_v9 = vadd.f32 %v2417_v43, %v8802_v1  ;;  %v2435_v22 = vpop.permute.xlu1 %2434  ;;  %v2433_v48 = vpop.permute.xlu0 %2432 }
 0x39f   : > { %v2994_v6 = vrot.slane %v2993_v42, 1  ;;  %v2987_v49 = vrot.slane %v2986_v59, 1  ;;  %v3104_v0 = vrot.slane %v3103_v2, 2  ;;  %v2977_v8 = vadd.f32 %v2976_v5, %v2975_v24 }
 0x3a0   : > { %v3097_v61 = vrot.slane %v3096_v58, 2  ;;  %v2970_v11 = vadd.f32 %v2969_v40, %v2968_v12  ;;  %v2443_v25 = vmul.f32 %v2420_v9, %v8777_v34  ;;  %v2440_v63 = vmul.f32 %v2435_v22, %v7187_v35  ;;  %v8804_v9 = vld [vmem:[#allocation91_spill] sm:$0xff] }
 0x3a1   : > { %v3105_v31 = vadd.f32 %v3104_v0, %v3103_v2  ;;  %v2978_v36 = vrot.slane %v2977_v8, 2  ;;  %v2436_v38 = vsel %vm293_vm0, %v2433_v48, %v2435_v22  ;;  %v2995_v37 = vadd.f32 %v2994_v6, %v2993_v42 }
 0x3a2   : > { %v3098_v45 = vadd.f32 %v3097_v61, %v3096_v58  ;;  %v2971_v55 = vrot.slane %v2970_v11, 2  ;;  %v2442_v52 = vadd.f32 %v2440_v63, %v8803_v46  ;;  %v2439_v39 = vmul.f32 %v2436_v38, %v7185_v47  ;;  %v2777_v23 = vpop.permute.xlu1 %2776  ;;  %v2775_v19 = vpop.permute.xlu0 %2774 }
 0x3a3   : > { %v3106_v26 = vrot.slane %v3105_v31, 1  ;;  %v2979_v54 = vadd.f32 %v2978_v36, %v2977_v8  ;;  %v7585_v28 = vadd.f32 %v2987_v49, %v2986_v59  ;;  %v2782_v16 = vmul.f32 %v2777_v23, %v8791_v57 }
 0x3a4   : > { %v3099_v27 = vrot.slane %v3098_v45, 1  ;;  %v2972_v62 = vadd.f32 %v2971_v55, %v2970_v11  ;;  %v2446_v44 = vadd.f32 %v2444_v56, %v2442_v52  ;;  %v2441_v53 = vadd.f32 %v2439_v39, %v1484_v50  ;;  %v8805_v11 = vld [vmem:[#allocation78_spill] sm:$0xff] }
 0x3a5   : > { %v2980_v30 = vrot.slane %v2979_v54, 1  ;;  %v2778_v10 = vsel %vm293_vm0, %v2775_v19, %v2777_v23  ;;  %v7589_v24 = vadd.f32 %v3106_v26, %v3105_v31  ;;  %v2784_v12 = vadd.f32 %v2782_v16, %v7483_v4 }
 0x3a6   : > { %v2973_v18 = vrot.slane %v2972_v62, 1  ;;  %v3003_v7 = vsel %vm1828_vm1, %v2446_v44, 0.0  ;;  %v2445_v2 = vadd.f32 %v2443_v25, %v2441_v53  ;;  %v2781_v42 = vmul.f32 %v2778_v10, %v8792_v15  ;;  %v2838_v43 = vpop.permute.xlu1 %2837  ;;  %v2836_v58 = vpop.permute.xlu0 %2835 }
 0x3a7   : > { %v2981_v5 = vadd.f32 %v2980_v30, %v2979_v54  ;;  %v3004_v59 = vrot.slane %v3003_v7, 4  ;;  %v7594_v50 = vadd.f32 %v3099_v27, %v3098_v45  ;;  %v2843_v6 = vadd.f32 %v2838_v43, %v8804_v9 }
 0x3a8   : > { %v2974_v40 = vadd.f32 %v2973_v18, %v2972_v62  ;;  %v2996_v56 = vsel %vm2911_vm2, %v2445_v2, 0.0  ;;  %v2783_v1 = vadd.f32 %v2781_v42, %v7493_v29  ;;  %v3087_v8 = vsel %vm1828_vm1, %v2784_v12, 0.0  ;;  %v8806_v62 = vld [vmem:[#allocation120_spill] sm:$0xff] }
 0x3a9   : > { %v3005_v49 = vadd.f32 %v3004_v59, %v3003_v7  ;;  %v2997_v0 = vrot.slane %v2996_v56, 4  ;;  %v2839_v22 = vsel %vm293_vm0, %v2836_v58, %v2838_v43  ;;  %v3088_v48 = vrot.slane %v3087_v8, 4  ;;  %v8807_v59 = vld [vmem:[#allocation117_spill] sm:$0xff] }
 0x3aa   : > { %v3080_v4 = vsel %vm2911_vm2, %v2783_v1, 0.0  ;;  %v2866_v61 = vmul.f32 %v2843_v6, %v8791_v57  ;;  %v2842_v25 = vadd.f32 %v2839_v22, %v8805_v11  ;;  %v2857_v29 = vpop.permute.xlu1 %2856  ;;  %v2855_v38 = vpop.permute.xlu0 %2854  ;;  %v3147_v45 = vsel %vm3145_vm6, %v7474_v17, %v2981_v5  ;;  %v8808_v1 = vld [vmem:[#allocation19_spill] sm:$0xff] }
 0x3ab   : > { %v3006_v63 = vrot.slane %v3005_v49, 2  ;;  %v2998_v31 = vadd.f32 %v2997_v0, %v2996_v56  ;;  %v3081_v36 = vrot.slane %v3080_v4, 4  ;;  %v3089_v55 = vadd.f32 %v3088_v48, %v3087_v8 }
 0x3ac   : > { %v2865_v46 = vmul.f32 %v2842_v25, %v8792_v15  ;;  %v2862_v52 = vmul.f32 %v2857_v29, %v7220_v21  ;;  %v2858_v39 = vsel %vm293_vm0, %v2855_v38, %v2857_v29  ;;  %v3150_v53 = vsel %vm3148_vm7, %v3147_v45, %v2995_v37  ;;  %v8809_v45 = vld [vmem:[#allocation137_spill] sm:$0xff] }
 0x3ad   : > { %v3007_v26 = vadd.f32 %v3006_v63, %v3005_v49  ;;  %v2999_v54 = vrot.slane %v2998_v31, 2  ;;  %v3082_v23 = vadd.f32 %v3081_v36, %v3080_v4  ;;  %v2861_v19 = vmul.f32 %v2858_v39, %v7218_v60 }
 0x3ae   : > { %v3090_v27 = vrot.slane %v3089_v55, 2  ;;  %v2864_v44 = vadd.f32 %v2862_v52, %v8806_v62  ;;  %v3146_v17 = vsel %vm3145_vm6, %v7488_v41, %v2974_v40  ;;  %v2458_v18 = vpop.permute.xlu1 %2457  ;;  %v2456_v7 = vpop.permute.xlu0 %2455 }
 0x3af   : > { %v3000_v30 = vadd.f32 %v2999_v54, %v2998_v31  ;;  %v3083_v16 = vrot.slane %v3082_v23, 2  ;;  %v2863_v10 = vadd.f32 %v2861_v19, %v7568_v14  ;;  %v3008_v2 = vrot.slane %v3007_v26, 1 }
 0x3b0   : > { %v3091_v42 = vadd.f32 %v3090_v27, %v3089_v55  ;;  %v2868_v5 = vadd.f32 %v2866_v61, %v2864_v44  ;;  %v2463_v12 = vadd.f32 %v2458_v18, %v8807_v59  ;;  %v2459_v43 = vsel %vm293_vm0, %v2456_v7, %v2458_v18  ;;  %v8810_v27 = vld [vmem:[#allocation122_spill] sm:$0xff] }
 0x3b1   : > { %v3084_v58 = vadd.f32 %v3083_v16, %v3082_v23  ;;  %v2867_v56 = vadd.f32 %v2865_v46, %v2863_v10  ;;  %v2462_v37 = vadd.f32 %v2459_v43, %v8808_v1  ;;  %v3009_v9 = vadd.f32 %v3008_v2, %v3007_v26 }
 0x3b2   : > { %v3092_v6 = vrot.slane %v3091_v42, 1  ;;  %v3115_v41 = vsel %vm1828_vm1, %v2868_v5, 0.0  ;;  %v2486_v40 = vmul.f32 %v2463_v12, %v8772_v51  ;;  %v3001_v14 = vrot.slane %v3000_v30, 1  ;;  %v2477_v48 = vpop.permute.xlu1 %2476  ;;  %v2475_v4 = vpop.permute.xlu0 %2474 }
 0x3b3   : > { %v3085_v49 = vrot.slane %v3084_v58, 1  ;;  %v3116_v0 = vrot.slane %v3115_v41, 4  ;;  %v3108_v8 = vsel %vm2911_vm2, %v2867_v56, 0.0  ;;  %v2485_v22 = vmul.f32 %v2462_v37, %v8777_v34  ;;  %v8811_v37 = vld [vmem:[#allocation138_spill] sm:$0xff] }
 0x3b4   : > { %v3093_v61 = vadd.f32 %v3092_v6, %v3091_v42  ;;  %v3109_v11 = vrot.slane %v3108_v8, 4  ;;  %v2482_v25 = vmul.f32 %v2477_v48, %v7187_v35  ;;  %v2478_v63 = vsel %vm293_vm0, %v2475_v4, %v2477_v48 }
 0x3b5   : > { %v3086_v31 = vadd.f32 %v3085_v49, %v3084_v58  ;;  %v3117_v36 = vadd.f32 %v3116_v0, %v3115_v41  ;;  %v2481_v29 = vmul.f32 %v2478_v63, %v7185_v47  ;;  %v3153_v51 = vsel %vm3151_vm8, %v3150_v53, %v3009_v9 }
 0x3b6   : > { %v3110_v38 = vadd.f32 %v3109_v11, %v3108_v8  ;;  %v2484_v55 = vadd.f32 %v2482_v25, %v8809_v45  ;;  %v3002_v46 = vadd.f32 %v3001_v14, %v3000_v30  ;;  %v3149_v34 = vsel %vm3148_vm7, %v3146_v17, %v7585_v28  ;;  %v2880_v26 = vpop.permute.xlu1 %2879  ;;  %v2878_v35 = vpop.permute.xlu0 %2877 }
 0x3b7   : > { %v3118_v52 = vrot.slane %v3117_v36, 2  ;;  %v2483_v39 = vadd.f32 %v2481_v29, %v7564_v13  ;;  %v3164_v54 = vsel %vm3145_vm6, %v7532_v20, %v3093_v61  ;;  %v3163_v47 = vsel %vm3145_vm6, %v7543_v32, %v3086_v31 }
 0x3b8   : > { %v3111_v23 = vrot.slane %v3110_v38, 2  ;;  %v2488_v19 = vadd.f32 %v2486_v40, %v2484_v55  ;;  %v2885_v62 = vadd.f32 %v2880_v26, %v8810_v27  ;;  %v2881_v44 = vsel %vm293_vm0, %v2878_v35, %v2880_v26 }
 0x3b9   : > { %v3119_v53 = vadd.f32 %v3118_v52, %v3117_v36  ;;  %v2487_v30 = vadd.f32 %v2485_v22, %v2483_v39  ;;  %v2884_v28 = vadd.f32 %v2881_v44, %v7502_v33  ;;  %v3152_v13 = vsel %vm3151_vm8, %v3149_v34, %v3002_v46 }
 0x3ba   : > { %v3112_v17 = vadd.f32 %v3111_v23, %v3110_v38  ;;  %v3017_v16 = vsel %vm1828_vm1, %v2488_v19, 0.0  ;;  %v2908_v20 = vmul.f32 %v2885_v62, %v8791_v57  ;;  %v3166_v32 = vsel %vm3148_vm7, %v3164_v54, %v7589_v24  ;;  %v2899_v2 = vpop.permute.xlu1 %2898  ;;  %v2897_v42 = vpop.permute.xlu0 %2896 }
 0x3bb   : > { %v3018_v10 = vrot.slane %v3017_v16, 4  ;;  %v3010_v18 = vsel %vm2911_vm2, %v2487_v30, 0.0  ;;  %v2907_v7 = vmul.f32 %v2884_v28, %v8792_v15  ;;  %v3120_v5 = vrot.slane %v3119_v53, 1 }
 0x3bc   : > { %v3011_v59 = vrot.slane %v3010_v18, 4  ;;  %v2904_v33 = vmul.f32 %v2899_v2, %v7220_v21  ;;  %v2900_v12 = vsel %vm293_vm0, %v2897_v42, %v2899_v2  ;;  %v3113_v43 = vrot.slane %v3112_v17, 1 }
 0x3bd   : > { %v3019_v58 = vadd.f32 %v3018_v10, %v3017_v16  ;;  %v2903_v57 = vmul.f32 %v2900_v12, %v7218_v60  ;;  %v3121_v56 = vadd.f32 %v3120_v5, %v3119_v53  ;;  %v3165_v24 = vsel %vm3148_vm7, %v3163_v47, %v7594_v50 }
 0x3be   : > { %v3012_v1 = vadd.f32 %v3011_v59, %v3010_v18  ;;  %v2906_v9 = vadd.f32 %v2904_v33, %v8811_v37  ;;  %v3114_v15 = vadd.f32 %v3113_v43, %v3112_v17 }
 0x3bf   : > { %v3020_v6 = vrot.slane %v3019_v58, 2  ;;  %v2905_v41 = vadd.f32 %v2903_v57, %v7574_v3  ;;  %v3168_v40 = vsel %vm3151_vm8, %v3166_v32, %v3121_v56 }
 0x3c0   : > { %v3013_v21 = vrot.slane %v3012_v1, 2  ;;  %v2910_v14 = vadd.f32 %v2908_v20, %v2906_v9  ;;  %v3167_v49 = vsel %vm3151_vm8, %v3165_v24, %v3114_v15 }
 0x3c1   : > { %v2909_v0 = vadd.f32 %v2907_v7, %v2905_v41  ;;  %v3021_v8 = vadd.f32 %v3020_v6, %v3019_v58 }
 0x3c2   : > { %v3129_v60 = vsel %vm1828_vm1, %v2910_v14, 0.0  ;;  %v3014_v22 = vadd.f32 %v3013_v21, %v3012_v1 }
 0x3c3   : > { %v3130_v48 = vrot.slane %v3129_v60, 4  ;;  %v3122_v50 = vsel %vm2911_vm2, %v2909_v0, 0.0  ;;  %v3022_v4 = vrot.slane %v3021_v8, 1 }
 0x3c4   : > { %v3123_v61 = vrot.slane %v3122_v50, 4  ;;  %v3015_v11 = vrot.slane %v3014_v22, 1 }
 0x3c5   : > { %v3131_v25 = vadd.f32 %v3130_v48, %v3129_v60  ;;  %v3023_v3 = vadd.f32 %v3022_v4, %v3021_v8 }
 0x3c6   : > { %v3124_v63 = vadd.f32 %v3123_v61, %v3122_v50  ;;  %v3016_v31 = vadd.f32 %v3015_v11, %v3014_v22 }
 0x3c7   : > { %v3132_v36 = vrot.slane %v3131_v25, 2  ;;  %v3156_v29 = vsel %vm3154_vm9, %v3153_v51, %v3023_v3 }
 0x3c8   : > { %v3125_v38 = vrot.slane %v3124_v63, 2  ;;  %3177 = vrot.lane.b32.xlu1 %v3156_v29, %s3697_s19  ;;  %v3155_v45 = vsel %vm3154_vm9, %v3152_v13, %v3016_v31 }
 0x3c9   : > { %3175 = vrot.lane.b32.xlu0 %v3155_v45, %s3697_s19  ;;  %v3133_v55 = vadd.f32 %v3132_v36, %v3131_v25 }
 0x3ca   : > { %v3126_v46 = vadd.f32 %v3125_v38, %v3124_v63 }
 0x3cb   : > { %v3134_v34 = vrot.slane %v3133_v55, 1 }
 0x3cc   : > { %v3127_v52 = vrot.slane %v3126_v46, 1 }
 0x3cd   : > { %v3135_v39 = vadd.f32 %v3134_v34, %v3133_v55 }
 0x3ce   : > { %v3128_v26 = vadd.f32 %v3127_v52, %v3126_v46 }
 0x3cf   : > { %v3170_v35 = vsel %vm3154_vm9, %v3168_v40, %v3135_v39 }
 0x3d0   : > { %3181 = vrot.lane.b32.xlu1 %v3170_v35, %s3697_s19  ;;  %v3169_v51 = vsel %vm3154_vm9, %v3167_v49, %v3128_v26 }
 0x3d1   : > { %3179 = vrot.lane.b32.xlu0 %v3169_v51, %s3697_s19 }
 0x43a   : > { %v3178_v54 = vpop.permute.xlu1 %3177 }
 0x43b   : > { %v3176_v47 = vpop.permute.xlu0 %3175 }
 0x43c   : > { %v3183_v23 = vsel %vm293_vm0, %v3176_v47, %v3178_v54 }
 0x43d   : > { %3187 = vst [vmem:[%s211_s4] sm:$0xff] %v3183_v23 }
 0x442   : > { %v3182_v19 = vpop.permute.xlu1 %3181 }
 0x443   : > { %v3180_v27 = vpop.permute.xlu0 %3179 }
 0x444   : > { %v3184_v62 = vsel %vm293_vm0, %v3180_v27, %v3182_v19 }
 0x445   : > { %3188 = vst [vmem:[%s211_s4 + $0x8] sm:$0xff] %v3184_v62 }
 0x446   : > { %3612 = shalt.err (!%p3609_p5)
}
 0x447   : > { %s3613_s8 = scalar_lea.hbm %s7671_s23, 256  ;;  %s3617_s24 = scalar_lea.hbm %s7723_s2, 512 }
 0x448   : > { %p3614_p9 = scmp.ne.s32.totalorder %s7671_s23, %s3613_s8  ;;  %p3618_p3 = scmp.lt.u32.totalorder %s7671_s23, %s7723_s2 }
 0x449   : > { %p3619_p7 = scmp.lt.u32.totalorder %s3617_s24, %s3613_s8  ;;  %p3621_p4 = scmp.lt.u32.totalorder %s3613_s8, %s7671_s23 }
 0x44a   : > { %p3615_p1 = pnand %p3614_p9, %p3821_p10 }
 0x44b   : > { %p3620_p13 = por %p3619_p7, %p3618_p3 }
 0x44c   : > { %p3616_p2 = pneg %p3615_p1 }
 0x44d   : > { %p3622_p6 = por %p3621_p4, %p3620_p13 }
 0x44f   : > { %p3623_p8 = pnand %p3622_p6, %p3616_p2 }
 0x451   : > { %3626 = shalt.err (!%p3623_p8)
}
 0x452   : > { %s3708_s21 = smov 128   ;;  %s3709_s4 = smov 8  }
 0x453   : > { %3340 = dma.vmem_to_hbm [thread:$0]  (%p3821_p10), %s7666_s5, 256, %s7671_s23, %s3190_s29, %s3708_s21, %s3708_s21, %s3709_s4  }
 0x454 PF: > { %s3221_s6 = sand.u32 1, %s3665_s9   ;;  %p8812_p12 = scmp.ne.s32.totalorder %s8030_s20, 0 }
 0x455   : > { %p8813_p11 = scmp.ge.s32.totalorder %s3685_s14, 2  ;;  %s3222_s7 = scalar_lea.sflag [#allocation4], %s3221_s6 }
 0x457   : > { %p3351_p0 = pnand %p8813_p11, %p8812_p12 }
 0x459   : > { %3660 = dma.done.wait (!%p3351_p0), %s3222_s7, 256  }
 0x45a   : > { %3662 = vsyncadd (!%p3351_p0), %s3222_s7, 4294967040  ;;  %s19_s14 = sadd.s32 1, %s3685_s14   ;;  %s8814_s9 = smov %s3669_s10 }
 0x45b   : > { %p16_p5 = scmp.ge.s32.totalorder %s19_s14, 4   ;;  %s8815_s10 = smov %s3673_s11 }
 0x45c   : > { %s8816_s11 = smov %s3830_s28  ;;  %s8817_s12 = smov %s3681_s13 }
 0x45d   : > { %s8818_s13 = smov %s8820_s25  ;;  %18 = sbr.rel (!%p16_p5) target bundleno = 7 (0x7), region = 84 }
 0x464   :  { %3227 = vsyncpa [#allocation3], 1 }
 0x465   :  { %3229 = vsyncpa [#allocation3 + $0x1], 1 }
 0x466   :  { %3230 = vsyncpa [#allocation6], 1 }
 0x467   :  { %3231 = vsyncpa [#allocation4], 1 }
 0x468   :  { %3233 = vsyncpa [#allocation4 + $0x1], 1 }

</bundles_post_ra>
